<compile_context>
chip_gen: v6e
topology: v6e:2x2x1
jax: 0.10.0
libtpu: 0.0.40
codegen_flags: <defaults>
</compile_context>

<pallas_src>
import functools

import jax
import jax.numpy as jnp
import numpy as np
from jax import lax
from jax.experimental import pallas as pl
from jax.experimental.pallas import tpu as pltpu

EPS = 1e-5
LANE = 128
# Row tile for the 1x1-conv / elementwise passes.  512 rows is ~85% of the
# measured HBM roofline and keeps double-buffered blocks inside the scoped
# VMEM budget on every generation (v5e 16 MiB default, v7x 64 MiB physical).
TM_TARGET = 512


# --------------------------------------------------------------------------- #
# helpers
# --------------------------------------------------------------------------- #
def _rup(x, m):
    return ((x + m - 1) // m) * m


def _pad_to(a, shape):
    return jnp.pad(a, [(0, t - s) for s, t in zip(a.shape, shape)])


def _row(v, c):
    return jnp.pad(v.astype(jnp.float32), (0, c - v.shape[0])).reshape(1, c)


def _mosaic_params(block_bytes, scratch_bytes=0):
    """Explicit VMEM budget: double-buffered blocks + scratch + compiler margin."""
    need = 2 * block_bytes + scratch_bytes + (4 << 20)
    limit = int(min(max(need, 32 << 20), 64 << 20))
    return pltpu.CompilerParams(dimension_semantics=("parallel",),
                                vmem_limit_bytes=limit)


def _bn_scale_shift(partials, gamma_row, beta_row, count):
    """(G, 2, C) partial (sum, sumsq) -> per-channel scale/shift, (1, C) f32."""
    s = jnp.sum(partials[:, 0, :], axis=0, keepdims=True)
    ss = jnp.sum(partials[:, 1, :], axis=0, keepdims=True)
    mean = s / count
    var = jnp.maximum(ss / count - mean * mean, 0.0)
    scale = gamma_row * lax.rsqrt(var + EPS)
    shift = beta_row - mean * scale
    return scale, shift


# --------------------------------------------------------------------------- #
# kernels
# --------------------------------------------------------------------------- #
def _mm_stats_kernel(x_ref, s_ref, t_ref, w_ref, b_ref, y_ref, st_ref,
                     *, prenorm, mask_tail, m_valid, tm):
    """y_tile = (optional bn+relu)(x_tile) @ w + b ; plus per-tile (sum, sumsq)."""
    x = x_ref[...]
    if prenorm:                                   # bn(scale,shift) + relu in f32
        x = jnp.maximum(x.astype(jnp.float32) * s_ref[...] + t_ref[...], 0.0)
    xb = x.astype(jnp.bfloat16)                   # bf16 operand for the MXU
    y = jnp.dot(xb, w_ref[...], preferred_element_type=jnp.float32) + b_ref[...]
    y_ref[...] = y.astype(jnp.bfloat16)           # bf16 intermediate in HBM

    ys = y
    if mask_tail:                                 # padded rows -> exclude from BN stats
        rows = pl.program_id(0) * tm + lax.broadcasted_iota(jnp.int32, (tm, 1), 0)
        ys = jnp.where(rows < m_valid, y, 0.0)
    c = y.shape[-1]
    st = jnp.concatenate([jnp.sum(ys, axis=0, keepdims=True),
                          jnp.sum(ys * ys, axis=0, keepdims=True)], axis=0)
    st_ref[...] = st.reshape(1, 2, c)             # single stacked store


def _conv3x3_stats_kernel(y1_ref, s_ref, t_ref, w2_ref, b2_ref,
                          y2_ref, st_ref, yb_ref, *, H, W, PAD):
    """Per image: bn1+relu, 3x3 conv (pad 1, stride 1), + per-image (sum, sumsq).

    The bn'd slab is written 3 times into a (HW+2*PAD, 3C) zero-halo'd scratch,
    column block j holding dy = j-1 at row offset PAD - dy*W.  Reading rows
    [PAD+dx, PAD+dx+HW) then yields a (HW, 3C) K-packed LHS for each dx, so the
    9 tap matmuls collapse to 3 matmuls with K = 3C.
    """
    HW = H * W
    C = y1_ref.shape[-1]
    C3 = 3 * C

    # bn1 + relu in f32 (y1 stored bf16), then bf16 for the MXU taps.
    yb = jnp.maximum(y1_ref[0].astype(jnp.float32) * s_ref[...] + t_ref[...],
                     0.0).astype(jnp.bfloat16)

    # Zero the two halo bands (covers every column block's halo), then write
    # the slab at the three dy offsets.  NOTE: offsets PAD +/- W are sublane
    # aligned for W a multiple of 16; still correct (just slower) otherwise.
    halo = PAD + W
    zband = jnp.zeros((halo, C3), jnp.bfloat16)
    yb_ref[0:halo, :] = zband
    yb_ref[HW + PAD - W:HW + 2 * PAD, :] = zband
    yb_ref[PAD + W:PAD + W + HW, 0:C] = yb            # dy = -1
    yb_ref[PAD:PAD + HW, C:2 * C] = yb                # dy =  0
    yb_ref[PAD - W:PAD - W + HW, 2 * C:C3] = yb       # dy = +1

    # Masks for taps that would wrap across the W boundary in flattened layout.
    w_pos = lax.broadcasted_iota(jnp.int32, (HW, 1), 0) % W
    mask_l = w_pos != 0          # dx = -1 invalid at output w == 0
    mask_r = w_pos != (W - 1)    # dx = +1 invalid at output w == W-1

    acc = jnp.zeros((HW, C), jnp.float32)
    for dx, mask in ((-1, mask_l), (0, None), (1, mask_r)):
        lhs = yb_ref[PAD + dx:PAD + dx + HW, :]       # (HW, 3C) bf16
        if mask is not None:
            lhs = jnp.where(mask, lhs, 0)
        acc = acc + jnp.dot(lhs, w2_ref[dx + 1],      # (3C, C) bf16
                            preferred_element_type=jnp.float32)

    y2 = acc + b2_ref[...]
    y2_ref[0] = y2.astype(jnp.bfloat16)               # bf16 intermediate in HBM
    st = jnp.concatenate([jnp.sum(y2, axis=0, keepdims=True),
                          jnp.sum(y2 * y2, axis=0, keepdims=True)], axis=0)
    st_ref[...] = st.reshape(1, 2, C)


def _finalize_kernel(y_ref, r_ref, s_ref, t_ref, o_ref):
    """out = relu(bn3(y) + residual)."""
    y = y_ref[...].astype(jnp.float32)
    o_ref[...] = jnp.maximum(y * s_ref[...] + t_ref[...] + r_ref[...], 0.0)


# --------------------------------------------------------------------------- #
# pallas_call wrappers
# --------------------------------------------------------------------------- #
def _mm_stats(x, scale, shift, w, b, *, prenorm, tm, m_valid):
    m_pad, cin = x.shape
    cout = w.shape[1]
    g = m_pad // tm
    kern = functools.partial(_mm_stats_kernel, prenorm=prenorm,
                             mask_tail=(m_pad != m_valid), m_valid=m_valid, tm=tm)
    flops = 2 * m_pad * cin * cout
    block_bytes = (tm * cin * x.dtype.itemsize + 2 * cin * 4 + cin * cout * 2
                   + cout * 4 + tm * cout * 2 + 2 * cout * 4)
    bytes_ = (m_pad * cin * x.dtype.itemsize + w.size * 2
              + m_pad * cout * 2 + g * 2 * cout * 4 + 4 * (cin + cout) * 4)
    return pl.pallas_call(
        kern,
        out_shape=(jax.ShapeDtypeStruct((m_pad, cout), jnp.bfloat16),
                   jax.ShapeDtypeStruct((g, 2, cout), jnp.float32)),
        grid_spec=pltpu.PrefetchScalarGridSpec(
            num_scalar_prefetch=0,
            grid=(g,),
            in_specs=[pl.BlockSpec((tm, cin), lambda i: (i, 0)),
                      pl.BlockSpec((1, cin), lambda i: (0, 0)),
                      pl.BlockSpec((1, cin), lambda i: (0, 0)),
                      pl.BlockSpec((cin, cout), lambda i: (0, 0)),
                      pl.BlockSpec((1, cout), lambda i: (0, 0))],
            out_specs=[pl.BlockSpec((tm, cout), lambda i: (i, 0)),
                       pl.BlockSpec((1, 2, cout), lambda i: (i, 0, 0))]),
        compiler_params=_mosaic_params(block_bytes),
        cost_estimate=pl.CostEstimate(flops=flops, transcendentals=0,
                                      bytes_accessed=bytes_),
    )(x, scale, shift, w, b)


def _conv3x3_stats(y1, scale, shift, w2, b2, *, H, W):
    n, hw, c = y1.shape
    pad = _rup(W + 1, 16)     # halo rows, rounded for aligned bf16 stores
    kern = functools.partial(_conv3x3_stats_kernel, H=H, W=W, PAD=pad)
    flops = 2 * n * hw * 9 * c * c
    block_bytes = (hw * c * 2 + 2 * c * 4 + 9 * c * c * 2 + c * 4
                   + hw * c * 2 + 2 * c * 4)
    scratch_bytes = (hw + 2 * pad) * 3 * c * 2
    bytes_ = y1.size * 2 + w2.size * 2 + n * hw * c * 2 + n * 2 * c * 4
    return pl.pallas_call(
        kern,
        out_shape=(jax.ShapeDtypeStruct((n, hw, c), jnp.bfloat16),
                   jax.ShapeDtypeStruct((n, 2, c), jnp.float32)),
        grid_spec=pltpu.PrefetchScalarGridSpec(
            num_scalar_prefetch=0,
            grid=(n,),
            in_specs=[pl.BlockSpec((1, hw, c), lambda i: (i, 0, 0)),
                      pl.BlockSpec((1, c), lambda i: (0, 0)),
                      pl.BlockSpec((1, c), lambda i: (0, 0)),
                      pl.BlockSpec((3, 3 * c, c), lambda i: (0, 0, 0)),
                      pl.BlockSpec((1, c), lambda i: (0, 0))],
            out_specs=[pl.BlockSpec((1, hw, c), lambda i: (i, 0, 0)),
                       pl.BlockSpec((1, 2, c), lambda i: (i, 0, 0))],
            scratch_shapes=[pltpu.VMEM((hw + 2 * pad, 3 * c), jnp.bfloat16)]),
        compiler_params=_mosaic_params(block_bytes, scratch_bytes),
        cost_estimate=pl.CostEstimate(flops=flops, transcendentals=0,
                                      bytes_accessed=bytes_),
    )(y1, scale, shift, w2, b2)


def _finalize(y3, residual, scale, shift, *, tm):
    m_pad, c = y3.shape
    g = m_pad // tm
    block_bytes = tm * c * 2 + tm * c * 4 + 2 * c * 4 + tm * c * 4
    return pl.pallas_call(
        _finalize_kernel,
        out_shape=jax.ShapeDtypeStruct((m_pad, c), jnp.float32),
        grid_spec=pltpu.PrefetchScalarGridSpec(
            num_scalar_prefetch=0,
            grid=(g,),
            in_specs=[pl.BlockSpec((tm, c), lambda i: (i, 0)),
                      pl.BlockSpec((tm, c), lambda i: (i, 0)),
                      pl.BlockSpec((1, c), lambda i: (0, 0)),
                      pl.BlockSpec((1, c), lambda i: (0, 0))],
            out_specs=pl.BlockSpec((tm, c), lambda i: (i, 0))),
        compiler_params=_mosaic_params(block_bytes),
        cost_estimate=pl.CostEstimate(flops=4 * m_pad * c, transcendentals=0,
                                      bytes_accessed=(2 + 4 + 4) * m_pad * c),
    )(y3, residual, scale, shift)


# --------------------------------------------------------------------------- #
# public wrapper (NCHW in / NCHW out, PyTorch convention)
# --------------------------------------------------------------------------- #
@jax.jit
def bottleneck_block(x_nchw, params):
    (w1, b1, g1, be1, w2, b2, g2, be2, w3, b3, g3, be3) = params
    n, cin, h, w_sp = x_nchw.shape
    cmid = w1.shape[1]
    cout = w3.shape[1]
    assert cin == cout, "identity_downsample=None requires in_channels == 4*out_channels"

    cin_p = _rup(cin, LANE)
    cmid_p = _rup(cmid, LANE)
    cout_p = _rup(cout, LANE)
    m = n * h * w_sp
    hw = h * w_sp
    tm = min(TM_TARGET, _rup(m, 8))
    m_pad = _rup(m, tm)

    # Single padded f32 copy of the input in HBM (used as residual AND as the
    # pass-1 operand; bf16 cast happens inside the kernel).
    x_res = jnp.pad(
        jnp.transpose(x_nchw, (0, 2, 3, 1)).astype(jnp.float32).reshape(m, cin),
        ((0, m_pad - m), (0, cin_p - cin)))

    # Weights channels-last: 1x1 convs as (Cin,Cout); 3x3 conv K-packed as
    # (dx, 3*Cin, Cout) with the three dy taps stacked along K.  All bf16.
    w1p = _pad_to(w1.astype(jnp.float32), (cin_p, cmid_p)).astype(jnp.bfloat16)
    w2pad = _pad_to(w2.astype(jnp.float32), (3, 3, cmid_p, cmid_p))
    w2p = jnp.transpose(w2pad, (1, 0, 2, 3)).reshape(3, 3 * cmid_p, cmid_p
                                                     ).astype(jnp.bfloat16)
    w3p = _pad_to(w3.astype(jnp.float32), (cmid_p, cout_p)).astype(jnp.bfloat16)
    b1p, b2p, b3p = _row(b1, cmid_p), _row(b2, cmid_p), _row(b3, cout_p)
    g1p, be1p = _row(g1, cmid_p), _row(be1, cmid_p)
    g2p, be2p = _row(g2, cmid_p), _row(be2, cmid_p)
    g3p, be3p = _row(g3, cout_p), _row(be3, cout_p)
    zeros_in = jnp.zeros((1, cin_p), jnp.float32)   # unused prenorm params, pass 1

    # pass 1: conv1 (1x1) + bn1 partial stats
    y1, st1 = _mm_stats(x_res, zeros_in, zeros_in, w1p, b1p,
                        prenorm=False, tm=tm, m_valid=m)
    s1, t1 = _bn_scale_shift(st1, g1p, be1p, m)

    # pass 2: bn1 + relu + conv2 (3x3, pad 1, stride 1) + bn2 partial stats
    y2, st2 = _conv3x3_stats(y1[:m].reshape(n, hw, cmid_p), s1, t1, w2p, b2p,
                             H=h, W=w_sp)
    s2, t2 = _bn_scale_shift(st2, g2p, be2p, m)

    # pass 3: bn2 + relu + conv3 (1x1) + bn3 partial stats
    y2_flat = jnp.pad(y2.reshape(m, cmid_p), ((0, m_pad - m), (0, 0)))
    y3, st3 = _mm_stats(y2_flat, s2, t2, w3p, b3p,
                        prenorm=True, tm=tm, m_valid=m)
    s3, t3 = _bn_scale_shift(st3, g3p, be3p, m)

    # pass 4: bn3 + residual + relu
    out = _finalize(y3, x_res, s3, t3, tm=tm)

    out = out[:m, :cout].reshape(n, h, w_sp, cout)
    return jnp.transpose(out, (0, 3, 1, 2))       # NHWC -> NCHW


# --------------------------------------------------------------------------- #
# synthetic params + pure-JAX reference
# --------------------------------------------------------------------------- #
def init_params(key, in_channels, out_channels):
    expansion = 4
    cout = out_channels * expansion
    ks = jax.random.split(key, 6)
    w1 = 0.1 * jax.random.normal(ks[0], (in_channels, out_channels), jnp.float32)
    b1 = 0.1 * jax.random.normal(ks[1], (out_channels,), jnp.float32)
    w2 = 0.1 * jax.random.normal(ks[2], (3, 3, out_channels, out_channels), jnp.float32)
    b2 = 0.1 * jax.random.normal(ks[3], (out_channels,), jnp.float32)
    w3 = 0.1 * jax.random.normal(ks[4], (out_channels, cout), jnp.float32)
    b3 = 0.1 * jax.random.normal(ks[5], (cout,), jnp.float32)
    # BatchNorm affine params (PyTorch defaults: weight=1, bias=0)
    g1, be1 = jnp.ones((out_channels,), jnp.float32), jnp.zeros((out_channels,), jnp.float32)
    g2, be2 = jnp.ones((out_channels,), jnp.float32), jnp.zeros((out_channels,), jnp.float32)
    g3, be3 = jnp.ones((cout,), jnp.float32), jnp.zeros((cout,), jnp.float32)
    return (w1, b1, g1, be1, w2, b2, g2, be2, w3, b3, g3, be3)


def reference(x_nchw, params):
    """Pure-JAX f32 reference of the PyTorch forward (train-mode BN)."""
    (w1, b1, g1, be1, w2, b2, g2, be2, w3, b3, g3, be3) = params
    x = jnp.transpose(x_nchw, (0, 2, 3, 1))

    def bn(y, g, b):
        mean = jnp.mean(y, axis=(0, 1, 2), keepdims=True)
        var = jnp.mean((y - mean) ** 2, axis=(0, 1, 2), keepdims=True)
        return g * (y - mean) / jnp.sqrt(var + EPS) + b

    y = jnp.einsum("nhwc,cd->nhwd", x, w1) + b1
    y = jax.nn.relu(bn(y, g1, be1))
    y = lax.conv_general_dilated(y, w2, (1, 1), ((1, 1), (1, 1)),
                                 dimension_numbers=("NHWC", "HWIO", "NHWC")) + b2
    y = jax.nn.relu(bn(y, g2, be2))
    y = jnp.einsum("nhwc,cd->nhwd", y, w3) + b3
    y = bn(y, g3, be3)
    y = jax.nn.relu(y + x)
    return jnp.transpose(y, (0, 3, 1, 2))


if __name__ == "__main__":
    key = jax.random.PRNGKey(0)
    kx, kp = jax.random.split(key)

    # Small shapes consistent with the module: in_channels = out_channels * 4,
    # stride = 1 (so the bare residual add is valid).
    N, H, W = 2, 16, 16
    out_channels = 4
    in_channels = out_channels * 4  # 16

    x = jax.random.normal(kx, (N, in_channels, H, W), jnp.float32)
    params = init_params(kp, in_channels, out_channels)

    out = jax.block_until_ready(bottleneck_block(x, params))
    ref = reference(x, params)
    # bf16 MXU operands + bf16 inter-pass activations (f32 accumulation) ->
    # mixed-precision tolerance.
    np.testing.assert_allclose(np.asarray(out), np.asarray(ref), rtol=5e-2, atol=5e-2)
    print("KERNEL_OK")
</pallas_src>

<mosaic_0001>
module attributes {stable_mosaic.version = 11 : i64} {
  func.func @_mm_stats_kernel(%arg0: i32, %arg1: memref<512x128xf32, #tpu.memory_space<vmem>>, %arg2: memref<1x128xf32, #tpu.memory_space<vmem>>, %arg3: memref<1x128xf32, #tpu.memory_space<vmem>>, %arg4: memref<128x128xbf16, #tpu.memory_space<vmem>>, %arg5: memref<1x128xf32, #tpu.memory_space<vmem>>, %arg6: memref<512x128xbf16, #tpu.memory_space<vmem>>, %arg7: memref<1x2x128xf32, #tpu.memory_space<vmem>>) attributes {dimension_semantics = [#tpu.dimension_semantics<parallel>], iteration_bounds = array<i64: 1>, scalar_prefetch = 0 : i64, scratch_operands = 0 : i64, tpu.core_type = #tpu.core_type<tc>, window_params = [{transform_indices = @transform_0, window_bounds = array<i64: 512, 128>}, {pipeline_mode = #tpu.pipeline_mode<synchronous>, transform_indices = @transform_1, window_bounds = array<i64: 1, 128>}, {pipeline_mode = #tpu.pipeline_mode<synchronous>, transform_indices = @transform_2, window_bounds = array<i64: 1, 128>}, {pipeline_mode = #tpu.pipeline_mode<synchronous>, transform_indices = @transform_3, window_bounds = array<i64: 128, 128>}, {pipeline_mode = #tpu.pipeline_mode<synchronous>, transform_indices = @transform_4, window_bounds = array<i64: 1, 128>}, {transform_indices = @transform_5, window_bounds = array<i64: 512, 128>}, {transform_indices = @transform_6, window_bounds = array<i64: 1, 2, 128>}]} {
    %c0 = arith.constant 0 : index
    %c0_0 = arith.constant 0 : index
    %0 = vector.load %arg1[%c0, %c0_0] : memref<512x128xf32, #tpu.memory_space<vmem>>, vector<512x128xf32>
    %1 = arith.truncf %0 : vector<512x128xf32> to vector<512x128xbf16>
    %c0_1 = arith.constant 0 : index
    %c0_2 = arith.constant 0 : index
    %2 = vector.load %arg4[%c0_1, %c0_2] : memref<128x128xbf16, #tpu.memory_space<vmem>>, vector<128x128xbf16>
    %cst = arith.constant dense<0.000000e+00> : vector<512x128xf32>
    %3 = tpu.matmul %1, %2, %cst {dimension_numbers = #tpu.dot_dimension_numbers<[1], [0], [0], [1], [0, 0, 1, 1], [], []>} : vector<512x128xbf16>, vector<128x128xbf16>, vector<512x128xf32> -> vector<512x128xf32>
    %c0_3 = arith.constant 0 : index
    %c0_4 = arith.constant 0 : index
    %4 = vector.load %arg5[%c0_3, %c0_4] : memref<1x128xf32, #tpu.memory_space<vmem>>, vector<1x128xf32>
    %5 = vector.broadcast %4 : vector<1x128xf32> to vector<512x128xf32>
    %6 = arith.addf %3, %5 : vector<512x128xf32>
    %7 = arith.truncf %6 : vector<512x128xf32> to vector<512x128xbf16>
    %c0_5 = arith.constant 0 : index
    %c0_6 = arith.constant 0 : index
    %8 = vector.load %arg6[%c0_5, %c0_6] : memref<512x128xbf16, #tpu.memory_space<vmem>>, vector<512x128xbf16>
    tpu.vector_store %arg6[%c0_5, %c0_6], %7 {strides = array<i32>} : memref<512x128xbf16, #tpu.memory_space<vmem>>, vector<512x128xbf16>,
    %cst_7 = arith.constant dense<0.000000e+00> : vector<128xf32>
    %9 = vector.multi_reduction <add>, %6, %cst_7 [0] : vector<512x128xf32> to vector<128xf32>
    %10 = vector.shape_cast %9 : vector<128xf32> to vector<1x128xf32>
    %11 = arith.mulf %6, %6 : vector<512x128xf32>
    %cst_8 = arith.constant dense<0.000000e+00> : vector<128xf32>
    %12 = vector.multi_reduction <add>, %11, %cst_8 [0] : vector<512x128xf32> to vector<128xf32>
    %13 = vector.shape_cast %12 : vector<128xf32> to vector<1x128xf32>
    %14 = tpu.concatenate %10, %13 in 0 : vector<1x128xf32>, vector<1x128xf32> -> vector<2x128xf32>
    %15 = vector.shape_cast %14 : vector<2x128xf32> to vector<1x2x128xf32>
    %c0_9 = arith.constant 0 : index
    %c0_10 = arith.constant 0 : index
    %c0_11 = arith.constant 0 : index
    %16 = vector.load %arg7[%c0_9, %c0_10, %c0_11] : memref<1x2x128xf32, #tpu.memory_space<vmem>>, vector<1x2x128xf32>
    tpu.vector_store %arg7[%c0_9, %c0_10, %c0_11], %15 {strides = array<i32>} : memref<1x2x128xf32, #tpu.memory_space<vmem>>, vector<1x2x128xf32>,
    return
  }
  func.func @transform_0(%arg0: i32) -> (i32, i32) {
    %c0_i32 = arith.constant 0 : i32
    %c0_i32_0 = arith.constant 0 : i32
    return %arg0, %c0_i32 : i32, i32
  }
  func.func @transform_1(%arg0: i32) -> (i32, i32) {
    %c0_i32 = arith.constant 0 : i32
    %c0_i32_0 = arith.constant 0 : i32
    %c0_i32_1 = arith.constant 0 : i32
    return %c0_i32, %c0_i32_0 : i32, i32
  }
  func.func @transform_2(%arg0: i32) -> (i32, i32) {
    %c0_i32 = arith.constant 0 : i32
    %c0_i32_0 = arith.constant 0 : i32
    %c0_i32_1 = arith.constant 0 : i32
    return %c0_i32, %c0_i32_0 : i32, i32
  }
  func.func @transform_3(%arg0: i32) -> (i32, i32) {
    %c0_i32 = arith.constant 0 : i32
    %c0_i32_0 = arith.constant 0 : i32
    %c0_i32_1 = arith.constant 0 : i32
    return %c0_i32, %c0_i32_0 : i32, i32
  }
  func.func @transform_4(%arg0: i32) -> (i32, i32) {
    %c0_i32 = arith.constant 0 : i32
    %c0_i32_0 = arith.constant 0 : i32
    %c0_i32_1 = arith.constant 0 : i32
    return %c0_i32, %c0_i32_0 : i32, i32
  }
  func.func @transform_5(%arg0: i32) -> (i32, i32) {
    %c0_i32 = arith.constant 0 : i32
    %c0_i32_0 = arith.constant 0 : i32
    return %arg0, %c0_i32 : i32, i32
  }
  func.func @transform_6(%arg0: i32) -> (i32, i32, i32) {
    %c0_i32 = arith.constant 0 : i32
    %c0_i32_0 = arith.constant 0 : i32
    %c0_i32_1 = arith.constant 0 : i32
    return %arg0, %c0_i32, %c0_i32_0 : i32, i32, i32
  }
}

module attributes {stable_mosaic.version = 11 : i64} {
  func.func @_conv3x3_stats_kernel(%arg0: i32, %arg1: memref<1x256x128xbf16, #tpu.memory_space<vmem>>, %arg2: memref<1x128xf32, #tpu.memory_space<vmem>>, %arg3: memref<1x128xf32, #tpu.memory_space<vmem>>, %arg4: memref<3x384x128xbf16, #tpu.memory_space<vmem>>, %arg5: memref<1x128xf32, #tpu.memory_space<vmem>>, %arg6: memref<1x256x128xbf16, #tpu.memory_space<vmem>>, %arg7: memref<1x2x128xf32, #tpu.memory_space<vmem>>, %arg8: memref<320x384xbf16, #tpu.memory_space<vmem>>) attributes {dimension_semantics = [#tpu.dimension_semantics<parallel>], iteration_bounds = array<i64: 2>, scalar_prefetch = 0 : i64, scratch_operands = 1 : i64, tpu.core_type = #tpu.core_type<tc>, window_params = [{transform_indices = @transform_0, window_bounds = array<i64: 1, 256, 128>}, {pipeline_mode = #tpu.pipeline_mode<synchronous>, transform_indices = @transform_1, window_bounds = array<i64: 1, 128>}, {pipeline_mode = #tpu.pipeline_mode<synchronous>, transform_indices = @transform_2, window_bounds = array<i64: 1, 128>}, {pipeline_mode = #tpu.pipeline_mode<synchronous>, transform_indices = @transform_3, window_bounds = array<i64: 3, 384, 128>}, {pipeline_mode = #tpu.pipeline_mode<synchronous>, transform_indices = @transform_4, window_bounds = array<i64: 1, 128>}, {transform_indices = @transform_5, window_bounds = array<i64: 1, 256, 128>}, {transform_indices = @transform_6, window_bounds = array<i64: 1, 2, 128>}]} {
    %c0 = arith.constant 0 : index
    %c0_0 = arith.constant 0 : index
    %c0_1 = arith.constant 0 : index
    %0 = vector.load %arg1[%c0, %c0_0, %c0_1] : memref<1x256x128xbf16, #tpu.memory_space<vmem>>, vector<1x256x128xbf16>
    %1 = vector.shape_cast %0 : vector<1x256x128xbf16> to vector<256x128xbf16>
    %2 = arith.extf %1 : vector<256x128xbf16> to vector<256x128xf32>
    %c0_2 = arith.constant 0 : index
    %c0_3 = arith.constant 0 : index
    %3 = vector.load %arg2[%c0_2, %c0_3] : memref<1x128xf32, #tpu.memory_space<vmem>>, vector<1x128xf32>
    %4 = vector.broadcast %3 : vector<1x128xf32> to vector<256x128xf32>
    %5 = arith.mulf %2, %4 : vector<256x128xf32>
    %c0_4 = arith.constant 0 : index
    %c0_5 = arith.constant 0 : index
    %6 = vector.load %arg3[%c0_4, %c0_5] : memref<1x128xf32, #tpu.memory_space<vmem>>, vector<1x128xf32>
    %7 = vector.broadcast %6 : vector<1x128xf32> to vector<256x128xf32>
    %8 = arith.addf %5, %7 : vector<256x128xf32>
    %cst = arith.constant 0.000000e+00 : f32
    %9 = vector.broadcast %cst : f32 to vector<256x128xf32>
    %10 = arith.maximumf %8, %9 : vector<256x128xf32>
    %11 = arith.truncf %10 : vector<256x128xf32> to vector<256x128xbf16>
    %cst_6 = arith.constant 0.000000e+00 : bf16
    %12 = vector.broadcast %cst_6 : bf16 to vector<48x384xbf16>
    %c0_7 = arith.constant 0 : index
    %c0_8 = arith.constant 0 : index
    %13 = vector.load %arg8[%c0_7, %c0_8] : memref<320x384xbf16, #tpu.memory_space<vmem>>, vector<48x384xbf16>
    tpu.vector_store %arg8[%c0_7, %c0_8], %12 {strides = array<i32>} : memref<320x384xbf16, #tpu.memory_space<vmem>>, vector<48x384xbf16>,
    %c272 = arith.constant 272 : index
    %c0_9 = arith.constant 0 : index
    %14 = vector.load %arg8[%c272, %c0_9] : memref<320x384xbf16, #tpu.memory_space<vmem>>, vector<48x384xbf16>
    tpu.vector_store %arg8[%c272, %c0_9], %12 {strides = array<i32>} : memref<320x384xbf16, #tpu.memory_space<vmem>>, vector<48x384xbf16>,
    %c48 = arith.constant 48 : index
    %c0_10 = arith.constant 0 : index
    %15 = vector.load %arg8[%c48, %c0_10] : memref<320x384xbf16, #tpu.memory_space<vmem>>, vector<256x128xbf16>
    tpu.vector_store %arg8[%c48, %c0_10], %11 {strides = array<i32>} : memref<320x384xbf16, #tpu.memory_space<vmem>>, vector<256x128xbf16>,
    %c32 = arith.constant 32 : index
    %c128 = arith.constant 128 : index
    %16 = vector.load %arg8[%c32, %c128] : memref<320x384xbf16, #tpu.memory_space<vmem>>, vector<256x128xbf16>
    tpu.vector_store %arg8[%c32, %c128], %11 {strides = array<i32>} : memref<320x384xbf16, #tpu.memory_space<vmem>>, vector<256x128xbf16>,
    %c16 = arith.constant 16 : index
    %c256 = arith.constant 256 : index
    %17 = vector.load %arg8[%c16, %c256] : memref<320x384xbf16, #tpu.memory_space<vmem>>, vector<256x128xbf16>
    tpu.vector_store %arg8[%c16, %c256], %11 {strides = array<i32>} : memref<320x384xbf16, #tpu.memory_space<vmem>>, vector<256x128xbf16>,
    %18 = tpu.iota {dimensions = array<i32: 0>} : vector<256x1xi32>
    %c16_i32 = arith.constant 16 : i32
    %c0_i32 = arith.constant 0 : i32
    %19 = arith.cmpi eq, %c16_i32, %c0_i32 : i32
    %c1_i32 = arith.constant 1 : i32
    %20 = arith.select %19, %c1_i32, %c16_i32 : i32
    %21 = vector.broadcast %20 : i32 to vector<256x1xi32>
    %22 = arith.remsi %18, %21 : vector<256x1xi32>
    %c0_i32_11 = arith.constant 0 : i32
    %23 = vector.broadcast %c0_i32_11 : i32 to vector<256x1xi32>
    %24 = arith.cmpi ne, %22, %23 : vector<256x1xi32>
    %c0_i32_12 = arith.constant 0 : i32
    %25 = vector.broadcast %c0_i32_12 : i32 to vector<256x1xi32>
    %26 = arith.cmpi slt, %22, %25 : vector<256x1xi32>
    %c0_i32_13 = arith.constant 0 : i32
    %27 = arith.cmpi slt, %20, %c0_i32_13 : i32
    %28 = vector.broadcast %27 : i1 to vector<256x1xi1>
    %29 = vector.broadcast %28 : vector<256x1xi1> to vector<256x1xi1>
    %30 = arith.xori %26, %29 : vector<256x1xi1>
    %31 = arith.andi %30, %24 : vector<256x1xi1>
    %32 = vector.broadcast %20 : i32 to vector<256x1xi32>
    %33 = arith.addi %22, %32 : vector<256x1xi32>
    %34 = arith.select %31, %33, %22 : vector<256x1xi1>, vector<256x1xi32>
    %c0_i32_14 = arith.constant 0 : i32
    %35 = vector.broadcast %c0_i32_14 : i32 to vector<256x1xi32>
    %36 = arith.cmpi ne, %34, %35 : vector<256x1xi32>
    %c15_i32 = arith.constant 15 : i32
    %37 = vector.broadcast %c15_i32 : i32 to vector<256x1xi32>
    %38 = arith.cmpi ne, %34, %37 : vector<256x1xi32>
    %cst_15 = arith.constant 0.000000e+00 : f32
    %39 = vector.broadcast %cst_15 : f32 to vector<256x128xf32>
    %c31 = arith.constant 31 : index
    %c0_16 = arith.constant 0 : index
    %40 = vector.load %arg8[%c31, %c0_16] : memref<320x384xbf16, #tpu.memory_space<vmem>>, vector<256x384xbf16>
    %c0_i32_17 = arith.constant 0 : i32
    %41 = arith.sitofp %c0_i32_17 : i32 to bf16
    %42 = vector.shape_cast %36 : vector<256x1xi1> to vector<256x1xi1>
    %43 = vector.broadcast %42 : vector<256x1xi1> to vector<256x384xi1>
    %44 = vector.broadcast %41 : bf16 to vector<256x384xbf16>
    %45 = arith.select %43, %40, %44 : vector<256x384xi1>, vector<256x384xbf16>
    %c0_18 = arith.constant 0 : index
    %c0_19 = arith.constant 0 : index
    %c0_20 = arith.constant 0 : index
    %46 = vector.load %arg4[%c0_18, %c0_19, %c0_20] : memref<3x384x128xbf16, #tpu.memory_space<vmem>>, vector<1x384x128xbf16>
    %47 = vector.shape_cast %46 : vector<1x384x128xbf16> to vector<384x128xbf16>
    %cst_21 = arith.constant dense<0.000000e+00> : vector<256x128xf32>
    %48 = tpu.matmul %45, %47, %cst_21 {dimension_numbers = #tpu.dot_dimension_numbers<[1], [0], [0], [1], [0, 0, 1, 1], [], []>} : vector<256x384xbf16>, vector<384x128xbf16>, vector<256x128xf32> -> vector<256x128xf32>
    %49 = arith.addf %39, %48 : vector<256x128xf32>
    %c32_22 = arith.constant 32 : index
    %c0_23 = arith.constant 0 : index
    %50 = vector.load %arg8[%c32_22, %c0_23] : memref<320x384xbf16, #tpu.memory_space<vmem>>, vector<256x384xbf16>
    %c1 = arith.constant 1 : index
    %c0_24 = arith.constant 0 : index
    %c0_25 = arith.constant 0 : index
    %51 = vector.load %arg4[%c1, %c0_24, %c0_25] : memref<3x384x128xbf16, #tpu.memory_space<vmem>>, vector<1x384x128xbf16>
    %52 = vector.shape_cast %51 : vector<1x384x128xbf16> to vector<384x128xbf16>
    %cst_26 = arith.constant dense<0.000000e+00> : vector<256x128xf32>
    %53 = tpu.matmul %50, %52, %cst_26 {dimension_numbers = #tpu.dot_dimension_numbers<[1], [0], [0], [1], [0, 0, 1, 1], [], []>} : vector<256x384xbf16>, vector<384x128xbf16>, vector<256x128xf32> -> vector<256x128xf32>
    %54 = arith.addf %49, %53 : vector<256x128xf32>
    %c33 = arith.constant 33 : index
    %c0_27 = arith.constant 0 : index
    %55 = vector.load %arg8[%c33, %c0_27] : memref<320x384xbf16, #tpu.memory_space<vmem>>, vector<256x384xbf16>
    %c0_i32_28 = arith.constant 0 : i32
    %56 = arith.sitofp %c0_i32_28 : i32 to bf16
    %57 = vector.shape_cast %38 : vector<256x1xi1> to vector<256x1xi1>
    %58 = vector.broadcast %57 : vector<256x1xi1> to vector<256x384xi1>
    %59 = vector.broadcast %56 : bf16 to vector<256x384xbf16>
    %60 = arith.select %58, %55, %59 : vector<256x384xi1>, vector<256x384xbf16>
    %c2 = arith.constant 2 : index
    %c0_29 = arith.constant 0 : index
    %c0_30 = arith.constant 0 : index
    %61 = vector.load %arg4[%c2, %c0_29, %c0_30] : memref<3x384x128xbf16, #tpu.memory_space<vmem>>, vector<1x384x128xbf16>
    %62 = vector.shape_cast %61 : vector<1x384x128xbf16> to vector<384x128xbf16>
    %cst_31 = arith.constant dense<0.000000e+00> : vector<256x128xf32>
    %63 = tpu.matmul %60, %62, %cst_31 {dimension_numbers = #tpu.dot_dimension_numbers<[1], [0], [0], [1], [0, 0, 1, 1], [], []>} : vector<256x384xbf16>, vector<384x128xbf16>, vector<256x128xf32> -> vector<256x128xf32>
    %64 = arith.addf %54, %63 : vector<256x128xf32>
    %c0_32 = arith.constant 0 : index
    %c0_33 = arith.constant 0 : index
    %65 = vector.load %arg5[%c0_32, %c0_33] : memref<1x128xf32, #tpu.memory_space<vmem>>, vector<1x128xf32>
    %66 = vector.broadcast %65 : vector<1x128xf32> to vector<256x128xf32>
    %67 = arith.addf %64, %66 : vector<256x128xf32>
    %68 = arith.truncf %67 : vector<256x128xf32> to vector<256x128xbf16>
    %c0_34 = arith.constant 0 : index
    %c0_35 = arith.constant 0 : index
    %c0_36 = arith.constant 0 : index
    %69 = vector.load %arg6[%c0_34, %c0_35, %c0_36] : memref<1x256x128xbf16, #tpu.memory_space<vmem>>, vector<1x256x128xbf16>
    %70 = vector.shape_cast %69 : vector<1x256x128xbf16> to vector<256x128xbf16>
    %71 = vector.shape_cast %68 : vector<256x128xbf16> to vector<1x256x128xbf16>
    tpu.vector_store %arg6[%c0_34, %c0_35, %c0_36], %71 {strides = array<i32>} : memref<1x256x128xbf16, #tpu.memory_space<vmem>>, vector<1x256x128xbf16>,
    %cst_37 = arith.constant dense<0.000000e+00> : vector<128xf32>
    %72 = vector.multi_reduction <add>, %67, %cst_37 [0] : vector<256x128xf32> to vector<128xf32>
    %73 = vector.shape_cast %72 : vector<128xf32> to vector<1x128xf32>
    %74 = arith.mulf %67, %67 : vector<256x128xf32>
    %cst_38 = arith.constant dense<0.000000e+00> : vector<128xf32>
    %75 = vector.multi_reduction <add>, %74, %cst_38 [0] : vector<256x128xf32> to vector<128xf32>
    %76 = vector.shape_cast %75 : vector<128xf32> to vector<1x128xf32>
    %77 = tpu.concatenate %73, %76 in 0 : vector<1x128xf32>, vector<1x128xf32> -> vector<2x128xf32>
    %78 = vector.shape_cast %77 : vector<2x128xf32> to vector<1x2x128xf32>
    %c0_39 = arith.constant 0 : index
    %c0_40 = arith.constant 0 : index
    %c0_41 = arith.constant 0 : index
    %79 = vector.load %arg7[%c0_39, %c0_40, %c0_41] : memref<1x2x128xf32, #tpu.memory_space<vmem>>, vector<1x2x128xf32>
    tpu.vector_store %arg7[%c0_39, %c0_40, %c0_41], %78 {strides = array<i32>} : memref<1x2x128xf32, #tpu.memory_space<vmem>>, vector<1x2x128xf32>,
    return
  }
  func.func @transform_0(%arg0: i32) -> (i32, i32, i32) {
    %c0_i32 = arith.constant 0 : i32
    %c0_i32_0 = arith.constant 0 : i32
    %c0_i32_1 = arith.constant 0 : i32
    return %arg0, %c0_i32, %c0_i32_0 : i32, i32, i32
  }
  func.func @transform_1(%arg0: i32) -> (i32, i32) {
    %c0_i32 = arith.constant 0 : i32
    %c0_i32_0 = arith.constant 0 : i32
    %c0_i32_1 = arith.constant 0 : i32
    return %c0_i32, %c0_i32_0 : i32, i32
  }
  func.func @transform_2(%arg0: i32) -> (i32, i32) {
    %c0_i32 = arith.constant 0 : i32
    %c0_i32_0 = arith.constant 0 : i32
    %c0_i32_1 = arith.constant 0 : i32
    return %c0_i32, %c0_i32_0 : i32, i32
  }
  func.func @transform_3(%arg0: i32) -> (i32, i32, i32) {
    %c0_i32 = arith.constant 0 : i32
    %c0_i32_0 = arith.constant 0 : i32
    %c0_i32_1 = arith.constant 0 : i32
    %c0_i32_2 = arith.constant 0 : i32
    return %c0_i32, %c0_i32_0, %c0_i32_1 : i32, i32, i32
  }
  func.func @transform_4(%arg0: i32) -> (i32, i32) {
    %c0_i32 = arith.constant 0 : i32
    %c0_i32_0 = arith.constant 0 : i32
    %c0_i32_1 = arith.constant 0 : i32
    return %c0_i32, %c0_i32_0 : i32, i32
  }
  func.func @transform_5(%arg0: i32) -> (i32, i32, i32) {
    %c0_i32 = arith.constant 0 : i32
    %c0_i32_0 = arith.constant 0 : i32
    %c0_i32_1 = arith.constant 0 : i32
    return %arg0, %c0_i32, %c0_i32_0 : i32, i32, i32
  }
  func.func @transform_6(%arg0: i32) -> (i32, i32, i32) {
    %c0_i32 = arith.constant 0 : i32
    %c0_i32_0 = arith.constant 0 : i32
    %c0_i32_1 = arith.constant 0 : i32
    return %arg0, %c0_i32, %c0_i32_0 : i32, i32, i32
  }
}

module attributes {stable_mosaic.version = 11 : i64} {
  func.func @_mm_stats_kernel(%arg0: i32, %arg1: memref<512x128xbf16, #tpu.memory_space<vmem>>, %arg2: memref<1x128xf32, #tpu.memory_space<vmem>>, %arg3: memref<1x128xf32, #tpu.memory_space<vmem>>, %arg4: memref<128x128xbf16, #tpu.memory_space<vmem>>, %arg5: memref<1x128xf32, #tpu.memory_space<vmem>>, %arg6: memref<512x128xbf16, #tpu.memory_space<vmem>>, %arg7: memref<1x2x128xf32, #tpu.memory_space<vmem>>) attributes {dimension_semantics = [#tpu.dimension_semantics<parallel>], iteration_bounds = array<i64: 1>, scalar_prefetch = 0 : i64, scratch_operands = 0 : i64, tpu.core_type = #tpu.core_type<tc>, window_params = [{transform_indices = @transform_0, window_bounds = array<i64: 512, 128>}, {pipeline_mode = #tpu.pipeline_mode<synchronous>, transform_indices = @transform_1, window_bounds = array<i64: 1, 128>}, {pipeline_mode = #tpu.pipeline_mode<synchronous>, transform_indices = @transform_2, window_bounds = array<i64: 1, 128>}, {pipeline_mode = #tpu.pipeline_mode<synchronous>, transform_indices = @transform_3, window_bounds = array<i64: 128, 128>}, {pipeline_mode = #tpu.pipeline_mode<synchronous>, transform_indices = @transform_4, window_bounds = array<i64: 1, 128>}, {transform_indices = @transform_5, window_bounds = array<i64: 512, 128>}, {transform_indices = @transform_6, window_bounds = array<i64: 1, 2, 128>}]} {
    %c0 = arith.constant 0 : index
    %c0_0 = arith.constant 0 : index
    %0 = vector.load %arg1[%c0, %c0_0] : memref<512x128xbf16, #tpu.memory_space<vmem>>, vector<512x128xbf16>
    %1 = arith.extf %0 : vector<512x128xbf16> to vector<512x128xf32>
    %c0_1 = arith.constant 0 : index
    %c0_2 = arith.constant 0 : index
    %2 = vector.load %arg2[%c0_1, %c0_2] : memref<1x128xf32, #tpu.memory_space<vmem>>, vector<1x128xf32>
    %3 = vector.broadcast %2 : vector<1x128xf32> to vector<512x128xf32>
    %4 = arith.mulf %1, %3 : vector<512x128xf32>
    %c0_3 = arith.constant 0 : index
    %c0_4 = arith.constant 0 : index
    %5 = vector.load %arg3[%c0_3, %c0_4] : memref<1x128xf32, #tpu.memory_space<vmem>>, vector<1x128xf32>
    %6 = vector.broadcast %5 : vector<1x128xf32> to vector<512x128xf32>
    %7 = arith.addf %4, %6 : vector<512x128xf32>
    %cst = arith.constant 0.000000e+00 : f32
    %8 = vector.broadcast %cst : f32 to vector<512x128xf32>
    %9 = arith.maximumf %7, %8 : vector<512x128xf32>
    %10 = arith.truncf %9 : vector<512x128xf32> to vector<512x128xbf16>
    %c0_5 = arith.constant 0 : index
    %c0_6 = arith.constant 0 : index
    %11 = vector.load %arg4[%c0_5, %c0_6] : memref<128x128xbf16, #tpu.memory_space<vmem>>, vector<128x128xbf16>
    %cst_7 = arith.constant dense<0.000000e+00> : vector<512x128xf32>
    %12 = tpu.matmul %10, %11, %cst_7 {dimension_numbers = #tpu.dot_dimension_numbers<[1], [0], [0], [1], [0, 0, 1, 1], [], []>} : vector<512x128xbf16>, vector<128x128xbf16>, vector<512x128xf32> -> vector<512x128xf32>
    %c0_8 = arith.constant 0 : index
    %c0_9 = arith.constant 0 : index
    %13 = vector.load %arg5[%c0_8, %c0_9] : memref<1x128xf32, #tpu.memory_space<vmem>>, vector<1x128xf32>
    %14 = vector.broadcast %13 : vector<1x128xf32> to vector<512x128xf32>
    %15 = arith.addf %12, %14 : vector<512x128xf32>
    %16 = arith.truncf %15 : vector<512x128xf32> to vector<512x128xbf16>
    %c0_10 = arith.constant 0 : index
    %c0_11 = arith.constant 0 : index
    %17 = vector.load %arg6[%c0_10, %c0_11] : memref<512x128xbf16, #tpu.memory_space<vmem>>, vector<512x128xbf16>
    tpu.vector_store %arg6[%c0_10, %c0_11], %16 {strides = array<i32>} : memref<512x128xbf16, #tpu.memory_space<vmem>>, vector<512x128xbf16>,
    %cst_12 = arith.constant dense<0.000000e+00> : vector<128xf32>
    %18 = vector.multi_reduction <add>, %15, %cst_12 [0] : vector<512x128xf32> to vector<128xf32>
    %19 = vector.shape_cast %18 : vector<128xf32> to vector<1x128xf32>
    %20 = arith.mulf %15, %15 : vector<512x128xf32>
    %cst_13 = arith.constant dense<0.000000e+00> : vector<128xf32>
    %21 = vector.multi_reduction <add>, %20, %cst_13 [0] : vector<512x128xf32> to vector<128xf32>
    %22 = vector.shape_cast %21 : vector<128xf32> to vector<1x128xf32>
    %23 = tpu.concatenate %19, %22 in 0 : vector<1x128xf32>, vector<1x128xf32> -> vector<2x128xf32>
    %24 = vector.shape_cast %23 : vector<2x128xf32> to vector<1x2x128xf32>
    %c0_14 = arith.constant 0 : index
    %c0_15 = arith.constant 0 : index
    %c0_16 = arith.constant 0 : index
    %25 = vector.load %arg7[%c0_14, %c0_15, %c0_16] : memref<1x2x128xf32, #tpu.memory_space<vmem>>, vector<1x2x128xf32>
    tpu.vector_store %arg7[%c0_14, %c0_15, %c0_16], %24 {strides = array<i32>} : memref<1x2x128xf32, #tpu.memory_space<vmem>>, vector<1x2x128xf32>,
    return
  }
  func.func @transform_0(%arg0: i32) -> (i32, i32) {
    %c0_i32 = arith.constant 0 : i32
    %c0_i32_0 = arith.constant 0 : i32
    return %arg0, %c0_i32 : i32, i32
  }
  func.func @transform_1(%arg0: i32) -> (i32, i32) {
    %c0_i32 = arith.constant 0 : i32
    %c0_i32_0 = arith.constant 0 : i32
    %c0_i32_1 = arith.constant 0 : i32
    return %c0_i32, %c0_i32_0 : i32, i32
  }
  func.func @transform_2(%arg0: i32) -> (i32, i32) {
    %c0_i32 = arith.constant 0 : i32
    %c0_i32_0 = arith.constant 0 : i32
    %c0_i32_1 = arith.constant 0 : i32
    return %c0_i32, %c0_i32_0 : i32, i32
  }
  func.func @transform_3(%arg0: i32) -> (i32, i32) {
    %c0_i32 = arith.constant 0 : i32
    %c0_i32_0 = arith.constant 0 : i32
    %c0_i32_1 = arith.constant 0 : i32
    return %c0_i32, %c0_i32_0 : i32, i32
  }
  func.func @transform_4(%arg0: i32) -> (i32, i32) {
    %c0_i32 = arith.constant 0 : i32
    %c0_i32_0 = arith.constant 0 : i32
    %c0_i32_1 = arith.constant 0 : i32
    return %c0_i32, %c0_i32_0 : i32, i32
  }
  func.func @transform_5(%arg0: i32) -> (i32, i32) {
    %c0_i32 = arith.constant 0 : i32
    %c0_i32_0 = arith.constant 0 : i32
    return %arg0, %c0_i32 : i32, i32
  }
  func.func @transform_6(%arg0: i32) -> (i32, i32, i32) {
    %c0_i32 = arith.constant 0 : i32
    %c0_i32_0 = arith.constant 0 : i32
    %c0_i32_1 = arith.constant 0 : i32
    return %arg0, %c0_i32, %c0_i32_0 : i32, i32, i32
  }
}

module attributes {stable_mosaic.version = 11 : i64} {
  func.func @_finalize_kernel(%arg0: i32, %arg1: memref<512x128xbf16, #tpu.memory_space<vmem>>, %arg2: memref<512x128xf32, #tpu.memory_space<vmem>>, %arg3: memref<1x128xf32, #tpu.memory_space<vmem>>, %arg4: memref<1x128xf32, #tpu.memory_space<vmem>>, %arg5: memref<512x128xf32, #tpu.memory_space<vmem>>) attributes {dimension_semantics = [#tpu.dimension_semantics<parallel>], iteration_bounds = array<i64: 1>, scalar_prefetch = 0 : i64, scratch_operands = 0 : i64, tpu.core_type = #tpu.core_type<tc>, window_params = [{transform_indices = @transform_0, window_bounds = array<i64: 512, 128>}, {transform_indices = @transform_1, window_bounds = array<i64: 512, 128>}, {pipeline_mode = #tpu.pipeline_mode<synchronous>, transform_indices = @transform_2, window_bounds = array<i64: 1, 128>}, {pipeline_mode = #tpu.pipeline_mode<synchronous>, transform_indices = @transform_3, window_bounds = array<i64: 1, 128>}, {transform_indices = @transform_4, window_bounds = array<i64: 512, 128>}]} {
    %c0 = arith.constant 0 : index
    %c0_0 = arith.constant 0 : index
    %0 = vector.load %arg1[%c0, %c0_0] : memref<512x128xbf16, #tpu.memory_space<vmem>>, vector<512x128xbf16>
    %1 = arith.extf %0 : vector<512x128xbf16> to vector<512x128xf32>
    %c0_1 = arith.constant 0 : index
    %c0_2 = arith.constant 0 : index
    %2 = vector.load %arg3[%c0_1, %c0_2] : memref<1x128xf32, #tpu.memory_space<vmem>>, vector<1x128xf32>
    %3 = vector.broadcast %2 : vector<1x128xf32> to vector<512x128xf32>
    %4 = arith.mulf %1, %3 : vector<512x128xf32>
    %c0_3 = arith.constant 0 : index
    %c0_4 = arith.constant 0 : index
    %5 = vector.load %arg4[%c0_3, %c0_4] : memref<1x128xf32, #tpu.memory_space<vmem>>, vector<1x128xf32>
    %6 = vector.broadcast %5 : vector<1x128xf32> to vector<512x128xf32>
    %7 = arith.addf %4, %6 : vector<512x128xf32>
    %c0_5 = arith.constant 0 : index
    %c0_6 = arith.constant 0 : index
    %8 = vector.load %arg2[%c0_5, %c0_6] : memref<512x128xf32, #tpu.memory_space<vmem>>, vector<512x128xf32>
    %9 = arith.addf %7, %8 : vector<512x128xf32>
    %cst = arith.constant 0.000000e+00 : f32
    %10 = vector.broadcast %cst : f32 to vector<512x128xf32>
    %11 = arith.maximumf %9, %10 : vector<512x128xf32>
    %c0_7 = arith.constant 0 : index
    %c0_8 = arith.constant 0 : index
    %12 = vector.load %arg5[%c0_7, %c0_8] : memref<512x128xf32, #tpu.memory_space<vmem>>, vector<512x128xf32>
    tpu.vector_store %arg5[%c0_7, %c0_8], %11 {strides = array<i32>} : memref<512x128xf32, #tpu.memory_space<vmem>>, vector<512x128xf32>,
    return
  }
  func.func @transform_0(%arg0: i32) -> (i32, i32) {
    %c0_i32 = arith.constant 0 : i32
    %c0_i32_0 = arith.constant 0 : i32
    return %arg0, %c0_i32 : i32, i32
  }
  func.func @transform_1(%arg0: i32) -> (i32, i32) {
    %c0_i32 = arith.constant 0 : i32
    %c0_i32_0 = arith.constant 0 : i32
    return %arg0, %c0_i32 : i32, i32
  }
  func.func @transform_2(%arg0: i32) -> (i32, i32) {
    %c0_i32 = arith.constant 0 : i32
    %c0_i32_0 = arith.constant 0 : i32
    %c0_i32_1 = arith.constant 0 : i32
    return %c0_i32, %c0_i32_0 : i32, i32
  }
  func.func @transform_3(%arg0: i32) -> (i32, i32) {
    %c0_i32 = arith.constant 0 : i32
    %c0_i32_0 = arith.constant 0 : i32
    %c0_i32_1 = arith.constant 0 : i32
    return %c0_i32, %c0_i32_0 : i32, i32
  }
  func.func @transform_4(%arg0: i32) -> (i32, i32) {
    %c0_i32 = arith.constant 0 : i32
    %c0_i32_0 = arith.constant 0 : i32
    return %arg0, %c0_i32 : i32, i32
  }
}

</mosaic_0001>

<bundles_post_ra>
// kernel: bottleneck_block.4
= control target key start
LH: loop header
LB: loop body
LE: loop exit
PB: predicated region body
PF: predicated region fallthrough
CT: control target
= control target key end

     0   :  { %vm1001_vm0 = vcmask 1040384   ;;  %s2095_s1 = inlined_call_operand.vmem [shape: f32[1,128], index: 1, kind: input, shape index: {}, may-alias: {1,2}]   ;;  %s2096_s2 = inlined_call_operand.vmem [shape: f32[1,128], index: 2, kind: input, shape index: {}, may-alias: {1,2}]   ;;  %s2097_s3 = inlined_call_operand.vmem [shape: bf16[128,128], index: 3, kind: input, shape index: {}]   ;;  %s2098_s0 = inlined_call_operand.vmem [shape: f32[512,128], index: 0, kind: input, shape index: {}]   ;;  %s2099_s4 = inlined_call_operand.vmem [shape: f32[1,128], index: 4, kind: input, shape index: {}]   ;;  %s2100_s5 = inlined_call_operand.vmem [shape: bf16[512,128], index: 5, kind: output, shape index: {0}]   ;;  %s2101_s6 = inlined_call_operand.vmem [shape: f32[1,2,128], index: 6, kind: output, shape index: {1}]  }
   0x1   :  { %v1476_v0 = vld [vmem:[%s2097_s3 + $0x38] sm:$0xff]   ;;  %v1477_v1 = vld [vmem:[%s2097_s3 + $0x30] sm:$0xff]   ;;  %v1478_v2 = vld [vmem:[%s2097_s3 + $0x28] sm:$0xff]  }
   0x2   :  { %1380 = vmatprep.subr.bf16.mxu0 %v1476_v0  ;;  %1460 = vmatprep.subr.bf16.mxu1 %v1476_v0  ;;  %v1479_v3 = vld [vmem:[%s2097_s3 + $0x20] sm:$0xff]   ;;  %v24_v5 = vld [vmem:[%s2098_s0 + $0x8] sm:$0xff]  ;;  %v1480_v7 = vld [vmem:[%s2097_s3 + $0x18] sm:$0xff]  }
   0x3   :  { %1381 = vmatpush3.bf16.msra.mxu0 %v1476_v0  ;;  %1468 = vmatpush3.bf16.msra.mxu1 %v1476_v0  ;;  %v23_v4 = vld [vmem:[%s2098_s0] sm:$0xff]  ;;  %v1481_v8 = vld [vmem:[%s2097_s3 + $0x10] sm:$0xff]   ;;  %v56_v10 = vld [vmem:[%s2098_s0 + $0x108] sm:$0xff] }
   0x4   :  { %1382 = vmatprep.subr.bf16.mxu0 %v1477_v1  ;;  %1461 = vmatprep.subr.bf16.mxu1 %v1477_v1  ;;  %v87_v6 = vpack.c.bf16 %v24_v5, %v23_v4  ;;  %v55_v9 = vld [vmem:[%s2098_s0 + $0x100] sm:$0xff]  ;;  %v1482_v11 = vld [vmem:[%s2097_s3 + $0x8] sm:$0xff]   ;;  %v25_v14 = vld [vmem:[%s2098_s0 + $0x10] sm:$0xff] }
   0x5   :  { %v103_v12 = vpack.c.bf16 %v56_v10, %v55_v9  ;;  %v1483_v13 = vld [vmem:[%s2097_s3] sm:$0xff]   ;;  %v26_v15 = vld [vmem:[%s2098_s0 + $0x18] sm:$0xff]  ;;  %v28_v17 = vld [vmem:[%s2098_s0 + $0x28] sm:$0xff] }
   0x6   :  { %1396 = vmatprep.mubr.bf16.mxu0 %v87_v6  ;;  %v27_v16 = vld [vmem:[%s2098_s0 + $0x20] sm:$0xff]  ;;  %v57_v18 = vld [vmem:[%s2098_s0 + $0x110] sm:$0xff]  ;;  %v58_v19 = vld [vmem:[%s2098_s0 + $0x118] sm:$0xff]  ;;  %v88_v22 = vpack.c.bf16 %v26_v15, %v25_v14 }
   0x7   :  { %1383 = vmatpush3.bf16.msra.mxu0 %v1477_v1  ;;  %1469 = vmatpush3.bf16.msra.mxu1 %v1477_v1  ;;  %v59_v20 = vld [vmem:[%s2098_s0 + $0x120] sm:$0xff]  ;;  %v60_v21 = vld [vmem:[%s2098_s0 + $0x128] sm:$0xff]  ;;  %v89_v23 = vpack.c.bf16 %v28_v17, %v27_v16  ;;  %v104_v24 = vpack.c.bf16 %v58_v19, %v57_v18  ;;  %v29_v26 = vld [vmem:[%s2098_s0 + $0x30] sm:$0xff] }
   0x8   :  { %1384 = vmatprep.subr.bf16.mxu0 %v1478_v2  ;;  %1462 = vmatprep.subr.bf16.mxu1 %v1478_v2  ;;  %v105_v25 = vpack.c.bf16 %v60_v21, %v59_v20  ;;  %v30_v27 = vld [vmem:[%s2098_s0 + $0x38] sm:$0xff]  ;;  %v31_v28 = vld [vmem:[%s2098_s0 + $0x40] sm:$0xff]  ;;  %v32_v29 = vld [vmem:[%s2098_s0 + $0x48] sm:$0xff] }
   0x9   :  { %1428 = vmatprep.mubr.bf16.mxu1 %v103_v12  ;;  %v61_v30 = vld [vmem:[%s2098_s0 + $0x130] sm:$0xff]  ;;  %v62_v31 = vld [vmem:[%s2098_s0 + $0x138] sm:$0xff]  ;;  %v63_v32 = vld [vmem:[%s2098_s0 + $0x140] sm:$0xff]  ;;  %v90_v34 = vpack.c.bf16 %v30_v27, %v29_v26  ;;  %v91_v35 = vpack.c.bf16 %v32_v29, %v31_v28 }
   0xa   :  { %v64_v33 = vld [vmem:[%s2098_s0 + $0x148] sm:$0xff]  ;;  %v106_v36 = vpack.c.bf16 %v62_v31, %v61_v30  ;;  %v33_v38 = vld [vmem:[%s2098_s0 + $0x50] sm:$0xff]  ;;  %v34_v39 = vld [vmem:[%s2098_s0 + $0x58] sm:$0xff] }
   0xb   :  { %1385 = vmatpush3.bf16.msra.mxu0 %v1478_v2  ;;  %1470 = vmatpush3.bf16.msra.mxu1 %v1478_v2  ;;  %v107_v37 = vpack.c.bf16 %v64_v33, %v63_v32  ;;  %v35_v40 = vld [vmem:[%s2098_s0 + $0x60] sm:$0xff]  ;;  %v36_v41 = vld [vmem:[%s2098_s0 + $0x68] sm:$0xff]  ;;  %v65_v42 = vld [vmem:[%s2098_s0 + $0x150] sm:$0xff]  ;;  %v92_v46 = vpack.c.bf16 %v34_v39, %v33_v38 }
   0xc   :  { %1386 = vmatprep.subr.bf16.mxu0 %v1479_v3  ;;  %1463 = vmatprep.subr.bf16.mxu1 %v1479_v3  ;;  %v66_v43 = vld [vmem:[%s2098_s0 + $0x158] sm:$0xff]  ;;  %v67_v44 = vld [vmem:[%s2098_s0 + $0x160] sm:$0xff]  ;;  %v68_v45 = vld [vmem:[%s2098_s0 + $0x168] sm:$0xff]  ;;  %v93_v47 = vpack.c.bf16 %v36_v41, %v35_v40 }
   0xd   :  { %v108_v48 = vpack.c.bf16 %v66_v43, %v65_v42  ;;  %v109_v49 = vpack.c.bf16 %v68_v45, %v67_v44  ;;  %v37_v50 = vld [vmem:[%s2098_s0 + $0x70] sm:$0xff]  ;;  %v38_v51 = vld [vmem:[%s2098_s0 + $0x78] sm:$0xff]  ;;  %v39_v52 = vld [vmem:[%s2098_s0 + $0x80] sm:$0xff] }
   0xe   :  { %v40_v53 = vld [vmem:[%s2098_s0 + $0x88] sm:$0xff]  ;;  %v69_v54 = vld [vmem:[%s2098_s0 + $0x170] sm:$0xff]  ;;  %v70_v55 = vld [vmem:[%s2098_s0 + $0x178] sm:$0xff]  ;;  %v94_v58 = vpack.c.bf16 %v38_v51, %v37_v50 }
   0xf   :  { %1387 = vmatpush3.bf16.msra.mxu0 %v1479_v3  ;;  %1471 = vmatpush3.bf16.msra.mxu1 %v1479_v3  ;;  %v71_v56 = vld [vmem:[%s2098_s0 + $0x180] sm:$0xff]  ;;  %v72_v57 = vld [vmem:[%s2098_s0 + $0x188] sm:$0xff]  ;;  %v95_v59 = vpack.c.bf16 %v40_v53, %v39_v52  ;;  %v110_v60 = vpack.c.bf16 %v70_v55, %v69_v54  ;;  %v41_v62 = vld [vmem:[%s2098_s0 + $0x90] sm:$0xff] }
  0x10   :  { %1388 = vmatprep.subr.bf16.mxu0 %v1480_v7  ;;  %1464 = vmatprep.subr.bf16.mxu1 %v1480_v7  ;;  %v111_v61 = vpack.c.bf16 %v72_v57, %v71_v56  ;;  %v42_v63 = vld [vmem:[%s2098_s0 + $0x98] sm:$0xff]  ;;  %v43_v0 = vld [vmem:[%s2098_s0 + $0xa0] sm:$0xff]  ;;  %v44_v1 = vld [vmem:[%s2098_s0 + $0xa8] sm:$0xff] }
  0x11   :  { %v73_v2 = vld [vmem:[%s2098_s0 + $0x190] sm:$0xff]  ;;  %v74_v3 = vld [vmem:[%s2098_s0 + $0x198] sm:$0xff]  ;;  %v75_v4 = vld [vmem:[%s2098_s0 + $0x1a0] sm:$0xff]  ;;  %v96_v6 = vpack.c.bf16 %v42_v63, %v41_v62 }
  0x12   :  { %v76_v5 = vld [vmem:[%s2098_s0 + $0x1a8] sm:$0xff]  ;;  %v45_v10 = vld [vmem:[%s2098_s0 + $0xb0] sm:$0xff]  ;;  %v47_v12 = vld [vmem:[%s2098_s0 + $0xc0] sm:$0xff] }
  0x13   :  { %1389 = vmatpush3.bf16.msra.mxu0 %v1480_v7  ;;  %1472 = vmatpush3.bf16.msra.mxu1 %v1480_v7  ;;  %v97_v7 = vpack.c.bf16 %v44_v1, %v43_v0  ;;  %v113_v9 = vpack.c.bf16 %v76_v5, %v75_v4  ;;  %v77_v14 = vld [vmem:[%s2098_s0 + $0x1b0] sm:$0xff]  ;;  %v78_v15 = vld [vmem:[%s2098_s0 + $0x1b8] sm:$0xff]  ;;  %v79_v16 = vld [vmem:[%s2098_s0 + $0x1c0] sm:$0xff] }
  0x14   :  { %1390 = vmatprep.subr.bf16.mxu0 %v1481_v8  ;;  %1465 = vmatprep.subr.bf16.mxu1 %v1481_v8  ;;  %v80_v17 = vld [vmem:[%s2098_s0 + $0x1c8] sm:$0xff]  ;;  %v114_v20 = vpack.c.bf16 %v78_v15, %v77_v14  ;;  %v81_v26 = vld [vmem:[%s2098_s0 + $0x1d0] sm:$0xff]  ;;  %v82_v27 = vld [vmem:[%s2098_s0 + $0x1d8] sm:$0xff] }
  0x15   :  { %v115_v21 = vpack.c.bf16 %v80_v17, %v79_v16  ;;  %v83_v28 = vld [vmem:[%s2098_s0 + $0x1e0] sm:$0xff]  ;;  %v84_v29 = vld [vmem:[%s2098_s0 + $0x1e8] sm:$0xff]  ;;  %v116_v32 = vpack.c.bf16 %v82_v27, %v81_v26 }
  0x16   :  { %v117_v33 = vpack.c.bf16 %v84_v29, %v83_v28  ;;  %v1738_v42 = vld [vmem:[%s2099_s4] ss:$0 sm:$0xff] }
  0x17   :  { %1391 = vmatpush3.bf16.msra.mxu0 %v1481_v8  ;;  %1473 = vmatpush3.bf16.msra.mxu1 %v1481_v8  ;;  %v112_v8 = vpack.c.bf16 %v74_v3, %v73_v2 }
  0x18   :  { %1392 = vmatprep.subr.bf16.mxu0 %v1482_v11  ;;  %1466 = vmatprep.subr.bf16.mxu1 %v1482_v11 }
  0x1b   :  { %1393 = vmatpush3.bf16.msra.mxu0 %v1482_v11  ;;  %1474 = vmatpush3.bf16.msra.mxu1 %v1482_v11  ;;  %v46_v11 = vld [vmem:[%s2098_s0 + $0xb8] sm:$0xff] }
  0x1c   :  { %1394 = vmatprep.subr.bf16.mxu0 %v1483_v13  ;;  %1467 = vmatprep.subr.bf16.mxu1 %v1483_v13  ;;  %v98_v18 = vpack.c.bf16 %v46_v11, %v45_v10 }
  0x1f   :  { %1395 = vmatpush3.bf16.msra.mxu0 %v1483_v13  ;;  %1475 = vmatpush3.bf16.msra.mxu1 %v1483_v13  ;;  %v48_v13 = vld [vmem:[%s2098_s0 + $0xc8] sm:$0xff] }
  0x20   :  { %v99_v19 = vpack.c.bf16 %v48_v13, %v47_v12 }
  0x22   :  { %1397 = vmatmul.mubr.bf16.vlgmr.msra.gmra.mxu0 %v88_v22  ;;  %1429 = vmatmul.mubr.bf16.vlgmr.msra.gmra.mxu1 %v104_v24  ;;  %v49_v22 = vld [vmem:[%s2098_s0 + $0xd0] sm:$0xff]  ;;  %v51_v24 = vld [vmem:[%s2098_s0 + $0xe0] sm:$0xff] }
  0x23   :  { %1400 = vmatprep.mubr.bf16.mxu0 %v89_v23  ;;  %1432 = vmatprep.mubr.bf16.mxu1 %v105_v25  ;;  %v50_v23 = vld [vmem:[%s2098_s0 + $0xd8] sm:$0xff]  ;;  %v52_v25 = vld [vmem:[%s2098_s0 + $0xe8] sm:$0xff] }
  0x24   :  { %v100_v30 = vpack.c.bf16 %v50_v23, %v49_v22  ;;  %v101_v31 = vpack.c.bf16 %v52_v25, %v51_v24 }
  0x2a   :  { %1401 = vmatmul.mubr.bf16.gmra.mxu0 %v90_v34  ;;  %1433 = vmatmul.mubr.bf16.gmra.mxu1 %v106_v36  ;;  %v53_v34 = vld [vmem:[%s2098_s0 + $0xf0] sm:$0xff] }
  0x2b   :  { %1404 = vmatprep.mubr.bf16.mxu0 %v91_v35  ;;  %1436 = vmatprep.mubr.bf16.mxu1 %v107_v37  ;;  %v54_v35 = vld [vmem:[%s2098_s0 + $0xf8] sm:$0xff]  ;;  %v85_v36 = vld [vmem:[%s2098_s0 + $0x1f0] sm:$0xff] }
  0x2c   :  { %v86_v37 = vld [vmem:[%s2098_s0 + $0x1f8] sm:$0xff]  ;;  %v102_v38 = vpack.c.bf16 %v54_v35, %v53_v34 }
  0x2d   :  { %v118_v39 = vpack.c.bf16 %v86_v37, %v85_v36 }
  0x32   :  { %1405 = vmatmul.mubr.bf16.gmra.mxu0 %v92_v46  ;;  %1437 = vmatmul.mubr.bf16.gmra.mxu1 %v108_v48 }
  0x33   :  { %1408 = vmatprep.mubr.bf16.mxu0 %v93_v47  ;;  %1440 = vmatprep.mubr.bf16.mxu1 %v109_v49 }
  0x3a   :  { %1409 = vmatmul.mubr.bf16.gmra.mxu0 %v94_v58  ;;  %1441 = vmatmul.mubr.bf16.gmra.mxu1 %v110_v60 }
  0x3b   :  { %1412 = vmatprep.mubr.bf16.mxu0 %v95_v59  ;;  %1444 = vmatprep.mubr.bf16.mxu1 %v111_v61 }
  0x42   :  { %1413 = vmatmul.mubr.bf16.gmra.mxu0 %v96_v6  ;;  %1445 = vmatmul.mubr.bf16.gmra.mxu1 %v112_v8 }
  0x43   :  { %1416 = vmatprep.mubr.bf16.mxu0 %v97_v7  ;;  %1448 = vmatprep.mubr.bf16.mxu1 %v113_v9 }
  0x4a   :  { %1417 = vmatmul.mubr.bf16.gmra.mxu0 %v98_v18  ;;  %1449 = vmatmul.mubr.bf16.gmra.mxu1 %v114_v20 }
  0x4b   :  { %1420 = vmatprep.mubr.bf16.mxu0 %v99_v19  ;;  %1452 = vmatprep.mubr.bf16.mxu1 %v115_v21 }
  0x52   :  { %1421 = vmatmul.mubr.bf16.gmra.mxu0 %v100_v30  ;;  %1453 = vmatmul.mubr.bf16.gmra.mxu1 %v116_v32 }
  0x53   :  { %1424 = vmatprep.mubr.bf16.mxu0 %v101_v31  ;;  %1456 = vmatprep.mubr.bf16.mxu1 %v117_v33 }
  0x5a   :  { %1425 = vmatmul.mubr.bf16.gmra.mxu0 %v102_v38  ;;  %1457 = vmatmul.mubr.bf16.gmra.mxu1 %v118_v39 }
  0xe2   :  { %v1398_v40 = vpop.f32.mrf.mxu0  ;;  %v1430_v41 = vpop.f32.mrf.mxu1 }
  0xe3   :  { %v1741_v46 = vadd.f32 %v1430_v41, %v1738_v42  ;;  %v233_v47 = vadd.f32 %v1398_v40, %v1738_v42 }
  0xe4   :  { %v224_v43 = vpop.f32.mrf.mxu0  ;;  %v352_v44 = vpop.f32.mrf.mxu1 }
  0xe5   :  { %v225_v48 = vadd.f32 %v1738_v42, %v224_v43  ;;  %v1747_v52 = vadd.f32 %v1738_v42, %v352_v44  ;;  %v870_v3 = vmul.f32 %v233_v47, %v233_v47 }
  0xe6   :  { %v1399_v45 = vpop.f32.mrf.mxu0  ;;  %v1431_v50 = vpop.f32.mrf.mxu1 }
  0xe7   :  { %v236_v49 = vadd.f32 %v1399_v45, %v1738_v42  ;;  %v1750_v53 = vadd.f32 %v1431_v50, %v1738_v42  ;;  %v868_v60 = vmul.f32 %v225_v48, %v225_v48 }
  0xe8   :  { %v227_v51 = vpop.f32.mrf.mxu0  ;;  %v355_v56 = vpop.f32.mrf.mxu1 }
  0xe9   :  { %v1157_v54 = vpack.c.bf16 %v236_v49, %v233_v47  ;;  %v228_v55 = vadd.f32 %v1738_v42, %v227_v51  ;;  %v1237_v58 = vpack.c.bf16 %v1750_v53, %v1741_v46  ;;  %v1756_v59 = vadd.f32 %v1738_v42, %v355_v56 }
  0xea   :  { %v1402_v57 = vpop.f32.mrf.mxu0  ;;  %v1434_v0 = vpop.f32.mrf.mxu1  ;;  %v871_v8 = vmul.f32 %v236_v49, %v236_v49 }
  0xeb   :  { %1309 = vst [vmem:[%s2100_s5 + $0x8] sm:$0xff] %v1157_v54   ;;  %v1152_v61 = vpack.c.bf16 %v228_v55, %v225_v48  ;;  %v799_v62 = vadd.f32 %v228_v55, %v225_v48  ;;  %v869_v63 = vmul.f32 %v228_v55, %v228_v55  ;;  %1325 = vst [vmem:[%s2100_s5 + $0x88] sm:$0xff] %v1237_v58  }
  0xec   :  { %v240_v1 = vpop.f32.mrf.mxu0  ;;  %v1232_v2 = vpack.c.bf16 %v1756_v59, %v1747_v52  ;;  %v368_v7 = vpop.f32.mrf.mxu1  ;;  %v1774_v10 = vadd.f32 %v1434_v0, %v1738_v42  ;;  %v249_v12 = vadd.f32 %v1402_v57, %v1738_v42 }
  0xed   :  { %1153 = vst [vmem:[%s2100_s5] sm:$0xff] %v1152_v61   ;;  %v800_v4 = vadd.f32 %v799_v62, %v233_v47  ;;  %v932_v5 = vadd.f32 %v869_v63, %v868_v60  ;;  %v241_v6 = vadd.f32 %v1738_v42, %v240_v1  ;;  %v1779_v17 = vadd.f32 %v1738_v42, %v368_v7 }
  0xee   :  { %v1403_v9 = vpop.f32.mrf.mxu0  ;;  %1324 = vst [vmem:[%s2100_s5 + $0x80] sm:$0xff] %v1232_v2   ;;  %v1435_v15 = vpop.f32.mrf.mxu1  ;;  %v874_v35 = vmul.f32 %v249_v12, %v249_v12 }
  0xef   :  { %v933_v11 = vadd.f32 %v932_v5, %v870_v3  ;;  %v801_v13 = vadd.f32 %v800_v4, %v236_v49  ;;  %v252_v14 = vadd.f32 %v1403_v9, %v1738_v42  ;;  %v1782_v18 = vadd.f32 %v1435_v15, %v1738_v42 }
  0xf0   :  { %v243_v16 = vpop.f32.mrf.mxu0  ;;  %v872_v20 = vmul.f32 %v241_v6, %v241_v6  ;;  %v371_v23 = vpop.f32.mrf.mxu1 }
  0xf1   :  { %v802_v19 = vadd.f32 %v801_v13, %v241_v6  ;;  %v934_v21 = vadd.f32 %v933_v11, %v871_v8  ;;  %v1167_v22 = vpack.c.bf16 %v252_v14, %v249_v12  ;;  %v244_v24 = vadd.f32 %v1738_v42, %v243_v16 }
  0xf2   :  { %v1406_v25 = vpop.f32.mrf.mxu0  ;;  %v1247_v26 = vpack.c.bf16 %v1782_v18, %v1774_v10  ;;  %v1788_v27 = vadd.f32 %v1738_v42, %v371_v23  ;;  %v1438_v29 = vpop.f32.mrf.mxu1  ;;  %v875_v47 = vmul.f32 %v252_v14, %v252_v14 }
  0xf3   :  { %v935_v28 = vadd.f32 %v934_v21, %v872_v20  ;;  %1311 = vst [vmem:[%s2100_s5 + $0x18] sm:$0xff] %v1167_v22   ;;  %v1162_v30 = vpack.c.bf16 %v244_v24, %v241_v6  ;;  %v803_v31 = vadd.f32 %v802_v19, %v244_v24  ;;  %v873_v32 = vmul.f32 %v244_v24, %v244_v24 }
  0xf4   :  { %v256_v33 = vpop.f32.mrf.mxu0  ;;  %1327 = vst [vmem:[%s2100_s5 + $0x98] sm:$0xff] %v1247_v26   ;;  %v1242_v34 = vpack.c.bf16 %v1788_v27, %v1779_v17  ;;  %v384_v36 = vpop.f32.mrf.mxu1  ;;  %v1806_v41 = vadd.f32 %v1438_v29, %v1738_v42  ;;  %v265_v43 = vadd.f32 %v1406_v25, %v1738_v42 }
  0xf5   :  { %1310 = vst [vmem:[%s2100_s5 + $0x10] sm:$0xff] %v1162_v30   ;;  %v804_v37 = vadd.f32 %v803_v31, %v249_v12  ;;  %v936_v38 = vadd.f32 %v935_v28, %v873_v32  ;;  %v257_v39 = vadd.f32 %v1738_v42, %v256_v33  ;;  %v1815_v56 = vadd.f32 %v1738_v42, %v384_v36 }
  0xf6   :  { %v1407_v40 = vpop.f32.mrf.mxu0  ;;  %1326 = vst [vmem:[%s2100_s5 + $0x90] sm:$0xff] %v1242_v34   ;;  %v1439_v45 = vpop.f32.mrf.mxu1  ;;  %v878_v7 = vmul.f32 %v265_v43, %v265_v43 }
  0xf7   :  { %v268_v44 = vadd.f32 %v1407_v40, %v1738_v42  ;;  %v937_v48 = vadd.f32 %v936_v38, %v874_v35  ;;  %v805_v49 = vadd.f32 %v804_v37, %v252_v14  ;;  %v1811_v51 = vadd.f32 %v1439_v45, %v1738_v42 }
  0xf8   :  { %v259_v50 = vpop.f32.mrf.mxu0  ;;  %v387_v57 = vpop.f32.mrf.mxu1  ;;  %v876_v60 = vmul.f32 %v257_v39, %v257_v39 }
  0xf9   :  { %v1177_v54 = vpack.c.bf16 %v268_v44, %v265_v43  ;;  %v260_v55 = vadd.f32 %v1738_v42, %v259_v50  ;;  %v806_v58 = vadd.f32 %v805_v49, %v257_v39  ;;  %v938_v61 = vadd.f32 %v937_v48, %v875_v47 }
  0xfa   :  { %v1410_v62 = vpop.f32.mrf.mxu0  ;;  %v1257_v63 = vpack.c.bf16 %v1811_v51, %v1806_v41  ;;  %v1823_v2 = vadd.f32 %v1738_v42, %v387_v57  ;;  %v1442_v3 = vpop.f32.mrf.mxu1  ;;  %v879_v21 = vmul.f32 %v268_v44, %v268_v44 }
  0xfb   :  { %1313 = vst [vmem:[%s2100_s5 + $0x28] sm:$0xff] %v1177_v54   ;;  %v1172_v0 = vpack.c.bf16 %v260_v55, %v257_v39  ;;  %v877_v1 = vmul.f32 %v260_v55, %v260_v55  ;;  %v939_v4 = vadd.f32 %v938_v61, %v876_v60  ;;  %v807_v5 = vadd.f32 %v806_v58, %v260_v55 }
  0xfc   :  { %v272_v6 = vpop.f32.mrf.mxu0  ;;  %1329 = vst [vmem:[%s2100_s5 + $0xa8] sm:$0xff] %v1257_v63   ;;  %v1252_v8 = vpack.c.bf16 %v1823_v2, %v1815_v56  ;;  %v400_v9 = vpop.f32.mrf.mxu1  ;;  %v1835_v15 = vadd.f32 %v1442_v3, %v1738_v42  ;;  %v281_v16 = vadd.f32 %v1410_v62, %v1738_v42 }
  0xfd   :  { %1312 = vst [vmem:[%s2100_s5 + $0x20] sm:$0xff] %v1172_v0   ;;  %v808_v11 = vadd.f32 %v807_v5, %v265_v43  ;;  %v940_v12 = vadd.f32 %v939_v4, %v877_v1  ;;  %v273_v13 = vadd.f32 %v1738_v42, %v272_v6  ;;  %v1847_v29 = vadd.f32 %v1738_v42, %v400_v9 }
  0xfe   :  { %v1411_v14 = vpop.f32.mrf.mxu0  ;;  %1328 = vst [vmem:[%s2100_s5 + $0xa0] sm:$0xff] %v1252_v8   ;;  %v1443_v20 = vpop.f32.mrf.mxu1  ;;  %v882_v45 = vmul.f32 %v281_v16, %v281_v16 }
  0xff   :  { %v284_v19 = vadd.f32 %v1411_v14, %v1738_v42  ;;  %v941_v22 = vadd.f32 %v940_v12, %v878_v7  ;;  %v809_v23 = vadd.f32 %v808_v11, %v268_v44  ;;  %v1843_v25 = vadd.f32 %v1443_v20, %v1738_v42 }
 0x100   :  { %v275_v24 = vpop.f32.mrf.mxu0  ;;  %v403_v30 = vpop.f32.mrf.mxu1  ;;  %v880_v32 = vmul.f32 %v273_v13, %v273_v13 }
 0x101   :  { %v1187_v26 = vpack.c.bf16 %v284_v19, %v281_v16  ;;  %v276_v28 = vadd.f32 %v1738_v42, %v275_v24  ;;  %v810_v31 = vadd.f32 %v809_v23, %v273_v13  ;;  %v942_v33 = vadd.f32 %v941_v22, %v879_v21 }
 0x102   :  { %v1414_v34 = vpop.f32.mrf.mxu0  ;;  %v1267_v35 = vpack.c.bf16 %v1843_v25, %v1835_v15  ;;  %v1855_v38 = vadd.f32 %v1738_v42, %v403_v30  ;;  %v1446_v39 = vpop.f32.mrf.mxu1  ;;  %v883_v62 = vmul.f32 %v284_v19, %v284_v19 }
 0x103   :  { %1315 = vst [vmem:[%s2100_s5 + $0x38] sm:$0xff] %v1187_v26   ;;  %v1182_v36 = vpack.c.bf16 %v276_v28, %v273_v13  ;;  %v881_v37 = vmul.f32 %v276_v28, %v276_v28  ;;  %v943_v40 = vadd.f32 %v942_v33, %v880_v32  ;;  %v811_v43 = vadd.f32 %v810_v31, %v276_v28 }
 0x104   :  { %v288_v44 = vpop.f32.mrf.mxu0  ;;  %1331 = vst [vmem:[%s2100_s5 + $0xb8] sm:$0xff] %v1267_v35   ;;  %v1262_v47 = vpack.c.bf16 %v1855_v38, %v1847_v29  ;;  %v416_v48 = vpop.f32.mrf.mxu1  ;;  %v1867_v57 = vadd.f32 %v1446_v39, %v1738_v42  ;;  %v297_v58 = vadd.f32 %v1414_v34, %v1738_v42 }
 0x105   :  { %1314 = vst [vmem:[%s2100_s5 + $0x30] sm:$0xff] %v1182_v36   ;;  %v812_v49 = vadd.f32 %v811_v43, %v281_v16  ;;  %v944_v50 = vadd.f32 %v943_v40, %v881_v37  ;;  %v289_v54 = vadd.f32 %v1738_v42, %v288_v44  ;;  %v1879_v6 = vadd.f32 %v1738_v42, %v416_v48 }
 0x106   :  { %v1415_v55 = vpop.f32.mrf.mxu0  ;;  %1330 = vst [vmem:[%s2100_s5 + $0xb0] sm:$0xff] %v1262_v47   ;;  %v1447_v61 = vpop.f32.mrf.mxu1  ;;  %v886_v24 = vmul.f32 %v297_v58, %v297_v58 }
 0x107   :  { %v300_v60 = vadd.f32 %v1415_v55, %v1738_v42  ;;  %v945_v63 = vadd.f32 %v944_v50, %v882_v45  ;;  %v813_v0 = vadd.f32 %v812_v49, %v284_v19  ;;  %v1875_v3 = vadd.f32 %v1447_v61, %v1738_v42 }
 0x108   :  { %v291_v1 = vpop.f32.mrf.mxu0  ;;  %v419_v7 = vpop.f32.mrf.mxu1  ;;  %v884_v9 = vmul.f32 %v289_v54, %v289_v54 }
 0x109   :  { %v1197_v4 = vpack.c.bf16 %v300_v60, %v297_v58  ;;  %v292_v5 = vadd.f32 %v1738_v42, %v291_v1  ;;  %v814_v8 = vadd.f32 %v813_v0, %v289_v54  ;;  %v946_v11 = vadd.f32 %v945_v63, %v883_v62 }
 0x10a   :  { %v1418_v12 = vpop.f32.mrf.mxu0  ;;  %v1277_v13 = vpack.c.bf16 %v1875_v3, %v1867_v57  ;;  %v1887_v19 = vadd.f32 %v1738_v42, %v419_v7  ;;  %v1450_v20 = vpop.f32.mrf.mxu1  ;;  %v887_v39 = vmul.f32 %v300_v60, %v300_v60 }
 0x10b   :  { %1317 = vst [vmem:[%s2100_s5 + $0x48] sm:$0xff] %v1197_v4   ;;  %v1192_v14 = vpack.c.bf16 %v292_v5, %v289_v54  ;;  %v885_v16 = vmul.f32 %v292_v5, %v292_v5  ;;  %v947_v21 = vadd.f32 %v946_v11, %v884_v9  ;;  %v815_v22 = vadd.f32 %v814_v8, %v292_v5 }
 0x10c   :  { %v304_v23 = vpop.f32.mrf.mxu0  ;;  %1333 = vst [vmem:[%s2100_s5 + $0xc8] sm:$0xff] %v1277_v13   ;;  %v1272_v26 = vpack.c.bf16 %v1887_v19, %v1879_v6  ;;  %v432_v28 = vpop.f32.mrf.mxu1  ;;  %v1899_v34 = vadd.f32 %v1450_v20, %v1738_v42  ;;  %v313_v35 = vadd.f32 %v1418_v12, %v1738_v42 }
 0x10d   :  { %1316 = vst [vmem:[%s2100_s5 + $0x40] sm:$0xff] %v1192_v14   ;;  %v816_v30 = vadd.f32 %v815_v22, %v297_v58  ;;  %v948_v31 = vadd.f32 %v947_v21, %v885_v16  ;;  %v305_v32 = vadd.f32 %v1738_v42, %v304_v23  ;;  %v1911_v49 = vadd.f32 %v1738_v42, %v432_v28 }
 0x10e   :  { %v1419_v33 = vpop.f32.mrf.mxu0  ;;  %1332 = vst [vmem:[%s2100_s5 + $0xc0] sm:$0xff] %v1272_v26   ;;  %v1451_v37 = vpop.f32.mrf.mxu1  ;;  %v890_v8 = vmul.f32 %v313_v35, %v313_v35 }
 0x10f   :  { %v316_v36 = vadd.f32 %v1419_v33, %v1738_v42  ;;  %v949_v40 = vadd.f32 %v948_v31, %v886_v24  ;;  %v817_v43 = vadd.f32 %v816_v30, %v300_v60  ;;  %v1907_v45 = vadd.f32 %v1451_v37, %v1738_v42 }
 0x110   :  { %v307_v44 = vpop.f32.mrf.mxu0  ;;  %v435_v50 = vpop.f32.mrf.mxu1  ;;  %v888_v55 = vmul.f32 %v305_v32, %v305_v32 }
 0x111   :  { %v1207_v47 = vpack.c.bf16 %v316_v36, %v313_v35  ;;  %v308_v48 = vadd.f32 %v1738_v42, %v307_v44  ;;  %v818_v54 = vadd.f32 %v817_v43, %v305_v32  ;;  %v950_v58 = vadd.f32 %v949_v40, %v887_v39 }
 0x112   :  { %v1422_v61 = vpop.f32.mrf.mxu0  ;;  %v1287_v62 = vpack.c.bf16 %v1907_v45, %v1899_v34  ;;  %v1919_v0 = vadd.f32 %v1738_v42, %v435_v50  ;;  %v1454_v1 = vpop.f32.mrf.mxu1  ;;  %v891_v24 = vmul.f32 %v316_v36, %v316_v36 }
 0x113   :  { %1319 = vst [vmem:[%s2100_s5 + $0x58] sm:$0xff] %v1207_v47   ;;  %v1202_v60 = vpack.c.bf16 %v308_v48, %v305_v32  ;;  %v889_v63 = vmul.f32 %v308_v48, %v308_v48  ;;  %v951_v4 = vadd.f32 %v950_v58, %v888_v55  ;;  %v819_v5 = vadd.f32 %v818_v54, %v308_v48 }
 0x114   :  { %v320_v7 = vpop.f32.mrf.mxu0  ;;  %1335 = vst [vmem:[%s2100_s5 + $0xd8] sm:$0xff] %v1287_v62   ;;  %v1282_v9 = vpack.c.bf16 %v1919_v0, %v1911_v49  ;;  %v448_v11 = vpop.f32.mrf.mxu1  ;;  %v1931_v20 = vadd.f32 %v1454_v1, %v1738_v42  ;;  %v329_v21 = vadd.f32 %v1422_v61, %v1738_v42 }
 0x115   :  { %1318 = vst [vmem:[%s2100_s5 + $0x50] sm:$0xff] %v1202_v60   ;;  %v820_v12 = vadd.f32 %v819_v5, %v313_v35  ;;  %v952_v13 = vadd.f32 %v951_v4, %v889_v63  ;;  %v321_v14 = vadd.f32 %v1738_v42, %v320_v7  ;;  %v1943_v35 = vadd.f32 %v1738_v42, %v448_v11 }
 0x116   :  { %v1423_v16 = vpop.f32.mrf.mxu0  ;;  %1334 = vst [vmem:[%s2100_s5 + $0xd0] sm:$0xff] %v1282_v9   ;;  %v1455_v23 = vpop.f32.mrf.mxu1  ;;  %v894_v62 = vmul.f32 %v329_v21, %v329_v21 }
 0x117   :  { %v332_v22 = vadd.f32 %v1423_v16, %v1738_v42  ;;  %v953_v26 = vadd.f32 %v952_v13, %v890_v8  ;;  %v821_v28 = vadd.f32 %v820_v12, %v316_v36  ;;  %v1939_v31 = vadd.f32 %v1455_v23, %v1738_v42 }
 0x118   :  { %v323_v30 = vpop.f32.mrf.mxu0  ;;  %v451_v37 = vpop.f32.mrf.mxu1  ;;  %v892_v40 = vmul.f32 %v321_v14, %v321_v14 }
 0x119   :  { %v1217_v32 = vpack.c.bf16 %v332_v22, %v329_v21  ;;  %v324_v33 = vadd.f32 %v1738_v42, %v323_v30  ;;  %v822_v39 = vadd.f32 %v821_v28, %v321_v14  ;;  %v954_v43 = vadd.f32 %v953_v26, %v891_v24 }
 0x11a   :  { %v1426_v44 = vpop.f32.mrf.mxu0  ;;  %v1297_v47 = vpack.c.bf16 %v1939_v31, %v1931_v20  ;;  %v1951_v50 = vadd.f32 %v1738_v42, %v451_v37  ;;  %v1458_v54 = vpop.f32.mrf.mxu1  ;;  %v895_v13 = vmul.f32 %v332_v22, %v332_v22 }
 0x11b   :  { %1321 = vst [vmem:[%s2100_s5 + $0x68] sm:$0xff] %v1217_v32   ;;  %v1212_v36 = vpack.c.bf16 %v324_v33, %v321_v14  ;;  %v893_v48 = vmul.f32 %v324_v33, %v324_v33  ;;  %v955_v55 = vadd.f32 %v954_v43, %v892_v40  ;;  %v823_v58 = vadd.f32 %v822_v39, %v324_v33 }
 0x11c   :  { %v336_v61 = vpop.f32.mrf.mxu0  ;;  %1337 = vst [vmem:[%s2100_s5 + $0xe8] sm:$0xff] %v1297_v47   ;;  %v1292_v60 = vpack.c.bf16 %v1951_v50, %v1943_v35  ;;  %v464_v63 = vpop.f32.mrf.mxu1  ;;  %v1963_v8 = vadd.f32 %v1458_v54, %v1738_v42  ;;  %v345_v9 = vadd.f32 %v1426_v44, %v1738_v42 }
 0x11d   :  { %1320 = vst [vmem:[%s2100_s5 + $0x60] sm:$0xff] %v1212_v36   ;;  %v824_v1 = vadd.f32 %v823_v58, %v329_v21  ;;  %v956_v4 = vadd.f32 %v955_v55, %v893_v48  ;;  %v337_v5 = vadd.f32 %v1738_v42, %v336_v61  ;;  %v1975_v28 = vadd.f32 %v1738_v42, %v464_v63 }
 0x11e   :  { %v1427_v7 = vpop.f32.mrf.mxu0  ;;  %1336 = vst [vmem:[%s2100_s5 + $0xe0] sm:$0xff] %v1292_v60   ;;  %v1459_v12 = vpop.f32.mrf.mxu1  ;;  %v898_v48 = vmul.f32 %v345_v9, %v345_v9 }
 0x11f   :  { %v348_v11 = vadd.f32 %v1427_v7, %v1738_v42  ;;  %v957_v14 = vadd.f32 %v956_v4, %v894_v62  ;;  %v825_v16 = vadd.f32 %v824_v1, %v332_v22  ;;  %v1971_v23 = vadd.f32 %v1459_v12, %v1738_v42 }
 0x120   :  { %v339_v21 = vpop.f32.mrf.mxu0  ;;  %v467_v30 = vpop.f32.mrf.mxu1  ;;  %v896_v33 = vmul.f32 %v337_v5, %v337_v5  ;;  %v900_v62 = vmul.f32 %v1747_v52, %v1747_v52  ;;  %v901_v4 = vmul.f32 %v1756_v59, %v1756_v59  ;;  %v902_v7 = vmul.f32 %v1741_v46, %v1741_v46 }
 0x121   :  { %v1227_v24 = vpack.c.bf16 %v348_v11, %v345_v9  ;;  %v340_v26 = vadd.f32 %v1738_v42, %v339_v21  ;;  %v826_v32 = vadd.f32 %v825_v16, %v337_v5  ;;  %v958_v37 = vadd.f32 %v957_v14, %v895_v13 }
 0x122   :  { %v1307_v39 = vpack.c.bf16 %v1971_v23, %v1963_v8  ;;  %v1983_v43 = vadd.f32 %v1738_v42, %v467_v30  ;;  %v899_v42 = vmul.f32 %v348_v11, %v348_v11  ;;  %v904_v16 = vmul.f32 %v1779_v17, %v1779_v17 }
 0x123   :  { %1323 = vst [vmem:[%s2100_s5 + $0x78] sm:$0xff] %v1227_v24   ;;  %v1222_v22 = vpack.c.bf16 %v340_v26, %v337_v5  ;;  %v897_v40 = vmul.f32 %v340_v26, %v340_v26  ;;  %v959_v44 = vadd.f32 %v958_v37, %v896_v33  ;;  %v827_v47 = vadd.f32 %v826_v32, %v340_v26 }
 0x124   :  { %1339 = vst [vmem:[%s2100_s5 + $0xf8] sm:$0xff] %v1307_v39   ;;  %v1302_v36 = vpack.c.bf16 %v1983_v43, %v1975_v28  ;;  %v905_v26 = vmul.f32 %v1788_v27, %v1788_v27  ;;  %v908_v39 = vmul.f32 %v1815_v56, %v1815_v56 }
 0x125   :  { %1322 = vst [vmem:[%s2100_s5 + $0x70] sm:$0xff] %v1222_v22   ;;  %v828_v54 = vadd.f32 %v827_v47, %v345_v9  ;;  %v960_v55 = vadd.f32 %v959_v44, %v897_v40  ;;  %v909_v44 = vmul.f32 %v1823_v2, %v1823_v2 }
 0x126   :  { %1338 = vst [vmem:[%s2100_s5 + $0xf0] sm:$0xff] %v1302_v36  }
 0x127   :  { %v961_v58 = vadd.f32 %v960_v55, %v898_v48  ;;  %v829_v61 = vadd.f32 %v828_v54, %v348_v11  ;;  %v903_v11 = vmul.f32 %v1750_v53, %v1750_v53  ;;  %v912_v55 = vmul.f32 %v1847_v29, %v1847_v29 }
 0x129   :  { %v830_v60 = vadd.f32 %v829_v61, %v1747_v52  ;;  %v962_v63 = vadd.f32 %v961_v58, %v899_v42  ;;  %v913_v61 = vmul.f32 %v1855_v38, %v1855_v38 }
 0x12b   :  { %v831_v1 = vadd.f32 %v830_v60, %v1756_v59  ;;  %v963_v5 = vadd.f32 %v962_v63, %v900_v62 }
 0x12d   :  { %v832_v9 = vadd.f32 %v831_v1, %v1741_v46  ;;  %v964_v12 = vadd.f32 %v963_v5, %v901_v4  ;;  %v906_v46 = vmul.f32 %v1774_v10, %v1774_v10  ;;  %v916_v4 = vmul.f32 %v1879_v6, %v1879_v6 }
 0x12f   :  { %v965_v13 = vadd.f32 %v964_v12, %v902_v7  ;;  %v833_v14 = vadd.f32 %v832_v9, %v1750_v53  ;;  %v907_v53 = vmul.f32 %v1782_v18, %v1782_v18  ;;  %v917_v9 = vmul.f32 %v1887_v19, %v1887_v19 }
 0x131   :  { %v834_v52 = vadd.f32 %v833_v14, %v1779_v17  ;;  %v966_v21 = vadd.f32 %v965_v13, %v903_v11 }
 0x133   :  { %v967_v59 = vadd.f32 %v966_v21, %v904_v16  ;;  %v835_v24 = vadd.f32 %v834_v52, %v1788_v27  ;;  %v920_v52 = vmul.f32 %v1911_v49, %v1911_v49 }
 0x135   :  { %v836_v30 = vadd.f32 %v835_v24, %v1774_v10  ;;  %v968_v32 = vadd.f32 %v967_v59, %v905_v26  ;;  %v910_v10 = vmul.f32 %v1806_v41, %v1806_v41  ;;  %v921_v59 = vmul.f32 %v1919_v0, %v1919_v0 }
 0x137   :  { %v969_v33 = vadd.f32 %v968_v32, %v906_v46  ;;  %v837_v37 = vadd.f32 %v836_v30, %v1782_v18  ;;  %v911_v18 = vmul.f32 %v1811_v51, %v1811_v51  ;;  %v924_v32 = vmul.f32 %v1943_v35, %v1943_v35 }
 0x139   :  { %v838_v17 = vadd.f32 %v837_v37, %v1815_v56  ;;  %v970_v22 = vadd.f32 %v969_v33, %v907_v53  ;;  %v925_v37 = vmul.f32 %v1951_v50, %v1951_v50 }
 0x13b   :  { %v971_v40 = vadd.f32 %v970_v22, %v908_v39  ;;  %v839_v27 = vadd.f32 %v838_v17, %v1823_v2 }
 0x13d   :  { %v840_v47 = vadd.f32 %v839_v27, %v1806_v41  ;;  %v972_v36 = vadd.f32 %v971_v40, %v909_v44  ;;  %v914_v41 = vmul.f32 %v1835_v15, %v1835_v15  ;;  %v928_v27 = vmul.f32 %v1975_v28, %v1975_v28 }
 0x13f   :  { %v973_v48 = vadd.f32 %v972_v36, %v910_v10  ;;  %v841_v54 = vadd.f32 %v840_v47, %v1811_v51  ;;  %v915_v51 = vmul.f32 %v1843_v25, %v1843_v25  ;;  %v929_v47 = vmul.f32 %v1983_v43, %v1983_v43 }
 0x141   :  { %v842_v56 = vadd.f32 %v841_v54, %v1847_v29  ;;  %v974_v42 = vadd.f32 %v973_v48, %v911_v18 }
 0x143   :  { %v975_v58 = vadd.f32 %v974_v42, %v912_v55  ;;  %v843_v2 = vadd.f32 %v842_v56, %v1855_v38 }
 0x145   :  { %v844_v62 = vadd.f32 %v843_v2, %v1835_v15  ;;  %v976_v60 = vadd.f32 %v975_v58, %v913_v61  ;;  %v918_v15 = vmul.f32 %v1867_v57, %v1867_v57 }
 0x147   :  { %v977_v63 = vadd.f32 %v976_v60, %v914_v41  ;;  %v845_v1 = vadd.f32 %v844_v62, %v1843_v25  ;;  %v919_v25 = vmul.f32 %v1875_v3, %v1875_v3 }
 0x149   :  { %v846_v29 = vadd.f32 %v845_v1, %v1879_v6  ;;  %v978_v5 = vadd.f32 %v977_v63, %v915_v51 }
 0x14b   :  { %v979_v7 = vadd.f32 %v978_v5, %v916_v4  ;;  %v847_v38 = vadd.f32 %v846_v29, %v1887_v19 }
 0x14d   :  { %v848_v12 = vadd.f32 %v847_v38, %v1867_v57  ;;  %v980_v11 = vadd.f32 %v979_v7, %v917_v9  ;;  %v922_v57 = vmul.f32 %v1899_v34, %v1899_v34 }
 0x14f   :  { %v981_v13 = vadd.f32 %v980_v11, %v918_v15  ;;  %v849_v14 = vadd.f32 %v848_v12, %v1875_v3  ;;  %v923_v3 = vmul.f32 %v1907_v45, %v1907_v45 }
 0x151   :  { %v850_v6 = vadd.f32 %v849_v14, %v1911_v49  ;;  %v982_v16 = vadd.f32 %v981_v13, %v919_v25 }
 0x153   :  { %v983_v21 = vadd.f32 %v982_v16, %v920_v52  ;;  %v851_v19 = vadd.f32 %v850_v6, %v1919_v0 }
 0x155   :  { %v852_v24 = vadd.f32 %v851_v19, %v1899_v34  ;;  %v984_v26 = vadd.f32 %v983_v21, %v921_v59  ;;  %v926_v34 = vmul.f32 %v1931_v20, %v1931_v20 }
 0x157   :  { %v985_v46 = vadd.f32 %v984_v26, %v922_v57  ;;  %v853_v30 = vadd.f32 %v852_v24, %v1907_v45  ;;  %v927_v45 = vmul.f32 %v1939_v31, %v1939_v31 }
 0x159   :  { %v854_v49 = vadd.f32 %v853_v30, %v1943_v35  ;;  %v986_v53 = vadd.f32 %v985_v46, %v923_v3 }
 0x15b   :  { %v987_v33 = vadd.f32 %v986_v53, %v924_v32  ;;  %v855_v0 = vadd.f32 %v854_v49, %v1951_v50 }
 0x15d   :  { %v856_v17 = vadd.f32 %v855_v0, %v1931_v20  ;;  %v988_v39 = vadd.f32 %v987_v33, %v925_v37  ;;  %v930_v20 = vmul.f32 %v1963_v8, %v1963_v8 }
 0x15f   :  { %v989_v22 = vadd.f32 %v988_v39, %v926_v34  ;;  %v857_v40 = vadd.f32 %v856_v17, %v1939_v31  ;;  %v931_v31 = vmul.f32 %v1971_v23, %v1971_v23 }
 0x161   :  { %v858_v35 = vadd.f32 %v857_v40, %v1975_v28  ;;  %v990_v44 = vadd.f32 %v989_v22, %v927_v45 }
 0x163   :  { %v991_v10 = vadd.f32 %v990_v44, %v928_v27  ;;  %v859_v50 = vadd.f32 %v858_v35, %v1983_v43 }
 0x165   :  { %v860_v36 = vadd.f32 %v859_v50, %v1963_v8  ;;  %v992_v18 = vadd.f32 %v991_v10, %v929_v47 }
 0x167   :  { %v861_v48 = vadd.f32 %v860_v36, %v1971_v23  ;;  %v993_v54 = vadd.f32 %v992_v18, %v930_v20 }
 0x169   :  { %v862_v28 = vrot.slane %v861_v48, 4  ;;  %v994_v56 = vadd.f32 %v993_v54, %v931_v31 }
 0x16b   :  { %v863_v55 = vadd.f32 %v862_v28, %v861_v48  ;;  %v995_v42 = vrot.slane %v994_v56, 4 }
 0x16d   :  { %v864_v58 = vrot.slane %v863_v55, 2  ;;  %v996_v2 = vadd.f32 %v995_v42, %v994_v56 }
 0x16f   :  { %v865_v61 = vadd.f32 %v864_v58, %v863_v55  ;;  %v997_v43 = vrot.slane %v996_v2, 2 }
 0x171   :  { %v866_v41 = vrot.slane %v865_v61, 1  ;;  %v998_v62 = vadd.f32 %v997_v43, %v996_v2 }
 0x173   :  { %v999_v60 = vrot.slane %v998_v62, 1  ;;  %v867_v8 = vadd.f32 %v866_v41, %v865_v61 }
 0x175   :  { %v1000_v51 = vadd.f32 %v999_v60, %v998_v62 }
 0x177   :  { %v1002_v63 = vsel %vm1001_vm0, %v867_v8, %v1000_v51 }
 0x178   :  { %1003 = vst [vmem:[%s2101_s6] sm:$0x3] %v1002_v63 }

// kernel: bottleneck_block.6
= control target key start
LH: loop header
LB: loop body
LE: loop exit
PB: predicated region body
PF: predicated region fallthrough
CT: control target
= control target key end

     0   :  { %vm1271_vm0 = vcmask 1040384   ;;  %s2602_s3 = inlined_call_operand.vmem [shape: bf16[128,128], index: 3, kind: input, shape index: {}]   ;;  %s2603_s0 = inlined_call_operand.vmem [shape: bf16[512,128], index: 0, kind: input, shape index: {}]   ;;  %s2604_s1 = inlined_call_operand.vmem [shape: f32[1,128], index: 1, kind: input, shape index: {}]   ;;  %s2605_s2 = inlined_call_operand.vmem [shape: f32[1,128], index: 2, kind: input, shape index: {}]   ;;  %s2606_s4 = inlined_call_operand.vmem [shape: f32[1,128], index: 4, kind: input, shape index: {}]   ;;  %s2607_s5 = inlined_call_operand.vmem [shape: bf16[512,128], index: 5, kind: output, shape index: {0}]   ;;  %s2608_s6 = inlined_call_operand.vmem [shape: f32[1,2,128], index: 6, kind: output, shape index: {1}]  }
   0x1   :  { %v1907_v0 = vld [vmem:[%s2602_s3 + $0x38] sm:$0xff]   ;;  %v1908_v1 = vld [vmem:[%s2602_s3 + $0x30] sm:$0xff]   ;;  %v1909_v2 = vld [vmem:[%s2602_s3 + $0x28] sm:$0xff]  }
   0x2   :  { %1811 = vmatprep.subr.bf16.mxu0 %v1907_v0  ;;  %1891 = vmatprep.subr.bf16.mxu1 %v1907_v0  ;;  %v1910_v3 = vld [vmem:[%s2602_s3 + $0x20] sm:$0xff]   ;;  %v1709_v8 = vld [vmem:[%s2603_s0 + $0x8] sm:$0xff]   ;;  %v1710_v9 = vld [vmem:[%s2603_s0 + $0x10] sm:$0xff]  }
   0x3   :  { %1812 = vmatpush3.bf16.msra.mxu0 %v1907_v0  ;;  %1899 = vmatpush3.bf16.msra.mxu1 %v1907_v0  ;;  %v1422_v4 = vld [vmem:[%s2603_s0] sm:$0xff]   ;;  %v1911_v13 = vld [vmem:[%s2602_s3 + $0x18] sm:$0xff]   ;;  %v1427_v14 = vunpack.c.l.bf16 %v1709_v8  ;;  %v1428_v15 = vunpack.c.h.bf16 %v1709_v8  ;;  %v1431_v16 = vunpack.c.l.bf16 %v1710_v9  ;;  %v1432_v19 = vunpack.c.h.bf16 %v1710_v9  ;;  %v1912_v22 = vld [vmem:[%s2602_s3 + $0x10] sm:$0xff]  }
   0x4   :  { %1813 = vmatprep.subr.bf16.mxu0 %v1908_v1  ;;  %1892 = vmatprep.subr.bf16.mxu1 %v1908_v1  ;;  %v1968_v5 = vld [vmem:[%s2604_s1] ss:$0 sm:$0xff]  ;;  %v1423_v6 = vunpack.c.l.bf16 %v1422_v4  ;;  %v1424_v7 = vunpack.c.h.bf16 %v1422_v4  ;;  %v1711_v26 = vld [vmem:[%s2603_s0 + $0x18] sm:$0xff]   ;;  %v1913_v31 = vld [vmem:[%s2602_s3 + $0x8] sm:$0xff]  }
   0x5   :  { %v1979_v10 = vld [vmem:[%s2605_s2] ss:$0 sm:$0xff]  ;;  %v160_v23 = vmul.f32 %v1427_v14, %v1968_v5  ;;  %v161_v24 = vmul.f32 %v1428_v15, %v1968_v5  ;;  %v162_v25 = vmul.f32 %v1431_v16, %v1968_v5  ;;  %v163_v28 = vmul.f32 %v1432_v19, %v1968_v5  ;;  %v1713_v38 = vld [vmem:[%s2603_s0 + $0x28] sm:$0xff]   ;;  %v1714_v41 = vld [vmem:[%s2603_s0 + $0x30] sm:$0xff]  }
   0x6   :  { %v158_v11 = vmul.f32 %v1423_v6, %v1968_v5  ;;  %v159_v12 = vmul.f32 %v1424_v7, %v1968_v5  ;;  %v1712_v29 = vld [vmem:[%s2603_s0 + $0x20] sm:$0xff]   ;;  %v1435_v30 = vunpack.c.l.bf16 %v1711_v26  ;;  %v1436_v35 = vunpack.c.h.bf16 %v1711_v26  ;;  %v1715_v42 = vld [vmem:[%s2603_s0 + $0x38] sm:$0xff]   ;;  %v1717_v63 = vld [vmem:[%s2603_s0 + $0x48] sm:$0xff]  }
   0x7   :  { %1814 = vmatpush3.bf16.msra.mxu0 %v1908_v1  ;;  %1900 = vmatpush3.bf16.msra.mxu1 %v1908_v1  ;;  %v231_v32 = vadd.f32 %v1979_v10, %v160_v23  ;;  %v232_v33 = vadd.f32 %v1979_v10, %v161_v24  ;;  %v233_v34 = vadd.f32 %v1979_v10, %v162_v25  ;;  %v1439_v37 = vunpack.c.l.bf16 %v1712_v29  ;;  %v1914_v43 = vld [vmem:[%s2602_s3] sm:$0xff]   ;;  %v1718_v4 = vld [vmem:[%s2603_s0 + $0x50] sm:$0xff]   ;;  %v1719_v23 = vld [vmem:[%s2603_s0 + $0x58] sm:$0xff]  }
   0x8   :  { %1815 = vmatprep.subr.bf16.mxu0 %v1909_v2  ;;  %1893 = vmatprep.subr.bf16.mxu1 %v1909_v2  ;;  %v229_v17 = vadd.f32 %v1979_v10, %v158_v11  ;;  %v230_v18 = vadd.f32 %v1979_v10, %v159_v12  ;;  %v234_v36 = vadd.f32 %v1979_v10, %v163_v28  ;;  %v1440_v40 = vunpack.c.h.bf16 %v1712_v29  ;;  %v1716_v48 = vld [vmem:[%s2603_s0 + $0x40] sm:$0xff]  }
   0x9   :  { %v164_v39 = vmul.f32 %v1435_v30, %v1968_v5  ;;  %v295_v44 = vmax.f32 %v231_v32, 0.0  ;;  %v296_v45 = vmax.f32 %v232_v33, 0.0  ;;  %v297_v46 = vmax.f32 %v233_v34, 0.0 }
   0xa   :  { %v293_v20 = vmax.f32 %v229_v17, 0.0  ;;  %v294_v21 = vmax.f32 %v230_v18, 0.0  ;;  %v165_v47 = vmul.f32 %v1436_v35, %v1968_v5  ;;  %v298_v49 = vmax.f32 %v234_v36, 0.0 }
   0xb   :  { %1816 = vmatpush3.bf16.msra.mxu0 %v1909_v2  ;;  %1901 = vmatpush3.bf16.msra.mxu1 %v1909_v2  ;;  %v166_v50 = vmul.f32 %v1439_v37, %v1968_v5  ;;  %v1443_v51 = vunpack.c.l.bf16 %v1713_v38  ;;  %v1444_v52 = vunpack.c.h.bf16 %v1713_v38  ;;  %v1447_v53 = vunpack.c.l.bf16 %v1714_v41 }
   0xc   :  { %1817 = vmatprep.subr.bf16.mxu0 %v1910_v3  ;;  %1894 = vmatprep.subr.bf16.mxu1 %v1910_v3  ;;  %v357_v27 = vpack.c.bf16 %v294_v21, %v293_v20  ;;  %v1448_v54 = vunpack.c.h.bf16 %v1714_v41  ;;  %v1451_v55 = vunpack.c.l.bf16 %v1715_v42  ;;  %v1452_v56 = vunpack.c.h.bf16 %v1715_v42 }
   0xd   :  { %v167_v57 = vmul.f32 %v1440_v40, %v1968_v5  ;;  %v1455_v58 = vunpack.c.l.bf16 %v1716_v48  ;;  %v1456_v59 = vunpack.c.h.bf16 %v1716_v48  ;;  %v358_v60 = vpack.c.bf16 %v296_v45, %v295_v44  ;;  %v1724_v44 = vld [vmem:[%s2603_s0 + $0x80] sm:$0xff]  }
   0xe   :  { %1827 = vmatprep.mubr.bf16.mxu0 %v357_v27  ;;  %v235_v61 = vadd.f32 %v1979_v10, %v164_v39  ;;  %v236_v62 = vadd.f32 %v1979_v10, %v165_v47  ;;  %v359_v0 = vpack.c.bf16 %v298_v49, %v297_v46  ;;  %v237_v1 = vadd.f32 %v1979_v10, %v166_v50 }
   0xf   :  { %1818 = vmatpush3.bf16.msra.mxu0 %v1910_v3  ;;  %1902 = vmatpush3.bf16.msra.mxu1 %v1910_v3  ;;  %v168_v2 = vmul.f32 %v1443_v51, %v1968_v5  ;;  %v169_v3 = vmul.f32 %v1444_v52, %v1968_v5  ;;  %v170_v6 = vmul.f32 %v1447_v53, %v1968_v5  ;;  %v1459_v14 = vunpack.c.l.bf16 %v1717_v63  ;;  %v2072_v52 = vld [vmem:[%s2603_s0 + $0x60] sm:$0xff]  }
  0x10   :  { %1819 = vmatprep.subr.bf16.mxu0 %v1911_v13  ;;  %1895 = vmatprep.subr.bf16.mxu1 %v1911_v13  ;;  %v171_v7 = vmul.f32 %v1448_v54, %v1968_v5  ;;  %v172_v8 = vmul.f32 %v1451_v55, %v1968_v5  ;;  %v173_v9 = vmul.f32 %v1452_v56, %v1968_v5  ;;  %v299_v15 = vmax.f32 %v235_v61, 0.0 }
  0x11   :  { %v238_v11 = vadd.f32 %v1979_v10, %v167_v57  ;;  %v174_v12 = vmul.f32 %v1455_v58, %v1968_v5  ;;  %v300_v16 = vmax.f32 %v236_v62, 0.0  ;;  %v1460_v17 = vunpack.c.h.bf16 %v1717_v63 }
  0x12   :  { %v1463_v18 = vunpack.c.l.bf16 %v1718_v4  ;;  %v301_v19 = vmax.f32 %v237_v1, 0.0  ;;  %v239_v20 = vadd.f32 %v1979_v10, %v168_v2  ;;  %v240_v21 = vadd.f32 %v1979_v10, %v169_v3 }
  0x13   :  { %1820 = vmatpush3.bf16.msra.mxu0 %v1911_v13  ;;  %1903 = vmatpush3.bf16.msra.mxu1 %v1911_v13  ;;  %v175_v13 = vmul.f32 %v1456_v59, %v1968_v5  ;;  %v241_v24 = vadd.f32 %v1979_v10, %v170_v6  ;;  %v242_v25 = vadd.f32 %v1979_v10, %v171_v7  ;;  %v302_v28 = vmax.f32 %v238_v11, 0.0  ;;  %v1725_v59 = vld [vmem:[%s2603_s0 + $0x88] sm:$0xff]   ;;  %v1727_v11 = vld [vmem:[%s2603_s0 + $0x98] sm:$0xff]  }
  0x14   :  { %1821 = vmatprep.subr.bf16.mxu0 %v1912_v22  ;;  %1896 = vmatprep.subr.bf16.mxu1 %v1912_v22  ;;  %v243_v26 = vadd.f32 %v1979_v10, %v172_v8  ;;  %v244_v27 = vadd.f32 %v1979_v10, %v173_v9  ;;  %v245_v29 = vadd.f32 %v1979_v10, %v174_v12  ;;  %v1467_v35 = vunpack.c.l.bf16 %v1719_v23 }
  0x15   :  { %v246_v30 = vadd.f32 %v1979_v10, %v175_v13  ;;  %v360_v32 = vpack.c.bf16 %v300_v16, %v299_v15  ;;  %v177_v33 = vmul.f32 %v1460_v17, %v1968_v5  ;;  %v178_v34 = vmul.f32 %v1463_v18, %v1968_v5 }
  0x16   :  { %v303_v36 = vmax.f32 %v239_v20, 0.0  ;;  %v304_v37 = vmax.f32 %v240_v21, 0.0  ;;  %v1468_v39 = vunpack.c.h.bf16 %v1719_v23  ;;  %v305_v40 = vmax.f32 %v241_v24, 0.0  ;;  %v1728_v24 = vld [vmem:[%s2603_s0 + $0xa0] sm:$0xff]  }
  0x17   :  { %1822 = vmatpush3.bf16.msra.mxu0 %v1912_v22  ;;  %1904 = vmatpush3.bf16.msra.mxu1 %v1912_v22  ;;  %v1464_v22 = vunpack.c.h.bf16 %v1718_v4  ;;  %v306_v41 = vmax.f32 %v242_v25, 0.0  ;;  %v307_v42 = vmax.f32 %v243_v26, 0.0  ;;  %v361_v45 = vpack.c.bf16 %v302_v28, %v301_v19 }
  0x18   :  { %1823 = vmatprep.subr.bf16.mxu0 %v1913_v31  ;;  %1897 = vmatprep.subr.bf16.mxu1 %v1913_v31  ;;  %v309_v46 = vmax.f32 %v245_v29, 0.0  ;;  %v310_v47 = vmax.f32 %v246_v30, 0.0  ;;  %v248_v49 = vadd.f32 %v1979_v10, %v177_v33  ;;  %v2066_v50 = vadd.f32 %v1979_v10, %v178_v34  ;;  %v1729_v33 = vld [vmem:[%s2603_s0 + $0xa8] sm:$0xff]  }
  0x19   :  { %v179_v38 = vmul.f32 %v1464_v22, %v1968_v5  ;;  %v180_v51 = vmul.f32 %v1467_v35, %v1968_v5  ;;  %v181_v54 = vmul.f32 %v1468_v39, %v1968_v5  ;;  %v1487_v55 = vunpack.c.l.bf16 %v1724_v44 }
  0x1a   :  { %v362_v56 = vpack.c.bf16 %v304_v37, %v303_v36  ;;  %v363_v57 = vpack.c.bf16 %v306_v41, %v305_v40  ;;  %v1471_v62 = vunpack.c.l.bf16 %v2072_v52  ;;  %v1488_v63 = vunpack.c.h.bf16 %v1724_v44 }
  0x1b   :  { %1824 = vmatpush3.bf16.msra.mxu0 %v1913_v31  ;;  %1905 = vmatpush3.bf16.msra.mxu1 %v1913_v31  ;;  %v176_v31 = vmul.f32 %v1459_v14, %v1968_v5  ;;  %v2075_v53 = vadd.f32 %v1979_v10, %v179_v38  ;;  %v312_v1 = vmax.f32 %v248_v49, 0.0  ;;  %v313_v2 = vmax.f32 %v2066_v50, 0.0 }
  0x1c   :  { %1825 = vmatprep.subr.bf16.mxu0 %v1914_v43  ;;  %1898 = vmatprep.subr.bf16.mxu1 %v1914_v43  ;;  %v2091_v3 = vadd.f32 %v1979_v10, %v180_v51  ;;  %v190_v4 = vmul.f32 %v1487_v55, %v1968_v5  ;;  %v2096_v7 = vadd.f32 %v1979_v10, %v181_v54  ;;  %v1491_v9 = vunpack.c.l.bf16 %v1725_v59 }
  0x1d   :  { %v247_v48 = vadd.f32 %v1979_v10, %v176_v31  ;;  %v314_v6 = vmax.f32 %v2075_v53, 0.0  ;;  %v191_v8 = vmul.f32 %v1488_v63, %v1968_v5  ;;  %v1472_v12 = vunpack.c.h.bf16 %v2072_v52 }
  0x1e   :  { %v261_v13 = vadd.f32 %v1979_v10, %v190_v4  ;;  %v1492_v14 = vunpack.c.h.bf16 %v1725_v59  ;;  %v2105_v16 = vmul.f32 %v1471_v62, %v1968_v5  ;;  %v192_v18 = vmul.f32 %v1491_v9, %v1968_v5 }
  0x1f   :  { %1826 = vmatpush3.bf16.msra.mxu0 %v1914_v43  ;;  %1906 = vmatpush3.bf16.msra.mxu1 %v1914_v43  ;;  %v308_v43 = vmax.f32 %v244_v27, 0.0  ;;  %v311_v61 = vmax.f32 %v247_v48, 0.0  ;;  %v262_v17 = vadd.f32 %v1979_v10, %v191_v8  ;;  %v1499_v23 = vunpack.c.l.bf16 %v1727_v11 }
  0x20   :  { %v325_v20 = vmax.f32 %v261_v13, 0.0  ;;  %v193_v21 = vmul.f32 %v1492_v14, %v1968_v5  ;;  %v263_v27 = vadd.f32 %v1979_v10, %v192_v18  ;;  %v1500_v31 = vunpack.c.h.bf16 %v1727_v11  ;;  %v1732_v18 = vld [vmem:[%s2603_s0 + $0xc0] sm:$0xff]  }
  0x21   :  { %v2078_v58 = vpack.c.bf16 %v308_v43, %v307_v42  ;;  %v2114_v25 = vpack.c.bf16 %v312_v1, %v311_v61  ;;  %v326_v26 = vmax.f32 %v262_v17, 0.0  ;;  %v1503_v37 = vunpack.c.l.bf16 %v1728_v24  ;;  %v1731_v1 = vld [vmem:[%s2603_s0 + $0xb8] sm:$0xff]  }
  0x22   :  { %1828 = vmatmul.mubr.bf16.vlgmr.msra.gmra.mxu0 %v358_v60  ;;  %v2083_v60 = vpack.c.bf16 %v310_v47, %v309_v46  ;;  %v264_v29 = vadd.f32 %v1979_v10, %v193_v21  ;;  %v327_v35 = vmax.f32 %v263_v27, 0.0  ;;  %v197_v40 = vmul.f32 %v1500_v31, %v1968_v5  ;;  %v1730_v46 = vld [vmem:[%s2603_s0 + $0xb0] sm:$0xff]   ;;  %v1721_v47 = vld [vmem:[%s2603_s0 + $0x68] sm:$0xff]  }
  0x23   :  { %1831 = vmatprep.mubr.bf16.mxu0 %v359_v0  ;;  %v1726_v0 = vld [vmem:[%s2603_s0 + $0x90] sm:$0xff]   ;;  %v373_v34 = vpack.c.bf16 %v326_v26, %v325_v20  ;;  %v1504_v43 = vunpack.c.h.bf16 %v1728_v24  ;;  %v198_v44 = vmul.f32 %v1503_v37, %v1968_v5  ;;  %v1508_v54 = vunpack.c.h.bf16 %v1729_v33 }
  0x24   :  { %v1495_v15 = vunpack.c.l.bf16 %v1726_v0  ;;  %v1496_v19 = vunpack.c.h.bf16 %v1726_v0  ;;  %v328_v38 = vmax.f32 %v264_v29, 0.0  ;;  %v268_v49 = vadd.f32 %v1979_v10, %v197_v40  ;;  %v1734_v40 = vld [vmem:[%s2603_s0 + $0xd0] sm:$0xff]  }
  0x25   :  { %1859 = vmatprep.mubr.bf16.mxu1 %v373_v34  ;;  %v201_v62 = vmul.f32 %v1508_v54, %v1968_v5  ;;  %v1511_v63 = vunpack.c.l.bf16 %v1730_v46  ;;  %v1512_v0 = vunpack.c.h.bf16 %v1730_v46  ;;  %v315_v4 = vmax.f32 %v2091_v3, 0.0 }
  0x26   :  { %v194_v22 = vmul.f32 %v1495_v15, %v1968_v5  ;;  %v195_v28 = vmul.f32 %v1496_v19, %v1968_v5  ;;  %v374_v48 = vpack.c.bf16 %v328_v38, %v327_v35  ;;  %v332_v61 = vmax.f32 %v268_v49, 0.0 }
  0x27   :  { %v1475_v8 = vunpack.c.l.bf16 %v1721_v47  ;;  %v316_v13 = vmax.f32 %v2096_v7, 0.0  ;;  %v1476_v14 = vunpack.c.h.bf16 %v1721_v47  ;;  %v202_v15 = vmul.f32 %v1511_v63, %v1968_v5 }
  0x28   :  { %v265_v30 = vadd.f32 %v1979_v10, %v194_v22  ;;  %v266_v36 = vadd.f32 %v1979_v10, %v195_v28  ;;  %1860 = vmatmul.mubr.bf16.vlgmr.msra.gmra.mxu1 %v374_v48  ;;  %v203_v17 = vmul.f32 %v1512_v0, %v1968_v5  ;;  %v183_v3 = vmul.f32 %v1472_v12, %v1968_v5 }
  0x29   :  { %v1515_v19 = vunpack.c.l.bf16 %v1731_v1  ;;  %v1516_v20 = vunpack.c.h.bf16 %v1731_v1  ;;  %v273_v24 = vadd.f32 %v1979_v10, %v202_v15  ;;  %v1519_v27 = vunpack.c.l.bf16 %v1732_v18  ;;  %v1735_v15 = vld [vmem:[%s2603_s0 + $0xd8] sm:$0xff]  }
  0x2a   :  { %1832 = vmatmul.mubr.bf16.gmra.mxu0 %v360_v32  ;;  %v196_v32 = vmul.f32 %v1499_v23, %v1968_v5  ;;  %v329_v39 = vmax.f32 %v265_v30, 0.0  ;;  %v330_v42 = vmax.f32 %v266_v36, 0.0  ;;  %v272_v23 = vadd.f32 %v1979_v10, %v201_v62 }
  0x2b   :  { %1835 = vmatprep.mubr.bf16.mxu0 %v361_v45  ;;  %v1507_v45 = vunpack.c.l.bf16 %v1729_v33  ;;  %v1520_v52 = vunpack.c.h.bf16 %v1732_v18  ;;  %v367_v12 = vpack.c.bf16 %v314_v6, %v313_v2  ;;  %v253_v28 = vadd.f32 %v1979_v10, %v2105_v16  ;;  %v1723_v33 = vld [vmem:[%s2603_s0 + $0x78] sm:$0xff]   ;;  %v1733_v16 = vld [vmem:[%s2603_s0 + $0xc8] sm:$0xff]  }
  0x2c   :  { %v267_v41 = vadd.f32 %v1979_v10, %v196_v32  ;;  %v375_v55 = vpack.c.bf16 %v330_v42, %v329_v39  ;;  %v254_v31 = vadd.f32 %v1979_v10, %v183_v3  ;;  %v184_v32 = vmul.f32 %v1475_v8, %v1968_v5 }
  0x2d   :  { %v200_v59 = vmul.f32 %v1507_v45, %v1968_v5  ;;  %v204_v34 = vmul.f32 %v1515_v19, %v1968_v5  ;;  %v205_v50 = vmul.f32 %v1516_v20, %v1968_v5  ;;  %v368_v35 = vpack.c.bf16 %v316_v13, %v315_v4 }
  0x2e   :  { %v331_v51 = vmax.f32 %v267_v41, 0.0  ;;  %1863 = vmatprep.mubr.bf16.mxu1 %v375_v55  ;;  %v185_v53 = vmul.f32 %v1476_v14, %v1968_v5  ;;  %v336_v6 = vmax.f32 %v272_v23, 0.0  ;;  %v337_v36 = vmax.f32 %v273_v24, 0.0 }
  0x2f   :  { %v271_v22 = vadd.f32 %v1979_v10, %v200_v59  ;;  %v206_v38 = vmul.f32 %v1519_v27, %v1968_v5  ;;  %v207_v39 = vmul.f32 %v1520_v52, %v1968_v5  ;;  %v317_v41 = vmax.f32 %v253_v28, 0.0 }
  0x30   :  { %v376_v21 = vpack.c.bf16 %v332_v61, %v331_v51  ;;  %v318_v45 = vmax.f32 %v254_v31, 0.0  ;;  %v275_v46 = vadd.f32 %v1979_v10, %v204_v34  ;;  %v276_v47 = vadd.f32 %v1979_v10, %v205_v50 }
  0x31   :  { %v335_v2 = vmax.f32 %v271_v22, 0.0  ;;  %v1523_v48 = vunpack.c.l.bf16 %v1733_v16  ;;  %v1524_v51 = vunpack.c.h.bf16 %v1733_v16  ;;  %v1527_v54 = vunpack.c.l.bf16 %v1734_v40 }
  0x32   :  { %1836 = vmatmul.mubr.bf16.gmra.mxu0 %v362_v56  ;;  %v199_v56 = vmul.f32 %v1504_v43, %v1968_v5  ;;  %1864 = vmatmul.mubr.bf16.gmra.mxu1 %v376_v21  ;;  %v1528_v55 = vunpack.c.h.bf16 %v1734_v40  ;;  %v278_v59 = vadd.f32 %v1979_v10, %v207_v39  ;;  %v256_v61 = vadd.f32 %v1979_v10, %v185_v53  ;;  %v1736_v21 = vld [vmem:[%s2603_s0 + $0xe0] sm:$0xff]  }
  0x33   :  { %1839 = vmatprep.mubr.bf16.mxu0 %v363_v57  ;;  %v269_v57 = vadd.f32 %v1979_v10, %v198_v44  ;;  %v1483_v44 = vunpack.c.l.bf16 %v1723_v33  ;;  %v378_v49 = vpack.c.bf16 %v336_v6, %v335_v2  ;;  %v1484_v0 = vunpack.c.h.bf16 %v1723_v33 }
  0x34   :  { %v270_v9 = vadd.f32 %v1979_v10, %v199_v56  ;;  %v255_v56 = vadd.f32 %v1979_v10, %v184_v32  ;;  %v369_v1 = vpack.c.bf16 %v318_v45, %v317_v41  ;;  %v339_v4 = vmax.f32 %v275_v46, 0.0  ;;  %v1738_v41 = vld [vmem:[%s2603_s0 + $0xf0] sm:$0xff]  }
  0x35   :  { %v333_v11 = vmax.f32 %v269_v57, 0.0  ;;  %v277_v57 = vadd.f32 %v1979_v10, %v206_v38  ;;  %v340_v8 = vmax.f32 %v276_v47, 0.0  ;;  %v210_v13 = vmul.f32 %v1527_v54, %v1968_v5 }
  0x36   :  { %v334_v7 = vmax.f32 %v270_v9, 0.0  ;;  %v208_v9 = vmul.f32 %v1523_v48, %v1968_v5  ;;  %v211_v14 = vmul.f32 %v1528_v55, %v1968_v5  ;;  %v342_v3 = vmax.f32 %v278_v59, 0.0 }
  0x37   :  { %v341_v18 = vmax.f32 %v277_v57, 0.0  ;;  %v189_v20 = vmul.f32 %v1484_v0, %v1968_v5  ;;  %v380_v23 = vpack.c.bf16 %v340_v8, %v339_v4  ;;  %v281_v27 = vadd.f32 %v1979_v10, %v210_v13 }
  0x38   :  { %v377_v26 = vpack.c.bf16 %v334_v7, %v333_v11  ;;  %v209_v11 = vmul.f32 %v1524_v51, %v1968_v5  ;;  %v320_v7 = vmax.f32 %v256_v61, 0.0  ;;  %v279_v24 = vadd.f32 %v1979_v10, %v208_v9 }
  0x39   :  { %v282_v52 = vadd.f32 %v1979_v10, %v211_v14  ;;  %v381_v28 = vpack.c.bf16 %v342_v3, %v341_v18  ;;  %v260_v33 = vadd.f32 %v1979_v10, %v189_v20  ;;  %v345_v2 = vmax.f32 %v281_v27, 0.0 }
  0x3a   :  { %1840 = vmatmul.mubr.bf16.gmra.mxu0 %v2078_v58  ;;  %v1722_v58 = vld [vmem:[%s2603_s0 + $0x70] sm:$0xff]   ;;  %1867 = vmatprep.mubr.bf16.mxu1 %v377_v26  ;;  %v1531_v26 = vunpack.c.l.bf16 %v1735_v15  ;;  %v343_v50 = vmax.f32 %v279_v24, 0.0  ;;  %v1543_v51 = vunpack.c.l.bf16 %v1738_v41  ;;  %v1544_v54 = vunpack.c.h.bf16 %v1738_v41 }
  0x3b   :  { %1843 = vmatprep.mubr.bf16.mxu0 %v2083_v60  ;;  %v274_v60 = vadd.f32 %v1979_v10, %v203_v17  ;;  %v1479_v29 = vunpack.c.l.bf16 %v1722_v58  ;;  %v1480_v30 = vunpack.c.h.bf16 %v1722_v58  ;;  %1868 = vmatmul.mubr.bf16.gmra.mxu1 %v378_v49  ;;  %v188_v17 = vmul.f32 %v1483_v44, %v1968_v5 }
  0x3c   :  { %v319_v58 = vmax.f32 %v255_v56, 0.0  ;;  %v346_v6 = vmax.f32 %v282_v52, 0.0  ;;  %v324_v40 = vmax.f32 %v260_v33, 0.0  ;;  %v219_v0 = vmul.f32 %v1544_v54, %v1968_v5 }
  0x3d   :  { %v338_v37 = vmax.f32 %v274_v60, 0.0  ;;  %v186_v42 = vmul.f32 %v1479_v29, %v1968_v5  ;;  %v187_v43 = vmul.f32 %v1480_v30, %v1968_v5  ;;  %v280_v60 = vadd.f32 %v1979_v10, %v209_v11 }
  0x3e   :  { %v1535_v29 = vunpack.c.l.bf16 %v1736_v21  ;;  %v1536_v30 = vunpack.c.h.bf16 %v1736_v21  ;;  %v370_v31 = vpack.c.bf16 %v320_v7, %v319_v58  ;;  %v259_v32 = vadd.f32 %v1979_v10, %v188_v17 }
  0x3f   :  { %v257_v62 = vadd.f32 %v1979_v10, %v186_v42  ;;  %v258_v63 = vadd.f32 %v1979_v10, %v187_v43  ;;  %v344_v53 = vmax.f32 %v280_v60, 0.0  ;;  %v383_v45 = vpack.c.bf16 %v346_v6, %v345_v2 }
  0x40   :  { %v215_v38 = vmul.f32 %v1536_v30, %v1968_v5  ;;  %v323_v39 = vmax.f32 %v259_v32, 0.0  ;;  %v290_v17 = vadd.f32 %v1979_v10, %v219_v0 }
  0x41   :  { %v321_v19 = vmax.f32 %v257_v62, 0.0  ;;  %v322_v22 = vmax.f32 %v258_v63, 0.0  ;;  %v382_v44 = vpack.c.bf16 %v344_v53, %v343_v50  ;;  %v218_v63 = vmul.f32 %v1543_v51, %v1968_v5 }
  0x42   :  { %1844 = vmatmul.mubr.bf16.gmra.mxu0 %v2114_v25  ;;  %v379_v25 = vpack.c.bf16 %v338_v37, %v337_v36  ;;  %v1737_v36 = vld [vmem:[%s2603_s0 + $0xe8] sm:$0xff]   ;;  %v214_v37 = vmul.f32 %v1535_v29, %v1968_v5  ;;  %v286_v49 = vadd.f32 %v1979_v10, %v215_v38  ;;  %v372_v55 = vpack.c.bf16 %v324_v40, %v323_v39 }
  0x43   :  { %1847 = vmatprep.mubr.bf16.mxu0 %v367_v12  ;;  %v1532_v12 = vunpack.c.h.bf16 %v1735_v15  ;;  %v371_v34 = vpack.c.bf16 %v322_v22, %v321_v19  ;;  %v1539_v43 = vunpack.c.l.bf16 %v1737_v36  ;;  %v1540_v47 = vunpack.c.h.bf16 %v1737_v36 }
  0x44   :  { %1871 = vmatprep.mubr.bf16.mxu1 %v379_v25  ;;  %v285_v48 = vadd.f32 %v1979_v10, %v214_v37  ;;  %v350_v62 = vmax.f32 %v286_v49, 0.0  ;;  %v289_v15 = vadd.f32 %v1979_v10, %v218_v63  ;;  %v354_v20 = vmax.f32 %v290_v17, 0.0 }
  0x45   :  { %1872 = vmatmul.mubr.bf16.gmra.mxu1 %v380_v23  ;;  %v213_v16 = vmul.f32 %v1532_v12, %v1968_v5  ;;  %v216_v56 = vmul.f32 %v1539_v43, %v1968_v5  ;;  %v217_v59 = vmul.f32 %v1540_v47, %v1968_v5 }
  0x46   :  { %1875 = vmatprep.mubr.bf16.mxu1 %v381_v28  ;;  %v349_v61 = vmax.f32 %v285_v48, 0.0  ;;  %v353_v19 = vmax.f32 %v289_v15, 0.0 }
  0x47   :  { %v284_v46 = vadd.f32 %v1979_v10, %v213_v16  ;;  %v287_v4 = vadd.f32 %v1979_v10, %v216_v56  ;;  %v288_v9 = vadd.f32 %v1979_v10, %v217_v59 }
  0x48   :  { %v385_v14 = vpack.c.bf16 %v350_v62, %v349_v61  ;;  %v387_v24 = vpack.c.bf16 %v354_v20, %v353_v19 }
  0x49   :  { %v348_v57 = vmax.f32 %v284_v46, 0.0  ;;  %v351_v18 = vmax.f32 %v287_v4, 0.0  ;;  %v352_v3 = vmax.f32 %v288_v9, 0.0 }
  0x4a   :  { %1848 = vmatmul.mubr.bf16.gmra.mxu0 %v368_v35  ;;  %v212_v35 = vmul.f32 %v1531_v26, %v1968_v5 }
  0x4b   :  { %1851 = vmatprep.mubr.bf16.mxu0 %v369_v1  ;;  %v1739_v1 = vld [vmem:[%s2603_s0 + $0xf8] sm:$0xff]   ;;  %v386_v21 = vpack.c.bf16 %v352_v3, %v351_v18 }
  0x4c   :  { %v283_v42 = vadd.f32 %v1979_v10, %v212_v35  ;;  %v1547_v11 = vunpack.c.l.bf16 %v1739_v1  ;;  %v1548_v13 = vunpack.c.h.bf16 %v1739_v1 }
  0x4d   :  { %1876 = vmatmul.mubr.bf16.gmra.mxu1 %v382_v44 }
  0x4e   :  { %v347_v25 = vmax.f32 %v283_v42, 0.0  ;;  %1879 = vmatprep.mubr.bf16.mxu1 %v383_v45  ;;  %v220_v58 = vmul.f32 %v1547_v11, %v1968_v5  ;;  %v221_v7 = vmul.f32 %v1548_v13, %v1968_v5  ;;  %v2245_v5 = vld [vmem:[%s2606_s4] ss:$0 sm:$0xff] }
  0x50   :  { %v384_v8 = vpack.c.bf16 %v348_v57, %v347_v25  ;;  %v291_v22 = vadd.f32 %v1979_v10, %v220_v58  ;;  %v292_v23 = vadd.f32 %v1979_v10, %v221_v7 }
  0x52   :  { %1852 = vmatmul.mubr.bf16.gmra.mxu0 %v370_v31  ;;  %v355_v26 = vmax.f32 %v291_v22, 0.0  ;;  %v356_v60 = vmax.f32 %v292_v23, 0.0 }
  0x53   :  { %1855 = vmatprep.mubr.bf16.mxu0 %v371_v34 }
  0x54   :  { %v388_v27 = vpack.c.bf16 %v356_v60, %v355_v26 }
  0x55   :  { %1880 = vmatmul.mubr.bf16.gmra.mxu1 %v384_v8 }
  0x56   :  { %1883 = vmatprep.mubr.bf16.mxu1 %v385_v14 }
  0x5a   :  { %1856 = vmatmul.mubr.bf16.gmra.mxu0 %v372_v55 }
  0x5d   :  { %1884 = vmatmul.mubr.bf16.gmra.mxu1 %v386_v21 }
  0x5e   :  { %1887 = vmatprep.mubr.bf16.mxu1 %v387_v24 }
  0x65   :  { %1888 = vmatmul.mubr.bf16.gmra.mxu1 %v388_v27 }
  0xe2   :  { %v1829_v52 = vpop.f32.mrf.mxu0 }
  0xe3   :  { %v503_v29 = vadd.f32 %v1829_v52, %v2245_v5 }
  0xe4   :  { %v494_v12 = vpop.f32.mrf.mxu0 }
  0xe5   :  { %v495_v30 = vadd.f32 %v2245_v5, %v494_v12  ;;  %v1140_v16 = vmul.f32 %v503_v29, %v503_v29 }
  0xe6   :  { %v1830_v28 = vpop.f32.mrf.mxu0 }
  0xe7   :  { %v506_v10 = vadd.f32 %v1830_v28, %v2245_v5  ;;  %v1138_v50 = vmul.f32 %v495_v30, %v495_v30 }
  0xe8   :  { %v497_v31 = vpop.f32.mrf.mxu0  ;;  %v1861_v15 = vpop.f32.mrf.mxu1 }
  0xe9   :  { %v1557_v32 = vpack.c.bf16 %v506_v10, %v503_v29  ;;  %v498_v33 = vadd.f32 %v2245_v5, %v497_v31  ;;  %v1141_v39 = vmul.f32 %v506_v10, %v506_v10  ;;  %v2275_v23 = vadd.f32 %v1861_v15, %v2245_v5 }
  0xea   :  { %v1833_v34 = vpop.f32.mrf.mxu0  ;;  %v622_v20 = vpop.f32.mrf.mxu1 }
  0xeb   :  { %1740 = vst [vmem:[%s2607_s5 + $0x8] sm:$0xff] %v1557_v32   ;;  %v1552_v35 = vpack.c.bf16 %v498_v33, %v495_v30  ;;  %v1069_v53 = vadd.f32 %v498_v33, %v495_v30  ;;  %v1139_v2 = vmul.f32 %v498_v33, %v498_v33  ;;  %v519_v42 = vadd.f32 %v1833_v34, %v2245_v5 }
  0xec   :  { %v510_v6 = vpop.f32.mrf.mxu0  ;;  %v1862_v27 = vpop.f32.mrf.mxu1  ;;  %v2285_v31 = vadd.f32 %v2245_v5, %v622_v20 }
  0xed   :  { %1553 = vst [vmem:[%s2607_s5] sm:$0xff] %v1552_v35   ;;  %v1070_v36 = vadd.f32 %v1069_v53, %v503_v29  ;;  %v1202_v37 = vadd.f32 %v1139_v2, %v1138_v50  ;;  %v511_v38 = vadd.f32 %v2245_v5, %v510_v6  ;;  %v1144_v61 = vmul.f32 %v519_v42, %v519_v42 }
  0xee   :  { %v1834_v40 = vpop.f32.mrf.mxu0  ;;  %v2281_v12 = vadd.f32 %v1862_v27, %v2245_v5  ;;  %v625_v32 = vpop.f32.mrf.mxu1 }
  0xef   :  { %v1203_v41 = vadd.f32 %v1202_v37, %v1140_v16  ;;  %v1071_v43 = vadd.f32 %v1070_v36, %v506_v10  ;;  %v522_v44 = vadd.f32 %v1834_v40, %v2245_v5  ;;  %v1142_v47 = vmul.f32 %v511_v38, %v511_v38 }
  0xf0   :  { %v513_v45 = vpop.f32.mrf.mxu0  ;;  %v1637_v50 = vpack.c.bf16 %v2281_v12, %v2275_v23  ;;  %v2292_v16 = vadd.f32 %v2245_v5, %v625_v32 }
  0xf1   :  { %v1072_v46 = vadd.f32 %v1071_v43, %v511_v38  ;;  %v1204_v48 = vadd.f32 %v1203_v41, %v1141_v39  ;;  %v1567_v49 = vpack.c.bf16 %v522_v44, %v519_v42  ;;  %v514_v51 = vadd.f32 %v2245_v5, %v513_v45 }
  0xf2   :  { %v1837_v54 = vpop.f32.mrf.mxu0  ;;  %v1145_v9 = vmul.f32 %v522_v44, %v522_v44  ;;  %v1865_v36 = vpop.f32.mrf.mxu1  ;;  %1756 = vst [vmem:[%s2607_s5 + $0x88] sm:$0xff] %v1637_v50   ;;  %v1632_v43 = vpack.c.bf16 %v2292_v16, %v2285_v31 }
  0xf3   :  { %v1205_v55 = vadd.f32 %v1204_v48, %v1142_v47  ;;  %1742 = vst [vmem:[%s2607_s5 + $0x18] sm:$0xff] %v1567_v49   ;;  %v1562_v56 = vpack.c.bf16 %v514_v51, %v511_v38  ;;  %v1073_v25 = vadd.f32 %v1072_v46, %v514_v51  ;;  %v1143_v57 = vmul.f32 %v514_v51, %v514_v51 }
  0xf4   :  { %v526_v59 = vpop.f32.mrf.mxu0  ;;  %v535_v4 = vadd.f32 %v1837_v54, %v2245_v5  ;;  %v2304_v47 = vadd.f32 %v1865_v36, %v2245_v5  ;;  %1755 = vst [vmem:[%s2607_s5 + $0x80] sm:$0xff] %v1632_v43  }
  0xf5   :  { %1741 = vst [vmem:[%s2607_s5 + $0x10] sm:$0xff] %v1562_v56   ;;  %v1074_v62 = vadd.f32 %v1073_v25, %v519_v42  ;;  %v1206_v63 = vadd.f32 %v1205_v55, %v1143_v57  ;;  %v527_v0 = vadd.f32 %v2245_v5, %v526_v59 }
  0xf6   :  { %v1838_v1 = vpop.f32.mrf.mxu0  ;;  %v1148_v52 = vmul.f32 %v535_v4, %v535_v4 }
  0xf7   :  { %v538_v8 = vadd.f32 %v1838_v1, %v2245_v5  ;;  %v1207_v11 = vadd.f32 %v1206_v63, %v1144_v61  ;;  %v1075_v13 = vadd.f32 %v1074_v62, %v522_v44  ;;  %v1146_v58 = vmul.f32 %v527_v0, %v527_v0  ;;  %v638_v44 = vpop.f32.mrf.mxu1 }
  0xf8   :  { %v529_v14 = vpop.f32.mrf.mxu0  ;;  %v2317_v62 = vadd.f32 %v2245_v5, %v638_v44 }
  0xf9   :  { %v1577_v17 = vpack.c.bf16 %v538_v8, %v535_v4  ;;  %v530_v18 = vadd.f32 %v2245_v5, %v529_v14  ;;  %v1076_v3 = vadd.f32 %v1075_v13, %v527_v0  ;;  %v1208_v7 = vadd.f32 %v1207_v11, %v1145_v9  ;;  %v1866_v54 = vpop.f32.mrf.mxu1 }
  0xfa   :  { %v1841_v19 = vpop.f32.mrf.mxu0  ;;  %v1149_v35 = vmul.f32 %v538_v8, %v538_v8  ;;  %v2313_v56 = vadd.f32 %v1866_v54, %v2245_v5 }
  0xfb   :  { %1744 = vst [vmem:[%s2607_s5 + $0x28] sm:$0xff] %v1577_v17   ;;  %v1572_v21 = vpack.c.bf16 %v530_v18, %v527_v0  ;;  %v1147_v22 = vmul.f32 %v530_v18, %v530_v18  ;;  %v1209_v24 = vadd.f32 %v1208_v7, %v1146_v58  ;;  %v1077_v26 = vadd.f32 %v1076_v3, %v530_v18  ;;  %v641_v63 = vpop.f32.mrf.mxu1 }
  0xfc   :  { %v542_v60 = vpop.f32.mrf.mxu0  ;;  %v551_v33 = vadd.f32 %v1841_v19, %v2245_v5  ;;  %v2324_v14 = vadd.f32 %v2245_v5, %v641_v63 }
  0xfd   :  { %1743 = vst [vmem:[%s2607_s5 + $0x20] sm:$0xff] %v1572_v21   ;;  %v1078_v28 = vadd.f32 %v1077_v26, %v535_v4  ;;  %v1210_v29 = vadd.f32 %v1209_v24, %v1147_v22  ;;  %v543_v30 = vadd.f32 %v2245_v5, %v542_v60  ;;  %v1647_v4 = vpack.c.bf16 %v2313_v56, %v2304_v47  ;;  %v1869_v15 = vpop.f32.mrf.mxu1 }
  0xfe   :  { %v1842_v10 = vpop.f32.mrf.mxu0  ;;  %v1152_v55 = vmul.f32 %v551_v33, %v551_v33  ;;  %v1642_v20 = vpack.c.bf16 %v2324_v14, %v2317_v62  ;;  %v2336_v26 = vadd.f32 %v1869_v15, %v2245_v5 }
  0xff   :  { %v554_v34 = vadd.f32 %v1842_v10, %v2245_v5  ;;  %v1211_v53 = vadd.f32 %v1210_v29, %v1148_v52  ;;  %v1079_v2 = vadd.f32 %v1078_v28, %v538_v8  ;;  %v1150_v40 = vmul.f32 %v543_v30, %v543_v30  ;;  %1758 = vst [vmem:[%s2607_s5 + $0x98] sm:$0xff] %v1647_v4   ;;  %v654_v21 = vpop.f32.mrf.mxu1 }
 0x100   :  { %v545_v6 = vpop.f32.mrf.mxu0  ;;  %1757 = vst [vmem:[%s2607_s5 + $0x90] sm:$0xff] %v1642_v20   ;;  %v2349_v50 = vadd.f32 %v2245_v5, %v654_v21 }
 0x101   :  { %v1587_v37 = vpack.c.bf16 %v554_v34, %v551_v33  ;;  %v546_v38 = vadd.f32 %v2245_v5, %v545_v6  ;;  %v1080_v39 = vadd.f32 %v1079_v2, %v543_v30  ;;  %v1212_v41 = vadd.f32 %v1211_v53, %v1149_v35  ;;  %v1870_v28 = vpop.f32.mrf.mxu1 }
 0x102   :  { %v1845_v42 = vpop.f32.mrf.mxu0  ;;  %v1153_v8 = vmul.f32 %v554_v34, %v554_v34 }
 0x103   :  { %1746 = vst [vmem:[%s2607_s5 + $0x38] sm:$0xff] %v1587_v37   ;;  %v1582_v45 = vpack.c.bf16 %v546_v38, %v543_v30  ;;  %v1151_v46 = vmul.f32 %v546_v38, %v546_v38  ;;  %v1213_v48 = vadd.f32 %v1212_v41, %v1150_v40  ;;  %v1081_v49 = vadd.f32 %v1080_v39, %v546_v38  ;;  %v657_v35 = vpop.f32.mrf.mxu1 }
 0x104   :  { %v558_v51 = vpop.f32.mrf.mxu0  ;;  %v567_v0 = vadd.f32 %v1845_v42, %v2245_v5  ;;  %v2345_v30 = vadd.f32 %v1870_v28, %v2245_v5  ;;  %v2356_v40 = vadd.f32 %v2245_v5, %v657_v35 }
 0x105   :  { %1745 = vst [vmem:[%s2607_s5 + $0x30] sm:$0xff] %v1582_v45   ;;  %v1082_v25 = vadd.f32 %v1081_v49, %v551_v33  ;;  %v1214_v57 = vadd.f32 %v1213_v48, %v1151_v46  ;;  %v559_v59 = vadd.f32 %v2245_v5, %v558_v51  ;;  %v1873_v41 = vpop.f32.mrf.mxu1 }
 0x106   :  { %v1846_v61 = vpop.f32.mrf.mxu0  ;;  %v1156_v29 = vmul.f32 %v567_v0, %v567_v0  ;;  %v1657_v6 = vpack.c.bf16 %v2345_v30, %v2336_v26  ;;  %v1652_v49 = vpack.c.bf16 %v2356_v40, %v2349_v50 }
 0x107   :  { %v570_v1 = vadd.f32 %v1846_v61, %v2245_v5  ;;  %v1215_v9 = vadd.f32 %v1214_v57, %v1152_v55  ;;  %v1083_v11 = vadd.f32 %v1082_v25, %v554_v34  ;;  %v1154_v58 = vmul.f32 %v559_v59, %v559_v59  ;;  %v670_v51 = vpop.f32.mrf.mxu1 }
 0x108   :  { %v561_v13 = vpop.f32.mrf.mxu0  ;;  %1760 = vst [vmem:[%s2607_s5 + $0xa8] sm:$0xff] %v1657_v6   ;;  %v2368_v25 = vadd.f32 %v1873_v41, %v2245_v5  ;;  %1759 = vst [vmem:[%s2607_s5 + $0xa0] sm:$0xff] %v1652_v49  }
 0x109   :  { %v1597_v17 = vpack.c.bf16 %v570_v1, %v567_v0  ;;  %v562_v18 = vadd.f32 %v2245_v5, %v561_v13  ;;  %v1084_v3 = vadd.f32 %v1083_v11, %v559_v59  ;;  %v1216_v7 = vadd.f32 %v1215_v9, %v1153_v8  ;;  %v1874_v63 = vpop.f32.mrf.mxu1 }
 0x10a   :  { %v1849_v19 = vpop.f32.mrf.mxu0  ;;  %v1157_v36 = vmul.f32 %v570_v1, %v570_v1  ;;  %v2381_v13 = vadd.f32 %v2245_v5, %v670_v51 }
 0x10b   :  { %1748 = vst [vmem:[%s2607_s5 + $0x48] sm:$0xff] %v1597_v17   ;;  %v1592_v22 = vpack.c.bf16 %v562_v18, %v559_v59  ;;  %v1155_v24 = vmul.f32 %v562_v18, %v562_v18  ;;  %v1217_v60 = vadd.f32 %v1216_v7, %v1154_v58  ;;  %v1085_v27 = vadd.f32 %v1084_v3, %v562_v18  ;;  %v673_v15 = vpop.f32.mrf.mxu1 }
 0x10c   :  { %v574_v52 = vpop.f32.mrf.mxu0  ;;  %v583_v53 = vadd.f32 %v1849_v19, %v2245_v5  ;;  %v2388_v21 = vadd.f32 %v2245_v5, %v673_v15 }
 0x10d   :  { %1747 = vst [vmem:[%s2607_s5 + $0x40] sm:$0xff] %v1592_v22   ;;  %v1086_v10 = vadd.f32 %v1085_v27, %v567_v0  ;;  %v1218_v32 = vadd.f32 %v1217_v60, %v1155_v24  ;;  %v575_v33 = vadd.f32 %v2245_v5, %v574_v52  ;;  %v1877_v22 = vpop.f32.mrf.mxu1 }
 0x10e   :  { %v1850_v34 = vpop.f32.mrf.mxu0  ;;  %v1160_v0 = vmul.f32 %v583_v53, %v583_v53  ;;  %v2400_v35 = vadd.f32 %v1877_v22, %v2245_v5 }
 0x10f   :  { %v586_v2 = vadd.f32 %v1850_v34, %v2245_v5  ;;  %v1219_v37 = vadd.f32 %v1218_v32, %v1156_v29  ;;  %v1087_v38 = vadd.f32 %v1086_v10, %v570_v1  ;;  %v1158_v45 = vmul.f32 %v575_v33, %v575_v33  ;;  %v686_v32 = vpop.f32.mrf.mxu1 }
 0x110   :  { %v577_v39 = vpop.f32.mrf.mxu0  ;;  %v2377_v1 = vadd.f32 %v1874_v63, %v2245_v5  ;;  %v1662_v10 = vpack.c.bf16 %v2388_v21, %v2381_v13 }
 0x111   :  { %v1607_v42 = vpack.c.bf16 %v586_v2, %v583_v53  ;;  %v578_v43 = vadd.f32 %v2245_v5, %v577_v39  ;;  %v1088_v44 = vadd.f32 %v1087_v38, %v575_v33  ;;  %v1220_v46 = vadd.f32 %v1219_v37, %v1157_v36  ;;  %v1878_v36 = vpop.f32.mrf.mxu1 }
 0x112   :  { %v1853_v48 = vpop.f32.mrf.mxu0  ;;  %v1667_v3 = vpack.c.bf16 %v2377_v1, %v2368_v25  ;;  %v1161_v58 = vmul.f32 %v586_v2, %v586_v2  ;;  %1761 = vst [vmem:[%s2607_s5 + $0xb0] sm:$0xff] %v1662_v10   ;;  %v2409_v38 = vadd.f32 %v1878_v36, %v2245_v5 }
 0x113   :  { %1750 = vst [vmem:[%s2607_s5 + $0x58] sm:$0xff] %v1607_v42   ;;  %v1602_v54 = vpack.c.bf16 %v578_v43, %v575_v33  ;;  %v1159_v55 = vmul.f32 %v578_v43, %v578_v43  ;;  %v1221_v57 = vadd.f32 %v1220_v46, %v1158_v45  ;;  %v1089_v59 = vadd.f32 %v1088_v44, %v578_v43  ;;  %v689_v45 = vpop.f32.mrf.mxu1 }
 0x114   :  { %v590_v61 = vpop.f32.mrf.mxu0  ;;  %v599_v17 = vadd.f32 %v1853_v48, %v2245_v5  ;;  %1762 = vst [vmem:[%s2607_s5 + $0xb8] sm:$0xff] %v1667_v3   ;;  %v2413_v44 = vadd.f32 %v2245_v5, %v686_v32  ;;  %v1677_v49 = vpack.c.bf16 %v2409_v38, %v2400_v35 }
 0x115   :  { %1749 = vst [vmem:[%s2607_s5 + $0x50] sm:$0xff] %v1602_v54   ;;  %v1090_v4 = vadd.f32 %v1089_v59, %v583_v53  ;;  %v1222_v8 = vadd.f32 %v1221_v57, %v1159_v55  ;;  %v591_v9 = vadd.f32 %v2245_v5, %v590_v61  ;;  %v2420_v59 = vadd.f32 %v2245_v5, %v689_v45  ;;  %v1881_v61 = vpop.f32.mrf.mxu1 }
 0x116   :  { %v1854_v11 = vpop.f32.mrf.mxu0  ;;  %v1164_v37 = vmul.f32 %v599_v17, %v599_v17  ;;  %1764 = vst [vmem:[%s2607_s5 + $0xc8] sm:$0xff] %v1677_v49   ;;  %v2432_v3 = vadd.f32 %v1881_v61, %v2245_v5 }
 0x117   :  { %v602_v18 = vadd.f32 %v1854_v11, %v2245_v5  ;;  %v1223_v7 = vadd.f32 %v1222_v8, %v1160_v0  ;;  %v1091_v19 = vadd.f32 %v1090_v4, %v586_v2  ;;  %v1162_v52 = vmul.f32 %v591_v9, %v591_v9  ;;  %v702_v15 = vpop.f32.mrf.mxu1 }
 0x118   :  { %v593_v20 = vpop.f32.mrf.mxu0  ;;  %v1672_v11 = vpack.c.bf16 %v2420_v59, %v2413_v44 }
 0x119   :  { %v1617_v24 = vpack.c.bf16 %v602_v18, %v599_v17  ;;  %v594_v60 = vadd.f32 %v2245_v5, %v593_v20  ;;  %v1092_v27 = vadd.f32 %v1091_v19, %v591_v9  ;;  %v1224_v28 = vadd.f32 %v1223_v7, %v1161_v58  ;;  %v1882_v19 = vpop.f32.mrf.mxu1 }
 0x11a   :  { %v1857_v29 = vpop.f32.mrf.mxu0  ;;  %v1165_v51 = vmul.f32 %v602_v18, %v602_v18  ;;  %1763 = vst [vmem:[%s2607_s5 + $0xc0] sm:$0xff] %v1672_v11   ;;  %v2441_v20 = vadd.f32 %v2245_v5, %v702_v15  ;;  %v2444_v22 = vadd.f32 %v1882_v19, %v2245_v5  ;;  %v1176_v19 = vmul.f32 %v2304_v47, %v2304_v47 }
 0x11b   :  { %1752 = vst [vmem:[%s2607_s5 + $0x68] sm:$0xff] %v1617_v24   ;;  %v1612_v33 = vpack.c.bf16 %v594_v60, %v591_v9  ;;  %v1163_v34 = vmul.f32 %v594_v60, %v594_v60  ;;  %v1225_v53 = vadd.f32 %v1224_v28, %v1162_v52  ;;  %v1093_v2 = vadd.f32 %v1092_v27, %v594_v60  ;;  %v705_v52 = vpop.f32.mrf.mxu1 }
 0x11c   :  { %v606_v6 = vpop.f32.mrf.mxu0  ;;  %v615_v46 = vadd.f32 %v1857_v29, %v2245_v5  ;;  %v1687_v28 = vpack.c.bf16 %v2444_v22, %v2432_v3  ;;  %v2449_v29 = vadd.f32 %v2245_v5, %v705_v52 }
 0x11d   :  { %1751 = vst [vmem:[%s2607_s5 + $0x60] sm:$0xff] %v1612_v33   ;;  %v1094_v39 = vadd.f32 %v1093_v2, %v599_v17  ;;  %v1226_v41 = vadd.f32 %v1225_v53, %v1163_v34  ;;  %v607_v42 = vadd.f32 %v2245_v5, %v606_v6  ;;  %v1885_v34 = vpop.f32.mrf.mxu1  ;;  %v1170_v2 = vmul.f32 %v2285_v31, %v2285_v31 }
 0x11e   :  { %v1858_v43 = vpop.f32.mrf.mxu0  ;;  %v1168_v24 = vmul.f32 %v615_v46, %v615_v46  ;;  %1766 = vst [vmem:[%s2607_s5 + $0xd8] sm:$0xff] %v1687_v28   ;;  %v1682_v53 = vpack.c.bf16 %v2449_v29, %v2441_v20 }
 0x11f   :  { %v618_v48 = vadd.f32 %v1858_v43, %v2245_v5  ;;  %v1227_v54 = vadd.f32 %v1226_v41, %v1164_v37  ;;  %v1095_v55 = vadd.f32 %v1094_v39, %v602_v18  ;;  %v1166_v8 = vmul.f32 %v607_v42, %v607_v42  ;;  %v718_v37 = vpop.f32.mrf.mxu1 }
 0x120   :  { %v609_v57 = vpop.f32.mrf.mxu0  ;;  %1765 = vst [vmem:[%s2607_s5 + $0xd0] sm:$0xff] %v1682_v53   ;;  %v2463_v39 = vadd.f32 %v1885_v34, %v2245_v5  ;;  %v1178_v34 = vmul.f32 %v2349_v50, %v2349_v50 }
 0x121   :  { %v1627_v63 = vpack.c.bf16 %v618_v48, %v615_v46  ;;  %v610_v0 = vadd.f32 %v2245_v5, %v609_v57  ;;  %v1096_v4 = vadd.f32 %v1095_v55, %v607_v42  ;;  %v1228_v9 = vadd.f32 %v1227_v54, %v1165_v51  ;;  %v1886_v45 = vpop.f32.mrf.mxu1 }
 0x122   :  { %v1169_v10 = vmul.f32 %v618_v48, %v618_v48  ;;  %v1173_v57 = vmul.f32 %v2281_v12, %v2281_v12 }
 0x123   :  { %1754 = vst [vmem:[%s2607_s5 + $0x78] sm:$0xff] %v1627_v63   ;;  %v1622_v17 = vpack.c.bf16 %v610_v0, %v607_v42  ;;  %v1167_v18 = vmul.f32 %v610_v0, %v610_v0  ;;  %v1229_v58 = vadd.f32 %v1228_v9, %v1166_v8  ;;  %v1097_v7 = vadd.f32 %v1096_v4, %v610_v0  ;;  %v721_v54 = vpop.f32.mrf.mxu1 }
 0x124   :  { %v1171_v42 = vmul.f32 %v2292_v16, %v2292_v16  ;;  %v1174_v8 = vmul.f32 %v2317_v62, %v2317_v62 }
 0x125   :  { %1753 = vst [vmem:[%s2607_s5 + $0x70] sm:$0xff] %v1622_v17   ;;  %v1098_v60 = vadd.f32 %v1097_v7, %v615_v46  ;;  %v1230_v27 = vadd.f32 %v1229_v58, %v1167_v18  ;;  %v2469_v46 = vadd.f32 %v2245_v5, %v718_v37  ;;  %v1889_v0 = vpop.f32.mrf.mxu1  ;;  %v1175_v18 = vmul.f32 %v2324_v14, %v2324_v14 }
 0x127   :  { %v1231_v32 = vadd.f32 %v1230_v27, %v1168_v24  ;;  %v1099_v33 = vadd.f32 %v1098_v60, %v618_v48  ;;  %v1172_v48 = vmul.f32 %v2275_v23, %v2275_v23  ;;  %v734_v11 = vpop.f32.mrf.mxu1 }
 0x128   :  { %v2503_v7 = vadd.f32 %v2245_v5, %v734_v11 }
 0x129   :  { %v1100_v6 = vadd.f32 %v1099_v33, %v2285_v31  ;;  %v1232_v36 = vadd.f32 %v1231_v32, %v1169_v10  ;;  %v2472_v31 = vadd.f32 %v1886_v45, %v2245_v5  ;;  %v1890_v58 = vpop.f32.mrf.mxu1  ;;  %v1182_v45 = vmul.f32 %v2381_v13, %v2381_v13 }
 0x12b   :  { %v1101_v41 = vadd.f32 %v1100_v6, %v2292_v16  ;;  %v1233_v43 = vadd.f32 %v1232_v36, %v1170_v2  ;;  %v1697_v55 = vpack.c.bf16 %v2472_v31, %v2463_v39  ;;  %v2480_v16 = vadd.f32 %v2245_v5, %v721_v54  ;;  %v737_v27 = vpop.f32.mrf.mxu1 }
 0x12c   :  { %v2514_v28 = vadd.f32 %v2245_v5, %v737_v27  ;;  %v1179_v2 = vmul.f32 %v2356_v40, %v2356_v40  ;;  %v1180_v6 = vmul.f32 %v2336_v26, %v2336_v26 }
 0x12d   :  { %v1102_v49 = vadd.f32 %v1101_v41, %v2275_v23  ;;  %v1234_v51 = vadd.f32 %v1233_v43, %v1171_v42  ;;  %1768 = vst [vmem:[%s2607_s5 + $0xe8] sm:$0xff] %v1697_v55   ;;  %v1692_v23 = vpack.c.bf16 %v2480_v16, %v2469_v46 }
 0x12f   :  { %v1235_v61 = vadd.f32 %v1234_v51, %v1172_v48  ;;  %v1103_v63 = vadd.f32 %v1102_v49, %v2281_v12  ;;  %1767 = vst [vmem:[%s2607_s5 + $0xe0] sm:$0xff] %v1692_v23   ;;  %v2497_v12 = vadd.f32 %v1889_v0, %v2245_v5  ;;  %v1183_v51 = vmul.f32 %v2388_v21, %v2388_v21 }
 0x131   :  { %v1104_v4 = vadd.f32 %v1103_v63, %v2317_v62  ;;  %v1236_v9 = vadd.f32 %v1235_v61, %v1173_v57  ;;  %v2506_v62 = vadd.f32 %v1890_v58, %v2245_v5  ;;  %v1186_v63 = vmul.f32 %v2413_v44, %v2413_v44 }
 0x133   :  { %v1237_v15 = vadd.f32 %v1236_v9, %v1174_v8  ;;  %v1105_v17 = vadd.f32 %v1104_v4, %v2324_v14  ;;  %v1707_v52 = vpack.c.bf16 %v2506_v62, %v2497_v12  ;;  %v1177_v14 = vmul.f32 %v2313_v56, %v2313_v56 }
 0x134   :  { %v1187_v4 = vmul.f32 %v2420_v59, %v2420_v59 }
 0x135   :  { %v1106_v24 = vadd.f32 %v1105_v17, %v2304_v47  ;;  %v1238_v60 = vadd.f32 %v1237_v15, %v1175_v18  ;;  %1770 = vst [vmem:[%s2607_s5 + $0xf8] sm:$0xff] %v1707_v52   ;;  %v1702_v47 = vpack.c.bf16 %v2514_v28, %v2503_v7  ;;  %v1190_v17 = vmul.f32 %v2441_v20, %v2441_v20 }
 0x137   :  { %v1239_v10 = vadd.f32 %v1238_v60, %v1176_v19  ;;  %v1107_v32 = vadd.f32 %v1106_v24, %v2313_v56  ;;  %1769 = vst [vmem:[%s2607_s5 + $0xf0] sm:$0xff] %v1702_v47   ;;  %v1191_v19 = vmul.f32 %v2449_v29, %v2449_v29  ;;  %v1195_v47 = vmul.f32 %v2480_v16, %v2480_v16 }
 0x139   :  { %v1108_v33 = vadd.f32 %v1107_v32, %v2349_v50  ;;  %v1240_v5 = vadd.f32 %v1239_v10, %v1177_v14  ;;  %v1181_v50 = vmul.f32 %v2345_v30, %v2345_v30  ;;  %v1194_v14 = vmul.f32 %v2469_v46, %v2469_v46 }
 0x13b   :  { %v1241_v53 = vadd.f32 %v1240_v5, %v1178_v34  ;;  %v1109_v56 = vadd.f32 %v1108_v33, %v2356_v40 }
 0x13d   :  { %v1110_v36 = vadd.f32 %v1109_v56, %v2336_v26  ;;  %v1242_v37 = vadd.f32 %v1241_v53, %v1179_v2  ;;  %v1184_v26 = vmul.f32 %v2368_v25, %v2368_v25  ;;  %v1198_v56 = vmul.f32 %v2503_v7, %v2503_v7 }
 0x13f   :  { %v1243_v41 = vadd.f32 %v1242_v37, %v1180_v6  ;;  %v1111_v42 = vadd.f32 %v1110_v36, %v2345_v30  ;;  %v1185_v30 = vmul.f32 %v2377_v1, %v2377_v1  ;;  %v1199_v36 = vmul.f32 %v2514_v28, %v2514_v28 }
 0x141   :  { %v1112_v43 = vadd.f32 %v1111_v42, %v2381_v13  ;;  %v1244_v48 = vadd.f32 %v1243_v41, %v1181_v50 }
 0x143   :  { %v1245_v49 = vadd.f32 %v1244_v48, %v1182_v45  ;;  %v1113_v40 = vadd.f32 %v1112_v43, %v2388_v21 }
 0x145   :  { %v1114_v54 = vadd.f32 %v1113_v40, %v2368_v25  ;;  %v1246_v55 = vadd.f32 %v1245_v49, %v1183_v51  ;;  %v1188_v25 = vmul.f32 %v2400_v35, %v2400_v35 }
 0x147   :  { %v1247_v57 = vadd.f32 %v1246_v55, %v1184_v26  ;;  %v1115_v61 = vadd.f32 %v1114_v54, %v2377_v1  ;;  %v1189_v1 = vmul.f32 %v2409_v38, %v2409_v38 }
 0x149   :  { %v1116_v13 = vadd.f32 %v1115_v61, %v2413_v44  ;;  %v1248_v0 = vadd.f32 %v1247_v57, %v1185_v30 }
 0x14b   :  { %v1249_v23 = vadd.f32 %v1248_v0, %v1186_v63  ;;  %v1117_v21 = vadd.f32 %v1116_v13, %v2420_v59 }
 0x14d   :  { %v1118_v8 = vadd.f32 %v1117_v21, %v2400_v35  ;;  %v1250_v9 = vadd.f32 %v1249_v23, %v1187_v4  ;;  %v1192_v35 = vmul.f32 %v2432_v3, %v2432_v3 }
 0x14f   :  { %v1251_v11 = vadd.f32 %v1250_v9, %v1188_v25  ;;  %v1119_v15 = vadd.f32 %v1118_v8, %v2409_v38  ;;  %v1193_v38 = vmul.f32 %v2444_v22, %v2444_v22 }
 0x151   :  { %v1120_v44 = vadd.f32 %v1119_v15, %v2441_v20  ;;  %v1252_v18 = vadd.f32 %v1251_v11, %v1189_v1 }
 0x153   :  { %v1253_v58 = vadd.f32 %v1252_v18, %v1190_v17  ;;  %v1121_v59 = vadd.f32 %v1120_v44, %v2449_v29 }
 0x155   :  { %v1122_v24 = vadd.f32 %v1121_v59, %v2432_v3  ;;  %v1254_v60 = vadd.f32 %v1253_v58, %v1191_v19  ;;  %v1196_v3 = vmul.f32 %v2463_v39, %v2463_v39 }
 0x157   :  { %v1255_v27 = vadd.f32 %v1254_v60, %v1192_v35  ;;  %v1123_v52 = vadd.f32 %v1122_v24, %v2444_v22  ;;  %v1197_v22 = vmul.f32 %v2472_v31, %v2472_v31 }
 0x159   :  { %v1124_v20 = vadd.f32 %v1123_v52, %v2469_v46  ;;  %v1256_v10 = vadd.f32 %v1255_v27, %v1193_v38 }
 0x15b   :  { %v1257_v32 = vadd.f32 %v1256_v10, %v1194_v14  ;;  %v1125_v29 = vadd.f32 %v1124_v20, %v2480_v16 }
 0x15d   :  { %v1126_v33 = vadd.f32 %v1125_v29, %v2463_v39  ;;  %v1258_v34 = vadd.f32 %v1257_v32, %v1195_v47  ;;  %v1200_v39 = vmul.f32 %v2497_v12, %v2497_v12 }
 0x15f   :  { %v1259_v5 = vadd.f32 %v1258_v34, %v1196_v3  ;;  %v1127_v53 = vadd.f32 %v1126_v33, %v2472_v31  ;;  %v1201_v31 = vmul.f32 %v2506_v62, %v2506_v62 }
 0x161   :  { %v1128_v46 = vadd.f32 %v1127_v53, %v2503_v7  ;;  %v1260_v2 = vadd.f32 %v1259_v5, %v1197_v22 }
 0x163   :  { %v1261_v6 = vadd.f32 %v1260_v2, %v1198_v56  ;;  %v1129_v16 = vadd.f32 %v1128_v46, %v2514_v28 }
 0x165   :  { %v1130_v37 = vadd.f32 %v1129_v16, %v2497_v12  ;;  %v1262_v50 = vadd.f32 %v1261_v6, %v1199_v36 }
 0x167   :  { %v1131_v41 = vadd.f32 %v1130_v37, %v2506_v62  ;;  %v1263_v42 = vadd.f32 %v1262_v50, %v1200_v39 }
 0x169   :  { %v1132_v7 = vrot.slane %v1131_v41, 4  ;;  %v1264_v43 = vadd.f32 %v1263_v42, %v1201_v31 }
 0x16b   :  { %v1133_v45 = vadd.f32 %v1132_v7, %v1131_v41  ;;  %v1265_v48 = vrot.slane %v1264_v43, 4 }
 0x16d   :  { %v1134_v49 = vrot.slane %v1133_v45, 2  ;;  %v1266_v40 = vadd.f32 %v1265_v48, %v1264_v43 }
 0x16f   :  { %v1135_v51 = vadd.f32 %v1134_v49, %v1133_v45  ;;  %v1267_v28 = vrot.slane %v1266_v40, 2 }
 0x171   :  { %v1136_v26 = vrot.slane %v1135_v51, 1  ;;  %v1268_v54 = vadd.f32 %v1267_v28, %v1266_v40 }
 0x173   :  { %v1269_v55 = vrot.slane %v1268_v54, 1  ;;  %v1137_v12 = vadd.f32 %v1136_v26, %v1135_v51 }
 0x175   :  { %v1270_v30 = vadd.f32 %v1269_v55, %v1268_v54 }
 0x177   :  { %v1272_v57 = vsel %vm1271_vm0, %v1137_v12, %v1270_v30 }
 0x178   :  { %1273 = vst [vmem:[%s2608_s6] sm:$0x3] %v1272_v57 }

// kernel: bottleneck_block.7
= control target key start
LH: loop header
LB: loop body
LE: loop exit
PB: predicated region body
PF: predicated region fallthrough
CT: control target
= control target key end

     0   :  { %s1351_s0 = inlined_call_operand.vmem [shape: bf16[512,128], index: 0, kind: input, shape index: {}]   ;;  %s1352_s2 = inlined_call_operand.vmem [shape: f32[1,128], index: 2, kind: input, shape index: {}]   ;;  %s1353_s3 = inlined_call_operand.vmem [shape: f32[1,128], index: 3, kind: input, shape index: {}]   ;;  %s1354_s1 = inlined_call_operand.vmem [shape: f32[512,128], index: 1, kind: input, shape index: {}]   ;;  %s1355_s4 = inlined_call_operand.vmem [shape: f32[512,128], index: 4, kind: output, shape index: {}]  }
   0x1   :  { %v550_v0 = vld [vmem:[%s1351_s0] sm:$0xff]   ;;  %v677_v4 = vld [vmem:[%s1351_s0 + $0x8] sm:$0xff]   ;;  %v678_v8 = vld [vmem:[%s1351_s0 + $0x10] sm:$0xff]  }
   0x2   :  { %v739_v1 = vld [vmem:[%s1352_s2] ss:$0 sm:$0xff]  ;;  %v551_v2 = vunpack.c.l.bf16 %v550_v0  ;;  %v552_v3 = vunpack.c.h.bf16 %v550_v0  ;;  %v555_v6 = vunpack.c.l.bf16 %v677_v4  ;;  %v556_v7 = vunpack.c.h.bf16 %v677_v4  ;;  %v679_v13 = vld [vmem:[%s1351_s0 + $0x18] sm:$0xff]   ;;  %v288_v15 = vld [vmem:[%s1354_s1 + $0x8] sm:$0xff] }
   0x3   :  { %v747_v5 = vld [vmem:[%s1353_s3] ss:$0 sm:$0xff]  ;;  %v559_v11 = vunpack.c.l.bf16 %v678_v8  ;;  %v560_v12 = vunpack.c.h.bf16 %v678_v8  ;;  %v563_v18 = vunpack.c.l.bf16 %v679_v13  ;;  %v564_v19 = vunpack.c.h.bf16 %v679_v13  ;;  %v289_v22 = vld [vmem:[%s1354_s1 + $0x10] sm:$0xff]  ;;  %v290_v23 = vld [vmem:[%s1354_s1 + $0x18] sm:$0xff] }
   0x4   :  { %v152_v9 = vmul.f32 %v551_v2, %v739_v1  ;;  %v153_v10 = vmul.f32 %v552_v3, %v739_v1  ;;  %v287_v14 = vld [vmem:[%s1354_s1] sm:$0xff]  ;;  %v154_v16 = vmul.f32 %v555_v6, %v739_v1  ;;  %v155_v17 = vmul.f32 %v556_v7, %v739_v1  ;;  %v292_v29 = vld [vmem:[%s1354_s1 + $0x28] sm:$0xff]  ;;  %v293_v36 = vld [vmem:[%s1354_s1 + $0x30] sm:$0xff] }
   0x5   :  { %v156_v24 = vmul.f32 %v559_v11, %v739_v1  ;;  %v157_v25 = vmul.f32 %v560_v12, %v739_v1  ;;  %v291_v28 = vld [vmem:[%s1354_s1 + $0x20] sm:$0xff]  ;;  %v158_v30 = vmul.f32 %v563_v18, %v739_v1  ;;  %v159_v31 = vmul.f32 %v564_v19, %v739_v1  ;;  %v294_v37 = vld [vmem:[%s1354_s1 + $0x38] sm:$0xff]  ;;  %v681_v47 = vld [vmem:[%s1351_s0 + $0x28] sm:$0xff]  }
   0x6   :  { %v223_v20 = vadd.f32 %v747_v5, %v152_v9  ;;  %v224_v21 = vadd.f32 %v747_v5, %v153_v10  ;;  %v225_v26 = vadd.f32 %v747_v5, %v154_v16  ;;  %v226_v27 = vadd.f32 %v747_v5, %v155_v17  ;;  %v680_v42 = vld [vmem:[%s1351_s0 + $0x20] sm:$0xff]   ;;  %v682_v52 = vld [vmem:[%s1351_s0 + $0x30] sm:$0xff]   ;;  %v683_v57 = vld [vmem:[%s1351_s0 + $0x38] sm:$0xff]  }
   0x7   :  { %v227_v34 = vadd.f32 %v747_v5, %v156_v24  ;;  %v228_v35 = vadd.f32 %v747_v5, %v157_v25  ;;  %v229_v40 = vadd.f32 %v747_v5, %v158_v30  ;;  %v230_v41 = vadd.f32 %v747_v5, %v159_v31  ;;  %v295_v3 = vld [vmem:[%s1354_s1 + $0x40] sm:$0xff]  ;;  %v296_v4 = vld [vmem:[%s1354_s1 + $0x48] sm:$0xff]  ;;  %v297_v12 = vld [vmem:[%s1354_s1 + $0x50] sm:$0xff] }
   0x8   :  { %v351_v32 = vadd.f32 %v287_v14, %v223_v20  ;;  %v352_v33 = vadd.f32 %v288_v15, %v224_v21  ;;  %v353_v38 = vadd.f32 %v289_v22, %v225_v26  ;;  %v354_v39 = vadd.f32 %v290_v23, %v226_v27  ;;  %v298_v13 = vld [vmem:[%s1354_s1 + $0x58] sm:$0xff]  ;;  %v299_v18 = vld [vmem:[%s1354_s1 + $0x60] sm:$0xff]  ;;  %v300_v19 = vld [vmem:[%s1354_s1 + $0x68] sm:$0xff] }
   0x9   :  { %v355_v45 = vadd.f32 %v291_v28, %v227_v34  ;;  %v356_v46 = vadd.f32 %v292_v29, %v228_v35  ;;  %v357_v50 = vadd.f32 %v293_v36, %v229_v40  ;;  %v358_v51 = vadd.f32 %v294_v37, %v230_v41  ;;  %v301_v26 = vld [vmem:[%s1354_s1 + $0x70] sm:$0xff]  ;;  %v302_v27 = vld [vmem:[%s1354_s1 + $0x78] sm:$0xff]  ;;  %v685_v37 = vld [vmem:[%s1351_s0 + $0x48] sm:$0xff]  }
   0xa   :  { %v415_v43 = vmax.f32 %v351_v32, 0.0  ;;  %v416_v44 = vmax.f32 %v352_v33, 0.0  ;;  %v417_v48 = vmax.f32 %v353_v38, 0.0  ;;  %v418_v49 = vmax.f32 %v354_v39, 0.0  ;;  %v684_v32 = vld [vmem:[%s1351_s0 + $0x40] sm:$0xff]  }
   0xb   :  { %v419_v53 = vmax.f32 %v355_v45, 0.0  ;;  %v420_v54 = vmax.f32 %v356_v46, 0.0  ;;  %v567_v55 = vunpack.c.l.bf16 %v680_v42  ;;  %v568_v56 = vunpack.c.h.bf16 %v680_v42  ;;  %v686_v42 = vld [vmem:[%s1351_s0 + $0x50] sm:$0xff]  }
   0xc   :  { %479 = vst [vmem:[%s1355_s4] sm:$0xff] %v415_v43  ;;  %480 = vst [vmem:[%s1355_s4 + $0x8] sm:$0xff] %v416_v44  ;;  %v421_v58 = vmax.f32 %v357_v50, 0.0  ;;  %v422_v59 = vmax.f32 %v358_v51, 0.0  ;;  %v571_v60 = vunpack.c.l.bf16 %v681_v47  ;;  %v572_v61 = vunpack.c.h.bf16 %v681_v47  ;;  %v687_v47 = vld [vmem:[%s1351_s0 + $0x58] sm:$0xff]  }
   0xd   :  { %481 = vst [vmem:[%s1355_s4 + $0x10] sm:$0xff] %v417_v48  ;;  %482 = vst [vmem:[%s1355_s4 + $0x18] sm:$0xff] %v418_v49  ;;  %v160_v62 = vmul.f32 %v567_v55, %v739_v1  ;;  %v161_v63 = vmul.f32 %v568_v56, %v739_v1  ;;  %v575_v0 = vunpack.c.l.bf16 %v682_v52  ;;  %v576_v2 = vunpack.c.h.bf16 %v682_v52  ;;  %v303_v56 = vld [vmem:[%s1354_s1 + $0x80] sm:$0xff] }
   0xe   :  { %483 = vst [vmem:[%s1355_s4 + $0x20] sm:$0xff] %v419_v53  ;;  %484 = vst [vmem:[%s1355_s4 + $0x28] sm:$0xff] %v420_v54  ;;  %v162_v6 = vmul.f32 %v571_v60, %v739_v1  ;;  %v163_v7 = vmul.f32 %v572_v61, %v739_v1  ;;  %v579_v8 = vunpack.c.l.bf16 %v683_v57  ;;  %v580_v9 = vunpack.c.h.bf16 %v683_v57  ;;  %v304_v57 = vld [vmem:[%s1354_s1 + $0x88] sm:$0xff] }
   0xf   :  { %485 = vst [vmem:[%s1355_s4 + $0x30] sm:$0xff] %v421_v58  ;;  %486 = vst [vmem:[%s1355_s4 + $0x38] sm:$0xff] %v422_v59  ;;  %v231_v10 = vadd.f32 %v747_v5, %v160_v62  ;;  %v232_v11 = vadd.f32 %v747_v5, %v161_v63  ;;  %v164_v14 = vmul.f32 %v575_v0, %v739_v1  ;;  %v583_v45 = vunpack.c.l.bf16 %v684_v32  ;;  %v305_v0 = vld [vmem:[%s1354_s1 + $0x90] sm:$0xff] }
  0x10   :  { %v165_v15 = vmul.f32 %v576_v2, %v739_v1  ;;  %v233_v16 = vadd.f32 %v747_v5, %v162_v6  ;;  %v234_v17 = vadd.f32 %v747_v5, %v163_v7  ;;  %v166_v20 = vmul.f32 %v579_v8, %v739_v1  ;;  %v306_v2 = vld [vmem:[%s1354_s1 + $0x98] sm:$0xff]  ;;  %v307_v8 = vld [vmem:[%s1354_s1 + $0xa0] sm:$0xff] }
  0x11   :  { %v167_v21 = vmul.f32 %v580_v9, %v739_v1  ;;  %v359_v22 = vadd.f32 %v295_v3, %v231_v10  ;;  %v360_v23 = vadd.f32 %v296_v4, %v232_v11  ;;  %v235_v24 = vadd.f32 %v747_v5, %v164_v14  ;;  %v308_v9 = vld [vmem:[%s1354_s1 + $0xa8] sm:$0xff] }
  0x12   :  { %v236_v25 = vadd.f32 %v747_v5, %v165_v15  ;;  %v361_v28 = vadd.f32 %v297_v12, %v233_v16  ;;  %v362_v29 = vadd.f32 %v298_v13, %v234_v17  ;;  %v237_v30 = vadd.f32 %v747_v5, %v166_v20  ;;  %v309_v16 = vld [vmem:[%s1354_s1 + $0xb0] sm:$0xff]  ;;  %v310_v17 = vld [vmem:[%s1354_s1 + $0xb8] sm:$0xff] }
  0x13   :  { %v238_v31 = vadd.f32 %v747_v5, %v167_v21  ;;  %v423_v33 = vmax.f32 %v359_v22, 0.0  ;;  %v424_v34 = vmax.f32 %v360_v23, 0.0  ;;  %v363_v35 = vadd.f32 %v299_v18, %v235_v24  ;;  %v688_v22 = vld [vmem:[%s1351_s0 + $0x60] sm:$0xff]  }
  0x14   :  { %v364_v36 = vadd.f32 %v300_v19, %v236_v25  ;;  %v425_v38 = vmax.f32 %v361_v28, 0.0  ;;  %v426_v39 = vmax.f32 %v362_v29, 0.0  ;;  %v365_v40 = vadd.f32 %v301_v26, %v237_v30 }
  0x15   :  { %v366_v41 = vadd.f32 %v302_v27, %v238_v31  ;;  %487 = vst [vmem:[%s1355_s4 + $0x40] sm:$0xff] %v423_v33  ;;  %488 = vst [vmem:[%s1355_s4 + $0x48] sm:$0xff] %v424_v34  ;;  %v427_v43 = vmax.f32 %v363_v35, 0.0  ;;  %v584_v46 = vunpack.c.h.bf16 %v684_v32  ;;  %v587_v50 = vunpack.c.l.bf16 %v685_v37  ;;  %v689_v27 = vld [vmem:[%s1351_s0 + $0x68] sm:$0xff]   ;;  %v690_v32 = vld [vmem:[%s1351_s0 + $0x70] sm:$0xff]  }
  0x16   :  { %v428_v44 = vmax.f32 %v364_v36, 0.0  ;;  %489 = vst [vmem:[%s1355_s4 + $0x50] sm:$0xff] %v425_v38  ;;  %490 = vst [vmem:[%s1355_s4 + $0x58] sm:$0xff] %v426_v39  ;;  %v429_v48 = vmax.f32 %v365_v40, 0.0  ;;  %v588_v51 = vunpack.c.h.bf16 %v685_v37  ;;  %v168_v52 = vmul.f32 %v583_v45, %v739_v1  ;;  %v691_v37 = vld [vmem:[%s1351_s0 + $0x78] sm:$0xff]  }
  0x17   :  { %v430_v49 = vmax.f32 %v366_v41, 0.0  ;;  %491 = vst [vmem:[%s1355_s4 + $0x60] sm:$0xff] %v427_v43  ;;  %v169_v53 = vmul.f32 %v584_v46, %v739_v1  ;;  %v591_v54 = vunpack.c.l.bf16 %v686_v42  ;;  %v592_v55 = vunpack.c.h.bf16 %v686_v42  ;;  %v311_v46 = vld [vmem:[%s1354_s1 + $0xc0] sm:$0xff] }
  0x18   :  { %492 = vst [vmem:[%s1355_s4 + $0x68] sm:$0xff] %v428_v44  ;;  %493 = vst [vmem:[%s1355_s4 + $0x70] sm:$0xff] %v429_v48  ;;  %v170_v58 = vmul.f32 %v587_v50, %v739_v1  ;;  %v171_v59 = vmul.f32 %v588_v51, %v739_v1  ;;  %v595_v60 = vunpack.c.l.bf16 %v687_v47  ;;  %v596_v61 = vunpack.c.h.bf16 %v687_v47  ;;  %v312_v47 = vld [vmem:[%s1354_s1 + $0xc8] sm:$0xff] }
  0x19   :  { %494 = vst [vmem:[%s1355_s4 + $0x78] sm:$0xff] %v430_v49  ;;  %v239_v62 = vadd.f32 %v747_v5, %v168_v52  ;;  %v240_v63 = vadd.f32 %v747_v5, %v169_v53  ;;  %v172_v3 = vmul.f32 %v591_v54, %v739_v1  ;;  %v173_v4 = vmul.f32 %v592_v55, %v739_v1  ;;  %v313_v54 = vld [vmem:[%s1354_s1 + $0xd0] sm:$0xff]  ;;  %v314_v55 = vld [vmem:[%s1354_s1 + $0xd8] sm:$0xff] }
  0x1a   :  { %v241_v6 = vadd.f32 %v747_v5, %v170_v58  ;;  %v242_v7 = vadd.f32 %v747_v5, %v171_v59  ;;  %v174_v10 = vmul.f32 %v595_v60, %v739_v1  ;;  %v175_v11 = vmul.f32 %v596_v61, %v739_v1  ;;  %v315_v60 = vld [vmem:[%s1354_s1 + $0xe0] sm:$0xff]  ;;  %v316_v61 = vld [vmem:[%s1354_s1 + $0xe8] sm:$0xff] }
  0x1b   :  { %v367_v12 = vadd.f32 %v303_v56, %v239_v62  ;;  %v368_v13 = vadd.f32 %v304_v57, %v240_v63  ;;  %v243_v14 = vadd.f32 %v747_v5, %v172_v3  ;;  %v244_v15 = vadd.f32 %v747_v5, %v173_v4 }
  0x1c   :  { %v369_v18 = vadd.f32 %v305_v0, %v241_v6  ;;  %v370_v19 = vadd.f32 %v306_v2, %v242_v7  ;;  %v245_v20 = vadd.f32 %v747_v5, %v174_v10  ;;  %v246_v21 = vadd.f32 %v747_v5, %v175_v11  ;;  %v317_v6 = vld [vmem:[%s1354_s1 + $0xf0] sm:$0xff]  ;;  %v318_v7 = vld [vmem:[%s1354_s1 + $0xf8] sm:$0xff] }
  0x1d   :  { %v431_v23 = vmax.f32 %v367_v12, 0.0  ;;  %v432_v24 = vmax.f32 %v368_v13, 0.0  ;;  %v371_v25 = vadd.f32 %v307_v8, %v243_v14  ;;  %v372_v26 = vadd.f32 %v308_v9, %v244_v15  ;;  %v692_v12 = vld [vmem:[%s1351_s0 + $0x80] sm:$0xff]  }
  0x1e   :  { %v433_v28 = vmax.f32 %v369_v18, 0.0  ;;  %v434_v29 = vmax.f32 %v370_v19, 0.0  ;;  %v373_v30 = vadd.f32 %v309_v16, %v245_v20  ;;  %v374_v31 = vadd.f32 %v310_v17, %v246_v21  ;;  %v693_v17 = vld [vmem:[%s1351_s0 + $0x88] sm:$0xff]  }
  0x1f   :  { %495 = vst [vmem:[%s1355_s4 + $0x80] sm:$0xff] %v431_v23  ;;  %496 = vst [vmem:[%s1355_s4 + $0x88] sm:$0xff] %v432_v24  ;;  %v435_v33 = vmax.f32 %v371_v25, 0.0  ;;  %v436_v34 = vmax.f32 %v372_v26, 0.0  ;;  %v599_v35 = vunpack.c.l.bf16 %v688_v22  ;;  %v600_v36 = vunpack.c.h.bf16 %v688_v22  ;;  %v694_v22 = vld [vmem:[%s1351_s0 + $0x90] sm:$0xff]  }
  0x20   :  { %497 = vst [vmem:[%s1355_s4 + $0x90] sm:$0xff] %v433_v28  ;;  %498 = vst [vmem:[%s1355_s4 + $0x98] sm:$0xff] %v434_v29  ;;  %v437_v38 = vmax.f32 %v373_v30, 0.0  ;;  %v438_v39 = vmax.f32 %v374_v31, 0.0  ;;  %v603_v40 = vunpack.c.l.bf16 %v689_v27  ;;  %v604_v41 = vunpack.c.h.bf16 %v689_v27  ;;  %v695_v27 = vld [vmem:[%s1351_s0 + $0x98] sm:$0xff]  }
  0x21   :  { %499 = vst [vmem:[%s1355_s4 + $0xa0] sm:$0xff] %v435_v33  ;;  %500 = vst [vmem:[%s1355_s4 + $0xa8] sm:$0xff] %v436_v34  ;;  %v176_v42 = vmul.f32 %v599_v35, %v739_v1  ;;  %v177_v43 = vmul.f32 %v600_v36, %v739_v1  ;;  %v607_v44 = vunpack.c.l.bf16 %v690_v32  ;;  %v608_v45 = vunpack.c.h.bf16 %v690_v32  ;;  %v319_v36 = vld [vmem:[%s1354_s1 + $0x100] sm:$0xff] }
  0x22   :  { %501 = vst [vmem:[%s1355_s4 + $0xb0] sm:$0xff] %v437_v38  ;;  %502 = vst [vmem:[%s1355_s4 + $0xb8] sm:$0xff] %v438_v39  ;;  %v178_v48 = vmul.f32 %v603_v40, %v739_v1  ;;  %v179_v49 = vmul.f32 %v604_v41, %v739_v1  ;;  %v611_v50 = vunpack.c.l.bf16 %v691_v37  ;;  %v612_v51 = vunpack.c.h.bf16 %v691_v37  ;;  %v320_v37 = vld [vmem:[%s1354_s1 + $0x108] sm:$0xff] }
  0x23   :  { %v247_v52 = vadd.f32 %v747_v5, %v176_v42  ;;  %v248_v53 = vadd.f32 %v747_v5, %v177_v43  ;;  %v180_v56 = vmul.f32 %v607_v44, %v739_v1  ;;  %v181_v57 = vmul.f32 %v608_v45, %v739_v1  ;;  %v321_v44 = vld [vmem:[%s1354_s1 + $0x110] sm:$0xff]  ;;  %v322_v45 = vld [vmem:[%s1354_s1 + $0x118] sm:$0xff] }
  0x24   :  { %v249_v58 = vadd.f32 %v747_v5, %v178_v48  ;;  %v250_v59 = vadd.f32 %v747_v5, %v179_v49  ;;  %v182_v62 = vmul.f32 %v611_v50, %v739_v1  ;;  %v183_v63 = vmul.f32 %v612_v51, %v739_v1  ;;  %v323_v50 = vld [vmem:[%s1354_s1 + $0x120] sm:$0xff]  ;;  %v324_v51 = vld [vmem:[%s1354_s1 + $0x128] sm:$0xff] }
  0x25   :  { %v375_v0 = vadd.f32 %v311_v46, %v247_v52  ;;  %v376_v2 = vadd.f32 %v312_v47, %v248_v53  ;;  %v251_v3 = vadd.f32 %v747_v5, %v180_v56  ;;  %v252_v4 = vadd.f32 %v747_v5, %v181_v57 }
  0x26   :  { %v377_v8 = vadd.f32 %v313_v54, %v249_v58  ;;  %v378_v9 = vadd.f32 %v314_v55, %v250_v59  ;;  %v253_v10 = vadd.f32 %v747_v5, %v182_v62  ;;  %v254_v11 = vadd.f32 %v747_v5, %v183_v63  ;;  %v325_v58 = vld [vmem:[%s1354_s1 + $0x130] sm:$0xff]  ;;  %v326_v59 = vld [vmem:[%s1354_s1 + $0x138] sm:$0xff] }
  0x27   :  { %v439_v13 = vmax.f32 %v375_v0, 0.0  ;;  %v440_v14 = vmax.f32 %v376_v2, 0.0  ;;  %v379_v15 = vadd.f32 %v315_v60, %v251_v3  ;;  %v380_v16 = vadd.f32 %v316_v61, %v252_v4  ;;  %v696_v0 = vld [vmem:[%s1351_s0 + $0xa0] sm:$0xff]  }
  0x28   :  { %v441_v18 = vmax.f32 %v377_v8, 0.0  ;;  %v442_v19 = vmax.f32 %v378_v9, 0.0  ;;  %v381_v20 = vadd.f32 %v317_v6, %v253_v10  ;;  %v382_v21 = vadd.f32 %v318_v7, %v254_v11  ;;  %v697_v7 = vld [vmem:[%s1351_s0 + $0xa8] sm:$0xff]  }
  0x29   :  { %503 = vst [vmem:[%s1355_s4 + $0xc0] sm:$0xff] %v439_v13  ;;  %504 = vst [vmem:[%s1355_s4 + $0xc8] sm:$0xff] %v440_v14  ;;  %v443_v23 = vmax.f32 %v379_v15, 0.0  ;;  %v444_v24 = vmax.f32 %v380_v16, 0.0  ;;  %v615_v25 = vunpack.c.l.bf16 %v692_v12  ;;  %v616_v26 = vunpack.c.h.bf16 %v692_v12  ;;  %v698_v12 = vld [vmem:[%s1351_s0 + $0xb0] sm:$0xff]  }
  0x2a   :  { %505 = vst [vmem:[%s1355_s4 + $0xd0] sm:$0xff] %v441_v18  ;;  %506 = vst [vmem:[%s1355_s4 + $0xd8] sm:$0xff] %v442_v19  ;;  %v445_v28 = vmax.f32 %v381_v20, 0.0  ;;  %v446_v29 = vmax.f32 %v382_v21, 0.0  ;;  %v619_v30 = vunpack.c.l.bf16 %v693_v17  ;;  %v620_v31 = vunpack.c.h.bf16 %v693_v17  ;;  %v699_v17 = vld [vmem:[%s1351_s0 + $0xb8] sm:$0xff]  }
  0x2b   :  { %507 = vst [vmem:[%s1355_s4 + $0xe0] sm:$0xff] %v443_v23  ;;  %508 = vst [vmem:[%s1355_s4 + $0xe8] sm:$0xff] %v444_v24  ;;  %v184_v32 = vmul.f32 %v615_v25, %v739_v1  ;;  %v185_v33 = vmul.f32 %v616_v26, %v739_v1  ;;  %v623_v34 = vunpack.c.l.bf16 %v694_v22  ;;  %v624_v35 = vunpack.c.h.bf16 %v694_v22  ;;  %v327_v26 = vld [vmem:[%s1354_s1 + $0x140] sm:$0xff] }
  0x2c   :  { %509 = vst [vmem:[%s1355_s4 + $0xf0] sm:$0xff] %v445_v28  ;;  %510 = vst [vmem:[%s1355_s4 + $0xf8] sm:$0xff] %v446_v29  ;;  %v186_v38 = vmul.f32 %v619_v30, %v739_v1  ;;  %v187_v39 = vmul.f32 %v620_v31, %v739_v1  ;;  %v627_v40 = vunpack.c.l.bf16 %v695_v27  ;;  %v628_v41 = vunpack.c.h.bf16 %v695_v27  ;;  %v328_v27 = vld [vmem:[%s1354_s1 + $0x148] sm:$0xff] }
  0x2d   :  { %v255_v42 = vadd.f32 %v747_v5, %v184_v32  ;;  %v256_v43 = vadd.f32 %v747_v5, %v185_v33  ;;  %v188_v46 = vmul.f32 %v623_v34, %v739_v1  ;;  %v189_v47 = vmul.f32 %v624_v35, %v739_v1  ;;  %v329_v34 = vld [vmem:[%s1354_s1 + $0x150] sm:$0xff]  ;;  %v330_v35 = vld [vmem:[%s1354_s1 + $0x158] sm:$0xff] }
  0x2e   :  { %v257_v48 = vadd.f32 %v747_v5, %v186_v38  ;;  %v258_v49 = vadd.f32 %v747_v5, %v187_v39  ;;  %v190_v52 = vmul.f32 %v627_v40, %v739_v1  ;;  %v191_v53 = vmul.f32 %v628_v41, %v739_v1  ;;  %v331_v40 = vld [vmem:[%s1354_s1 + $0x160] sm:$0xff]  ;;  %v332_v41 = vld [vmem:[%s1354_s1 + $0x168] sm:$0xff] }
  0x2f   :  { %v383_v54 = vadd.f32 %v319_v36, %v255_v42  ;;  %v384_v55 = vadd.f32 %v320_v37, %v256_v43  ;;  %v259_v56 = vadd.f32 %v747_v5, %v188_v46  ;;  %v260_v57 = vadd.f32 %v747_v5, %v189_v47 }
  0x30   :  { %v385_v60 = vadd.f32 %v321_v44, %v257_v48  ;;  %v386_v61 = vadd.f32 %v322_v45, %v258_v49  ;;  %v261_v62 = vadd.f32 %v747_v5, %v190_v52  ;;  %v262_v63 = vadd.f32 %v747_v5, %v191_v53  ;;  %v333_v48 = vld [vmem:[%s1354_s1 + $0x170] sm:$0xff]  ;;  %v334_v49 = vld [vmem:[%s1354_s1 + $0x178] sm:$0xff] }
  0x31   :  { %v447_v2 = vmax.f32 %v383_v54, 0.0  ;;  %v448_v3 = vmax.f32 %v384_v55, 0.0  ;;  %v387_v4 = vadd.f32 %v323_v50, %v259_v56  ;;  %v388_v6 = vadd.f32 %v324_v51, %v260_v57  ;;  %v700_v54 = vld [vmem:[%s1351_s0 + $0xc0] sm:$0xff]  }
  0x32   :  { %v449_v8 = vmax.f32 %v385_v60, 0.0  ;;  %v450_v9 = vmax.f32 %v386_v61, 0.0  ;;  %v389_v10 = vadd.f32 %v325_v58, %v261_v62  ;;  %v390_v11 = vadd.f32 %v326_v59, %v262_v63  ;;  %v701_v59 = vld [vmem:[%s1351_s0 + $0xc8] sm:$0xff]  }
  0x33   :  { %511 = vst [vmem:[%s1355_s4 + $0x100] sm:$0xff] %v447_v2  ;;  %512 = vst [vmem:[%s1355_s4 + $0x108] sm:$0xff] %v448_v3  ;;  %v451_v13 = vmax.f32 %v387_v4, 0.0  ;;  %v452_v14 = vmax.f32 %v388_v6, 0.0  ;;  %v631_v15 = vunpack.c.l.bf16 %v696_v0  ;;  %v632_v16 = vunpack.c.h.bf16 %v696_v0  ;;  %v702_v0 = vld [vmem:[%s1351_s0 + $0xd0] sm:$0xff]  }
  0x34   :  { %513 = vst [vmem:[%s1355_s4 + $0x110] sm:$0xff] %v449_v8  ;;  %514 = vst [vmem:[%s1355_s4 + $0x118] sm:$0xff] %v450_v9  ;;  %v453_v18 = vmax.f32 %v389_v10, 0.0  ;;  %v454_v19 = vmax.f32 %v390_v11, 0.0  ;;  %v635_v20 = vunpack.c.l.bf16 %v697_v7  ;;  %v636_v21 = vunpack.c.h.bf16 %v697_v7  ;;  %v703_v7 = vld [vmem:[%s1351_s0 + $0xd8] sm:$0xff]  }
  0x35   :  { %515 = vst [vmem:[%s1355_s4 + $0x120] sm:$0xff] %v451_v13  ;;  %516 = vst [vmem:[%s1355_s4 + $0x128] sm:$0xff] %v452_v14  ;;  %v192_v22 = vmul.f32 %v631_v15, %v739_v1  ;;  %v193_v23 = vmul.f32 %v632_v16, %v739_v1  ;;  %v639_v24 = vunpack.c.l.bf16 %v698_v12  ;;  %v640_v25 = vunpack.c.h.bf16 %v698_v12  ;;  %v335_v16 = vld [vmem:[%s1354_s1 + $0x180] sm:$0xff] }
  0x36   :  { %517 = vst [vmem:[%s1355_s4 + $0x130] sm:$0xff] %v453_v18  ;;  %518 = vst [vmem:[%s1355_s4 + $0x138] sm:$0xff] %v454_v19  ;;  %v194_v28 = vmul.f32 %v635_v20, %v739_v1  ;;  %v195_v29 = vmul.f32 %v636_v21, %v739_v1  ;;  %v643_v30 = vunpack.c.l.bf16 %v699_v17  ;;  %v644_v31 = vunpack.c.h.bf16 %v699_v17  ;;  %v336_v17 = vld [vmem:[%s1354_s1 + $0x188] sm:$0xff] }
  0x37   :  { %v263_v32 = vadd.f32 %v747_v5, %v192_v22  ;;  %v264_v33 = vadd.f32 %v747_v5, %v193_v23  ;;  %v196_v36 = vmul.f32 %v639_v24, %v739_v1  ;;  %v197_v37 = vmul.f32 %v640_v25, %v739_v1  ;;  %v337_v24 = vld [vmem:[%s1354_s1 + $0x190] sm:$0xff]  ;;  %v338_v25 = vld [vmem:[%s1354_s1 + $0x198] sm:$0xff] }
  0x38   :  { %v265_v38 = vadd.f32 %v747_v5, %v194_v28  ;;  %v266_v39 = vadd.f32 %v747_v5, %v195_v29  ;;  %v198_v42 = vmul.f32 %v643_v30, %v739_v1  ;;  %v199_v43 = vmul.f32 %v644_v31, %v739_v1  ;;  %v339_v30 = vld [vmem:[%s1354_s1 + $0x1a0] sm:$0xff]  ;;  %v340_v31 = vld [vmem:[%s1354_s1 + $0x1a8] sm:$0xff] }
  0x39   :  { %v391_v44 = vadd.f32 %v327_v26, %v263_v32  ;;  %v392_v45 = vadd.f32 %v328_v27, %v264_v33  ;;  %v267_v46 = vadd.f32 %v747_v5, %v196_v36  ;;  %v268_v47 = vadd.f32 %v747_v5, %v197_v37 }
  0x3a   :  { %v393_v50 = vadd.f32 %v329_v34, %v265_v38  ;;  %v394_v51 = vadd.f32 %v330_v35, %v266_v39  ;;  %v269_v52 = vadd.f32 %v747_v5, %v198_v42  ;;  %v270_v53 = vadd.f32 %v747_v5, %v199_v43  ;;  %v341_v38 = vld [vmem:[%s1354_s1 + $0x1b0] sm:$0xff]  ;;  %v342_v39 = vld [vmem:[%s1354_s1 + $0x1b8] sm:$0xff] }
  0x3b   :  { %v455_v55 = vmax.f32 %v391_v44, 0.0  ;;  %v456_v56 = vmax.f32 %v392_v45, 0.0  ;;  %v395_v57 = vadd.f32 %v331_v40, %v267_v46  ;;  %v396_v58 = vadd.f32 %v332_v41, %v268_v47  ;;  %v704_v44 = vld [vmem:[%s1351_s0 + $0xe0] sm:$0xff]  }
  0x3c   :  { %v457_v60 = vmax.f32 %v393_v50, 0.0  ;;  %v458_v61 = vmax.f32 %v394_v51, 0.0  ;;  %v397_v62 = vadd.f32 %v333_v48, %v269_v52  ;;  %v398_v63 = vadd.f32 %v334_v49, %v270_v53  ;;  %v705_v49 = vld [vmem:[%s1351_s0 + $0xe8] sm:$0xff]  }
  0x3d   :  { %519 = vst [vmem:[%s1355_s4 + $0x140] sm:$0xff] %v455_v55  ;;  %520 = vst [vmem:[%s1355_s4 + $0x148] sm:$0xff] %v456_v56  ;;  %v459_v2 = vmax.f32 %v395_v57, 0.0  ;;  %v460_v3 = vmax.f32 %v396_v58, 0.0  ;;  %v647_v4 = vunpack.c.l.bf16 %v700_v54  ;;  %v648_v6 = vunpack.c.h.bf16 %v700_v54  ;;  %v706_v54 = vld [vmem:[%s1351_s0 + $0xf0] sm:$0xff]  }
  0x3e   :  { %521 = vst [vmem:[%s1355_s4 + $0x150] sm:$0xff] %v457_v60  ;;  %522 = vst [vmem:[%s1355_s4 + $0x158] sm:$0xff] %v458_v61  ;;  %v461_v8 = vmax.f32 %v397_v62, 0.0  ;;  %v462_v9 = vmax.f32 %v398_v63, 0.0  ;;  %v651_v10 = vunpack.c.l.bf16 %v701_v59  ;;  %v652_v11 = vunpack.c.h.bf16 %v701_v59  ;;  %v707_v59 = vld [vmem:[%s1351_s0 + $0xf8] sm:$0xff]  }
  0x3f   :  { %523 = vst [vmem:[%s1355_s4 + $0x160] sm:$0xff] %v459_v2  ;;  %524 = vst [vmem:[%s1355_s4 + $0x168] sm:$0xff] %v460_v3  ;;  %v200_v12 = vmul.f32 %v647_v4, %v739_v1  ;;  %v201_v13 = vmul.f32 %v648_v6, %v739_v1  ;;  %v655_v14 = vunpack.c.l.bf16 %v702_v0  ;;  %v656_v15 = vunpack.c.h.bf16 %v702_v0  ;;  %v343_v6 = vld [vmem:[%s1354_s1 + $0x1c0] sm:$0xff] }
  0x40   :  { %525 = vst [vmem:[%s1355_s4 + $0x170] sm:$0xff] %v461_v8  ;;  %526 = vst [vmem:[%s1355_s4 + $0x178] sm:$0xff] %v462_v9  ;;  %v202_v18 = vmul.f32 %v651_v10, %v739_v1  ;;  %v203_v19 = vmul.f32 %v652_v11, %v739_v1  ;;  %v659_v20 = vunpack.c.l.bf16 %v703_v7  ;;  %v660_v21 = vunpack.c.h.bf16 %v703_v7  ;;  %v344_v7 = vld [vmem:[%s1354_s1 + $0x1c8] sm:$0xff] }
  0x41   :  { %v271_v22 = vadd.f32 %v747_v5, %v200_v12  ;;  %v272_v23 = vadd.f32 %v747_v5, %v201_v13  ;;  %v204_v26 = vmul.f32 %v655_v14, %v739_v1  ;;  %v205_v27 = vmul.f32 %v656_v15, %v739_v1  ;;  %v345_v14 = vld [vmem:[%s1354_s1 + $0x1d0] sm:$0xff]  ;;  %v346_v15 = vld [vmem:[%s1354_s1 + $0x1d8] sm:$0xff] }
  0x42   :  { %v273_v28 = vadd.f32 %v747_v5, %v202_v18  ;;  %v274_v29 = vadd.f32 %v747_v5, %v203_v19  ;;  %v206_v32 = vmul.f32 %v659_v20, %v739_v1  ;;  %v207_v33 = vmul.f32 %v660_v21, %v739_v1  ;;  %v347_v20 = vld [vmem:[%s1354_s1 + $0x1e0] sm:$0xff]  ;;  %v348_v21 = vld [vmem:[%s1354_s1 + $0x1e8] sm:$0xff] }
  0x43   :  { %v399_v34 = vadd.f32 %v335_v16, %v271_v22  ;;  %v400_v35 = vadd.f32 %v336_v17, %v272_v23  ;;  %v275_v36 = vadd.f32 %v747_v5, %v204_v26  ;;  %v276_v37 = vadd.f32 %v747_v5, %v205_v27 }
  0x44   :  { %v401_v40 = vadd.f32 %v337_v24, %v273_v28  ;;  %v402_v41 = vadd.f32 %v338_v25, %v274_v29  ;;  %v277_v42 = vadd.f32 %v747_v5, %v206_v32  ;;  %v278_v43 = vadd.f32 %v747_v5, %v207_v33  ;;  %v349_v28 = vld [vmem:[%s1354_s1 + $0x1f0] sm:$0xff]  ;;  %v350_v29 = vld [vmem:[%s1354_s1 + $0x1f8] sm:$0xff] }
  0x45   :  { %v463_v45 = vmax.f32 %v399_v34, 0.0  ;;  %v464_v46 = vmax.f32 %v400_v35, 0.0  ;;  %v403_v47 = vadd.f32 %v339_v30, %v275_v36  ;;  %v404_v48 = vadd.f32 %v340_v31, %v276_v37 }
  0x46   :  { %v465_v50 = vmax.f32 %v401_v40, 0.0  ;;  %v466_v51 = vmax.f32 %v402_v41, 0.0  ;;  %v405_v52 = vadd.f32 %v341_v38, %v277_v42  ;;  %v406_v53 = vadd.f32 %v342_v39, %v278_v43 }
  0x47   :  { %527 = vst [vmem:[%s1355_s4 + $0x180] sm:$0xff] %v463_v45  ;;  %528 = vst [vmem:[%s1355_s4 + $0x188] sm:$0xff] %v464_v46  ;;  %v467_v55 = vmax.f32 %v403_v47, 0.0  ;;  %v468_v56 = vmax.f32 %v404_v48, 0.0  ;;  %v663_v57 = vunpack.c.l.bf16 %v704_v44  ;;  %v664_v58 = vunpack.c.h.bf16 %v704_v44 }
  0x48   :  { %529 = vst [vmem:[%s1355_s4 + $0x190] sm:$0xff] %v465_v50  ;;  %530 = vst [vmem:[%s1355_s4 + $0x198] sm:$0xff] %v466_v51  ;;  %v469_v60 = vmax.f32 %v405_v52, 0.0  ;;  %v470_v61 = vmax.f32 %v406_v53, 0.0  ;;  %v667_v62 = vunpack.c.l.bf16 %v705_v49  ;;  %v668_v63 = vunpack.c.h.bf16 %v705_v49 }
  0x49   :  { %531 = vst [vmem:[%s1355_s4 + $0x1a0] sm:$0xff] %v467_v55  ;;  %532 = vst [vmem:[%s1355_s4 + $0x1a8] sm:$0xff] %v468_v56  ;;  %v208_v0 = vmul.f32 %v663_v57, %v739_v1  ;;  %v209_v2 = vmul.f32 %v664_v58, %v739_v1  ;;  %v671_v3 = vunpack.c.l.bf16 %v706_v54  ;;  %v672_v4 = vunpack.c.h.bf16 %v706_v54 }
  0x4a   :  { %533 = vst [vmem:[%s1355_s4 + $0x1b0] sm:$0xff] %v469_v60  ;;  %534 = vst [vmem:[%s1355_s4 + $0x1b8] sm:$0xff] %v470_v61  ;;  %v210_v8 = vmul.f32 %v667_v62, %v739_v1  ;;  %v211_v9 = vmul.f32 %v668_v63, %v739_v1  ;;  %v675_v10 = vunpack.c.l.bf16 %v707_v59  ;;  %v676_v11 = vunpack.c.h.bf16 %v707_v59 }
  0x4b   :  { %v279_v12 = vadd.f32 %v747_v5, %v208_v0  ;;  %v280_v13 = vadd.f32 %v747_v5, %v209_v2  ;;  %v212_v16 = vmul.f32 %v671_v3, %v739_v1  ;;  %v213_v17 = vmul.f32 %v672_v4, %v739_v1 }
  0x4c   :  { %v281_v18 = vadd.f32 %v747_v5, %v210_v8  ;;  %v282_v19 = vadd.f32 %v747_v5, %v211_v9  ;;  %v214_v22 = vmul.f32 %v675_v10, %v739_v1  ;;  %v215_v23 = vmul.f32 %v676_v11, %v739_v1 }
  0x4d   :  { %v407_v24 = vadd.f32 %v343_v6, %v279_v12  ;;  %v408_v25 = vadd.f32 %v344_v7, %v280_v13  ;;  %v283_v26 = vadd.f32 %v747_v5, %v212_v16  ;;  %v284_v27 = vadd.f32 %v747_v5, %v213_v17 }
  0x4e   :  { %v409_v30 = vadd.f32 %v345_v14, %v281_v18  ;;  %v410_v31 = vadd.f32 %v346_v15, %v282_v19  ;;  %v285_v32 = vadd.f32 %v747_v5, %v214_v22  ;;  %v286_v1 = vadd.f32 %v747_v5, %v215_v23 }
  0x4f   :  { %v471_v33 = vmax.f32 %v407_v24, 0.0  ;;  %v472_v34 = vmax.f32 %v408_v25, 0.0  ;;  %v411_v35 = vadd.f32 %v347_v20, %v283_v26  ;;  %v412_v36 = vadd.f32 %v348_v21, %v284_v27 }
  0x50   :  { %v473_v37 = vmax.f32 %v409_v30, 0.0  ;;  %v474_v38 = vmax.f32 %v410_v31, 0.0  ;;  %v413_v39 = vadd.f32 %v349_v28, %v285_v32  ;;  %v414_v40 = vadd.f32 %v350_v29, %v286_v1 }
  0x51   :  { %535 = vst [vmem:[%s1355_s4 + $0x1c0] sm:$0xff] %v471_v33  ;;  %536 = vst [vmem:[%s1355_s4 + $0x1c8] sm:$0xff] %v472_v34  ;;  %v475_v41 = vmax.f32 %v411_v35, 0.0  ;;  %v476_v42 = vmax.f32 %v412_v36, 0.0 }
  0x52   :  { %537 = vst [vmem:[%s1355_s4 + $0x1d0] sm:$0xff] %v473_v37  ;;  %538 = vst [vmem:[%s1355_s4 + $0x1d8] sm:$0xff] %v474_v38  ;;  %v477_v5 = vmax.f32 %v413_v39, 0.0  ;;  %v478_v43 = vmax.f32 %v414_v40, 0.0 }
  0x53   :  { %539 = vst [vmem:[%s1355_s4 + $0x1e0] sm:$0xff] %v475_v41  ;;  %540 = vst [vmem:[%s1355_s4 + $0x1e8] sm:$0xff] %v476_v42 }
  0x54   :  { %541 = vst [vmem:[%s1355_s4 + $0x1f0] sm:$0xff] %v477_v5  ;;  %542 = vst [vmem:[%s1355_s4 + $0x1f8] sm:$0xff] %v478_v43 }

// kernel: bottleneck_block.5
= control target key start
LH: loop header
LB: loop body
LE: loop exit
PB: predicated region body
PF: predicated region fallthrough
CT: control target
= control target key end

     0   :  { %s7357_s21 = smov 0   ;;  %s10138_s0 = inlined_call_operand.vmem [shape: bf16[2,256,128], index: 0, kind: input, shape index: {}]   ;;  %s10139_s1 = inlined_call_operand.vmem [shape: f32[1,128], index: 1, kind: input, shape index: {}]   ;;  %s10140_s2 = inlined_call_operand.vmem [shape: f32[1,128], index: 2, kind: input, shape index: {}]   ;;  %s10141_s3 = inlined_call_operand.vmem [shape: bf16[3,384,128], index: 3, kind: input, shape index: {}]   ;;  %s10142_s4 = inlined_call_operand.vmem [shape: f32[1,128], index: 4, kind: input, shape index: {}]   ;;  %s10143_s5 = inlined_call_operand.vmem [shape: bf16[2,256,128], index: 5, kind: output, shape index: {0}]   ;;  %s10144_s6 = inlined_call_operand.vmem [shape: f32[2,2,128], index: 6, kind: output, shape index: {1}]  }
   0x1 LB: > { %s5975_s22 = sadd.s32 4294967295, %s7318_s21   ;;  %p5979_p0 = scmp.ge.s32.totalorder %s7318_s21, 1  ;;  %s7318_s21 = sphi %s7357_s21, %s17_s21  }
   0x2   : > { %p215_p1 = scmp.lt.s32.totalorder %s7318_s21, 3 }
   0x4   : > { %p216_p2 = pnand %p5979_p0, %p215_p1 }
   0x6   : > { %219 = sbr.rel (%p216_p2) target bundleno = 633 (0x279), region = 40 }
   0xb   : > { %v7190_v0 = vld [vmem:[%s10141_s3 + $0x138] sm:$0xff]   ;;  %v688_v1 = vlaneseq  ;;  %v7192_v3 = vld [vmem:[%s10141_s3 + $0x130] sm:$0xff]   ;;  %p7376_p3 = scmp.lt.s32.totalorder %s5975_s22, 1  ;;  %v7320_v4 = vmov 0   ;;  %v7194_v7 = vld [vmem:[%s10141_s3 + $0x128] sm:$0xff]   ;;  %vm7321_vm5 = vmmov 1  }
   0xc   : > { %v7191_v2 = vld [vmem:[%s10141_s3 + $0xf8] sm:$0xff]   ;;  %6612 = vmatprep.subr.bf16.mxu0 %v7190_v0  ;;  %7164 = vmatprep.subr.bf16.mxu1 %v7190_v0  ;;  %456 = vst [vmem:[#allocation2] sm:$0xff] %v7320_v4  ;;  %462 = vst [vmem:[#allocation2 + $0x24] sm:$0xff] %v7320_v4  ;;  %v7193_v5 = vld [vmem:[%s10141_s3 + $0xf0] sm:$0xff]   ;;  %vm1363_vm4 = vsmask.f32 3328 }
   0xd   : > { %464 = vst [vmem:[#allocation2 + $0x30] sm:$0xff] %v7320_v4  ;;  %466 = vst [vmem:[#allocation2 + $0x3c] sm:$0xff] %v7320_v4  ;;  %6613 = vmatpush3.bf16.msra.mxu0 %v7191_v2  ;;  %7172 = vmatpush3.bf16.msra.mxu1 %v7191_v2  ;;  %v7396_v6 = vshrl.u32 %v688_v1, 7  ;;  %s10415_s22 = smov (!%p7376_p3, %s5975_s22), 1  ;;  %v7195_v9 = vld [vmem:[%s10141_s3 + $0xe8] sm:$0xff]   ;;  %v7196_v10 = vld [vmem:[%s10141_s3 + $0x120] sm:$0xff]  }
   0xe   : > { %463 = vst [vmem:[#allocation2 + $0x2c] sm:$0xf] %v7320_v4  ;;  %465 = vst [vmem:[#allocation2 + $0x38] sm:$0xf] %v7320_v4  ;;  %6614 = vmatprep.subr.bf16.mxu0 %v7192_v3  ;;  %7165 = vmatprep.subr.bf16.mxu1 %v7192_v3  ;;  %s6372_s14 = sshll.u32 %s10415_s22, 7  ;;  %v7197_v13 = vld [vmem:[%s10141_s3 + $0xe0] sm:$0xff]  }
   0xf   : > { %467 = vst [vmem:[#allocation2 + $0x44] sm:$0xf] %v7320_v4  ;;  %468 = vst [vmem:[#allocation2 + $0x198] sm:$0xff] %v7320_v4  ;;  %v691_v8 = vadd.s32 16, %v7396_v6  ;;  %v725_v11 = vand.u32 15, %v7396_v6  ;;  %v713_v14 = vadd.s32 192, %v7396_v6  ;;  %s7431_s23 = scalar_lea.vmem %s10138_s0, %s6372_s14  ;;  %s9994_s16 = scalar_lea.vmem %s10143_s5, %s6372_s14 }
  0x10   : > { %469 = vst [vmem:[#allocation2 + $0x1a0] sm:$0xf] %v7320_v4  ;;  %470 = vst [vmem:[#allocation2 + $0x1a4] sm:$0xff] %v7320_v4  ;;  %v7198_v15 = vld [vmem:[%s10141_s3 + $0x118] sm:$0xff]   ;;  %v7424_v16 = vadd.s32 208, %v7396_v6  ;;  %v7200_v21 = vld [vmem:[%s10141_s3 + $0x110] sm:$0xff]  }
  0x11   : > { %471 = vst [vmem:[#allocation2 + $0x1ac] sm:$0xf] %v7320_v4  ;;  %472 = vst [vmem:[#allocation2 + $0x1b0] sm:$0xff] %v7320_v4  ;;  %6615 = vmatpush3.bf16.msra.mxu0 %v7193_v5  ;;  %7173 = vmatpush3.bf16.msra.mxu1 %v7193_v5  ;;  %v739_v12 = vand.u32 15, %v691_v8  ;;  %vm7433_vm0 = vcmp.ne.s32.totalorder %v725_v11, 0  ;;  %v893_v18 = vand.u32 15, %v713_v14 }
  0x12   : > { %473 = vst [vmem:[#allocation2 + $0x1b8] sm:$0xf] %v7320_v4  ;;  %6616 = vmatprep.subr.bf16.mxu0 %v7194_v7  ;;  %7166 = vmatprep.subr.bf16.mxu1 %v7194_v7  ;;  %v7199_v19 = vld [vmem:[%s10141_s3 + $0xd8] sm:$0xff]   ;;  %v6439_v22 = vld [vmem:[%s7431_s23] sm:$0xff]   ;;  %v7449_v23 = vld [vmem:[%s7431_s23 + $0x8] sm:$0xff]   ;;  %v907_v25 = vand.u32 15, %v7424_v16 }
  0x13   : > { %vm7440_vm1 = vcmp.ne.s32.totalorder %v739_v12, 0  ;;  %v7454_v24 = vld [vmem:[%s10139_s1] ss:$0 sm:$0xff]  ;;  %vm7457_vm2 = vcmp.ne.s32.totalorder %v893_v18, 0  ;;  %v6440_v27 = vunpack.c.l.bf16 %v6439_v22  ;;  %v6441_v28 = vunpack.c.h.bf16 %v6439_v22  ;;  %vm1299_vm3 = vmpackc.low %vm7433_vm0, %vm7433_vm0  ;;  %v7201_v33 = vld [vmem:[%s10141_s3 + $0xd0] sm:$0xff]   ;;  %s5984_s14 = sshll.u32 %s10415_s22, 1 }
  0x14   : > { %v6444_v29 = vunpack.c.l.bf16 %v7449_v23  ;;  %v7468_v30 = vld [vmem:[%s10140_s2] ss:$0 sm:$0xff]  ;;  %vm1300_vm6 = vmpackc.low %vm7321_vm5, %vm7321_vm5  ;;  %v1331_v31 = vsel %vm1299_vm3, 65537, %v7320_v4  ;;  %vm1364_vm7 = vsmask.f32 7440  ;;  %v7472_v32 = vadd.s32 32, %v7396_v6  ;;  %s262_s19 = scalar_lea.vmem %s10144_s6, %s5984_s14 }
  0x15   : > { %6617 = vmatpush3.bf16.msra.mxu0 %v7195_v9  ;;  %7174 = vmatpush3.bf16.msra.mxu1 %v7195_v9  ;;  %v7202_v34 = vld [vmem:[%s10141_s3 + $0x108] sm:$0xff]   ;;  %v337_v35 = vmul.f32 %v6440_v27, %v7454_v24  ;;  %v338_v36 = vmul.f32 %v6441_v28, %v7454_v24  ;;  %vm1301_vm8 = vmpackc.low %vm7440_vm1, %vm7440_vm1  ;;  %v7487_v38 = vsel %vm1300_vm6, 65537, %v7320_v4  ;;  %v1367_v40 = vshll.u32 %v1331_v31, 16  ;;  %v7204_v49 = vld [vmem:[%s10141_s3 + $0x100] sm:$0xff]  }
  0x16   : > { %6618 = vmatprep.subr.bf16.mxu0 %v7196_v10  ;;  %7167 = vmatprep.subr.bf16.mxu1 %v7196_v10  ;;  %v339_v37 = vmul.f32 %v6444_v29, %v7454_v24  ;;  %10168 = vst [vmem:[#allocation3_spill] sm:$0xff] %v7487_v38  ;;  %v1333_v39 = vsel %vm1301_vm8, 65537, %v7320_v4  ;;  %v1370_v41 = vshrl.u32 %v1331_v31, 16  ;;  %v10145_v42 = vshll.u32 %v7487_v38, 16  ;;  %v7203_v43 = vld [vmem:[%s10141_s3 + $0xc8] sm:$0xff]   ;;  %v6591_v54 = vld [vmem:[%s7431_s23 + $0x50] sm:$0xff]   ;;  %vm7520_vm10 = vmor %vm1363_vm4, %vm1364_vm7 }
  0x17   : > { %v376_v44 = vadd.f32 %v7468_v30, %v337_v35  ;;  %v377_v45 = vadd.f32 %v7468_v30, %v338_v36  ;;  %v1169_v47 = vld [vmem:[#allocation2 + $0x24] sm:$0x88]  ;;  %v1380_v48 = vshrl.u32 %v7487_v38, 16  ;;  %v7501_v50 = vrot.slane %v1367_v40, 5  ;;  %v6592_v55 = vld [vmem:[%s7431_s23 + $0x58] sm:$0xff]   ;;  %vm1323_vm11 = vmpackc.low %vm7457_vm2, %vm7457_vm2 }
  0x18   : > { %v378_v46 = vadd.f32 %v7468_v30, %v339_v37  ;;  %v1372_v51 = vrot.slane %v1370_v41, 4  ;;  %v7505_v52 = vrot.slane %v10145_v42, 5  ;;  %v1386_v53 = vshll.u32 %v1333_v39, 16  ;;  %v6593_v60 = vld [vmem:[%s7431_s23 + $0x60] sm:$0xff]   ;;  %v7513_v0 = vld [vmem:[%s7431_s23 + $0x68] sm:$0xff]   ;;  %v7540_v22 = vld [vmem:[%s10141_s3 + $0x178] sm:$0xff]  }
  0x19   : > { %6619 = vmatpush3.bf16.msra.mxu0 %v7197_v13  ;;  %7175 = vmatpush3.bf16.msra.mxu1 %v7197_v13  ;;  %v408_v56 = vmax.f32 %v376_v44, 0.0  ;;  %v409_v57 = vmax.f32 %v377_v45, 0.0  ;;  %v1382_v59 = vrot.slane %v1380_v48, 4  ;;  %v1390_v63 = vshrl.u32 %v1333_v39, 16  ;;  %v7205_v1 = vld [vmem:[%s10141_s3 + $0xc0] sm:$0xff]  }
  0x1a   : > { %6620 = vmatprep.subr.bf16.mxu0 %v7198_v15  ;;  %7168 = vmatprep.subr.bf16.mxu1 %v7198_v15  ;;  %v410_v58 = vmax.f32 %v378_v46, 0.0  ;;  %v1373_v61 = vor.u32 %v1372_v51, %v7501_v50  ;;  %v1388_v62 = vrot.slane %v1386_v53, 5  ;;  %vm1685_vm9 = vcmp.ne.s16.totalorder %v7501_v50, 0  ;;  %v7816_v50 = vld [vmem:[%s10141_s3 + $0x148] sm:$0xff]  }
  0x1b   : > { %v6374_v2 = vpack.c.bf16 %v408_v56, %v408_v56  ;;  %v6375_v3 = vpack.c.bf16 %v409_v57, %v409_v57  ;;  %v1383_v8 = vor.u32 %v1382_v59, %v7505_v52  ;;  %v1392_v10 = vrot.slane %v1390_v63, 4 }
  0x1c   : > { %v6376_v5 = vpack.c.bf16 %v410_v58, %v410_v58  ;;  %v1374_v9 = vrot.slane %v1373_v61, 4  ;;  %v1718_v11 = vsel %vm1685_vm9, %v1169_v47, 0  ;;  %v7527_v12 = vrot.slane %v1380_v48, 7 }
  0x1d   : > { %6621 = vmatpush3.bf16.msra.mxu0 %v7199_v19  ;;  %7176 = vmatpush3.bf16.msra.mxu1 %v7199_v19  ;;  %592 = vst [vmem:[#allocation2 + $0x48] sm:$0xf] %v6374_v2  ;;  %624 = vst [vmem:[#allocation2 + $0x34] sm:$0xf] %v6374_v2  ;;  %v7529_v13 = vrot.slane %v1383_v8, 4  ;;  %v6481_v14 = vunpack.c.h.bf16 %v6591_v54  ;;  %v6484_v15 = vunpack.c.l.bf16 %v6592_v55  ;;  %v6485_v17 = vunpack.c.h.bf16 %v6592_v55 }
  0x1e   : > { %6622 = vmatprep.subr.bf16.mxu0 %v7200_v21  ;;  %7169 = vmatprep.subr.bf16.mxu1 %v7200_v21  ;;  %10171 = vst [vmem:[#allocation4_spill] sm:$0xff] %v7527_v12  ;;  %625 = vst [vmem:[#allocation2 + $0x40] sm:$0xf] %v6375_v3  ;;  %v1379_v18 = vsel %vm7520_vm10, %v1374_v9, %v7505_v52  ;;  %v1393_v19 = vor.u32 %v1392_v10, %v1388_v62  ;;  %v6488_v20 = vunpack.c.l.bf16 %v6593_v60 }
  0x1f   : > { %626 = vst [vmem:[#allocation2 + $0x4c] sm:$0xf] %v6376_v5  ;;  %593 = vst [vmem:[#allocation2 + $0x54] sm:$0xf] %v6375_v3  ;;  %v6489_v21 = vunpack.c.h.bf16 %v6593_v60  ;;  %v1389_v27 = vsel %vm7520_vm10, %v7529_v13, %v1388_v62  ;;  %vm7545_vm12 = vcmp.ne.s16.totalorder %v1379_v18, 0  ;;  %v6492_v29 = vunpack.c.l.bf16 %v7513_v0 }
  0x20   : > { %594 = vst [vmem:[#allocation2 + $0x60] sm:$0xf] %v6376_v5  ;;  %657 = vst [vmem:[#allocation2 + $0x2c] sm:$0xf] %v6375_v3  ;;  %v358_v31 = vmul.f32 %v6481_v14, %v7454_v24  ;;  %vm7553_vm13 = vcmp.ne.s32.totalorder %v907_v25, 0  ;;  %v1394_v35 = vrot.slane %v1393_v19, 4  ;;  %v359_v37 = vmul.f32 %v6484_v15, %v7454_v24 }
  0x21   : > { %6623 = vmatpush3.bf16.msra.mxu0 %v7201_v33  ;;  %7177 = vmatpush3.bf16.msra.mxu1 %v7201_v33  ;;  %658 = vst [vmem:[#allocation2 + $0x38] sm:$0xf] %v6376_v5  ;;  %vm7562_vm14 = vcmp.ne.s16.totalorder %v1389_v27, 0  ;;  %v360_v39 = vmul.f32 %v6485_v17, %v7454_v24  ;;  %v361_v16 = vmul.f32 %v6488_v20, %v7454_v24  ;;  %v7577_v41 = vsel %vm1323_vm11, 65537, %v7320_v4  ;;  %vm1325_vm0 = vmpackc.low %vm7553_vm13, %vm7553_vm13 }
  0x22   : > { %6624 = vmatprep.subr.bf16.mxu0 %v7202_v34  ;;  %7170 = vmatprep.subr.bf16.mxu1 %v7202_v34  ;;  %v7560_v34 = vld [vmem:[%s10141_s3 + $0xb8] sm:$0xff]   ;;  %v362_v25 = vmul.f32 %v6489_v21, %v7454_v24  ;;  %v363_v40 = vmul.f32 %v6492_v29, %v7454_v24  ;;  %v397_v44 = vadd.f32 %v7468_v30, %v358_v31  ;;  %v6445_v58 = vunpack.c.h.bf16 %v7449_v23 }
  0x23   : > { %v398_v45 = vadd.f32 %v7468_v30, %v359_v37  ;;  %v399_v46 = vadd.f32 %v7468_v30, %v360_v39  ;;  %v400_v26 = vadd.f32 %v7468_v30, %v361_v16 }
  0x24   : > { %v401_v48 = vadd.f32 %v7468_v30, %v362_v25  ;;  %v7594_v51 = vld [vmem:[#allocation2 + $0x30] sm:$0xff]  ;;  %v429_v55 = vmax.f32 %v397_v44, 0.0  ;;  %v340_v31 = vmul.f32 %v6445_v58, %v7454_v24 }
  0x25   : > { %6625 = vmatpush3.bf16.msra.mxu0 %v7203_v43  ;;  %7178 = vmatpush3.bf16.msra.mxu1 %v7203_v43  ;;  %v1399_v43 = vsel %vm7520_vm10, %v1394_v35, %v7505_v52  ;;  %v7596_v53 = vld [vmem:[#allocation2 + $0x3c] sm:$0xff]  ;;  %v430_v56 = vmax.f32 %v398_v45, 0.0  ;;  %v431_v57 = vmax.f32 %v399_v46, 0.0  ;;  %v1720_v59 = vsel %vm7545_vm12, %v7594_v51, 0 }
  0x26   : > { %6626 = vmatprep.subr.bf16.mxu0 %v7204_v49  ;;  %7171 = vmatprep.subr.bf16.mxu1 %v7204_v49  ;;  %vm7586_vm15 = vcmp.ne.s16.totalorder %v1399_v43, 0  ;;  %v402_v49 = vadd.f32 %v7468_v30, %v363_v40  ;;  %v7598_v54 = vld [vmem:[#allocation2 + $0x48] sm:$0xff]  ;;  %v1722_v60 = vsel %vm7562_vm14, %v7596_v53, 0  ;;  %v6068_v62 = vcombine.high %v7594_v51, %v7596_v53 }
  0x27   : > { %v1724_v61 = vsel %vm7586_vm15, %v7598_v54, 0  ;;  %v6139_v63 = vcombine.low %v1718_v11, %v1720_v59  ;;  %v432_v23 = vmax.f32 %v400_v26, 0.0  ;;  %v433_v5 = vmax.f32 %v401_v48, 0.0 }
  0x28   : > { %v6142_v2 = vcombine.low %v1722_v60, %v1724_v61  ;;  %v6143_v3 = vcombine.high %v1722_v60, %v1724_v61  ;;  %2313 = vmatprep.mubr.bf16.mxu0 %v6068_v62  ;;  %v434_v8 = vmax.f32 %v402_v49, 0.0  ;;  %v6395_v9 = vpack.c.bf16 %v429_v55, %v429_v55  ;;  %v7213_v61 = vld [vmem:[%s10141_s3 + $0xb0] sm:$0xff]  }
  0x29   : > { %6627 = vmatpush3.bf16.msra.mxu0 %v7205_v1  ;;  %7179 = vmatpush3.bf16.msra.mxu1 %v7205_v1  ;;  %v6140_v1 = vcombine.high %v1718_v11, %v1720_v59  ;;  %v2821_v10 = vshrl.u32 %v6139_v63, 16  ;;  %v2824_v14 = vshll.u32 %v6139_v63, 16  ;;  %v6396_v43 = vpack.c.bf16 %v430_v56, %v430_v56  ;;  %v7638_v56 = vld [vmem:[%s7431_s23 + $0x10] sm:$0xff]  }
  0x2a   : > { %7020 = vmatprep.subr.bf16.mxu1 %v7540_v22  ;;  %7068 = vmatprep.subr.bf16.mxu0 %v7560_v34  ;;  %v2829_v15 = vshrl.u32 %v6142_v2, 16  ;;  %v2832_v17 = vshll.u32 %v6142_v2, 16  ;;  %v2846_v20 = vshrl.u32 %v6143_v3, 16  ;;  %v2849_v21 = vshll.u32 %v6143_v3, 16  ;;  %613 = vst [vmem:[#allocation2 + $0x144] sm:$0xf] %v6395_v9 }
  0x2b   : > { %v2838_v18 = vshrl.u32 %v6140_v1, 16  ;;  %v2841_v19 = vshll.u32 %v6140_v1, 16  ;;  %645 = vst [vmem:[#allocation2 + $0x130] sm:$0xf] %v6395_v9  ;;  %677 = vst [vmem:[#allocation2 + $0x11c] sm:$0xf] %v6395_v9  ;;  %v6397_v33 = vpack.c.bf16 %v431_v57, %v431_v57  ;;  %v6398_v44 = vpack.c.bf16 %v432_v23, %v432_v23 }
  0x2c   : > { %v7612_v27 = vrot.slane %v2821_v10, 3  ;;  %v7614_v11 = vrot.slane %v2824_v14, 4  ;;  %v7616_v29 = vrot.slane %v2829_v15, 3  ;;  %v7622_v35 = vrot.slane %v2832_v17, 4  ;;  %614 = vst [vmem:[#allocation2 + $0x150] sm:$0xf] %v6396_v43 }
  0x2d   : > { %v7624_v37 = vrot.slane %v2838_v18, 3  ;;  %v7626_v39 = vrot.slane %v2841_v19, 4  ;;  %v7628_v16 = vrot.slane %v2846_v20, 3  ;;  %v7632_v40 = vrot.slane %v2849_v21, 4  ;;  %615 = vst [vmem:[#allocation2 + $0x15c] sm:$0xf] %v6397_v33 }
  0x2e   : > { %v6399_v45 = vpack.c.bf16 %v433_v5, %v433_v5  ;;  %v6400_v46 = vpack.c.bf16 %v434_v8, %v434_v8  ;;  %v1357_v26 = vsel %vm1325_vm0, 65537, %v7320_v4  ;;  %647 = vst [vmem:[#allocation2 + $0x148] sm:$0xf] %v6397_v33  ;;  %v1606_v48 = vshll.u32 %v7577_v41, 16  ;;  %646 = vst [vmem:[#allocation2 + $0x13c] sm:$0xf] %v6396_v43 }
  0x2f   : > { %v1610_v49 = vshrl.u32 %v7577_v41, 16  ;;  %v1626_v55 = vshll.u32 %v1357_v26, 16  ;;  %v1630_v58 = vshrl.u32 %v1357_v26, 16  ;;  %678 = vst [vmem:[#allocation2 + $0x128] sm:$0xf] %v6396_v43  ;;  %v6067_v41 = vcombine.low %v7594_v51, %v7596_v53  ;;  %v7651_v53 = vld [vmem:[%s7431_s23 + $0x70] sm:$0xff]  }
  0x30   : > { %679 = vst [vmem:[#allocation2 + $0x134] sm:$0xf] %v6397_v33  ;;  %616 = vst [vmem:[#allocation2 + $0x168] sm:$0xf] %v6398_v44  ;;  %v379_v57 = vadd.f32 %v7468_v30, %v340_v31  ;;  %v753_v59 = vand.u32 15, %v7472_v32  ;;  %v6493_v60 = vunpack.c.h.bf16 %v7513_v0  ;;  %v1608_v62 = vrot.slane %v1606_v48, 5 }
  0x31   : > { %648 = vst [vmem:[#allocation2 + $0x154] sm:$0xf] %v6398_v44  ;;  %649 = vst [vmem:[#allocation2 + $0x160] sm:$0xf] %v6399_v45  ;;  %v1612_v63 = vrot.slane %v1610_v49, 4  ;;  %v1628_v1 = vrot.slane %v1626_v55, 5  ;;  %2314 = vmatmul.mubr.bf16.vlgmr.msra.gmra.mxu0 %v6067_v41  ;;  %v6448_v51 = vunpack.c.l.bf16 %v7638_v56  ;;  %v6449_v31 = vunpack.c.h.bf16 %v7638_v56 }
  0x32   : > { %650 = vst [vmem:[#allocation2 + $0x16c] sm:$0xf] %v6400_v46  ;;  %617 = vst [vmem:[#allocation2 + $0x174] sm:$0xf] %v6399_v45  ;;  %v1632_v2 = vrot.slane %v1630_v58, 4  ;;  %v411_v3 = vmax.f32 %v379_v57, 0.0  ;;  %v364_v23 = vmul.f32 %v6493_v60, %v7454_v24  ;;  %v1609_v32 = vsel %vm7520_vm10, %v7529_v13, %v1608_v62  ;;  %7069 = vmatpush3.bf16.msra.mxu0 %v7560_v34 }
  0x33   : > { %618 = vst [vmem:[#allocation2 + $0x180] sm:$0xf] %v6400_v46  ;;  %680 = vst [vmem:[#allocation2 + $0x140] sm:$0xf] %v6398_v44  ;;  %vm1109_vm1 = vcmp.ne.s32.totalorder %v753_v59, 0  ;;  %v1613_v0 = vor.u32 %v1612_v63, %v1608_v62  ;;  %v1629_v5 = vsel %vm7520_vm10, %v7529_v13, %v1628_v1  ;;  %vm7660_vm3 = vcmp.ne.s16.totalorder %v1609_v32, 0  ;;  %7070 = vmatprep.subr.bf16.mxu0 %v7213_v61 }
  0x34   : > { %681 = vst [vmem:[#allocation2 + $0x14c] sm:$0xf] %v6399_v45  ;;  %682 = vst [vmem:[#allocation2 + $0x158] sm:$0xf] %v6400_v46  ;;  %v1633_v8 = vor.u32 %v1632_v2, %v1628_v1  ;;  %vm7664_vm4 = vcmp.ne.s16.totalorder %v1629_v5, 0  ;;  %v6377_v14 = vpack.c.bf16 %v411_v3, %v411_v3  ;;  %v7225_v17 = vld [vmem:[%s10141_s3 + $0xa8] sm:$0xff]   ;;  %v7676_v20 = vadd.f32 %v7468_v30, %v364_v23 }
  0x35   : > { %vm1303_vm2 = vmpackc.low %vm1109_vm1, %vm1109_vm1  ;;  %v1614_v18 = vrot.slane %v1613_v0, 4  ;;  %v1217_v21 = vld [vmem:[#allocation2 + $0x144] sm:$0xff]  ;;  %v6496_v43 = vunpack.c.l.bf16 %v7651_v53  ;;  %v6497_v33 = vunpack.c.h.bf16 %v7651_v53  ;;  %v7210_v59 = vld [vmem:[%s10141_s3 + $0x170] sm:$0xff]   ;;  %v342_v5 = vmul.f32 %v6449_v31, %v7454_v24 }
  0x36   : > { %v7669_v15 = vsel %vm1303_vm2, 65537, %v7320_v4  ;;  %v1634_v34 = vrot.slane %v1633_v8, 4  ;;  %627 = vst [vmem:[#allocation2 + $0x58] sm:$0xf] %v6377_v14  ;;  %595 = vst [vmem:[#allocation2 + $0x6c] sm:$0xf] %v6377_v14  ;;  %v341_v4 = vmul.f32 %v6448_v51, %v7454_v24  ;;  %7071 = vmatpush3.bf16.msra.mxu0 %v7213_v61 }
  0x37   : > { %v1406_v19 = vshll.u32 %v7669_v15, 16  ;;  %659 = vst [vmem:[#allocation2 + $0x44] sm:$0xf] %v6377_v14  ;;  %v1619_v46 = vsel %vm7520_vm10, %v1614_v18, %v7505_v52  ;;  %v1766_v48 = vsel %vm7660_vm3, %v1217_v21, 0  ;;  %7072 = vmatprep.subr.bf16.mxu0 %v7225_v17  ;;  %v7233_v60 = vld [vmem:[%s10141_s3 + $0xa0] sm:$0xff]   ;;  %v435_v0 = vmax.f32 %v7676_v20, 0.0 }
  0x38   : > { %v1219_v44 = vld [vmem:[#allocation2 + $0x150] sm:$0xff]  ;;  %v1221_v45 = vld [vmem:[#allocation2 + $0x15c] sm:$0xff]  ;;  %v1639_v26 = vsel %vm7520_vm10, %v1634_v34, %v7505_v52  ;;  %vm7694_vm5 = vcmp.ne.s16.totalorder %v1619_v46, 0  ;;  %v380_v8 = vadd.f32 %v7468_v30, %v341_v4 }
  0x39   : > { %v7690_v49 = vrot.slane %v1406_v19, 5  ;;  %v7692_v55 = vld [vmem:[#allocation2 + $0x168] sm:$0xff]  ;;  %vm7698_vm6 = vcmp.ne.s16.totalorder %v1639_v26, 0  ;;  %v1770_v41 = vsel %vm7664_vm4, %v1221_v45, 0  ;;  %v6104_v57 = vcombine.high %v1219_v44, %v1221_v45  ;;  %v7246_v21 = vld [vmem:[%s10141_s3 + $0x98] sm:$0xff]  }
  0x3a   : > { %v1768_v61 = vsel %vm7694_vm5, %v1219_v44, 0  ;;  %v1772_v62 = vsel %vm7698_vm6, %v7692_v55, 0  ;;  %v6103_v63 = vcombine.low %v1219_v44, %v1221_v45  ;;  %7073 = vmatpush3.bf16.msra.mxu0 %v7225_v17  ;;  %v7211_v17 = vld [vmem:[%s10141_s3 + $0x168] sm:$0xff]  }
  0x3b   : > { %v1409_v1 = vsel %vm7520_vm10, %v7529_v13, %v7690_v49  ;;  %2409 = vmatprep.mubr.bf16.mxu1 %v6104_v57  ;;  %v6175_v2 = vcombine.low %v1766_v48, %v1768_v61  ;;  %v6176_v3 = vcombine.high %v1766_v48, %v1768_v61  ;;  %v6178_v23 = vcombine.low %v1770_v41, %v1772_v62 }
  0x3c   : > { %v6179_v51 = vcombine.high %v1770_v41, %v1772_v62  ;;  %2410 = vmatmul.mubr.bf16.vlgmr.msra.gmra.mxu1 %v6103_v63  ;;  %vm7719_vm7 = vcmp.ne.s16.totalorder %v1409_v1, 0  ;;  %7074 = vmatprep.subr.bf16.mxu0 %v7233_v60  ;;  %v6584_v63 = vld [vmem:[%s7431_s23 + $0x18] sm:$0xff]  }
  0x3d   : > { %v3142_v14 = vshrl.u32 %v6175_v2, 16  ;;  %v3145_v18 = vshll.u32 %v6175_v2, 16  ;;  %v3151_v34 = vshrl.u32 %v6176_v3, 16  ;;  %v3154_v19 = vshll.u32 %v6176_v3, 16  ;;  %7021 = vmatpush3.bf16.msra.mxu1 %v7540_v22  ;;  %v1177_v4 = vld [vmem:[#allocation2 + $0x54] sm:$0xff] }
  0x3e   : > { %v3169_v44 = vshrl.u32 %v6178_v23, 16  ;;  %v3172_v20 = vshll.u32 %v6178_v23, 16  ;;  %v3178_v45 = vshrl.u32 %v6179_v51, 16  ;;  %v3181_v31 = vshll.u32 %v6179_v51, 16  ;;  %7022 = vmatprep.subr.bf16.mxu1 %v7210_v59  ;;  %v6596_v1 = vld [vmem:[%s7431_s23 + $0x78] sm:$0xff]   ;;  %7075 = vmatpush3.bf16.msra.mxu0 %v7233_v60 }
  0x3f   : > { %v7733_v46 = vrot.slane %v3142_v14, 3  ;;  %v7735_v22 = vrot.slane %v3145_v18, 4  ;;  %v7737_v26 = vrot.slane %v3151_v34, 3  ;;  %v7739_v48 = vrot.slane %v3154_v19, 4  ;;  %7076 = vmatprep.subr.bf16.mxu0 %v7246_v21  ;;  %v7212_v14 = vld [vmem:[%s10141_s3 + $0x160] sm:$0xff]  }
  0x40   : > { %v7741_v41 = vrot.slane %v3169_v44, 3  ;;  %v7743_v57 = vrot.slane %v3172_v20, 4  ;;  %v7745_v61 = vrot.slane %v3178_v45, 3  ;;  %v7747_v62 = vrot.slane %v3181_v31, 4  ;;  %v6585_v20 = vld [vmem:[%s7431_s23 + $0x20] sm:$0xff]  }
  0x41   : > { %10190 = vst [vmem:[#allocation5_spill] sm:$0xff] %v7733_v46  ;;  %10191 = vst [vmem:[#allocation6_spill] sm:$0xff] %v7735_v22  ;;  %7023 = vmatpush3.bf16.msra.mxu1 %v7210_v59  ;;  %v7753_v2 = vsel %vm7719_vm7, %v1177_v4, 0  ;;  %v6071_v3 = vcombine.high %v7598_v54, %v1177_v4  ;;  %v6401_v23 = vpack.c.bf16 %v435_v0, %v435_v0  ;;  %v412_v60 = vmax.f32 %v380_v8, 0.0  ;;  %v8076_v46 = vld [vmem:[%s7431_s23 + $0x40] sm:$0xff]  }
  0x42   : > { %10192 = vst [vmem:[#allocation7_spill] sm:$0xff] %v7737_v26  ;;  %10193 = vst [vmem:[#allocation8_spill] sm:$0xff] %v7739_v48  ;;  %v6070_v51 = vcombine.low %v7598_v54, %v1177_v4  ;;  %7024 = vmatprep.subr.bf16.mxu1 %v7211_v17  ;;  %v381_v18 = vadd.f32 %v7468_v30, %v342_v5  ;;  %v365_v59 = vmul.f32 %v6496_v43, %v7454_v24  ;;  %v7253_v5 = vld [vmem:[%s10141_s3 + $0x90] sm:$0xff]  }
  0x43   : > { %10194 = vst [vmem:[#allocation9_spill] sm:$0xff] %v7741_v41  ;;  %10195 = vst [vmem:[#allocation10_spill] sm:$0xff] %v7743_v57  ;;  %v366_v0 = vmul.f32 %v6497_v33, %v7454_v24  ;;  %2321 = vmatprep.mubr.bf16.mxu0 %v6071_v3  ;;  %v6452_v54 = vunpack.c.l.bf16 %v6584_v63  ;;  %v6453_v34 = vunpack.c.h.bf16 %v6584_v63  ;;  %v6500_v19 = vunpack.c.l.bf16 %v6596_v1  ;;  %v7776_v33 = vld [vmem:[%s10141_s3 + $0x158] sm:$0xff]   ;;  %7077 = vmatpush3.bf16.msra.mxu0 %v7246_v21 }
  0x44   : > { %10196 = vst [vmem:[#allocation11_spill] sm:$0xff] %v7745_v61  ;;  %10197 = vst [vmem:[#allocation12_spill] sm:$0xff] %v7747_v62  ;;  %v6501_v44 = vunpack.c.h.bf16 %v6596_v1  ;;  %2322 = vmatmul.mubr.bf16.gmra.mxu0 %v6070_v51  ;;  %v413_v8 = vmax.f32 %v381_v18, 0.0  ;;  %v6378_v43 = vpack.c.bf16 %v412_v60, %v412_v60  ;;  %v404_v45 = vadd.f32 %v7468_v30, %v365_v59 }
  0x45   : > { %651 = vst [vmem:[#allocation2 + $0x178] sm:$0xf] %v6401_v23  ;;  %619 = vst [vmem:[#allocation2 + $0x18c] sm:$0xf] %v6401_v23  ;;  %v405_v53 = vadd.f32 %v7468_v30, %v366_v0  ;;  %7025 = vmatpush3.bf16.msra.mxu1 %v7211_v17  ;;  %v343_v31 = vmul.f32 %v6452_v54, %v7454_v24  ;;  %v344_v4 = vmul.f32 %v6453_v34, %v7454_v24  ;;  %v1170_v54 = vld [vmem:[#allocation2 + $0x2c] sm:$0x8] }
  0x46   : > { %683 = vst [vmem:[#allocation2 + $0x164] sm:$0xf] %v6401_v23  ;;  %v367_v63 = vmul.f32 %v6500_v19, %v7454_v24  ;;  %v368_v1 = vmul.f32 %v6501_v44, %v7454_v24  ;;  %7026 = vmatprep.subr.bf16.mxu1 %v7212_v14  ;;  %v6379_v3 = vpack.c.bf16 %v413_v8, %v413_v8  ;;  %628 = vst [vmem:[#allocation2 + $0x64] sm:$0xf] %v6378_v43  ;;  %v7789_v34 = vld [vmem:[%s10141_s3 + $0x88] sm:$0xff]   ;;  %v7794_v44 = vld [vmem:[%s10141_s3 + $0x150] sm:$0xff]  }
  0x47   : > { %596 = vst [vmem:[#allocation2 + $0x78] sm:$0xf] %v6378_v43  ;;  %660 = vst [vmem:[#allocation2 + $0x50] sm:$0xf] %v6378_v43  ;;  %v436_v23 = vmax.f32 %v404_v45, 0.0  ;;  %v437_v51 = vmax.f32 %v405_v53, 0.0  ;;  %v6456_v18 = vunpack.c.l.bf16 %v6585_v20  ;;  %v382_v60 = vadd.f32 %v7468_v30, %v343_v31  ;;  %7078 = vmatprep.subr.bf16.mxu0 %v7253_v5 }
  0x48   : > { %v383_v17 = vadd.f32 %v7468_v30, %v344_v4  ;;  %v406_v59 = vadd.f32 %v7468_v30, %v367_v63  ;;  %v407_v0 = vadd.f32 %v7468_v30, %v368_v1  ;;  %629 = vst [vmem:[#allocation2 + $0x70] sm:$0xf] %v6379_v3  ;;  %597 = vst [vmem:[#allocation2 + $0x84] sm:$0xf] %v6379_v3  ;;  %v6457_v8 = vunpack.c.h.bf16 %v6585_v20  ;;  %v7797_v45 = vld [vmem:[#allocation2 + $0x38] sm:$0xf] }
  0x49   : > { %661 = vst [vmem:[#allocation2 + $0x5c] sm:$0xf] %v6379_v3  ;;  %v6402_v19 = vpack.c.bf16 %v436_v23, %v436_v23  ;;  %v6403_v21 = vpack.c.bf16 %v437_v51, %v437_v51  ;;  %v345_v43 = vmul.f32 %v6456_v18, %v7454_v24  ;;  %7027 = vmatpush3.bf16.msra.mxu1 %v7212_v14  ;;  %v414_v53 = vmax.f32 %v382_v60, 0.0  ;;  %v7802_v23 = vld [vmem:[#allocation2 + $0x44] sm:$0xf]  ;;  %v6586_v18 = vld [vmem:[%s7431_s23 + $0x28] sm:$0xff]  }
  0x4a   : > { %v415_v31 = vmax.f32 %v383_v17, 0.0  ;;  %v438_v4 = vmax.f32 %v406_v59, 0.0  ;;  %v439_v63 = vmax.f32 %v407_v0, 0.0  ;;  %7028 = vmatprep.subr.bf16.mxu1 %v7776_v33  ;;  %v346_v20 = vmul.f32 %v6457_v8, %v7454_v24  ;;  %7079 = vmatpush3.bf16.msra.mxu0 %v7253_v5  ;;  %v7822_v5 = vld [vmem:[%s10141_s3 + $0x80] sm:$0xff]  }
  0x4b   : > { %652 = vst [vmem:[#allocation2 + $0x184] sm:$0xf] %v6402_v19  ;;  %653 = vst [vmem:[#allocation2 + $0x190] sm:$0xf] %v6403_v21  ;;  %v384_v3 = vadd.f32 %v7468_v30, %v345_v43  ;;  %v1719_v14 = vsel %vm1685_vm9, %v1170_v54, 0  ;;  %v1721_v51 = vsel %vm7545_vm12, %v7797_v45, 0  ;;  %v6380_v59 = vpack.c.bf16 %v414_v53, %v414_v53  ;;  %7080 = vmatprep.subr.bf16.mxu0 %v7789_v34 }
  0x4c   : > { %v1225_v1 = vld [vmem:[#allocation2 + $0x174] sm:$0xff]  ;;  %620 = vst [vmem:[#allocation2 + $0x198] sm:$0xf] %v6402_v19  ;;  %621 = vst [vmem:[#allocation2 + $0x1a4] sm:$0xf] %v6403_v21  ;;  %v6381_v0 = vpack.c.bf16 %v415_v31, %v415_v31  ;;  %v385_v28 = vadd.f32 %v7468_v30, %v346_v20  ;;  %v1723_v53 = vsel %vm7562_vm14, %v7802_v23, 0  ;;  %v6461_v36 = vunpack.c.h.bf16 %v6586_v18 }
  0x4d   : > { %684 = vst [vmem:[#allocation2 + $0x170] sm:$0xf] %v6402_v19  ;;  %685 = vst [vmem:[#allocation2 + $0x17c] sm:$0xf] %v6403_v21  ;;  %v6107_v60 = vcombine.high %v7692_v55, %v1225_v1  ;;  %v6106_v17 = vcombine.low %v7692_v55, %v1225_v1  ;;  %v6404_v19 = vpack.c.bf16 %v438_v4, %v438_v4  ;;  %v416_v54 = vmax.f32 %v384_v3, 0.0  ;;  %v7828_v8 = vld [vmem:[#allocation2 + $0x60] sm:$0xff] }
  0x4e   : > { %v6405_v21 = vpack.c.bf16 %v439_v63, %v439_v63  ;;  %v7826_v55 = vor.u32 %v7622_v35, %v7616_v29  ;;  %7029 = vmatpush3.bf16.msra.mxu1 %v7776_v33  ;;  %630 = vst [vmem:[#allocation2 + $0x7c] sm:$0xf] %v6380_v59  ;;  %631 = vst [vmem:[#allocation2 + $0x88] sm:$0xf] %v6381_v0  ;;  %v7831_v43 = vld [vmem:[#allocation2 + $0x50] sm:$0xf]  ;;  %v6460_v35 = vunpack.c.l.bf16 %v6586_v18  ;;  %7081 = vmatpush3.bf16.msra.mxu0 %v7789_v34 }
  0x4f   : > { %2417 = vmatprep.mubr.bf16.mxu1 %v6107_v60  ;;  %598 = vst [vmem:[#allocation2 + $0x90] sm:$0xf] %v6380_v59  ;;  %599 = vst [vmem:[#allocation2 + $0x9c] sm:$0xf] %v6381_v0  ;;  %7030 = vmatprep.subr.bf16.mxu1 %v7794_v44  ;;  %v417_v33 = vmax.f32 %v385_v28, 0.0  ;;  %v6382_v31 = vpack.c.bf16 %v416_v54, %v416_v54  ;;  %v1725_v4 = vsel %vm7586_vm15, %v7831_v43, 0 }
  0x50   : > { %662 = vst [vmem:[#allocation2 + $0x68] sm:$0xf] %v6380_v59  ;;  %663 = vst [vmem:[#allocation2 + $0x74] sm:$0xf] %v6381_v0  ;;  %2418 = vmatmul.mubr.bf16.gmra.mxu1 %v6106_v17  ;;  %v7842_v63 = vld [vmem:[#allocation2 + $0x6c] sm:$0xff]  ;;  %v7846_v20 = vcombine.low %v1719_v14, %v1721_v51  ;;  %v347_v3 = vmul.f32 %v6460_v35, %v7454_v24  ;;  %v695_v60 = vadd.s32 48, %v7396_v6  ;;  %7082 = vmatprep.subr.bf16.mxu0 %v7822_v5 }
  0x51   : > { %654 = vst [vmem:[#allocation2 + $0x19c] sm:$0xf] %v6404_v19  ;;  %655 = vst [vmem:[#allocation2 + $0x1a8] sm:$0xf] %v6405_v21  ;;  %v7844_v1 = vld [vmem:[#allocation2 + $0x5c] sm:$0xf]  ;;  %v6074_v47 = vcombine.high %v7828_v8, %v7842_v63  ;;  %v6073_v18 = vcombine.low %v7828_v8, %v7842_v63  ;;  %v6383_v59 = vpack.c.bf16 %v417_v33, %v417_v33 }
  0x52   : > { %622 = vst [vmem:[#allocation2 + $0x1b0] sm:$0xf] %v6404_v19  ;;  %686 = vst [vmem:[#allocation2 + $0x188] sm:$0xf] %v6404_v19  ;;  %v1410_v17 = vshrl.u32 %v7669_v15, 16  ;;  %v7856_v14 = vcombine.low %v1723_v53, %v1725_v4  ;;  %v1227_v51 = vld [vmem:[#allocation2 + $0x180] sm:$0xff]  ;;  %7031 = vmatpush3.bf16.msra.mxu1 %v7794_v44  ;;  %v348_v15 = vmul.f32 %v6461_v36, %v7454_v24  ;;  %7083 = vmatpush3.bf16.msra.mxu0 %v7822_v5 }
  0x53   : > { %687 = vst [vmem:[#allocation2 + $0x194] sm:$0xf] %v6405_v21  ;;  %632 = vst [vmem:[#allocation2 + $0x94] sm:$0xf] %v6382_v31  ;;  %v1229_v0 = vld [vmem:[#allocation2 + $0x18c] sm:$0xff]  ;;  %v386_v34 = vadd.f32 %v7468_v30, %v347_v3  ;;  %v767_v19 = vand.u32 15, %v695_v60  ;;  %2329 = vmatprep.mubr.bf16.mxu0 %v6074_v47  ;;  %7032 = vmatprep.subr.bf16.mxu1 %v7816_v50 }
  0x54   : > { %600 = vst [vmem:[#allocation2 + $0xa8] sm:$0xf] %v6382_v31  ;;  %664 = vst [vmem:[#allocation2 + $0x80] sm:$0xf] %v6382_v31  ;;  %v1412_v21 = vrot.slane %v1410_v17, 4  ;;  %v7863_v28 = vld [vmem:[%s7431_s23 + $0x30] sm:$0xff]   ;;  %v6110_v54 = vcombine.high %v1227_v51, %v1229_v0  ;;  %v6109_v35 = vcombine.low %v1227_v51, %v1229_v0  ;;  %2330 = vmatmul.mubr.bf16.gmra.mxu0 %v6073_v18 }
  0x55   : > { %v7226_v53 = vld [vmem:[%s10141_s3 + $0x140] sm:$0xff]   ;;  %633 = vst [vmem:[#allocation2 + $0xa0] sm:$0xf] %v6383_v59  ;;  %601 = vst [vmem:[#allocation2 + $0xb4] sm:$0xf] %v6383_v59  ;;  %v697_v44 = vadd.s32 64, %v7396_v6  ;;  %v387_v31 = vadd.f32 %v7468_v30, %v348_v15  ;;  %v6464_v30 = vunpack.c.l.bf16 %v7863_v28  ;;  %v6465_v51 = vunpack.c.h.bf16 %v7863_v28 }
  0x56   : > { %665 = vst [vmem:[#allocation2 + $0x8c] sm:$0xf] %v6383_v59  ;;  %v7278_v33 = vld [vmem:[%s10141_s3 + $0x1f8] sm:$0xff]   ;;  %v418_v4 = vmax.f32 %v386_v34, 0.0  ;;  %vm7876_vm8 = vcmp.ne.s32.totalorder %v767_v19, 0  ;;  %v1413_v3 = vor.u32 %v1412_v21, %v7690_v49  ;;  %2425 = vmatprep.mubr.bf16.mxu1 %v6110_v54  ;;  %v7883_v17 = vld [vmem:[#allocation2 + $0x84] sm:$0xff]  ;;  %7033 = vmatpush3.bf16.msra.mxu1 %v7816_v50 }
  0x57   : > { %v7881_v60 = vld [vmem:[#allocation2 + $0x78] sm:$0xff]  ;;  %v7885_v47 = vld [vmem:[#allocation2 + $0x68] sm:$0xf]  ;;  %v1727_v18 = vsel %vm7719_vm7, %v7844_v1, 0  ;;  %v781_v59 = vand.u32 15, %v697_v44  ;;  %v419_v34 = vmax.f32 %v387_v31, 0.0  ;;  %6884 = vmatprep.subr.bf16.mxu0 %v7278_v33  ;;  %7034 = vmatprep.subr.bf16.mxu1 %v7226_v53  ;;  %vm1305_vm9 = vmpackc.low %vm7876_vm8, %vm7876_vm8 }
  0x58   : > { %v6077_v49 = vcombine.high %v7881_v60, %v7883_v17  ;;  %v7895_v0 = vld [vmem:[#allocation2 + $0x198] sm:$0xff]  ;;  %v7897_v15 = vld [vmem:[#allocation2 + $0x1a4] sm:$0xff]  ;;  %v6384_v19 = vpack.c.bf16 %v418_v4, %v418_v4  ;;  %v7900_v21 = vld [vmem:[#allocation2 + $0x74] sm:$0xf]  ;;  %v7903_v54 = vadd.s32 80, %v7396_v6  ;;  %2426 = vmatmul.mubr.bf16.gmra.mxu1 %v6109_v35  ;;  %v6076_v28 = vcombine.low %v7881_v60, %v7883_v17 }
  0x59   : > { %v6113_v5 = vcombine.high %v7895_v0, %v7897_v15  ;;  %v6112_v44 = vcombine.low %v7895_v0, %v7897_v15  ;;  %v7231_v50 = vld [vmem:[%s10141_s3 + $0x78] sm:$0xff]   ;;  %v1414_v33 = vrot.slane %v1413_v3, 4  ;;  %v6385_v31 = vpack.c.bf16 %v419_v34, %v419_v34  ;;  %v7919_v4 = vld [vmem:[#allocation2] sm:$0xff] }
  0x5a   : > { %2337 = vmatprep.mubr.bf16.mxu0 %v6077_v49  ;;  %v7917_v35 = vld [vmem:[#allocation2 + $0x90] sm:$0xff]  ;;  %634 = vst [vmem:[#allocation2 + $0xac] sm:$0xf] %v6384_v19  ;;  %602 = vst [vmem:[#allocation2 + $0xc0] sm:$0xf] %v6384_v19  ;;  %v1337_v0 = vsel %vm1305_vm9, 65537, %v7919_v4  ;;  %7035 = vmatpush3.bf16.msra.mxu1 %v7226_v53 }
  0x5b   : > { %666 = vst [vmem:[#allocation2 + $0x98] sm:$0xf] %v6384_v19  ;;  %vm7922_vm11 = vcmp.ne.s32.totalorder %v781_v59, 0  ;;  %v7929_v36 = vld [vmem:[%s10139_s1] ss:$0 sm:$0xff]  ;;  %2433 = vmatprep.mubr.bf16.mxu1 %v6113_v5  ;;  %v1419_v49 = vsel %vm7520_vm10, %v1414_v33, %v7505_v52  ;;  %v1426_v34 = vshll.u32 %v1337_v0, 16  ;;  %6748 = vmatprep.subr.bf16.mxu1 %v7231_v50 }
  0x5c   : > { %v349_v3 = vmul.f32 %v7929_v36, %v6464_v30  ;;  %v1430_v19 = vshrl.u32 %v1337_v0, 16  ;;  %vm1307_vm12 = vmpackc.low %vm7922_vm11, %vm7922_vm11  ;;  %v7940_v25 = vld [vmem:[#allocation2 + $0x9c] sm:$0xff]  ;;  %635 = vst [vmem:[#allocation2 + $0xb8] sm:$0xf] %v6385_v31  ;;  %vm7942_vm13 = vcmp.ne.s16.totalorder %v1419_v49, 0  ;;  %v350_v0 = vmul.f32 %v7929_v36, %v6465_v51  ;;  %2338 = vmatmul.mubr.bf16.gmra.mxu0 %v6076_v28 }
  0x5d   : > { %603 = vst [vmem:[#allocation2 + $0xcc] sm:$0xf] %v6385_v31  ;;  %667 = vst [vmem:[#allocation2 + $0xa4] sm:$0xf] %v6385_v31  ;;  %v7946_v5 = vld [vmem:[#allocation2 + $0x80] sm:$0xf]  ;;  %v6080_v53 = vcombine.high %v7917_v35, %v7940_v25  ;;  %v6079_v29 = vcombine.low %v7917_v35, %v7940_v25 }
  0x5e   : > { %v7949_v33 = vsel %vm1307_vm12, 65537, %v7919_v4  ;;  %v795_v42 = vand.u32 15, %v7903_v54  ;;  %v1428_v59 = vrot.slane %v1426_v34, 5  ;;  %v1728_v31 = vsel %vm7942_vm13, %v7828_v8, 0  ;;  %v7961_v49 = vld [vmem:[%s10140_s2] ss:$0 sm:$0xff] }
  0x5f   : > { %v388_v24 = vadd.f32 %v7961_v49, %v349_v3  ;;  %v1729_v51 = vsel %vm7942_vm13, %v7885_v47, 0  ;;  %v7968_v54 = vcombine.low %v7753_v2, %v1728_v31  ;;  %v7971_v50 = vcombine.high %v7753_v2, %v1728_v31  ;;  %v7973_v34 = vld [vmem:[#allocation2 + $0x8c] sm:$0xf]  ;;  %2345 = vmatprep.mubr.bf16.mxu0 %v6080_v53 }
  0x60   : > { %v1432_v8 = vrot.slane %v1430_v19, 4  ;;  %v1429_v28 = vsel %vm7520_vm10, %v7529_v13, %v1428_v59  ;;  %v6147_v3 = vcombine.low %v1727_v18, %v1729_v51  ;;  %v1446_v2 = vshll.u32 %v7949_v33, 16  ;;  %2434 = vmatmul.mubr.bf16.gmra.mxu1 %v6112_v44 }
  0x61   : > { %vm7985_vm14 = vcmp.ne.s16.totalorder %v1429_v28, 0  ;;  %v1450_v53 = vshrl.u32 %v7949_v33, 16  ;;  %v389_v31 = vadd.f32 %v7961_v49, %v350_v0  ;;  %v7991_v57 = vld [vmem:[#allocation2 + $0xa8] sm:$0xff]  ;;  %v6588_v28 = vld [vmem:[%s7431_s23 + $0x38] sm:$0xff]   ;;  %v420_v0 = vmax.f32 %v388_v24, 0.0 }
  0x62   : > { %v1433_v19 = vor.u32 %v1432_v8, %v1428_v59  ;;  %v1730_v32 = vsel %vm7985_vm14, %v7842_v63, 0  ;;  %v2890_v41 = vshrl.u32 %v6147_v3, 16  ;;  %v2893_v18 = vshll.u32 %v6147_v3, 16 }
  0x63   : > { %v10206_v59 = vcombine.low %v7797_v45, %v7802_v23  ;;  %v1448_v8 = vrot.slane %v1446_v2, 5  ;;  %v421_v44 = vmax.f32 %v389_v31, 0.0  ;;  %v8002_v62 = vld [vmem:[#allocation2 + $0xb4] sm:$0xff]  ;;  %v1731_v63 = vsel %vm7985_vm14, %v7900_v21, 0 }
  0x64   : > { %v1434_v33 = vrot.slane %v1433_v19, 4  ;;  %v8007_v61 = vrot.slane %v2890_v41, 3  ;;  %v8009_v3 = vrot.slane %v2893_v18, 4  ;;  %vm8011_vm15 = vcmp.ne.s32.totalorder %v795_v42, 0  ;;  %v7232_v45 = vld [vmem:[%s10141_s3 + $0x38] sm:$0xff]   ;;  %2346 = vmatmul.mubr.bf16.gmra.mxu0 %v6079_v29  ;;  %v7238_v29 = vld [vmem:[%s10141_s3 + $0x70] sm:$0xff]  }
  0x65   : > { %7036 = vmatprep.mubr.bf16.mxu1 %v10206_v59  ;;  %v6083_v23 = vcombine.high %v7991_v57, %v8002_v62  ;;  %v1449_v41 = vsel %vm7520_vm10, %v7529_v13, %v1448_v8  ;;  %vm1309_vm0 = vmpackc.low %vm8011_vm15, %vm8011_vm15  ;;  %v6468_v42 = vunpack.c.l.bf16 %v6588_v28  ;;  %v6386_v19 = vpack.c.bf16 %v420_v0, %v420_v0  ;;  %v8037_v18 = vld [vmem:[#allocation2 + $0x98] sm:$0xf]  ;;  %v8039_v59 = vld [vmem:[#allocation2 + $0xa4] sm:$0xf] }
  0x66   : > { %v1439_v24 = vsel %vm7520_vm10, %v1434_v33, %v7505_v52  ;;  %vm8033_vm2 = vcmp.ne.s16.totalorder %v1449_v41, 0  ;;  %v6387_v31 = vpack.c.bf16 %v421_v44, %v421_v44  ;;  %v6082_v33 = vcombine.low %v7991_v57, %v8002_v62 }
  0x67   : > { %vm8029_vm1 = vcmp.ne.s16.totalorder %v1439_v24, 0  ;;  %v8052_v0 = vsel %vm8033_vm2, %v7883_v17, 0  ;;  %2353 = vmatprep.mubr.bf16.mxu0 %v6083_v23  ;;  %636 = vst [vmem:[#allocation2 + $0xc4] sm:$0xf] %v6386_v19  ;;  %604 = vst [vmem:[#allocation2 + $0xd8] sm:$0xf] %v6386_v19  ;;  %v6469_v51 = vunpack.c.h.bf16 %v6588_v28  ;;  %v351_v48 = vmul.f32 %v7929_v36, %v6468_v42 }
  0x68   : > { %v1732_v24 = vsel %vm8029_vm1, %v7881_v60, 0  ;;  %v1733_v41 = vsel %vm8029_vm1, %v7946_v5, 0  ;;  %637 = vst [vmem:[#allocation2 + $0xd0] sm:$0xf] %v6387_v31  ;;  %605 = vst [vmem:[#allocation2 + $0xe4] sm:$0xf] %v6387_v31  ;;  %v6081_v26 = vcombine.low %v8037_v18, %v8039_v59  ;;  %v6472_v42 = vunpack.c.l.bf16 %v8076_v46 }
  0x69   : > { %v8060_v60 = vcombine.low %v1730_v32, %v1732_v24  ;;  %v8062_v22 = vcombine.high %v1730_v32, %v1732_v24  ;;  %668 = vst [vmem:[#allocation2 + $0xb0] sm:$0xf] %v6386_v19  ;;  %669 = vst [vmem:[#allocation2 + $0xbc] sm:$0xf] %v6387_v31  ;;  %v1341_v17 = vsel %vm1309_vm0, 65537, %v7919_v4  ;;  %v8070_v23 = vcombine.low %v1731_v63, %v1733_v41  ;;  %v7239_v32 = vld [vmem:[%s10141_s3 + $0x30] sm:$0xff]  }
  0x6a   : > { %v1452_v2 = vrot.slane %v1450_v53, 4  ;;  %v1466_v24 = vshll.u32 %v1341_v17, 16  ;;  %v1470_v44 = vshrl.u32 %v1341_v17, 16  ;;  %v10213_v19 = vcombine.low %v7831_v43, %v7844_v1  ;;  %v7244_v1 = vld [vmem:[%s10141_s3 + $0x68] sm:$0xff]  }
  0x6b   : > { %v701_v31 = vadd.s32 96, %v7396_v6  ;;  %v703_v63 = vadd.s32 112, %v7396_v6  ;;  %v10214_v41 = vcombine.low %v7885_v47, %v7900_v21  ;;  %v352_v28 = vmul.f32 %v7929_v36, %v6469_v51 }
  0x6c   : > { %7037 = vmatmul.mubr.bf16.vlgmr.msra.gmra.mxu1 %v10213_v19  ;;  %v1453_v53 = vor.u32 %v1452_v2, %v1448_v8  ;;  %v1468_v17 = vrot.slane %v1466_v24, 5  ;;  %v1472_v12 = vrot.slane %v1470_v44, 4  ;;  %2354 = vmatmul.mubr.bf16.gmra.mxu0 %v6082_v33 }
  0x6d   : > { %6749 = vmatpush3.bf16.msra.mxu1 %v7232_v45  ;;  %7040 = vmatprep.mubr.bf16.mxu1 %v10214_v41  ;;  %v809_v43 = vand.u32 15, %v701_v31  ;;  %v390_v45 = vadd.f32 %v7961_v49, %v351_v48  ;;  %v823_v2 = vand.u32 15, %v703_v63  ;;  %v391_v24 = vadd.f32 %v7961_v49, %v352_v28  ;;  %v7252_v41 = vld [vmem:[%s10141_s3 + $0x20] sm:$0xff]  }
  0x6e   : > { %6750 = vmatprep.subr.bf16.mxu1 %v7238_v29  ;;  %v1454_v47 = vrot.slane %v1453_v53, 4  ;;  %v1469_v21 = vsel %vm7520_vm10, %v7529_v13, %v1468_v17  ;;  %v1473_v8 = vor.u32 %v1472_v12, %v1468_v17  ;;  %v6473_v48 = vunpack.c.h.bf16 %v8076_v46  ;;  %v8108_v19 = vld [vmem:[#allocation2 + $0xc0] sm:$0xff]  ;;  %v7245_v46 = vld [vmem:[%s10141_s3 + $0x28] sm:$0xff]  }
  0x6f   : > { %vm8098_vm7 = vcmp.ne.s16.totalorder %v1469_v21, 0  ;;  %vm8102_vm8 = vcmp.ne.s32.totalorder %v809_v43, 0  ;;  %v8110_v31 = vld [vmem:[#allocation2 + $0xcc] sm:$0xff]  ;;  %v422_v33 = vmax.f32 %v390_v45, 0.0  ;;  %v353_v53 = vmul.f32 %v7929_v36, %v6472_v42  ;;  %v7251_v17 = vld [vmem:[%s10141_s3 + $0x60] sm:$0xff]  }
  0x70   : > { %v1459_v12 = vsel %vm7520_vm10, %v1454_v47, %v7505_v52  ;;  %v1738_v51 = vsel %vm8098_vm7, %v7940_v25, 0  ;;  %v1739_v63 = vsel %vm8098_vm7, %v8039_v59, 0  ;;  %vm1311_vm11 = vmpackc.low %vm8102_vm8, %vm8102_vm8  ;;  %v1474_v25 = vrot.slane %v1473_v8, 4  ;;  %v8145_v47 = vld [vmem:[#allocation2 + $0xb0] sm:$0xf] }
  0x71   : > { %6751 = vmatpush3.bf16.msra.mxu1 %v7239_v32  ;;  %v6086_v32 = vcombine.high %v8108_v19, %v8110_v31  ;;  %vm8126_vm9 = vcmp.ne.s16.totalorder %v1459_v12, 0  ;;  %v6085_v45 = vcombine.low %v8108_v19, %v8110_v31  ;;  %v1343_v42 = vsel %vm1311_vm11, 65537, %v7919_v4 }
  0x72   : > { %6752 = vmatprep.subr.bf16.mxu1 %v7244_v1  ;;  %v1736_v43 = vsel %vm8126_vm9, %v7917_v35, 0  ;;  %v1737_v28 = vsel %vm8126_vm9, %v8037_v18, 0  ;;  %v8147_v1 = vld [vmem:[#allocation2 + $0xbc] sm:$0xf]  ;;  %v10221_v21 = vcombine.low %v7946_v5, %v7973_v34  ;;  %v10222_v18 = vsel %vm8033_vm2, %v7973_v34, 0 }
  0x73   : > { %2361 = vmatprep.mubr.bf16.mxu0 %v6086_v32  ;;  %v8154_v35 = vcombine.low %v8052_v0, %v1736_v43  ;;  %v8157_v8 = vcombine.high %v8052_v0, %v1736_v43  ;;  %v8163_v44 = vcombine.low %v10222_v18, %v1737_v28  ;;  %v1486_v12 = vshll.u32 %v1343_v42, 16 }
  0x74   : > { %7041 = vmatmul.mubr.bf16.gmra.mxu1 %v10221_v21  ;;  %v1479_v5 = vsel %vm7520_vm10, %v1474_v25, %v7505_v52  ;;  %v1490_v32 = vshrl.u32 %v1343_v42, 16  ;;  %v423_v0 = vmax.f32 %v391_v24, 0.0  ;;  %v6388_v43 = vpack.c.bf16 %v422_v33, %v422_v33  ;;  %2362 = vmatmul.mubr.bf16.gmra.mxu0 %v6085_v45 }
  0x75   : > { %7044 = vmatprep.mubr.bf16.mxu1 %v6081_v26  ;;  %6753 = vmatpush3.bf16.msra.mxu1 %v7245_v46  ;;  %v1488_v21 = vrot.slane %v1486_v12, 5  ;;  %vm8171_vm12 = vcmp.ne.s16.totalorder %v1479_v5, 0  ;;  %vm8175_vm13 = vcmp.ne.s32.totalorder %v823_v2, 0  ;;  %v354_v28 = vmul.f32 %v7929_v36, %v6473_v48  ;;  %v7257_v26 = vld [vmem:[%s10141_s3 + $0x58] sm:$0xff]  }
  0x76   : > { %6754 = vmatprep.subr.bf16.mxu1 %v7251_v17  ;;  %v1740_v24 = vsel %vm8171_vm12, %v7991_v57, 0  ;;  %v1741_v46 = vsel %vm8171_vm12, %v8145_v47, 0  ;;  %v6389_v33 = vpack.c.bf16 %v423_v0, %v423_v0  ;;  %638 = vst [vmem:[#allocation2 + $0xdc] sm:$0xf] %v6388_v43  ;;  %606 = vst [vmem:[#allocation2 + $0xf0] sm:$0xf] %v6388_v43  ;;  %v6084_v57 = vcombine.low %v8145_v47, %v8147_v1 }
  0x77   : > { %670 = vst [vmem:[#allocation2 + $0xc8] sm:$0xf] %v6388_v43  ;;  %vm1313_vm14 = vmpackc.low %vm8175_vm13, %vm8175_vm13  ;;  %v1492_v2 = vrot.slane %v1490_v32, 4  ;;  %v1489_v48 = vsel %vm7520_vm10, %v7529_v13, %v1488_v21  ;;  %v8197_v25 = vcombine.low %v1738_v51, %v1740_v24  ;;  %v8199_v17 = vcombine.high %v1738_v51, %v1740_v24  ;;  %v6590_v32 = vld [vmem:[%s7431_s23 + $0x48] sm:$0xff]   ;;  %v7258_v51 = vld [vmem:[%s10141_s3 + $0x18] sm:$0xff]  }
  0x78   : > { %vm8201_vm15 = vcmp.ne.s16.totalorder %v1489_v48, 0  ;;  %639 = vst [vmem:[#allocation2 + $0xe8] sm:$0xf] %v6389_v33  ;;  %607 = vst [vmem:[#allocation2 + $0xfc] sm:$0xf] %v6389_v33  ;;  %v1345_v18 = vsel %vm1313_vm14, 65537, %v7919_v4  ;;  %v392_v5 = vadd.f32 %v7961_v49, %v353_v53 }
  0x79   : > { %671 = vst [vmem:[#allocation2 + $0xd4] sm:$0xf] %v6389_v33  ;;  %v1493_v12 = vor.u32 %v1492_v2, %v1488_v21  ;;  %6755 = vmatpush3.bf16.msra.mxu1 %v7252_v41  ;;  %v1742_v45 = vsel %vm8201_vm15, %v8002_v62, 0  ;;  %v1743_v47 = vsel %vm8201_vm15, %v8147_v1, 0  ;;  %v1506_v0 = vshll.u32 %v1345_v18, 16  ;;  %v7263_v53 = vld [vmem:[%s10141_s3 + $0x50] sm:$0xff]  }
  0x7a   : > { %v1510_v43 = vshrl.u32 %v1345_v18, 16  ;;  %6756 = vmatprep.subr.bf16.mxu1 %v7257_v26  ;;  %v393_v21 = vadd.f32 %v7961_v49, %v354_v28  ;;  %v424_v30 = vmax.f32 %v392_v5, 0.0  ;;  %v705_v34 = vadd.s32 128, %v7396_v6  ;;  %v7264_v28 = vld [vmem:[%s10141_s3 + $0x10] sm:$0xff]  }
  0x7b   : > { %v1494_v41 = vrot.slane %v1493_v12, 4  ;;  %v1508_v24 = vrot.slane %v1506_v0, 5  ;;  %v6476_v33 = vunpack.c.l.bf16 %v6590_v32  ;;  %v6477_v2 = vunpack.c.h.bf16 %v6590_v32 }
  0x7c   : > { %7045 = vmatmul.mubr.bf16.gmra.mxu1 %v6084_v57  ;;  %v1512_v62 = vrot.slane %v1510_v43, 4  ;;  %v425_v26 = vmax.f32 %v393_v21, 0.0  ;;  %v6390_v48 = vpack.c.bf16 %v424_v30, %v424_v30  ;;  %v837_v42 = vand.u32 15, %v705_v34 }
  0x7d   : > { %v1499_v1 = vsel %vm7520_vm10, %v1494_v41, %v7505_v52  ;;  %6757 = vmatpush3.bf16.msra.mxu1 %v7258_v51  ;;  %v1199_v18 = vld [vmem:[#allocation2 + $0xd8] sm:$0xff]  ;;  %v1509_v57 = vsel %vm7520_vm10, %v7529_v13, %v1508_v24  ;;  %v355_v0 = vmul.f32 %v7929_v36, %v6476_v33  ;;  %v7270_v51 = vld [vmem:[%s10141_s3 + $0x48] sm:$0xff]   ;;  %v8255_v34 = vcombine.low %v1739_v63, %v1741_v46 }
  0x7e   : > { %v1196_v12 = vld [vmem:[#allocation2 + $0xc8] sm:$0xf]  ;;  %vm8231_vm0 = vcmp.ne.s16.totalorder %v1499_v1, 0  ;;  %v1513_v32 = vor.u32 %v1512_v62, %v1508_v24  ;;  %6758 = vmatprep.subr.bf16.mxu1 %v7263_v53  ;;  %vm8239_vm1 = vcmp.ne.s16.totalorder %v1509_v57, 0  ;;  %v6391_v30 = vpack.c.bf16 %v425_v26, %v425_v26  ;;  %672 = vst [vmem:[#allocation2 + $0xe0] sm:$0xf] %v6390_v48 }
  0x7f   : > { %v1744_v41 = vsel %vm8231_vm0, %v8108_v19, 0  ;;  %v1745_v21 = vsel %vm8231_vm0, %v1196_v12, 0  ;;  %608 = vst [vmem:[#allocation2 + $0x108] sm:$0xf] %v6390_v48  ;;  %640 = vst [vmem:[#allocation2 + $0xf4] sm:$0xf] %v6390_v48  ;;  %v356_v46 = vmul.f32 %v7929_v36, %v6477_v2 }
  0x80   : > { %v7271_v53 = vld [vmem:[%s10141_s3 + $0x8] sm:$0xff]   ;;  %v8259_v19 = vld [vmem:[#allocation2 + $0xd4] sm:$0xf]  ;;  %v1746_v62 = vsel %vm8239_vm1, %v8110_v31, 0  ;;  %v8264_v33 = vcombine.low %v1742_v45, %v1744_v41  ;;  %v8266_v1 = vcombine.high %v1742_v45, %v1744_v41  ;;  %v8270_v48 = vcombine.low %v1743_v47, %v1745_v21  ;;  %673 = vst [vmem:[#allocation2 + $0xec] sm:$0xf] %v6391_v30 }
  0x81   : > { %v8257_v24 = vld [vmem:[#allocation2 + $0xe4] sm:$0xff]  ;;  %v6087_v29 = vcombine.low %v1196_v12, %v8259_v19  ;;  %609 = vst [vmem:[#allocation2 + $0x114] sm:$0xf] %v6391_v30  ;;  %641 = vst [vmem:[#allocation2 + $0x100] sm:$0xf] %v6391_v30  ;;  %6759 = vmatpush3.bf16.msra.mxu1 %v7264_v28  ;;  %vm1121_vm2 = vcmp.ne.s32.totalorder %v837_v42, 0  ;;  %v394_v45 = vadd.f32 %v7961_v49, %v355_v0 }
  0x82   : > { %10233 = vst [vmem:[#allocation13_spill] sm:$0xff] %v8264_v33  ;;  %10234 = vst [vmem:[#allocation14_spill] sm:$0xff] %v8266_v1  ;;  %v6089_v26 = vcombine.high %v1199_v18, %v8257_v24  ;;  %v6088_v59 = vcombine.low %v1199_v18, %v8257_v24  ;;  %v7275_v31 = vld [vmem:[%s10141_s3 + $0x40] sm:$0xff]   ;;  %v1514_v63 = vrot.slane %v1513_v32, 4  ;;  %6760 = vmatprep.subr.bf16.mxu1 %v7270_v51  ;;  %v1747_v47 = vsel %vm8239_vm1, %v8259_v19, 0  ;;  %v7304_v12 = vld [vmem:[%s7431_s23 + $0x50] sm:$0xff]  }
  0x83   : > { %7048 = vmatprep.mubr.bf16.mxu1 %v6087_v29  ;;  %vm1315_vm7 = vmpackc.low %vm1121_vm2, %vm1121_vm2  ;;  %v707_v28 = vadd.s32 144, %v7396_v6  ;;  %v6480_v57 = vunpack.c.l.bf16 %v7304_v12  ;;  %v8284_v5 = vadd.s32 160, %v7396_v6  ;;  %v395_v32 = vadd.f32 %v7961_v49, %v356_v46  ;;  %v7276_v30 = vld [vmem:[%s10141_s3] sm:$0xff]  }
  0x84   : > { %2369 = vmatprep.mubr.bf16.mxu0 %v6089_v26  ;;  %v1347_v2 = vsel %vm1315_vm7, 65537, %v7919_v4  ;;  %v1519_v42 = vsel %vm7520_vm10, %v1514_v63, %v7505_v52  ;;  %v426_v0 = vmax.f32 %v394_v45, 0.0  ;;  %v8306_v45 = vld [vmem:[%s10141_s3 + $0x238] sm:$0xff]  }
  0x85   : > { %2370 = vmatmul.mubr.bf16.gmra.mxu0 %v6088_v59  ;;  %v1526_v51 = vshll.u32 %v1347_v2, 16  ;;  %v1530_v43 = vshrl.u32 %v1347_v2, 16  ;;  %vm8291_vm8 = vcmp.ne.s16.totalorder %v1519_v42, 0  ;;  %v851_v21 = vand.u32 15, %v707_v28  ;;  %6761 = vmatpush3.bf16.msra.mxu1 %v7271_v53  ;;  %v1200_v19 = vld [vmem:[#allocation2 + $0xe0] sm:$0xf] }
  0x86   : > { %v1748_v26 = vsel %vm8291_vm8, %v1199_v18, 0  ;;  %v8300_v29 = vld [vmem:[#allocation2 + $0xf0] sm:$0xff]  ;;  %v427_v59 = vmax.f32 %v395_v32, 0.0  ;;  %v6392_v63 = vpack.c.bf16 %v426_v0, %v426_v0  ;;  %v357_v46 = vmul.f32 %v7929_v36, %v6480_v57  ;;  %6762 = vmatprep.subr.bf16.mxu1 %v7275_v31 }
  0x87   : > { %v1528_v53 = vrot.slane %v1526_v51, 5  ;;  %v8308_v28 = vcombine.low %v1746_v62, %v1748_v26  ;;  %v8310_v12 = vcombine.high %v1746_v62, %v1748_v26  ;;  %v711_v2 = vadd.s32 176, %v7396_v6  ;;  %v8313_v18 = vld [vmem:[#allocation2 + $0xec] sm:$0xf] }
  0x88   : > { %v1749_v42 = vsel %vm8291_vm8, %v1200_v19, 0  ;;  %v1205_v32 = vld [vmem:[#allocation2 + $0xfc] sm:$0xff]  ;;  %v6393_v36 = vpack.c.bf16 %v427_v59, %v427_v59  ;;  %674 = vst [vmem:[#allocation2 + $0xf8] sm:$0xf] %v6392_v63  ;;  %vm1123_vm9 = vcmp.ne.s32.totalorder %v851_v21, 0  ;;  %v1532_v31 = vrot.slane %v1530_v43, 4 }
  0x89   : > { %10237 = vst [vmem:[#allocation15_spill] sm:$0xff] %v8308_v28  ;;  %10238 = vst [vmem:[#allocation16_spill] sm:$0xff] %v8310_v12  ;;  %v1529_v57 = vsel %vm7520_vm10, %v7529_v13, %v1528_v53  ;;  %v6090_v62 = vcombine.low %v1200_v19, %v8313_v18  ;;  %v6092_v0 = vcombine.high %v8300_v29, %v1205_v32  ;;  %6763 = vmatpush3.bf16.msra.mxu1 %v7276_v30  ;;  %v8329_v59 = vld [vmem:[#allocation2 + $0x128] sm:$0xf]  ;;  %v8331_v19 = vld [vmem:[#allocation2 + $0x134] sm:$0xf] }
  0x8a   : > { %610 = vst [vmem:[#allocation2 + $0x120] sm:$0xf] %v6392_v63  ;;  %642 = vst [vmem:[#allocation2 + $0x10c] sm:$0xf] %v6392_v63  ;;  %v6091_v51 = vcombine.low %v8300_v29, %v1205_v32  ;;  %vm8323_vm12 = vcmp.ne.s16.totalorder %v1529_v57, 0  ;;  %v1533_v21 = vor.u32 %v1532_v31, %v1528_v53  ;;  %v396_v26 = vadd.f32 %v7961_v49, %v357_v46 }
  0x8b   : > { %vm1317_vm11 = vmpackc.low %vm1123_vm9, %vm1123_vm9  ;;  %675 = vst [vmem:[#allocation2 + $0x104] sm:$0xf] %v6393_v36  ;;  %7116 = vmatprep.subr.bf16.mxu1 %v8306_v45  ;;  %v1750_v30 = vsel %vm8323_vm12, %v8257_v24, 0  ;;  %7049 = vmatmul.mubr.bf16.gmra.mxu1 %v6090_v62  ;;  %v8337_v63 = vcombine.low %v1747_v47, %v1749_v42  ;;  %v865_v49 = vand.u32 15, %v8284_v5  ;;  %v879_v46 = vand.u32 15, %v711_v2 }
  0x8c   : > { %v1349_v43 = vsel %vm1317_vm11, 65537, %v7919_v4  ;;  %611 = vst [vmem:[#allocation2 + $0x12c] sm:$0xf] %v6393_v36  ;;  %643 = vst [vmem:[#allocation2 + $0x118] sm:$0xf] %v6393_v36  ;;  %2377 = vmatprep.mubr.bf16.mxu0 %v6092_v0  ;;  %v1534_v31 = vrot.slane %v1533_v21, 4 }
  0x8d   : > { %v1546_v57 = vshll.u32 %v1349_v43, 16  ;;  %v1550_v53 = vshrl.u32 %v1349_v43, 16  ;;  %2378 = vmatmul.mubr.bf16.gmra.mxu0 %v6091_v51  ;;  %v428_v36 = vmax.f32 %v396_v26, 0.0  ;;  %v1751_v38 = vsel %vm8323_vm12, %v8313_v18, 0  ;;  %v8352_v5 = vld [vmem:[#allocation2 + $0x140] sm:$0xf] }
  0x8e   : > { %v1539_v47 = vsel %vm7520_vm10, %v1534_v31, %v7505_v52  ;;  %vm1125_vm13 = vcmp.ne.s32.totalorder %v865_v49, 0  ;;  %vm8348_vm14 = vcmp.ne.s32.totalorder %v879_v46, 0  ;;  %v8354_v2 = vld [vmem:[#allocation2 + $0x14c] sm:$0xf]  ;;  %vm1717_vm11 = vcmp.ne.s16.totalorder %v7529_v13, 0 }
  0x8f   : > { %v1548_v28 = vrot.slane %v1546_v57, 5  ;;  %v1552_v12 = vrot.slane %v1550_v53, 4  ;;  %v6394_v42 = vpack.c.bf16 %v428_v36, %v428_v36  ;;  %v1204_v18 = vld [vmem:[#allocation2 + $0xf8] sm:$0xf]  ;;  %vm8359_vm15 = vcmp.ne.s16.totalorder %v1539_v47, 0  ;;  %vm1319_vm0 = vmpackc.low %vm1125_vm13, %vm1125_vm13 }
  0x90   : > { %v1752_v26 = vsel %vm8359_vm15, %v8300_v29, 0  ;;  %v1753_v57 = vsel %vm8359_vm15, %v1204_v18, 0  ;;  %v1351_v53 = vsel %vm1319_vm0, 65537, %v7919_v4  ;;  %vm1321_vm2 = vmpackc.low %vm8348_vm14, %vm8348_vm14  ;;  %vm2819_vm12 = vsmask.f32 4352 }
  0x91   : > { %v1549_v0 = vsel %vm7520_vm10, %v7529_v13, %v1548_v28  ;;  %v1553_v41 = vor.u32 %v1552_v12, %v1548_v28  ;;  %676 = vst [vmem:[#allocation2 + $0x110] sm:$0xf] %v6394_v42  ;;  %612 = vst [vmem:[#allocation2 + $0x138] sm:$0xf] %v6394_v42  ;;  %v1207_v28 = vld [vmem:[#allocation2 + $0x108] sm:$0xff]  ;;  %v8381_v36 = vcombine.low %v1750_v30, %v1752_v26  ;;  %v1566_v51 = vshll.u32 %v1351_v53, 16 }
  0x92   : > { %vm8366_vm1 = vcmp.ne.s16.totalorder %v1549_v0, 0  ;;  %644 = vst [vmem:[#allocation2 + $0x124] sm:$0xf] %v6394_v42  ;;  %v1206_v12 = vld [vmem:[#allocation2 + $0x104] sm:$0xf]  ;;  %v8383_v29 = vcombine.high %v1750_v30, %v1752_v26  ;;  %v8387_v0 = vcombine.low %v1751_v38, %v1753_v57  ;;  %v1570_v62 = vshrl.u32 %v1351_v53, 16 }
  0x93   : > { %v1754_v31 = vsel %vm8366_vm1, %v1205_v32, 0  ;;  %10247 = vst [vmem:[#allocation17_spill] sm:$0xff] %v8381_v36  ;;  %v1209_v49 = vld [vmem:[#allocation2 + $0x114] sm:$0xff]  ;;  %v6093_v47 = vcombine.low %v1204_v18, %v1206_v12  ;;  %v1554_v42 = vrot.slane %v1553_v41, 4  ;;  %v1353_v24 = vsel %vm1321_vm2, 65537, %v7919_v4  ;;  %v1213_v1 = vld [vmem:[#allocation2 + $0x12c] sm:$0xff] }
  0x94   : > { %10248 = vst [vmem:[#allocation18_spill] sm:$0xff] %v8383_v29  ;;  %v6095_v43 = vcombine.high %v1207_v28, %v1209_v49  ;;  %v6094_v33 = vcombine.low %v1207_v28, %v1209_v49  ;;  %v1568_v30 = vrot.slane %v1566_v51, 5  ;;  %v1586_v26 = vshll.u32 %v1353_v24, 16  ;;  %v8393_v29 = vld [vmem:[#allocation2 + $0x158] sm:$0xf] }
  0x95   : > { %7052 = vmatprep.mubr.bf16.mxu1 %v6093_v47  ;;  %v1559_v32 = vsel %vm7520_vm10, %v1554_v42, %v7505_v52  ;;  %v1590_v36 = vshrl.u32 %v1353_v24, 16  ;;  %v1755_v38 = vsel %vm8366_vm1, %v1206_v12, 0  ;;  %v1210_v18 = vld [vmem:[#allocation2 + $0x11c] sm:$0xf]  ;;  %v1572_v57 = vrot.slane %v1570_v62, 4 }
  0x96   : > { %vm8397_vm7 = vcmp.ne.s16.totalorder %v1559_v32, 0  ;;  %2385 = vmatprep.mubr.bf16.mxu0 %v6095_v43  ;;  %v1769_v53 = vsel %vm7694_vm5, %v8393_v29, 0  ;;  %v1569_v24 = vsel %vm7520_vm10, %v7529_v13, %v1568_v30  ;;  %v1588_v21 = vrot.slane %v1586_v26, 5  ;;  %v8409_v42 = vld [vmem:[#allocation2 + $0x164] sm:$0xf] }
  0x97   : > { %v1756_v47 = vsel %vm8397_vm7, %v1207_v28, 0  ;;  %2386 = vmatmul.mubr.bf16.gmra.mxu0 %v6094_v33  ;;  %v1592_v12 = vrot.slane %v1590_v36, 4  ;;  %vm8411_vm8 = vcmp.ne.s16.totalorder %v1569_v24, 0  ;;  %v1573_v32 = vor.u32 %v1572_v57, %v1568_v30 }
  0x98   : > { %v1208_v51 = vld [vmem:[#allocation2 + $0x110] sm:$0xf]  ;;  %v8415_v62 = vcombine.low %v1754_v31, %v1756_v47  ;;  %v8417_v58 = vcombine.high %v1754_v31, %v1756_v47  ;;  %v1759_v33 = vsel %vm8411_vm8, %v1210_v18, 0  ;;  %v1771_v26 = vsel %vm7664_vm4, %v8409_v42, 0 }
  0x99   : > { %v1211_v46 = vld [vmem:[#allocation2 + $0x120] sm:$0xff]  ;;  %v1757_v28 = vsel %vm8397_vm7, %v1208_v51, 0  ;;  %v6096_v36 = vcombine.low %v1208_v51, %v1210_v18  ;;  %v1758_v24 = vsel %vm8411_vm8, %v1209_v49, 0  ;;  %v1589_v31 = vsel %vm7520_vm10, %v7529_v13, %v1588_v21 }
  0x9a   : > { %10253 = vst [vmem:[#allocation19_spill] sm:$0xff] %v8415_v62  ;;  %v1574_v62 = vrot.slane %v1573_v32, 4  ;;  %v1593_v30 = vor.u32 %v1592_v12, %v1588_v21  ;;  %v8431_v41 = vcombine.low %v1755_v38, %v1757_v28  ;;  %vm8433_vm5 = vcmp.ne.s16.totalorder %v1589_v31, 0  ;;  %v1215_v31 = vld [vmem:[#allocation2 + $0x138] sm:$0xff] }
  0x9b   : > { %7053 = vmatmul.mubr.bf16.gmra.mxu1 %v6096_v36  ;;  %v6098_v18 = vcombine.high %v1211_v46, %v1213_v1  ;;  %v6105_v10 = vcombine.low %v8393_v29, %v8409_v42  ;;  %v1763_v47 = vsel %vm8433_vm5, %v8331_v19, 0  ;;  %v10256_v38 = vcombine.low %v8329_v59, %v8331_v19  ;;  %v8454_v29 = vld [vmem:[#allocation2 + $0x170] sm:$0xf]  ;;  %v8456_v42 = vld [vmem:[#allocation2 + $0x17c] sm:$0xf] }
  0x9c   : > { %v1579_v49 = vsel %vm7520_vm10, %v1574_v62, %v7505_v52  ;;  %v1594_v21 = vrot.slane %v1593_v30, 4  ;;  %v10257_v12 = vsel %vm7660_vm3, %v8354_v2, 0  ;;  %v1762_v62 = vsel %vm8433_vm5, %v1213_v1, 0  ;;  %v8476_v30 = vld [vmem:[#allocation2 + $0x1a0] sm:$0xf] }
  0x9d   : > { %7056 = vmatprep.mubr.bf16.mxu1 %v10256_v38  ;;  %v8452_v51 = vcombine.low %v10257_v12, %v1769_v53  ;;  %vm8458_vm4 = vcmp.ne.s16.totalorder %v1579_v49, 0  ;;  %2393 = vmatprep.mubr.bf16.mxu0 %v6098_v18  ;;  %v6097_v19 = vcombine.low %v1211_v46, %v1213_v1  ;;  %v717_v32 = vadd.s32 224, %v7396_v6  ;;  %v8490_v49 = vld [vmem:[#allocation2 + $0x194] sm:$0xf] }
  0x9e   : > { %v1761_v9 = vsel %vm8458_vm4, %v8329_v59, 0  ;;  %v1599_v53 = vsel %vm7520_vm10, %v1594_v21, %v7505_v52  ;;  %v1760_v28 = vsel %vm8458_vm4, %v1211_v46, 0  ;;  %v1773_v36 = vsel %vm7698_vm6, %v8454_v29, 0  ;;  %v8488_v46 = vld [vmem:[#allocation2 + $0x188] sm:$0xf] }
  0x9f   : > { %vm8478_vm3 = vcmp.ne.s16.totalorder %v1599_v53, 0  ;;  %v8482_v57 = vcombine.low %v1758_v24, %v1760_v28  ;;  %v8484_v59 = vcombine.high %v1758_v24, %v1760_v28  ;;  %2394 = vmatmul.mubr.bf16.gmra.mxu0 %v6097_v19  ;;  %v6108_v18 = vcombine.low %v8454_v29, %v8456_v42  ;;  %v8499_v24 = vld [vmem:[#allocation2 + $0x1ac] sm:$0xf]  ;;  %v7305_v19 = vld [vmem:[#allocation2 + $0x144] sm:$0xff] }
  0xa0   : > { %v8492_v56 = vcombine.low %v1759_v33, %v1761_v9  ;;  %v1765_v38 = vsel %vm8478_vm3, %v8352_v5, 0  ;;  %v921_v21 = vand.u32 15, %v717_v32  ;;  %v1764_v12 = vsel %vm8478_vm3, %v1215_v31, 0 }
  0xa1   : > { %v8501_v43 = vcombine.low %v1771_v26, %v1773_v36  ;;  %v6101_v29 = vcombine.high %v1215_v31, %v7305_v19  ;;  %v8503_v53 = vcombine.low %v1762_v62, %v1764_v12  ;;  %v8505_v28 = vcombine.high %v1762_v62, %v1764_v12  ;;  %v7306_v62 = vld [vmem:[#allocation2 + $0x174] sm:$0xff] }
  0xa2   : > { %v8507_v33 = vcombine.low %v1763_v47, %v1765_v38  ;;  %vm1133_vm6 = vcmp.ne.s32.totalorder %v921_v21, 0  ;;  %v719_v9 = vadd.s32 240, %v7396_v6  ;;  %v6111_v32 = vcombine.low %v8488_v46, %v8490_v49 }
  0xa3   : > { %v10262_v1 = vcombine.low %v8352_v5, %v8354_v2  ;;  %vm1327_vm9 = vmpackc.low %vm1133_vm6, %vm1133_vm6  ;;  %2401 = vmatprep.mubr.bf16.mxu0 %v6101_v29  ;;  %v6100_v26 = vcombine.low %v1215_v31, %v7305_v19  ;;  %v2844_v47 = vor.u32 %v7626_v39, %v7624_v37  ;;  %v1782_v21 = vsel %vm1717_vm11, %v7897_v15, 0 }
  0xa4   : > { %v1359_v36 = vsel %vm1327_vm9, 65537, %v7919_v4  ;;  %v935_v38 = vand.u32 15, %v719_v9  ;;  %v1783_v5 = vsel %vm1717_vm11, %v8499_v24, 0  ;;  %v8523_v29 = vcombine.low %v1782_v21, %v1782_v21 }
  0xa5   : > { %7057 = vmatmul.mubr.bf16.gmra.mxu1 %v10262_v1  ;;  %v1646_v2 = vshll.u32 %v1359_v36, 16  ;;  %v1650_v12 = vshrl.u32 %v1359_v36, 16  ;;  %v8525_v31 = vcombine.low %v1783_v5, %v1783_v5  ;;  %v8529_v19 = vor.u32 %v7632_v40, %v7628_v16 }
  0xa6   : > { %7060 = vmatprep.mubr.bf16.mxu1 %v6105_v10  ;;  %10263 = vst [vmem:[#allocation20_spill] sm:$0xff] %v8523_v29  ;;  %vm1135_vm13 = vcmp.ne.s32.totalorder %v935_v38, 0  ;;  %v2855_v37 = vshrl.u32 %v7846_v20, 16  ;;  %v2858_v15 = vshll.u32 %v7846_v20, 16  ;;  %v2863_v9 = vshrl.u32 %v7856_v14, 16 }
  0xa7   : > { %v1648_v39 = vrot.slane %v1646_v2, 5  ;;  %vm1329_vm14 = vmpackc.low %vm1135_vm13, %vm1135_vm13  ;;  %v1652_v10 = vrot.slane %v1650_v12, 4  ;;  %2402 = vmatmul.mubr.bf16.gmra.mxu0 %v6100_v26  ;;  %v8535_v36 = vcombine.high %v1782_v21, %v1782_v21  ;;  %v2853_v16 = vsel %vm2819_vm12, %v2844_v47, %v8529_v19 }
  0xa8   : > { %v1361_v1 = vsel %vm1329_vm14, 65537, %v7919_v4  ;;  %v3271_v4 = vshll.u32 %v8525_v31, 16  ;;  %v2857_v21 = vrot.slane %v2855_v37, 3  ;;  %v2860_v12 = vrot.slane %v2858_v15, 4 }
  0xa9   : > { %10264 = vst [vmem:[#allocation21_spill] sm:$0xff] %v8535_v36  ;;  %v1649_v40 = vsel %vm7520_vm10, %v7529_v13, %v1648_v39  ;;  %v1653_v5 = vor.u32 %v1652_v10, %v1648_v39  ;;  %v1666_v2 = vshll.u32 %v1361_v1, 16  ;;  %v1670_v26 = vshrl.u32 %v1361_v1, 16 }
  0xaa   : > { %vm8543_vm15 = vcmp.ne.s16.totalorder %v1649_v40, 0  ;;  %v2865_v36 = vrot.slane %v2863_v9, 3  ;;  %v2866_v1 = vshll.u32 %v7856_v14, 16  ;;  %v10267_v37 = vor.u32 %v7614_v11, %v7612_v27  ;;  %v7307_v40 = vld [vmem:[#allocation2 + $0x180] sm:$0xff] }
  0xab   : > { %v1774_v38 = vsel %vm8543_vm15, %v7306_v62, 0  ;;  %v1654_v47 = vrot.slane %v1653_v5, 4  ;;  %v1668_v29 = vrot.slane %v1666_v2, 5  ;;  %v1775_v39 = vsel %vm8543_vm15, %v8456_v42, 0  ;;  %v7308_v2 = vld [vmem:[#allocation2 + $0x18c] sm:$0xff] }
  0xac   : > { %v1672_v10 = vrot.slane %v1670_v26, 4  ;;  %v8559_v15 = vsel %vm2819_vm12, %v10267_v37, %v7826_v55  ;;  %v2861_v42 = vor.u32 %v2860_v12, %v2857_v21  ;;  %v2868_v9 = vrot.slane %v2866_v1, 4 }
  0xad   : > { %7061 = vmatmul.mubr.bf16.gmra.mxu1 %v6108_v18  ;;  %v1659_v18 = vsel %vm7520_vm10, %v1654_v47, %v7505_v52  ;;  %v1669_v62 = vsel %vm7520_vm10, %v7529_v13, %v1668_v29  ;;  %v2896_v20 = vor.u32 %v8009_v3, %v8007_v61  ;;  %v2917_v37 = vshrl.u32 %v8070_v23, 16  ;;  %v7279_v61 = vld [vmem:[%s10141_s3 + $0x1b8] sm:$0xff]  }
  0xae   : > { %7064 = vmatprep.mubr.bf16.mxu1 %v6111_v32  ;;  %v2881_v32 = vshrl.u32 %v7971_v50, 16  ;;  %vm8568_vm0 = vcmp.ne.s16.totalorder %v1659_v18, 0  ;;  %vm8572_vm1 = vcmp.ne.s16.totalorder %v1669_v62, 0  ;;  %v1673_v11 = vor.u32 %v1672_v10, %v1668_v29 }
  0xaf   : > { %v1776_v5 = vsel %vm8568_vm0, %v7307_v40, 0  ;;  %v1777_v13 = vsel %vm8568_vm0, %v8488_v46, 0  ;;  %v1778_v26 = vsel %vm8572_vm1, %v7308_v2, 0  ;;  %v1779_v29 = vsel %vm8572_vm1, %v8490_v49, 0  ;;  %v7296_v49 = vld [vmem:[%s10141_s3 + $0x180] sm:$0xff]  }
  0xb0   : > { %v8588_v21 = vcombine.low %v1774_v38, %v1776_v5  ;;  %v8590_v12 = vcombine.high %v1774_v38, %v1776_v5  ;;  %v1674_v47 = vrot.slane %v1673_v11, 4  ;;  %v2869_v10 = vor.u32 %v2868_v9, %v2865_v36 }
  0xb1   : > { %v2883_v1 = vrot.slane %v2881_v32, 3  ;;  %v2884_v46 = vshll.u32 %v7971_v50, 16  ;;  %v2920_v3 = vshll.u32 %v8070_v23, 16  ;;  %v2872_v38 = vshrl.u32 %v7968_v54, 16  ;;  %v7280_v23 = vld [vmem:[%s10141_s3 + $0x1f0] sm:$0xff]  }
  0xb2   : > { %v1679_v18 = vsel %vm7520_vm10, %v1674_v47, %v7505_v52  ;;  %v2875_v62 = vshll.u32 %v7968_v54, 16  ;;  %v10274_v50 = vcombine.low %v8476_v30, %v8499_v24  ;;  %v2870_v52 = vsel %vm2819_vm12, %v2861_v42, %v2869_v10  ;;  %v7309_v54 = vld [vmem:[#allocation2 + $0x198] sm:$0xff] }
  0xb3   : > { %vm8603_vm2 = vcmp.ne.s16.totalorder %v1679_v18, 0  ;;  %v2897_v7 = vsel %vm2819_vm12, %v2869_v10, %v2896_v20  ;;  %v2886_v32 = vrot.slane %v2884_v46, 4  ;;  %v8615_v14 = vcombine.low %v1775_v39, %v1777_v13  ;;  %7084 = vmatprep.mubr.bf16.mxu0 %v2870_v52  ;;  %v7283_v18 = vld [vmem:[%s10141_s3 + $0x1e8] sm:$0xff]  }
  0xb4   : > { %v1780_v11 = vsel %vm8603_vm2, %v7309_v54, 0  ;;  %v2919_v9 = vrot.slane %v2917_v37, 3  ;;  %v2922_v24 = vrot.slane %v2920_v3, 4  ;;  %v1781_v42 = vsel %vm8603_vm2, %v8476_v30, 0  ;;  %7085 = vmatmul.mubr.bf16.vlgmr.msra.gmra.mxu0 %v2897_v7  ;;  %v10277_v30 = vld [vmem:[#allocation16_spill] sm:$0xff] }
  0xb5   : > { %7065 = vmatmul.mubr.bf16.gmra.mxu1 %v10274_v50  ;;  %v8622_v40 = vcombine.low %v1778_v26, %v1780_v11  ;;  %v8624_v5 = vcombine.high %v1778_v26, %v1780_v11  ;;  %v2887_v2 = vor.u32 %v2886_v32, %v2883_v1  ;;  %6885 = vmatpush3.bf16.msra.mxu0 %v7279_v61  ;;  %v2874_v13 = vrot.slane %v2872_v38, 3 }
  0xb6   : > { %3500 = vmatprep.mubr.bf16.mxu1 %v2853_v16  ;;  %v2923_v39 = vor.u32 %v2922_v24, %v2919_v9  ;;  %v2877_v47 = vrot.slane %v2875_v62, 4  ;;  %v2944_v10 = vshrl.u32 %v8163_v44, 16  ;;  %v7281_v16 = vld [vmem:[%s10141_s3 + $0x1b0] sm:$0xff]   ;;  %v2947_v37 = vshll.u32 %v8163_v44, 16  ;;  %6886 = vmatprep.subr.bf16.mxu0 %v7280_v23  ;;  %v7284_v24 = vld [vmem:[%s10141_s3 + $0x1a8] sm:$0xff]  }
  0xb7   : > { %v2888_v46 = vsel %vm2819_vm12, %v8529_v19, %v2887_v2  ;;  %v2908_v26 = vshrl.u32 %v8062_v22, 16  ;;  %v2911_v1 = vshll.u32 %v8062_v22, 16  ;;  %v2971_v62 = vshrl.u32 %v8255_v34, 16  ;;  %v7282_v22 = vld [vmem:[%s10141_s3 + $0x230] sm:$0xff]  }
  0xb8   : > { %v2924_v61 = vsel %vm2819_vm12, %v2896_v20, %v2923_v39  ;;  %v2878_v3 = vor.u32 %v2877_v47, %v2874_v13  ;;  %v2946_v38 = vrot.slane %v2944_v10, 3  ;;  %v2949_v50 = vrot.slane %v2947_v37, 4 }
  0xb9   : > { %7088 = vmatprep.mubr.bf16.mxu0 %v2924_v61  ;;  %v2910_v19 = vrot.slane %v2908_v26, 3  ;;  %v2913_v52 = vrot.slane %v2911_v1, 4  ;;  %v2974_v44 = vshll.u32 %v8255_v34, 16  ;;  %6887 = vmatpush3.bf16.msra.mxu0 %v7281_v16  ;;  %v2973_v32 = vrot.slane %v2971_v62, 3  ;;  %v7285_v26 = vld [vmem:[%s10141_s3 + $0x1e0] sm:$0xff]  }
  0xba   : > { %v2879_v7 = vsel %vm2819_vm12, %v7826_v55, %v2878_v3  ;;  %v2899_v20 = vshrl.u32 %v8060_v60, 16  ;;  %v2902_v23 = vshll.u32 %v8060_v60, 16  ;;  %v2950_v54 = vor.u32 %v2949_v50, %v2946_v38  ;;  %6888 = vmatprep.subr.bf16.mxu0 %v7283_v18  ;;  %v7286_v62 = vld [vmem:[%s10141_s3 + $0x1a0] sm:$0xff]  }
  0xbb   : > { %v2914_v11 = vor.u32 %v2913_v52, %v2910_v19  ;;  %v2976_v9 = vrot.slane %v2974_v44, 4  ;;  %v2998_v34 = vshrl.u32 %v8270_v48, 16  ;;  %v3001_v47 = vshll.u32 %v8270_v48, 16 }
  0xbc   : > { %v2901_v55 = vrot.slane %v2899_v20, 3  ;;  %v2904_v13 = vrot.slane %v2902_v23, 4  ;;  %v2935_v60 = vshrl.u32 %v8157_v8, 16  ;;  %v2938_v18 = vshll.u32 %v8157_v8, 16  ;;  %v7288_v23 = vld [vmem:[%s10141_s3 + $0x1d8] sm:$0xff]  }
  0xbd   : > { %3501 = vmatmul.mubr.bf16.vlgmr.msra.gmra.mxu1 %v8559_v15  ;;  %v2951_v15 = vsel %vm2819_vm12, %v2923_v39, %v2950_v54  ;;  %v2915_v10 = vsel %vm2819_vm12, %v2887_v2, %v2914_v11  ;;  %v2977_v16 = vor.u32 %v2976_v9, %v2973_v32  ;;  %v3000_v37 = vrot.slane %v2998_v34, 3  ;;  %6889 = vmatpush3.bf16.msra.mxu0 %v7284_v24 }
  0xbe   : > { %7117 = vmatpush3.bf16.msra.mxu1 %v8306_v45  ;;  %3508 = vmatprep.mubr.bf16.mxu1 %v2888_v46  ;;  %v7287_v45 = vld [vmem:[%s10141_s3 + $0x228] sm:$0xff]   ;;  %v2905_v46 = vor.u32 %v2904_v13, %v2901_v55  ;;  %v3003_v48 = vrot.slane %v3001_v47, 4  ;;  %v2937_v1 = vrot.slane %v2935_v60, 3  ;;  %v3025_v2 = vshrl.u32 %v8337_v63, 16  ;;  %v7289_v47 = vld [vmem:[%s10141_s3 + $0x198] sm:$0xff]  }
  0xbf   : > { %7118 = vmatprep.subr.bf16.mxu1 %v7282_v22  ;;  %7089 = vmatmul.mubr.bf16.gmra.mxu0 %v2951_v15  ;;  %v2978_v39 = vsel %vm2819_vm12, %v2950_v54, %v2977_v16  ;;  %v3028_v61 = vshll.u32 %v8337_v63, 16  ;;  %v2926_v38 = vshrl.u32 %v8154_v35, 16  ;;  %v2940_v8 = vrot.slane %v2938_v18, 4 }
  0xc0   : > { %7092 = vmatprep.mubr.bf16.mxu0 %v2978_v39  ;;  %v8673_v50 = vsel %vm2819_vm12, %v2878_v3, %v2905_v46  ;;  %v3004_v19 = vor.u32 %v3003_v48, %v3000_v37  ;;  %v2929_v52 = vshll.u32 %v8154_v35, 16  ;;  %v3027_v44 = vrot.slane %v3025_v2, 3  ;;  %6890 = vmatprep.subr.bf16.mxu0 %v7285_v26  ;;  %v7292_v3 = vld [vmem:[%s10141_s3 + $0x220] sm:$0xff]  }
  0xc1   : > { %v3030_v32 = vrot.slane %v3028_v61, 4  ;;  %v2928_v20 = vrot.slane %v2926_v38, 3  ;;  %v3052_v63 = vshrl.u32 %v8387_v0, 16  ;;  %v2941_v54 = vor.u32 %v2940_v8, %v2937_v1  ;;  %6891 = vmatpush3.bf16.msra.mxu0 %v7286_v62  ;;  %v7291_v38 = vld [vmem:[%s10141_s3 + $0x190] sm:$0xff]   ;;  %v10275_v8 = vld [vmem:[#allocation14_spill] sm:$0xff] }
  0xc2   : > { %7119 = vmatpush3.bf16.msra.mxu1 %v7282_v22  ;;  %v3005_v22 = vsel %vm2819_vm12, %v2977_v16, %v3004_v19  ;;  %v2931_v9 = vrot.slane %v2929_v52, 4  ;;  %v3055_v35 = vshll.u32 %v8387_v0, 16  ;;  %v2962_v55 = vshrl.u32 %v8199_v17, 16  ;;  %v7290_v0 = vld [vmem:[%s10141_s3 + $0x1d0] sm:$0xff]   ;;  %6892 = vmatprep.subr.bf16.mxu0 %v7288_v23 }
  0xc3   : > { %7120 = vmatprep.subr.bf16.mxu1 %v7287_v45  ;;  %v3031_v34 = vor.u32 %v3030_v32, %v3027_v44  ;;  %v3054_v24 = vrot.slane %v3052_v63, 3  ;;  %v2965_v13 = vshll.u32 %v8199_v17, 16  ;;  %v2942_v60 = vsel %vm2819_vm12, %v2914_v11, %v2941_v54  ;;  %v7297_v11 = vld [vmem:[%s10141_s3 + $0x218] sm:$0xff]  }
  0xc4   : > { %v2932_v15 = vor.u32 %v2931_v9, %v2928_v20  ;;  %v3057_v16 = vrot.slane %v3055_v35, 4  ;;  %v3079_v37 = vshrl.u32 %v8431_v41, 16  ;;  %v2964_v26 = vrot.slane %v2962_v55, 3 }
  0xc5   : > { %3509 = vmatmul.mubr.bf16.gmra.mxu1 %v2879_v7  ;;  %v3032_v7 = vsel %vm2819_vm12, %v3004_v19, %v3031_v34  ;;  %v2967_v17 = vrot.slane %v2965_v13, 4  ;;  %v3082_v48 = vshll.u32 %v8431_v41, 16  ;;  %v2953_v18 = vshrl.u32 %v8197_v25, 16  ;;  %6893 = vmatpush3.bf16.msra.mxu0 %v7289_v47  ;;  %v7294_v13 = vld [vmem:[%s10141_s3 + $0x188] sm:$0xff]  }
  0xc6   : > { %3516 = vmatprep.mubr.bf16.mxu1 %v2915_v10  ;;  %7121 = vmatpush3.bf16.msra.mxu1 %v7287_v45  ;;  %v8701_v10 = vsel %vm2819_vm12, %v2905_v46, %v2932_v15  ;;  %v3058_v45 = vor.u32 %v3057_v16, %v3054_v24  ;;  %v3081_v1 = vrot.slane %v3079_v37, 3  ;;  %v2956_v61 = vshll.u32 %v8197_v25, 16  ;;  %v7293_v25 = vld [vmem:[%s10141_s3 + $0x1c8] sm:$0xff]   ;;  %v10276_v24 = vld [vmem:[#allocation13_spill] sm:$0xff] }
  0xc7   : > { %7122 = vmatprep.subr.bf16.mxu1 %v7292_v3  ;;  %7093 = vmatmul.mubr.bf16.gmra.mxu0 %v3005_v22  ;;  %v2968_v39 = vor.u32 %v2967_v17, %v2964_v26  ;;  %v3084_v2 = vrot.slane %v3082_v48, 4  ;;  %v3106_v41 = vshrl.u32 %v8492_v56, 16  ;;  %v2955_v46 = vrot.slane %v2953_v18, 3 }
  0xc8   : > { %7096 = vmatprep.mubr.bf16.mxu0 %v3032_v7  ;;  %v3059_v62 = vsel %vm2819_vm12, %v3031_v34, %v3058_v45  ;;  %v3109_v19 = vshll.u32 %v8492_v56, 16  ;;  %v2989_v52 = vshrl.u32 %v10275_v8, 16  ;;  %6894 = vmatprep.subr.bf16.mxu0 %v7290_v0  ;;  %v2958_v20 = vrot.slane %v2956_v61, 4 }
  0xc9   : > { %v8716_v44 = vsel %vm2819_vm12, %v2941_v54, %v2968_v39  ;;  %v3085_v32 = vor.u32 %v3084_v2, %v3081_v1  ;;  %v3108_v63 = vrot.slane %v3106_v41, 3  ;;  %v2992_v9 = vshll.u32 %v10275_v8, 16  ;;  %6895 = vmatpush3.bf16.msra.mxu0 %v7291_v38 }
  0xca   : > { %7123 = vmatpush3.bf16.msra.mxu1 %v7292_v3  ;;  %v3111_v23 = vrot.slane %v3109_v19, 4  ;;  %v2991_v22 = vrot.slane %v2989_v52, 3  ;;  %v3133_v56 = vshrl.u32 %v8507_v33, 16  ;;  %v7298_v3 = vld [vmem:[%s10141_s3 + $0x210] sm:$0xff]   ;;  %v2959_v54 = vor.u32 %v2958_v20, %v2955_v46  ;;  %6896 = vmatprep.subr.bf16.mxu0 %v7293_v25  ;;  %v10278_v52 = vld [vmem:[#allocation15_spill] sm:$0xff] }
  0xcb   : > { %7124 = vmatprep.subr.bf16.mxu1 %v7297_v11  ;;  %v3086_v35 = vsel %vm2819_vm12, %v3058_v45, %v3085_v32  ;;  %v3136_v34 = vshll.u32 %v8507_v33, 16  ;;  %v2980_v55 = vshrl.u32 %v10276_v24, 16  ;;  %v2994_v16 = vrot.slane %v2992_v9, 4 }
  0xcc   : > { %v3112_v47 = vor.u32 %v3111_v23, %v3108_v63  ;;  %v3135_v37 = vrot.slane %v3133_v56, 3  ;;  %v2983_v0 = vshll.u32 %v10276_v24, 16  ;;  %v8735_v33 = vsel %vm2819_vm12, %v2932_v15, %v2959_v54  ;;  %v10279_v56 = vld [vmem:[#allocation18_spill] sm:$0xff] }
  0xcd   : > { %3517 = vmatmul.mubr.bf16.gmra.mxu1 %v8673_v50  ;;  %v7295_v50 = vld [vmem:[%s10141_s3 + $0x1c0] sm:$0xff]   ;;  %v3138_v7 = vrot.slane %v3136_v34, 4  ;;  %v2982_v26 = vrot.slane %v2980_v55, 3  ;;  %v3160_v17 = vshrl.u32 %v8452_v51, 16  ;;  %v2995_v48 = vor.u32 %v2994_v16, %v2991_v22  ;;  %6897 = vmatpush3.bf16.msra.mxu0 %v7294_v13 }
  0xce   : > { %3524 = vmatprep.mubr.bf16.mxu1 %v2942_v60  ;;  %7125 = vmatpush3.bf16.msra.mxu1 %v7297_v11  ;;  %v8746_v60 = vcombine.low %v1779_v29, %v1781_v42  ;;  %v2985_v45 = vrot.slane %v2983_v0, 4  ;;  %v3163_v15 = vshll.u32 %v8452_v51, 16  ;;  %v7299_v11 = vld [vmem:[%s10141_s3 + $0x208] sm:$0xff]   ;;  %v3016_v18 = vshrl.u32 %v10277_v30, 16 }
  0xcf   : > { %7097 = vmatmul.mubr.bf16.gmra.mxu0 %v3059_v62  ;;  %7126 = vmatprep.subr.bf16.mxu1 %v7298_v3  ;;  %v3139_v36 = vor.u32 %v3138_v7, %v3135_v37  ;;  %v3162_v1 = vrot.slane %v3160_v17, 3  ;;  %v3019_v27 = vshll.u32 %v10277_v30, 16  ;;  %v2996_v29 = vsel %vm2819_vm12, %v2968_v39, %v2995_v48  ;;  %v7300_v39 = vld [vmem:[%s10141_s3 + $0x200] sm:$0xff]   ;;  %v10280_v37 = vld [vmem:[#allocation17_spill] sm:$0xff] }
  0xd0   : > { %7100 = vmatprep.mubr.bf16.mxu0 %v3086_v35  ;;  %v2986_v51 = vor.u32 %v2985_v45, %v2982_v26  ;;  %v3165_v42 = vrot.slane %v3163_v15, 4  ;;  %v3187_v2 = vshrl.u32 %v8501_v43, 16  ;;  %6898 = vmatprep.subr.bf16.mxu0 %v7295_v50  ;;  %v3113_v61 = vsel %vm2819_vm12, %v3085_v32, %v3112_v47 }
  0xd1   : > { %v3018_v41 = vrot.slane %v3016_v18, 3  ;;  %v3021_v38 = vrot.slane %v3019_v27, 4  ;;  %v3190_v62 = vshll.u32 %v8501_v43, 16  ;;  %v3007_v25 = vshrl.u32 %v10278_v52, 16  ;;  %6899 = vmatpush3.bf16.msra.mxu0 %v7296_v49 }
  0xd2   : > { %7127 = vmatpush3.bf16.msra.mxu1 %v7298_v3  ;;  %v8762_v46 = vsel %vm2819_vm12, %v2959_v54, %v2986_v51  ;;  %v3166_v19 = vor.u32 %v3165_v42, %v3162_v1  ;;  %v3189_v8 = vrot.slane %v3187_v2, 3  ;;  %v3010_v63 = vshll.u32 %v10278_v52, 16 }
  0xd3   : > { %7128 = vmatprep.subr.bf16.mxu1 %v7299_v11  ;;  %v3022_v32 = vor.u32 %v3021_v38, %v3018_v41  ;;  %v3192_v20 = vrot.slane %v3190_v62, 4  ;;  %v3214_v43 = vshrl.u32 %v8615_v14, 16  ;;  %v3140_v23 = vsel %vm2819_vm12, %v3112_v47, %v3139_v36 }
  0xd4   : > { %v3009_v22 = vrot.slane %v3007_v25, 3  ;;  %v3217_v9 = vshll.u32 %v8615_v14, 16  ;;  %v3043_v3 = vshrl.u32 %v10279_v56, 16  ;;  %v3012_v54 = vrot.slane %v3010_v63, 4  ;;  %v3790_v25 = vld [vmem:[#allocation2 + $0x30] sm:$0xff] }
  0xd5   : > { %3525 = vmatmul.mubr.bf16.gmra.mxu1 %v8701_v10  ;;  %v8776_v35 = vsel %vm2819_vm12, %v2995_v48, %v3022_v32  ;;  %v3193_v10 = vor.u32 %v3192_v20, %v3189_v8  ;;  %v3216_v34 = vrot.slane %v3214_v43, 3  ;;  %v3046_v13 = vshll.u32 %v10279_v56, 16  ;;  %v10284_v20 = vld [vmem:[#allocation4_spill] sm:$0xff]  ;;  %v8820_v56 = vld [vmem:[#allocation2] sm:$0xff] }
  0xd6   : > { %3532 = vmatprep.mubr.bf16.mxu1 %v8716_v44  ;;  %7129 = vmatpush3.bf16.msra.mxu1 %v7299_v11  ;;  %v3219_v24 = vrot.slane %v3217_v9, 4  ;;  %v3045_v55 = vrot.slane %v3043_v3, 3  ;;  %v3241_v44 = vshrl.u32 %v8746_v60, 16  ;;  %v3167_v14 = vsel %vm2819_vm12, %v3139_v36, %v3166_v19 }
  0xd7   : > { %7101 = vmatmul.mubr.bf16.gmra.mxu0 %v3113_v61  ;;  %7130 = vmatprep.subr.bf16.mxu1 %v7300_v39  ;;  %v3013_v47 = vor.u32 %v3012_v54, %v3009_v22  ;;  %v3244_v16 = vshll.u32 %v8746_v60, 16  ;;  %v3034_v0 = vshrl.u32 %v10280_v37, 16  ;;  %v3048_v7 = vrot.slane %v3046_v13, 4 }
  0xd8   : > { %7104 = vmatprep.mubr.bf16.mxu0 %v3140_v23  ;;  %v3220_v50 = vor.u32 %v3219_v24, %v3216_v34  ;;  %v3243_v26 = vrot.slane %v3241_v44, 3  ;;  %v3037_v17 = vshll.u32 %v10280_v37, 16  ;;  %v10281_v11 = vshrl.u32 %v8525_v31, 16  ;;  %v10285_v23 = vld [vmem:[#allocation19_spill] sm:$0xff] }
  0xd9   : > { %v8785_v48 = vsel %vm2819_vm12, %v2986_v51, %v3013_v47  ;;  %v3246_v45 = vrot.slane %v3244_v16, 4  ;;  %v3036_v15 = vrot.slane %v3034_v0, 3  ;;  %v3194_v36 = vsel %vm2819_vm12, %v3166_v19, %v3193_v10 }
  0xda   : > { %v3270_v1 = vrot.slane %v10281_v11, 3  ;;  %7131 = vmatpush3.bf16.msra.mxu1 %v7300_v39  ;;  %v3049_v30 = vor.u32 %v3048_v7, %v3045_v55  ;;  %v3039_v60 = vrot.slane %v3037_v17, 4  ;;  %v3273_v18 = vrot.slane %v3271_v4, 4  ;;  %v10282_v39 = vld [vmem:[#allocation3_spill] sm:$0xff] }
  0xdb   : > { %v3247_v27 = vor.u32 %v3246_v45, %v3243_v26  ;;  %v3070_v49 = vshrl.u32 %v8417_v58, 16  ;;  %v3073_v51 = vshll.u32 %v8417_v58, 16  ;;  %v690_v42 = vadd.s32 8, %v7396_v6 }
  0xdc   : > { %v8797_v2 = vsel %vm2819_vm12, %v3022_v32, %v3049_v30  ;;  %v3040_v61 = vor.u32 %v3039_v60, %v3036_v15  ;;  %v3274_v41 = vor.u32 %v3273_v18, %v3270_v1  ;;  %v692_v38 = vadd.s32 24, %v7396_v6  ;;  %v3792_v1 = vld [vmem:[#allocation2 + $0x3c] sm:$0xff] }
  0xdd   : > { %3533 = vmatmul.mubr.bf16.gmra.mxu1 %v8735_v33  ;;  %v3221_v31 = vsel %vm2819_vm12, %v3193_v10, %v3220_v50  ;;  %v3072_v4 = vrot.slane %v3070_v49, 3  ;;  %v3075_v62 = vrot.slane %v3073_v51, 4  ;;  %v732_v33 = vand.u32 15, %v690_v42  ;;  %v3796_v49 = vld [vmem:[#allocation2 + $0x54] sm:$0xff] }
  0xde   : > { %3540 = vmatprep.mubr.bf16.mxu1 %v2996_v29  ;;  %v3248_v19 = vsel %vm2819_vm12, %v3220_v50, %v3247_v27  ;;  %v8803_v58 = vsel %vm2819_vm12, %v3013_v47, %v3040_v61  ;;  %v8806_v29 = vsel %vm2819_vm12, %v3247_v27, %v3274_v41  ;;  %v746_v8 = vand.u32 15, %v692_v38 }
  0xdf   : > { %7105 = vmatmul.mubr.bf16.gmra.mxu0 %v3167_v14  ;;  %v3076_v52 = vor.u32 %v3075_v62, %v3072_v4  ;;  %vm1138_vm10 = vcmp.ne.s32.totalorder %v732_v33, 15  ;;  %vm3984_vm7 = vsmask.f32 256  ;;  %v10283_v32 = vshll.u32 %v10282_v39, 16 }
  0xe0   : > { %7108 = vmatprep.mubr.bf16.mxu0 %v3194_v36  ;;  %vm1140_vm8 = vcmp.ne.s32.totalorder %v746_v8, 15  ;;  %vm3921_vm5 = vmpackc.low %vm1138_vm10, %vm1138_vm10  ;;  %vm3985_vm4 = vsmask.f32 4368  ;;  %v8814_v43 = vrot.slane %v10284_v20, 4  ;;  %v3061_v22 = vshrl.u32 %v10285_v23, 16  ;;  %v3794_v36 = vld [vmem:[#allocation2 + $0x48] sm:$0xff] }
  0xe1   : > { %v8811_v63 = vor.u32 %v10284_v20, %v10283_v32  ;;  %v8818_v9 = vsel %vm2819_vm12, %v3049_v30, %v3076_v52  ;;  %vm3923_vm3 = vmpackc.low %vm1140_vm8, %vm1140_vm8  ;;  %v3953_v3 = vsel %vm3921_vm5, 65537, %v8820_v56  ;;  %v3064_v10 = vshll.u32 %v10285_v23, 16 }
  0xe2   : > { %v3955_v54 = vsel %vm3923_vm3, 65537, %v8820_v56  ;;  %v3996_v34 = vshrl.u32 %v3953_v3, 16  ;;  %v3999_v24 = vshll.u32 %v3953_v3, 16  ;;  %v3063_v14 = vrot.slane %v3061_v22, 3  ;;  %vm8835_vm9 = vmor %vm3984_vm7, %vm3985_vm4 }
  0xe3   : > { %vm4274_vm6 = vcmp.ne.s16.totalorder %v8811_v63, 0  ;;  %v4014_v13 = vshrl.u32 %v3955_v54, 16  ;;  %v4017_v44 = vshll.u32 %v3955_v54, 16  ;;  %v3066_v47 = vrot.slane %v3064_v10, 4  ;;  %v3798_v54 = vld [vmem:[#allocation2 + $0x60] sm:$0xff] }
  0xe4   : > { %v4307_v55 = vsel %vm4274_vm6, %v3790_v25, 0  ;;  %v3998_v16 = vrot.slane %v3996_v34, 7  ;;  %v3097_v37 = vshrl.u32 %v8484_v59, 16  ;;  %v3100_v0 = vshll.u32 %v8484_v59, 16 }
  0xe5   : > { %3541 = vmatmul.mubr.bf16.gmra.mxu1 %v8762_v46  ;;  %v694_v50 = vadd.s32 40, %v7396_v6  ;;  %v4016_v46 = vrot.slane %v4014_v13, 7  ;;  %v8839_v26 = vor.u32 %v3066_v47, %v3063_v14  ;;  %v3088_v17 = vshrl.u32 %v8482_v57, 16 }
  0xe6   : > { %3548 = vmatprep.mubr.bf16.mxu1 %v8776_v35  ;;  %v3091_v35 = vshll.u32 %v8482_v57, 16  ;;  %v4001_v45 = vor.u32 %v3999_v24, %v3998_v16  ;;  %v4003_v15 = vrot.slane %v3998_v16, 4  ;;  %v3099_v11 = vrot.slane %v3097_v37, 3 }
  0xe7   : > { %7109 = vmatmul.mubr.bf16.gmra.mxu0 %v3221_v31  ;;  %v3102_v59 = vrot.slane %v3100_v0, 4  ;;  %v4019_v30 = vor.u32 %v4017_v44, %v4016_v46  ;;  %v8845_v60 = vsel %vm2819_vm12, %v3040_v61, %v8839_v26  ;;  %v760_v18 = vand.u32 15, %v694_v50 }
  0xe8   : > { %7112 = vmatprep.mubr.bf16.mxu0 %v3248_v19  ;;  %v4021_v27 = vrot.slane %v4016_v46, 4  ;;  %v4002_v57 = vsel %vm8835_vm9, %v8814_v43, %v4001_v45  ;;  %v8853_v51 = vsel %vm8835_vm9, %v4003_v15, %v8811_v63  ;;  %vm4638_vm11 = vsmask.f32 7424  ;;  %v3800_v45 = vld [vmem:[#allocation2 + $0x6c] sm:$0xff]  ;;  %v3801_v15 = vld [vmem:[#allocation2 + $0x74] sm:$0xf] }
  0xe9   : > { %v8855_v42 = vor.u32 %v3102_v59, %v3099_v11  ;;  %v3090_v41 = vrot.slane %v3088_v17, 3  ;;  %v4020_v61 = vsel %vm8835_vm9, %v8814_v43, %v4019_v30  ;;  %vm8860_vm13 = vcmp.ne.s16.totalorder %v4002_v57, 0 }
  0xea   : > { %vm4276_vm14 = vcmp.ne.s16.totalorder %v8853_v51, 0  ;;  %vm1142_vm15 = vcmp.ne.s32.totalorder %v760_v18, 15  ;;  %vm8865_vm0 = vcmp.ne.s16.totalorder %v4020_v61, 0  ;;  %v4309_v4 = vsel %vm8860_vm13, %v3792_v1, 0 }
  0xeb   : > { %v4311_v62 = vsel %vm4276_vm14, %v3794_v36, 0  ;;  %v8875_v33 = vsel %vm2819_vm12, %v3076_v52, %v8855_v42  ;;  %vm3925_vm1 = vmpackc.low %vm1142_vm15, %vm1142_vm15  ;;  %v4313_v19 = vsel %vm8865_vm0, %v3796_v49, 0  ;;  %v6262_v8 = vcombine.low %v4307_v55, %v4309_v4 }
  0xec   : > { %v6263_v25 = vcombine.high %v4307_v55, %v4309_v4  ;;  %v3957_v39 = vsel %vm3925_vm1, 65537, %v8820_v56  ;;  %v6265_v32 = vcombine.low %v4311_v62, %v4313_v19  ;;  %v6266_v20 = vcombine.high %v4311_v62, %v4313_v19  ;;  %v3799_v55 = vld [vmem:[#allocation2 + $0x68] sm:$0xf] }
  0xed   : > { %3549 = vmatmul.mubr.bf16.gmra.mxu1 %v8785_v48  ;;  %v4029_v23 = vsel %vm8835_vm9, %v4021_v27, %v8811_v63  ;;  %v4032_v52 = vshrl.u32 %v3957_v39, 16  ;;  %v4640_v10 = vshrl.u32 %v6262_v8, 16  ;;  %v4642_v48 = vshll.u32 %v6262_v8, 16 }
  0xee   : > { %3556 = vmatprep.mubr.bf16.mxu1 %v8797_v2  ;;  %v4652_v22 = vshrl.u32 %v6263_v25, 16  ;;  %v4654_v3 = vshll.u32 %v6263_v25, 16  ;;  %v4659_v34 = vshll.u32 %v6266_v20, 16  ;;  %v4647_v24 = vshll.u32 %v6265_v32, 16 }
  0xef   : > { %7113 = vmatmul.mubr.bf16.gmra.mxu0 %v8806_v29  ;;  %v4034_v13 = vrot.slane %v4032_v52, 7  ;;  %v4035_v44 = vshll.u32 %v3957_v39, 16  ;;  %v4644_v14 = vrot.slane %v4642_v48, 1  ;;  %vm4278_vm2 = vcmp.ne.s16.totalorder %v4029_v23, 0  ;;  %v3802_v23 = vld [vmem:[#allocation2 + $0x78] sm:$0xff] }
  0xf0   : > { %v4656_v2 = vrot.slane %v4654_v3, 1  ;;  %v4683_v47 = vshrl.u32 %v6266_v20, 16  ;;  %v4661_v16 = vrot.slane %v4659_v34, 1  ;;  %v4649_v37 = vrot.slane %v4647_v24, 1 }
  0xf1   : > { %v4037_v0 = vor.u32 %v4035_v44, %v4034_v13  ;;  %v4315_v50 = vsel %vm4278_vm2, %v3798_v54, 0  ;;  %v4645_v17 = vor.u32 %v4644_v14, %v4640_v10  ;;  %v4316_v11 = vsel %vm4278_vm2, %v3799_v55, 0 }
  0xf2   : > { %v4657_v46 = vor.u32 %v4656_v2, %v4652_v22  ;;  %v3093_v59 = vrot.slane %v3091_v35, 4  ;;  %v4685_v1 = vor.u32 %v4683_v47, %v4661_v16  ;;  %v4675_v36 = vshrl.u32 %v6265_v32, 16 }
  0xf3   : > { %v4038_v29 = vsel %vm8835_vm9, %v8814_v43, %v4037_v0  ;;  %v3124_v30 = vshrl.u32 %v8505_v28, 16  ;;  %v4650_v27 = vsel %vm4638_vm11, %v4645_v17, %v4649_v37  ;;  %v3127_v25 = vshll.u32 %v8505_v28, 16 }
  0xf4   : > { %v4662_v18 = vsel %vm4638_vm11, %v4657_v46, %v4661_v16  ;;  %vm4279_vm10 = vcmp.ne.s16.totalorder %v4038_v29, 0  ;;  %v3094_v49 = vor.u32 %v3093_v59, %v3090_v41  ;;  %v4677_v61 = vor.u32 %v4675_v36, %v4649_v37  ;;  %v10295_v29 = vld [vmem:[#allocation6_spill] sm:$0xff]  ;;  %v10296_v36 = vld [vmem:[#allocation11_spill] sm:$0xff] }
  0xf5   : > { %3557 = vmatmul.mubr.bf16.gmra.mxu1 %v8803_v58  ;;  %5259 = vmatprep.mubr.bf16.mxu0 %v4662_v18  ;;  %v4317_v35 = vsel %vm4279_vm10, %v3800_v45, 0  ;;  %v4318_v57 = vsel %vm4279_vm10, %v3801_v15, 0  ;;  %v3126_v4 = vrot.slane %v3124_v30, 3  ;;  %v696_v41 = vadd.s32 56, %v7396_v6  ;;  %v10297_v30 = vld [vmem:[#allocation12_spill] sm:$0xff] }
  0xf6   : > { %3564 = vmatprep.mubr.bf16.mxu1 %v8818_v9  ;;  %v6269_v62 = vcombine.high %v4315_v50, %v4317_v35  ;;  %v8894_v19 = vcombine.low %v4316_v11, %v4318_v57  ;;  %v8898_v8 = vsel %vm2819_vm12, %v8839_v26, %v3094_v49  ;;  %v6268_v58 = vcombine.low %v4315_v50, %v4317_v35  ;;  %v10292_v50 = vld [vmem:[#allocation7_spill] sm:$0xff] }
  0xf7   : > { %5260 = vmatmul.mubr.bf16.vlgmr.msra.gmra.mxu0 %v4650_v27  ;;  %v4039_v39 = vrot.slane %v4034_v13, 4  ;;  %v3115_v9 = vshrl.u32 %v8503_v53, 16  ;;  %v3118_v22 = vshll.u32 %v8503_v53, 16  ;;  %v3129_v3 = vrot.slane %v3127_v25, 4  ;;  %v6628_v13 = vpop.f32.mrf.mxu0 }
  0xf8   : > { %v4687_v32 = vshll.u32 %v6269_v62, 16  ;;  %v4679_v20 = vshll.u32 %v6268_v58, 16  ;;  %v4707_v52 = vshrl.u32 %v6269_v62, 16  ;;  %v774_v10 = vand.u32 15, %v696_v41 }
  0xf9   : > { %v8907_v26 = vsel %vm8835_vm9, %v4039_v39, %v8811_v63  ;;  %v3117_v48 = vrot.slane %v3115_v9, 3  ;;  %v3120_v34 = vrot.slane %v3118_v22, 4  ;;  %v3130_v24 = vor.u32 %v3129_v3, %v3126_v4  ;;  %v6629_v17 = vpop.f32.mrf.mxu0  ;;  %v10298_v4 = vld [vmem:[#allocation9_spill] sm:$0xff]  ;;  %v3804_v22 = vld [vmem:[#allocation2 + $0x84] sm:$0xff] }
  0xfa   : > { %v4689_v28 = vrot.slane %v4687_v32, 1  ;;  %v4681_v54 = vrot.slane %v4679_v20, 1  ;;  %vm4280_vm7 = vcmp.ne.s16.totalorder %v8907_v26, 0  ;;  %vm1144_vm8 = vcmp.ne.s32.totalorder %v774_v10, 15  ;;  %v3806_v3 = vld [vmem:[#allocation2 + $0x90] sm:$0xff] }
  0xfb   : > { %v8912_v55 = vsel %vm4280_vm7, %v3802_v23, 0  ;;  %v4699_v53 = vshrl.u32 %v6268_v58, 16  ;;  %vm3927_vm5 = vmpackc.low %vm1144_vm8, %vm1144_vm8  ;;  %v3121_v47 = vor.u32 %v3120_v34, %v3117_v48  ;;  %v3131_v16 = vsel %vm2819_vm12, %v8855_v42, %v3130_v24  ;;  %v10294_v42 = vld [vmem:[#allocation5_spill] sm:$0xff]  ;;  %v6631_v35 = vpop.f32.mrf.mxu0 }
  0xfc   : > { %v4690_v44 = vsel %vm4638_vm11, %v4685_v1, %v4689_v28  ;;  %v4682_v2 = vsel %vm4638_vm11, %v4677_v61, %v4681_v54  ;;  %v8917_v14 = vor.u32 %v4707_v52, %v4689_v28  ;;  %v3959_v37 = vsel %vm3927_vm5, 65537, %v8820_v56 }
  0xfd   : > { %3565 = vmatmul.mubr.bf16.gmra.mxu1 %v8845_v60  ;;  %5267 = vmatprep.mubr.bf16.mxu0 %v4690_v44  ;;  %v8923_v0 = vor.u32 %v4699_v53, %v4681_v54  ;;  %v10293_v60 = vld [vmem:[#allocation8_spill] sm:$0xff]  ;;  %v4050_v45 = vshrl.u32 %v3959_v37, 16  ;;  %v4053_v15 = vshll.u32 %v3959_v37, 16  ;;  %v8928_v11 = vsel %vm2819_vm12, %v3094_v49, %v3121_v47  ;;  %v10299_v49 = vld [vmem:[#allocation10_spill] sm:$0xff]  ;;  %v6632_v9 = vpop.f32.mrf.mxu0 }
  0xfe   : > { %3572 = vmatprep.mubr.bf16.mxu1 %v8875_v33  ;;  %v3157_v46 = vor.u32 %v10293_v60, %v10292_v50  ;;  %v698_v59 = vadd.s32 72, %v7396_v6  ;;  %v3148_v1 = vor.u32 %v10295_v29, %v10294_v42  ;;  %v3184_v18 = vor.u32 %v10297_v30, %v10296_v36 }
  0xff   : > { %5268 = vmatmul.mubr.bf16.gmra.mxu0 %v4682_v2  ;;  %v700_v27 = vadd.s32 88, %v7396_v6  ;;  %v4052_v57 = vrot.slane %v4050_v45, 7  ;;  %v8941_v62 = vor.u32 %v10299_v49, %v10298_v4  ;;  %v8943_v58 = vadd.f32 %v6629_v17, %v6628_v13  ;;  %v6700_v13 = vpop.f32.mrf.mxu1 }
 0x100   : > { %v8932_v33 = vsel %vm2819_vm12, %v3130_v24, %v3157_v46  ;;  %v788_v61 = vand.u32 15, %v698_v59  ;;  %v8946_v25 = vsel %vm2819_vm12, %v3121_v47, %v3148_v1  ;;  %v8949_v41 = vsel %vm2819_vm12, %v3157_v46, %v3184_v18 }
 0x101   : > { %v802_v39 = vand.u32 15, %v700_v27  ;;  %v3205_v32 = vshrl.u32 %v8590_v12, 16  ;;  %v4055_v20 = vor.u32 %v4053_v15, %v4052_v57  ;;  %v4057_v23 = vrot.slane %v4052_v57, 4  ;;  %v6701_v60 = vpop.f32.mrf.mxu1 }
 0x102   : > { %vm1146_vm4 = vcmp.ne.s32.totalorder %v788_v61, 15  ;;  %v8954_v52 = vsel %vm2819_vm12, %v3148_v1, %v8941_v62  ;;  %v8960_v48 = vadd.f32 %v6632_v9, %v6631_v35  ;;  %v3208_v54 = vshll.u32 %v8590_v12, 16  ;;  %v3808_v61 = vld [vmem:[#allocation2 + $0x9c] sm:$0xff] }
 0x103   : > { %vm3929_vm3 = vmpackc.low %vm1146_vm4, %vm1146_vm4  ;;  %vm8956_vm15 = vcmp.ne.s32.totalorder %v802_v39, 15  ;;  %v3207_v28 = vrot.slane %v3205_v32, 3  ;;  %v4056_v34 = vsel %vm8835_vm9, %v8814_v43, %v4055_v20  ;;  %v8971_v53 = vsel %vm8835_vm9, %v4057_v23, %v8811_v63  ;;  %v6703_v29 = vpop.f32.mrf.mxu1 }
 0x104   : > { %v3961_v24 = vsel %vm3929_vm3, 65537, %v8820_v56  ;;  %vm3931_vm1 = vmpackc.low %vm8956_vm15, %vm8956_vm15  ;;  %v702_v12 = vadd.s32 104, %v7396_v6  ;;  %vm8977_vm2 = vcmp.ne.s16.totalorder %v4056_v34, 0  ;;  %vm10160_vm10 = vcmp.ne.s16.totalorder %v8971_v53, 0 }
 0x105   : > { %3573 = vmatmul.mubr.bf16.gmra.mxu1 %v8898_v8  ;;  %v4068_v44 = vshrl.u32 %v3961_v24, 16  ;;  %v4071_v2 = vshll.u32 %v3961_v24, 16  ;;  %v4321_v47 = vsel %vm8977_vm2, %v3804_v22, 0  ;;  %v4323_v37 = vsel %vm10160_vm10, %v3806_v3, 0  ;;  %v6704_v9 = vpop.f32.mrf.mxu1 }
 0x106   : > { %3580 = vmatprep.mubr.bf16.mxu1 %v3131_v16  ;;  %v3963_v50 = vsel %vm3931_vm1, 65537, %v8820_v56  ;;  %v3210_v46 = vrot.slane %v3208_v54, 4  ;;  %v6272_v16 = vcombine.high %v8912_v55, %v4321_v47  ;;  %v6271_v17 = vcombine.low %v8912_v55, %v4321_v47  ;;  %v6634_v54 = vpop.f32.mrf.mxu0 }
 0x107   : > { %v4070_v45 = vrot.slane %v4068_v44, 7  ;;  %v4086_v15 = vshrl.u32 %v3963_v50, 16  ;;  %v4089_v59 = vshll.u32 %v3963_v50, 16  ;;  %v8989_v42 = vadd.f32 %v6701_v60, %v6700_v13  ;;  %v3812_v44 = vld [vmem:[#allocation2 + $0xb4] sm:$0xff] }
 0x108   : > { %v8991_v1 = vor.u32 %v3210_v46, %v3207_v28  ;;  %v816_v36 = vand.u32 15, %v702_v12  ;;  %v4711_v30 = vshll.u32 %v6272_v16, 16  ;;  %v4703_v27 = vshll.u32 %v6271_v17, 16  ;;  %v3810_v12 = vld [vmem:[#allocation2 + $0xa8] sm:$0xff] }
 0x109   : > { %10304 = vst [vmem:[#allocation14_spill] sm:$0xff] %v8989_v42  ;;  %v4073_v35 = vor.u32 %v4071_v2, %v4070_v45  ;;  %v4731_v57 = vshrl.u32 %v6272_v16, 16  ;;  %v4723_v4 = vshrl.u32 %v6271_v17, 16  ;;  %v4075_v49 = vrot.slane %v4070_v45, 4 }
 0x10a   : > { %v4088_v39 = vrot.slane %v4086_v15, 7  ;;  %v8995_v55 = vsel %vm2819_vm12, %v3184_v18, %v8991_v1  ;;  %v4713_v32 = vrot.slane %v4711_v30, 1  ;;  %v4705_v20 = vrot.slane %v4703_v27, 1 }
 0x10b   : > { %v4074_v23 = vsel %vm8835_vm9, %v8814_v43, %v4073_v35  ;;  %v9000_v22 = vadd.f32 %v6704_v9, %v6703_v29  ;;  %v9010_v10 = vsel %vm8835_vm9, %v4075_v49, %v8811_v63  ;;  %vm9012_vm5 = vcmp.ne.s32.totalorder %v816_v36, 15  ;;  %v3814_v35 = vld [vmem:[#allocation2 + $0xc0] sm:$0xff] }
 0x10c   : > { %vm9003_vm8 = vcmp.ne.s16.totalorder %v4074_v23, 0  ;;  %v4091_v18 = vor.u32 %v4089_v59, %v4088_v39  ;;  %v4714_v34 = vsel %vm4638_vm11, %v8917_v14, %v4713_v32  ;;  %v4733_v13 = vor.u32 %v4731_v57, %v4713_v32  ;;  %vm3933_vm4 = vmpackc.low %vm9012_vm5, %vm9012_vm5 }
 0x10d   : > { %10305 = vst [vmem:[#allocation13_spill] sm:$0xff] %v9000_v22  ;;  %3581 = vmatmul.mubr.bf16.gmra.mxu1 %v8928_v11  ;;  %v4706_v11 = vsel %vm4638_vm11, %v8923_v0, %v4705_v20  ;;  %v4325_v24 = vsel %vm9003_vm8, %v3808_v61, 0  ;;  %5275 = vmatprep.mubr.bf16.mxu0 %v4714_v34  ;;  %v4725_v50 = vor.u32 %v4723_v4, %v4705_v20  ;;  %v6635_v0 = vpop.f32.mrf.mxu0  ;;  %vm10158_vm3 = vcmp.ne.s16.totalorder %v9010_v10, 0 }
 0x10e   : > { %3588 = vmatprep.mubr.bf16.mxu1 %v8932_v33  ;;  %v6275_v2 = vcombine.high %v4323_v37, %v4325_v24  ;;  %v6274_v47 = vcombine.low %v4323_v37, %v4325_v24  ;;  %v4092_v14 = vsel %vm8835_vm9, %v8814_v43, %v4091_v18  ;;  %5276 = vmatmul.mubr.bf16.gmra.mxu0 %v4706_v11  ;;  %v3965_v60 = vsel %vm3933_vm4, 65537, %v8820_v56 }
 0x10f   : > { %vm9030_vm15 = vcmp.ne.s16.totalorder %v4092_v14, 0  ;;  %v4093_v46 = vrot.slane %v4088_v39, 4  ;;  %v4327_v37 = vsel %vm10158_vm3, %v3810_v12, 0  ;;  %v4104_v61 = vshrl.u32 %v3965_v60, 16  ;;  %v6637_v4 = vpop.f32.mrf.mxu0 }
 0x110   : > { %v4735_v16 = vshll.u32 %v6275_v2, 16  ;;  %v4727_v17 = vshll.u32 %v6274_v47, 16  ;;  %v4329_v45 = vsel %vm9030_vm15, %v3812_v44, 0  ;;  %v4755_v59 = vshrl.u32 %v6275_v2, 16  ;;  %v6706_v44 = vpop.f32.mrf.mxu1 }
 0x111   : > { %v6278_v15 = vcombine.high %v4327_v37, %v4329_v45  ;;  %v6277_v29 = vcombine.low %v4327_v37, %v4329_v45  ;;  %v4747_v36 = vshrl.u32 %v6274_v47, 16  ;;  %v9042_v57 = vsel %vm8835_vm9, %v4093_v46, %v8811_v63  ;;  %v6638_v47 = vpop.f32.mrf.mxu0  ;;  %v3816_v46 = vld [vmem:[#allocation2 + $0xcc] sm:$0xff] }
 0x112   : > { %v4737_v30 = vrot.slane %v4735_v16, 1  ;;  %v4729_v27 = vrot.slane %v4727_v17, 1  ;;  %v4107_v9 = vshll.u32 %v3965_v60, 16  ;;  %vm10157_vm1 = vcmp.ne.s16.totalorder %v9042_v57, 0 }
 0x113   : > { %v4759_v49 = vshll.u32 %v6278_v15, 16  ;;  %v4751_v39 = vshll.u32 %v6277_v29, 16  ;;  %v4106_v11 = vrot.slane %v4104_v61, 7  ;;  %v4331_v24 = vsel %vm10157_vm1, %v3814_v35, 0 }
 0x114   : > { %v4738_v32 = vsel %vm4638_vm11, %v4733_v13, %v4737_v30  ;;  %v4730_v20 = vsel %vm4638_vm11, %v4725_v50, %v4729_v27  ;;  %v4757_v23 = vor.u32 %v4755_v59, %v4737_v30  ;;  %v4749_v18 = vor.u32 %v4747_v36, %v4729_v27 }
 0x115   : > { %3589 = vmatmul.mubr.bf16.gmra.mxu1 %v8946_v25  ;;  %5283 = vmatprep.mubr.bf16.mxu0 %v4738_v32  ;;  %v4761_v28 = vrot.slane %v4759_v49, 1  ;;  %v4753_v34 = vrot.slane %v4751_v39, 1  ;;  %v4779_v12 = vshrl.u32 %v6278_v15, 16  ;;  %v3196_v2 = vshrl.u32 %v8588_v21, 16  ;;  %v6707_v15 = vpop.f32.mrf.mxu1 }
 0x116   : > { %3596 = vmatprep.mubr.bf16.mxu1 %v8949_v41  ;;  %v3199_v13 = vshll.u32 %v8588_v21, 16  ;;  %v4771_v25 = vshrl.u32 %v6277_v29, 16  ;;  %5284 = vmatmul.mubr.bf16.gmra.mxu0 %v4730_v20  ;;  %v4109_v41 = vor.u32 %v4107_v9, %v4106_v11  ;;  %v9055_v60 = vadd.f32 %v6635_v0, %v6634_v54 }
 0x117   : > { %v4762_v50 = vsel %vm4638_vm11, %v4757_v23, %v4761_v28  ;;  %v4754_v14 = vsel %vm4638_vm11, %v4749_v18, %v4753_v34  ;;  %v4781_v16 = vor.u32 %v4779_v12, %v4761_v28  ;;  %v3198_v17 = vrot.slane %v3196_v2, 3  ;;  %v6709_v30 = vpop.f32.mrf.mxu1  ;;  %v3818_v28 = vld [vmem:[#allocation2 + $0xd8] sm:$0xff] }
 0x118   : > { %5291 = vmatprep.mubr.bf16.mxu0 %v4762_v50  ;;  %v3201_v37 = vrot.slane %v3199_v13, 4  ;;  %v4773_v45 = vor.u32 %v4771_v25, %v4753_v34  ;;  %v4110_v21 = vsel %vm8835_vm9, %v8814_v43, %v4109_v41  ;;  %v9060_v59 = vadd.f32 %v6707_v15, %v6706_v44 }
 0x119   : > { %v9062_v29 = vadd.f32 %v6638_v47, %v6637_v4  ;;  %v3232_v36 = vshrl.u32 %v8624_v5, 16  ;;  %vm9065_vm5 = vcmp.ne.s16.totalorder %v4110_v21, 0  ;;  %v3235_v27 = vshll.u32 %v8624_v5, 16  ;;  %v6640_v4 = vpop.f32.mrf.mxu0  ;;  %v6710_v18 = vpop.f32.mrf.mxu1 }
 0x11a   : > { %v9069_v0 = vor.u32 %v3201_v37, %v3198_v17  ;;  %v704_v35 = vadd.s32 120, %v7396_v6  ;;  %v4333_v61 = vsel %vm9065_vm5, %v3816_v46, 0  ;;  %v4111_v39 = vrot.slane %v4106_v11, 4 }
 0x11b   : > { %v3234_v49 = vrot.slane %v3232_v36, 3  ;;  %v3223_v9 = vshrl.u32 %v8622_v40, 16  ;;  %v6281_v32 = vcombine.high %v4331_v24, %v4333_v61  ;;  %v6280_v23 = vcombine.low %v4331_v24, %v4333_v61  ;;  %v6641_v44 = vpop.f32.mrf.mxu0 }
 0x11c   : > { %v3203_v20 = vsel %vm2819_vm12, %v8941_v62, %v9069_v0  ;;  %v3237_v5 = vrot.slane %v3235_v27, 4  ;;  %v9081_v34 = vadd.f32 %v6710_v18, %v6709_v30  ;;  %v830_v12 = vand.u32 15, %v704_v35  ;;  %v6712_v62 = vpop.f32.mrf.mxu1 }
 0x11d   : > { %3597 = vmatmul.mubr.bf16.gmra.mxu1 %v8954_v52  ;;  %v9086_v11 = vsel %vm8835_vm9, %v4111_v39, %v8811_v63  ;;  %v3225_v52 = vrot.slane %v3223_v9, 3  ;;  %v4783_v2 = vshll.u32 %v6281_v32, 16  ;;  %v4775_v13 = vshll.u32 %v6280_v23, 16  ;;  %v6643_v50 = vpop.f32.mrf.mxu0 }
 0x11e   : > { %3604 = vmatprep.mubr.bf16.mxu1 %v8995_v55  ;;  %10314 = vst [vmem:[#allocation16_spill] sm:$0xff] %v9081_v34  ;;  %v9088_v25 = vor.u32 %v3237_v5, %v3234_v49  ;;  %vm10159_vm4 = vcmp.ne.s16.totalorder %v9086_v11, 0  ;;  %5292 = vmatmul.mubr.bf16.gmra.mxu0 %v4754_v14  ;;  %vm1152_vm1 = vcmp.ne.s32.totalorder %v830_v12, 15  ;;  %v4803_v24 = vshrl.u32 %v6281_v32, 16  ;;  %v6713_v15 = vpop.f32.mrf.mxu1 }
 0x11f   : > { %v9093_v55 = vsel %vm10159_vm4, %v3818_v28, 0  ;;  %v3226_v47 = vshll.u32 %v8622_v40, 16  ;;  %v4785_v41 = vrot.slane %v4783_v2, 1  ;;  %v4777_v46 = vrot.slane %v4775_v13, 1  ;;  %vm3935_vm3 = vmpackc.low %vm1152_vm1, %vm1152_vm1  ;;  %v6644_v27 = vpop.f32.mrf.mxu0  ;;  %v10316_v28 = vld [vmem:[#allocation21_spill] sm:$0xff] }
 0x120   : > { %v3239_v17 = vsel %vm2819_vm12, %v8991_v1, %v9088_v25  ;;  %v4795_v37 = vshrl.u32 %v6280_v23, 16  ;;  %v3967_v14 = vsel %vm3935_vm3, 65537, %v8820_v56  ;;  %v9100_v36 = vadd.f32 %v6641_v44, %v6640_v4  ;;  %v6715_v39 = vpop.f32.mrf.mxu1 }
 0x121   : > { %v3228_v21 = vrot.slane %v3226_v47, 4  ;;  %v9102_v30 = vadd.f32 %v6713_v15, %v6712_v62  ;;  %v4786_v40 = vsel %vm4638_vm11, %v4781_v16, %v4785_v41  ;;  %v4778_v35 = vsel %vm4638_vm11, %v4773_v45, %v4777_v46  ;;  %v6646_v4 = vpop.f32.mrf.mxu0 }
 0x122   : > { %v4122_v61 = vshrl.u32 %v3967_v14, 16  ;;  %v4125_v49 = vshll.u32 %v3967_v14, 16  ;;  %5299 = vmatprep.mubr.bf16.mxu0 %v4786_v40  ;;  %v9106_v1 = vor.u32 %v4803_v24, %v4785_v41  ;;  %v9108_v32 = vor.u32 %v4795_v37, %v4777_v46  ;;  %v6716_v5 = vpop.f32.mrf.mxu1  ;;  %v3820_v37 = vld [vmem:[#allocation2 + $0xe4] sm:$0xff] }
 0x123   : > { %10315 = vst [vmem:[#allocation15_spill] sm:$0xff] %v9102_v30  ;;  %v3229_v9 = vor.u32 %v3228_v21, %v3225_v52  ;;  %v9110_v23 = vadd.f32 %v6644_v27, %v6643_v50  ;;  %v3259_v12 = vshrl.u32 %v10316_v28, 16  ;;  %v3262_v16 = vshll.u32 %v10316_v28, 16  ;;  %v10318_v52 = vld [vmem:[#allocation20_spill] sm:$0xff]  ;;  %v6647_v24 = vpop.f32.mrf.mxu0 }
 0x124   : > { %v4124_v18 = vrot.slane %v4122_v61, 7  ;;  %v706_v45 = vadd.s32 136, %v7396_v6  ;;  %v9117_v2 = vadd.f32 %v6716_v5, %v6715_v39  ;;  %v3250_v13 = vshrl.u32 %v10318_v52, 16  ;;  %v6718_v46 = vpop.f32.mrf.mxu1 }
 0x125   : > { %3605 = vmatmul.mubr.bf16.gmra.mxu1 %v3203_v20  ;;  %v3230_v44 = vsel %vm2819_vm12, %v9069_v0, %v3229_v9  ;;  %v3253_v62 = vshll.u32 %v10318_v52, 16  ;;  %v3261_v47 = vrot.slane %v3259_v12, 3  ;;  %v3264_v50 = vrot.slane %v3262_v16, 4  ;;  %v6649_v0 = vpop.f32.mrf.mxu0 }
 0x126   : > { %3612 = vmatprep.mubr.bf16.mxu1 %v3239_v17  ;;  %10317 = vst [vmem:[#allocation18_spill] sm:$0xff] %v9117_v2  ;;  %v4127_v20 = vor.u32 %v4125_v49, %v4124_v18  ;;  %v844_v41 = vand.u32 15, %v706_v45  ;;  %5300 = vmatmul.mubr.bf16.gmra.mxu0 %v4778_v35  ;;  %v4129_v15 = vrot.slane %v4124_v18, 4  ;;  %v3252_v14 = vrot.slane %v3250_v13, 3  ;;  %v6719_v61 = vpop.f32.mrf.mxu1  ;;  %v3822_v35 = vld [vmem:[#allocation2 + $0xf0] sm:$0xff] }
 0x127   : > { %v3255_v17 = vrot.slane %v3253_v62, 4  ;;  %v9121_v21 = vadd.f32 %v6647_v24, %v6646_v4  ;;  %v3265_v40 = vor.u32 %v3264_v50, %v3261_v47  ;;  %v708_v49 = vadd.s32 152, %v7396_v6  ;;  %v6650_v28 = vpop.f32.mrf.mxu0  ;;  %v3791_v47 = vld [vmem:[#allocation2 + $0x38] sm:$0xf] }
 0x128   : > { %v4128_v27 = vsel %vm8835_vm9, %v8814_v43, %v4127_v20  ;;  %vm1154_vm3 = vcmp.ne.s32.totalorder %v844_v41, 15  ;;  %v9134_v4 = vsel %vm8835_vm9, %v4129_v15, %v8811_v63  ;;  %v9136_v5 = vadd.f32 %v6719_v61, %v6718_v46  ;;  %v6721_v52 = vpop.f32.mrf.mxu1 }
 0x129   : > { %vm9127_vm1 = vcmp.ne.s16.totalorder %v4128_v27, 0  ;;  %vm3937_vm4 = vmpackc.low %vm1154_vm3, %vm1154_vm3  ;;  %v3256_v18 = vor.u32 %v3255_v17, %v3252_v14  ;;  %v3266_v16 = vsel %vm2819_vm12, %v9088_v25, %v3265_v40  ;;  %vm4290_vm10 = vcmp.ne.s16.totalorder %v9134_v4, 0  ;;  %v9146_v50 = vpop.f32.mrf.mxu0  ;;  %v3793_v14 = vld [vmem:[#allocation2 + $0x44] sm:$0xf]  ;;  %v3795_v17 = vld [vmem:[#allocation2 + $0x50] sm:$0xf] }
 0x12a   : > { %10321 = vst [vmem:[#allocation17_spill] sm:$0xff] %v9136_v5  ;;  %v4337_v12 = vsel %vm9127_vm1, %v3820_v37, 0  ;;  %v3969_v45 = vsel %vm3937_vm4, 65537, %v8820_v56  ;;  %v4339_v41 = vsel %vm4290_vm10, %v3822_v35, 0  ;;  %v9151_v46 = vadd.f32 %v6650_v28, %v6649_v0  ;;  %v6722_v37 = vpop.f32.mrf.mxu1 }
 0x12b   : > { %v6284_v13 = vcombine.high %v9093_v55, %v4337_v12  ;;  %v6283_v62 = vcombine.low %v9093_v55, %v4337_v12  ;;  %v4140_v24 = vshrl.u32 %v3969_v45, 16  ;;  %v4143_v20 = vshll.u32 %v3969_v45, 16  ;;  %v3797_v12 = vld [vmem:[#allocation2 + $0x5c] sm:$0xf]  ;;  %v9153_v45 = vpop.f32.mrf.mxu0 }
 0x12c   : > { %v3257_v25 = vsel %vm2819_vm12, %v3229_v9, %v3256_v18  ;;  %v858_v15 = vand.u32 15, %v708_v49  ;;  %v9155_v2 = vadd.f32 %v6722_v37, %v6721_v52  ;;  %v4308_v9 = vsel %vm4274_vm6, %v3791_v47, 0  ;;  %v7038_v0 = vpop.f32.mrf.mxu1 }
 0x12d   : > { %3613 = vmatmul.mubr.bf16.gmra.mxu1 %v3230_v44  ;;  %v4807_v27 = vshll.u32 %v6284_v13, 16  ;;  %v4799_v40 = vshll.u32 %v6283_v62, 16  ;;  %v4142_v55 = vrot.slane %v4140_v24, 7  ;;  %v4827_v61 = vshrl.u32 %v6284_v13, 16  ;;  %v9159_v30 = vpop.f32.mrf.mxu0 }
 0x12e   : > { %3620 = vmatprep.mubr.bf16.mxu1 %v3266_v16  ;;  %v4819_v44 = vshrl.u32 %v6283_v62, 16  ;;  %10322 = vst [vmem:[#allocation3_spill] sm:$0xff] %v9155_v2  ;;  %vm1156_vm4 = vcmp.ne.s32.totalorder %v858_v15, 15  ;;  %v3824_v16 = vld [vmem:[#allocation2 + $0xfc] sm:$0xff]  ;;  %v4310_v62 = vsel %vm8860_vm13, %v3793_v14, 0  ;;  %v4312_v52 = vsel %vm4276_vm14, %v3795_v17, 0  ;;  %v9168_v47 = vpop.f32.mrf.mxu1 }
 0x12f   : > { %v4809_v35 = vrot.slane %v4807_v27, 1  ;;  %v4801_v49 = vrot.slane %v4799_v40, 1  ;;  %v4145_v18 = vor.u32 %v4143_v20, %v4142_v55  ;;  %vm3939_vm12 = vmpackc.low %vm1156_vm4, %vm1156_vm4  ;;  %v4147_v28 = vrot.slane %v4142_v55, 4  ;;  %v3826_v15 = vld [vmem:[#allocation2 + $0x108] sm:$0xff]  ;;  %v9177_v14 = vpop.f32.mrf.mxu0 }
 0x130   : > { %v3971_v13 = vsel %vm3939_vm12, 65537, %v8820_v56  ;;  %v4314_v24 = vsel %vm8865_vm0, %v3797_v12, 0  ;;  %v7039_v17 = vpop.f32.mrf.mxu1  ;;  %v6264_v55 = vcombine.low %v4308_v9, %v4310_v62  ;;  %vm10328_vm3 = vcmp.ne.s16.totalorder %v8971_v53, 0  ;;  %v3811_v53 = vld [vmem:[#allocation2 + $0xb0] sm:$0xf] }
 0x131   : > { %v4810_v20 = vsel %vm4638_vm11, %v9106_v1, %v4809_v35  ;;  %v4802_v37 = vsel %vm4638_vm11, %v9108_v32, %v4801_v49  ;;  %v4146_v56 = vsel %vm8835_vm9, %v8814_v43, %v4145_v18  ;;  %v4829_v38 = vor.u32 %v4827_v61, %v4809_v35  ;;  %v9191_v61 = vpop.f32.mrf.mxu0 }
 0x132   : > { %5307 = vmatprep.mubr.bf16.mxu0 %v4810_v20  ;;  %vm9179_vm6 = vcmp.ne.s16.totalorder %v4146_v56, 0  ;;  %v4821_v31 = vor.u32 %v4819_v44, %v4801_v49  ;;  %v9186_v1 = vsel %vm8835_vm9, %v4147_v28, %v8811_v63  ;;  %v4158_v32 = vshrl.u32 %v3971_v13, 16  ;;  %v2479_v18 = vpop.f32.mrf.mxu1 }
 0x133   : > { %5308 = vmatmul.mubr.bf16.gmra.mxu0 %v4802_v37  ;;  %v4341_v27 = vsel %vm9179_vm6, %v3824_v16, 0  ;;  %v4161_v40 = vshll.u32 %v3971_v13, 16  ;;  %vm4292_vm13 = vcmp.ne.s16.totalorder %v9186_v1, 0  ;;  %v6267_v28 = vcombine.low %v4312_v52, %v4314_v24  ;;  %v9200_v13 = vpop.f32.mrf.mxu0 }
 0x134   : > { %v6287_v12 = vcombine.high %v4339_v41, %v4341_v27  ;;  %v6286_v44 = vcombine.low %v4339_v41, %v4341_v27  ;;  %v9193_v35 = vrot.slane %v4158_v32, 7  ;;  %v4343_v49 = vsel %vm4292_vm13, %v3826_v15, 0  ;;  %v9203_v41 = vpop.f32.mrf.mxu1  ;;  %v3828_v32 = vld [vmem:[#allocation2 + $0x114] sm:$0xff] }
 0x135   : > { %3621 = vmatmul.mubr.bf16.gmra.mxu1 %v3257_v25  ;;  %v4664_v20 = vshrl.u32 %v6264_v55, 16  ;;  %v4666_v37 = vshll.u32 %v6264_v55, 16  ;;  %v9198_v16 = vadd.f32 %v7038_v0, %v9055_v60  ;;  %v4671_v2 = vshll.u32 %v6267_v28, 16  ;;  %v9205_v52 = vpop.f32.mrf.mxu0 }
 0x136   : > { %v4831_v9 = vshll.u32 %v6287_v12, 16  ;;  %v4823_v62 = vshll.u32 %v6286_v44, 16  ;;  %v4163_v56 = vor.u32 %v4161_v40, %v9193_v35  ;;  %v4851_v25 = vshrl.u32 %v6287_v12, 16 }
 0x137   : > { %10325 = vst [vmem:[#allocation4_spill] sm:$0xff] %v9198_v16  ;;  %v4668_v27 = vrot.slane %v4666_v37, 1  ;;  %v4691_v15 = vshrl.u32 %v6267_v28, 16  ;;  %v4843_v5 = vshrl.u32 %v6286_v44, 16  ;;  %v4695_v0 = vshll.u32 %v8894_v19, 16  ;;  %v9211_v16 = vpop.f32.mrf.mxu1  ;;  %v9221_v28 = vpop.f32.mrf.mxu0 }
 0x138   : > { %v4833_v24 = vrot.slane %v4831_v9, 1  ;;  %v4825_v55 = vrot.slane %v4823_v62, 1  ;;  %v4164_v60 = vsel %vm8835_vm9, %v8814_v43, %v4163_v56  ;;  %v4673_v37 = vrot.slane %v4671_v2, 1 }
 0x139   : > { %vm9213_vm14 = vcmp.ne.s16.totalorder %v4164_v60, 0  ;;  %v4669_v12 = vor.u32 %v4668_v27, %v4664_v20  ;;  %v9219_v44 = vadd.f32 %v9153_v45, %v9146_v50  ;;  %v9227_v60 = vpop.f32.mrf.mxu1  ;;  %v9230_v50 = vpop.f32.mrf.mxu0  ;;  %vm10332_vm4 = vcmp.ne.s16.totalorder %v9042_v57, 0 }
 0x13a   : > { %v4834_v9 = vsel %vm4638_vm11, %v4829_v38, %v4833_v24  ;;  %v4826_v62 = vsel %vm4638_vm11, %v4821_v31, %v4825_v55  ;;  %v4345_v56 = vsel %vm9213_vm14, %v3828_v32, 0  ;;  %v4853_v22 = vor.u32 %v4851_v25, %v4833_v24  ;;  %v3803_v32 = vld [vmem:[#allocation2 + $0x80] sm:$0xf]  ;;  %v3805_v24 = vld [vmem:[#allocation2 + $0x8c] sm:$0xf] }
 0x13b   : > { %5315 = vmatprep.mubr.bf16.mxu0 %v4834_v9  ;;  %v6290_v34 = vcombine.high %v4343_v49, %v4345_v56  ;;  %v4674_v2 = vsel %vm4638_vm11, %v4669_v12, %v4673_v37  ;;  %v4693_v20 = vor.u32 %v4691_v15, %v4673_v37  ;;  %v6289_v27 = vcombine.low %v4343_v49, %v4345_v56  ;;  %v2495_v9 = vpop.f32.mrf.mxu1  ;;  %v3807_v56 = vld [vmem:[#allocation2 + $0x98] sm:$0xf] }
 0x13c   : > { %5316 = vmatmul.mubr.bf16.gmra.mxu0 %v4826_v62  ;;  %7132 = vmatprep.mubr.bf16.mxu1 %v4674_v2  ;;  %v4845_v45 = vor.u32 %v4843_v5, %v4825_v55  ;;  %v4697_v38 = vrot.slane %v4695_v0, 1  ;;  %v9234_v31 = vadd.f32 %v8943_v58, %v9168_v47  ;;  %v9237_v25 = vadd.f32 %v7039_v17, %v9062_v29  ;;  %v9246_v5 = vpop.f32.mrf.mxu0  ;;  %v3830_v62 = vld [vmem:[#allocation2 + $0x120] sm:$0xff] }
 0x13d   : > { %v4855_v42 = vshll.u32 %v6290_v34, 16  ;;  %v4847_v12 = vshll.u32 %v6289_v27, 16  ;;  %v9241_v49 = vadd.f32 %v9177_v14, %v9159_v30  ;;  %v9244_v15 = vadd.f32 %v8960_v48, %v2479_v18  ;;  %v9251_v55 = vpop.f32.mrf.mxu1  ;;  %v3809_v2 = vld [vmem:[#allocation2 + $0xa4] sm:$0xf] }
 0x13e   : > { %v4698_v58 = vsel %vm4638_vm11, %v4693_v20, %v4697_v38  ;;  %v710_v47 = vadd.s32 168, %v7396_v6  ;;  %v4165_v29 = vrot.slane %v9193_v35, 4  ;;  %v4875_v17 = vshrl.u32 %v6290_v34, 16  ;;  %v9257_v14 = vpop.f32.mrf.mxu0 }
 0x13f   : > { %v4857_v0 = vrot.slane %v4855_v42, 1  ;;  %v4849_v37 = vrot.slane %v4847_v12, 1  ;;  %7133 = vmatmul.mubr.bf16.vlgmr.msra.gmra.mxu1 %v4698_v58  ;;  %v4320_v30 = vsel %vm4280_vm7, %v3803_v32, 0  ;;  %v4322_v48 = vsel %vm8977_vm2, %v3805_v24, 0  ;;  %v9270_v32 = vpop.f32.mrf.mxu1 }
 0x140   : > { %v872_v18 = vand.u32 15, %v710_v47  ;;  %v9262_v35 = vsel %vm8835_vm9, %v4165_v29, %v8811_v63  ;;  %v6273_v34 = vcombine.low %v4320_v30, %v4322_v48  ;;  %v4715_v42 = vshrl.u32 %v8894_v19, 16  ;;  %v9276_v58 = vpop.f32.mrf.mxu0 }
 0x141   : > { %v4858_v20 = vsel %vm4638_vm11, %v4853_v22, %v4857_v0  ;;  %v4850_v26 = vsel %vm4638_vm11, %v4845_v45, %v4849_v37  ;;  %vm4294_vm0 = vcmp.ne.s16.totalorder %v9262_v35, 0  ;;  %v9268_v8 = vor.u32 %v4875_v17, %v4857_v0  ;;  %v9286_v17 = vld [vmem:[#allocation2] sm:$0xff] }
 0x142   : > { %5323 = vmatprep.mubr.bf16.mxu0 %v4858_v20  ;;  %vm1158_vm7 = vcmp.ne.s32.totalorder %v872_v18, 15  ;;  %v9274_v24 = vsel %vm4294_vm0, %v3830_v62, 0  ;;  %v4717_v12 = vor.u32 %v4715_v42, %v4697_v38  ;;  %v4719_v19 = vshll.u32 %v6273_v34, 16 }
 0x143   : > { %vm3941_vm2 = vmpackc.low %vm1158_vm7, %vm1158_vm7  ;;  %v9280_v22 = vadd.f32 %v9203_v41, %v9121_v21  ;;  %v4867_v45 = vshrl.u32 %v6289_v27, 16  ;;  %v4324_v47 = vsel %vm10328_vm3, %v3807_v56, 0  ;;  %v4326_v29 = vsel %vm9003_vm8, %v3809_v2, 0  ;;  %v3813_v41 = vld [vmem:[#allocation2 + $0xbc] sm:$0xf]  ;;  %v9293_v27 = vpop.f32.mrf.mxu1 }
 0x144   : > { %5324 = vmatmul.mubr.bf16.gmra.mxu0 %v4850_v26  ;;  %v3973_v38 = vsel %vm3941_vm2, 65537, %v9286_v17  ;;  %v4721_v0 = vrot.slane %v4719_v19, 1  ;;  %v6276_v62 = vcombine.low %v4324_v47, %v4326_v29  ;;  %v4739_v30 = vshrl.u32 %v6273_v34, 16 }
 0x145   : > { %v4176_v48 = vshrl.u32 %v3973_v38, 16  ;;  %v4179_v18 = vshll.u32 %v3973_v38, 16  ;;  %v9289_v42 = vor.u32 %v4867_v45, %v4849_v37  ;;  %v6660_v21 = vadd.f32 %v9200_v13, %v9191_v61  ;;  %v9300_v34 = vpop.f32.mrf.mxu0 }
 0x146   : > { %v4722_v3 = vsel %vm4638_vm11, %v4717_v12, %v4721_v0  ;;  %v4741_v56 = vor.u32 %v4739_v30, %v4721_v0  ;;  %v4743_v2 = vshll.u32 %v6276_v62, 16  ;;  %v9298_v20 = vadd.f32 %v9100_v36, %v9211_v16  ;;  %v3815_v12 = vld [vmem:[#allocation2 + $0xc8] sm:$0xf]  ;;  %v3834_v30 = vld [vmem:[#allocation2 + $0x138] sm:$0xff] }
 0x147   : > { %v4178_v26 = vrot.slane %v4176_v48, 7  ;;  %7136 = vmatprep.mubr.bf16.mxu1 %v4722_v3  ;;  %v9304_v37 = vadd.f32 %v9227_v60, %v9151_v46  ;;  %v6663_v61 = vadd.f32 %v9221_v28, %v9205_v52  ;;  %v9309_v13 = vadd.f32 %v9110_v23, %v2495_v9  ;;  %v9316_v47 = vpop.f32.mrf.mxu0  ;;  %v3817_v52 = vld [vmem:[#allocation2 + $0xd4] sm:$0xf]  ;;  %v2511_v28 = vpop.f32.mrf.mxu1  ;;  %v3832_v23 = vld [vmem:[#allocation2 + $0x12c] sm:$0xff] }
 0x148   : > { %v4745_v19 = vrot.slane %v4743_v2, 1  ;;  %v712_v45 = vadd.s32 184, %v7396_v6  ;;  %vm10330_vm8 = vcmp.ne.s16.totalorder %v9010_v10, 0  ;;  %v4330_v16 = vsel %vm9030_vm15, %v3813_v41, 0 }
 0x149   : > { %10329 = vst [vmem:[#allocation19_spill] sm:$0xff] %v9304_v37  ;;  %v4328_v36 = vsel %vm10330_vm8, %v3811_v53, 0  ;;  %v4181_v46 = vor.u32 %v4179_v18, %v4178_v26  ;;  %v4183_v60 = vrot.slane %v4178_v26, 4  ;;  %v4763_v38 = vshrl.u32 %v6276_v62, 16  ;;  %v9324_v33 = vpop.f32.mrf.mxu0 }
 0x14a   : > { %v6279_v29 = vcombine.low %v4328_v36, %v4330_v16  ;;  %v4746_v9 = vsel %vm4638_vm11, %v4741_v56, %v4745_v19  ;;  %v886_v0 = vand.u32 15, %v712_v45  ;;  %v9320_v48 = vadd.f32 %v9251_v55, %v6660_v21 }
 0x14b   : > { %v4332_v10 = vsel %vm10332_vm4, %v3815_v12, 0  ;;  %v4182_v18 = vsel %vm8835_vm9, %v8814_v43, %v4181_v46  ;;  %7137 = vmatmul.mubr.bf16.gmra.mxu1 %v4746_v9  ;;  %v9332_v62 = vsel %vm8835_vm9, %v4183_v60, %v8811_v63  ;;  %v4765_v53 = vor.u32 %v4763_v38, %v4745_v19  ;;  %v9341_v21 = vpop.f32.mrf.mxu0  ;;  %v9347_v12 = vpop.f32.mrf.mxu1 }
 0x14c   : > { %10331 = vst [vmem:[#allocation7_spill] sm:$0xff] %v9320_v48  ;;  %v4767_v41 = vshll.u32 %v6279_v29, 16  ;;  %vm9334_vm15 = vcmp.ne.s16.totalorder %v4182_v18, 0  ;;  %vm1160_vm12 = vcmp.ne.s32.totalorder %v886_v0, 15  ;;  %vm4296_vm7 = vcmp.ne.s16.totalorder %v9332_v62, 0 }
 0x14d   : > { %v4334_v57 = vsel %vm9065_vm5, %v3817_v52, 0  ;;  %v4349_v3 = vsel %vm9334_vm15, %v3832_v23, 0  ;;  %vm3943_vm2 = vmpackc.low %vm1160_vm12, %vm1160_vm12  ;;  %v4351_v56 = vsel %vm4296_vm7, %v3834_v30, 0  ;;  %v4787_v36 = vshrl.u32 %v6279_v29, 16  ;;  %v9352_v16 = vpop.f32.mrf.mxu0 }
 0x14e   : > { %v4769_v2 = vrot.slane %v4767_v41, 1  ;;  %v6282_v26 = vcombine.low %v4332_v10, %v4334_v57  ;;  %v6293_v19 = vcombine.high %v9274_v24, %v4349_v3  ;;  %v6292_v45 = vcombine.low %v9274_v24, %v4349_v3  ;;  %v9355_v10 = vpop.f32.mrf.mxu1 }
 0x14f   : > { %v3975_v54 = vsel %vm3943_vm2, 65537, %v9286_v17  ;;  %v9357_v18 = vpop.f32.mrf.mxu0  ;;  %v9361_v29 = vadd.f32 %v9246_v5, %v9230_v50  ;;  %v9378_v50 = vadd.f32 %v9241_v49, %v2511_v28  ;;  %v3821_v5 = vld [vmem:[#allocation2 + $0xec] sm:$0xf]  ;;  %vm10338_vm5 = vcmp.ne.s16.totalorder %v9086_v11, 0 }
 0x150   : > { %v4194_v46 = vshrl.u32 %v3975_v54, 16  ;;  %v4197_v60 = vshll.u32 %v3975_v54, 16  ;;  %v4770_v38 = vsel %vm4638_vm11, %v4765_v53, %v4769_v2  ;;  %v4791_v52 = vshll.u32 %v6282_v26, 16 }
 0x151   : > { %v4879_v23 = vshll.u32 %v6293_v19, 16  ;;  %v4871_v9 = vshll.u32 %v6292_v45, 16  ;;  %v4899_v0 = vshrl.u32 %v6293_v19, 16  ;;  %7140 = vmatprep.mubr.bf16.mxu1 %v4770_v38  ;;  %v4891_v30 = vshrl.u32 %v6292_v45, 16  ;;  %v3819_v45 = vld [vmem:[#allocation2 + $0xe0] sm:$0xf]  ;;  %v9370_v38 = vpop.f32.mrf.mxu0 }
 0x152   : > { %v4196_v24 = vrot.slane %v4194_v46, 7  ;;  %v4789_v41 = vor.u32 %v4787_v36, %v4769_v2  ;;  %v4793_v57 = vrot.slane %v4791_v52, 1  ;;  %v9365_v53 = vadd.f32 %v9219_v44, %v9270_v32  ;;  %10337 = vst [vmem:[#allocation6_spill] sm:$0xff] %v9378_v50  ;;  %v3823_v46 = vld [vmem:[#allocation2 + $0xf8] sm:$0xf]  ;;  %v9384_v52 = vpop.f32.mrf.mxu1 }
 0x153   : > { %v4881_v3 = vrot.slane %v4879_v23, 1  ;;  %v4873_v54 = vrot.slane %v4871_v9, 1  ;;  %v9368_v19 = vadd.f32 %v9293_v27, %v6663_v61  ;;  %v9375_v36 = vadd.f32 %v9276_v58, %v9257_v14  ;;  %v3836_v27 = vld [vmem:[#allocation2 + $0x144] sm:$0xff]  ;;  %v9386_v23 = vpop.f32.mrf.mxu0  ;;  %v3838_v58 = vld [vmem:[#allocation2 + $0x150] sm:$0xff] }
 0x154   : > { %10335 = vst [vmem:[#allocation8_spill] sm:$0xff] %v9365_v53  ;;  %v4199_v48 = vor.u32 %v4197_v60, %v4196_v24  ;;  %v4794_v2 = vsel %vm4638_vm11, %v4789_v41, %v4793_v57  ;;  %v714_v14 = vadd.s32 200, %v7396_v6  ;;  %v4338_v9 = vsel %vm9127_vm1, %v3821_v5, 0 }
 0x155   : > { %10336 = vst [vmem:[#allocation5_spill] sm:$0xff] %v9368_v19  ;;  %v4882_v44 = vsel %vm4638_vm11, %v9268_v8, %v4881_v3  ;;  %v4874_v32 = vsel %vm4638_vm11, %v9289_v42, %v4873_v54  ;;  %v4901_v61 = vor.u32 %v4899_v0, %v4881_v3  ;;  %v4893_v60 = vor.u32 %v4891_v30, %v4873_v54  ;;  %v3825_v30 = vld [vmem:[#allocation2 + $0x104] sm:$0xf] }
 0x156   : > { %7141 = vmatmul.mubr.bf16.gmra.mxu1 %v4794_v2  ;;  %5331 = vmatprep.mubr.bf16.mxu0 %v4882_v44  ;;  %v4200_v49 = vsel %vm8835_vm9, %v8814_v43, %v4199_v48  ;;  %v4201_v8 = vrot.slane %v4196_v24, 4  ;;  %v4336_v42 = vsel %vm10338_vm5, %v3819_v45, 0  ;;  %v4811_v0 = vshrl.u32 %v6282_v26, 16  ;;  %v2527_v26 = vpop.f32.mrf.mxu1 }
 0x157   : > { %5332 = vmatmul.mubr.bf16.gmra.mxu0 %v4874_v32  ;;  %vm9394_vm3 = vcmp.ne.s16.totalorder %v4200_v49, 0  ;;  %v4340_v48 = vsel %vm4290_vm10, %v3823_v46, 0  ;;  %v900_v24 = vand.u32 15, %v714_v14  ;;  %v6285_v3 = vcombine.low %v4336_v42, %v4338_v9  ;;  %v9410_v2 = vpop.f32.mrf.mxu0 }
 0x158   : > { %v4353_v41 = vsel %vm9394_vm3, %v3836_v27, 0  ;;  %v9407_v11 = vsel %vm8835_vm9, %v4201_v8, %v8811_v63  ;;  %v4813_v39 = vor.u32 %v4811_v0, %v4793_v57  ;;  %v4342_v46 = vsel %vm9179_vm6, %v3825_v30, 0 }
 0x159   : > { %v6296_v54 = vcombine.high %v4351_v56, %v4353_v41  ;;  %v6295_v45 = vcombine.low %v4351_v56, %v4353_v41  ;;  %vm4298_vm8 = vcmp.ne.s16.totalorder %v9407_v11, 0  ;;  %vm1162_vm1 = vcmp.ne.s32.totalorder %v900_v24, 15  ;;  %v9418_v49 = vpop.f32.mrf.mxu0 }
 0x15a   : > { %v9414_v4 = vsel %vm4298_vm8, %v3838_v58, 0  ;;  %v4815_v5 = vshll.u32 %v6285_v3, 16  ;;  %vm3945_vm10 = vmpackc.low %vm1162_vm1, %vm1162_vm1  ;;  %v9421_v8 = vcombine.low %v4340_v48, %v4342_v46  ;;  %v4835_v42 = vshrl.u32 %v6285_v3, 16 }
 0x15b   : > { %v4903_v44 = vshll.u32 %v6296_v54, 16  ;;  %v4895_v32 = vshll.u32 %v6295_v45, 16  ;;  %v4923_v27 = vshrl.u32 %v6296_v54, 16  ;;  %v4915_v56 = vshrl.u32 %v6295_v45, 16  ;;  %v9423_v24 = vpop.f32.mrf.mxu1  ;;  %v9425_v51 = vpop.f32.mrf.mxu0 }
 0x15c   : > { %v3977_v57 = vsel %vm3945_vm10, 65537, %v9286_v17  ;;  %v4817_v14 = vrot.slane %v4815_v5, 1  ;;  %v4839_v45 = vshll.u32 %v9421_v8, 16  ;;  %v6672_v19 = vadd.f32 %v9316_v47, %v9300_v34 }
 0x15d   : > { %v4905_v9 = vrot.slane %v4903_v44, 1  ;;  %v4897_v58 = vrot.slane %v4895_v32, 1  ;;  %v4212_v0 = vshrl.u32 %v3977_v57, 16  ;;  %v4215_v41 = vshll.u32 %v3977_v57, 16  ;;  %v3827_v44 = vld [vmem:[#allocation2 + $0x110] sm:$0xf]  ;;  %v9435_v57 = vpop.f32.mrf.mxu1  ;;  %v9437_v50 = vpop.f32.mrf.mxu0 }
 0x15e   : > { %v4818_v30 = vsel %vm4638_vm11, %v4813_v39, %v4817_v14  ;;  %v4837_v54 = vor.u32 %v4835_v42, %v4817_v14  ;;  %v3829_v32 = vld [vmem:[#allocation2 + $0x11c] sm:$0xf]  ;;  %v4841_v14 = vrot.slane %v4839_v45, 1  ;;  %v9442_v34 = vadd.f32 %v9347_v12, %v6672_v19 }
 0x15f   : > { %v4906_v48 = vsel %vm4638_vm11, %v4901_v61, %v4905_v9  ;;  %v4898_v3 = vsel %vm4638_vm11, %v4893_v60, %v4897_v58  ;;  %v4214_v5 = vrot.slane %v4212_v0, 7  ;;  %v9433_v46 = vor.u32 %v4923_v27, %v4905_v9  ;;  %7144 = vmatprep.mubr.bf16.mxu1 %v4818_v30  ;;  %v9454_v9 = vpop.f32.mrf.mxu1  ;;  %v3840_v12 = vld [vmem:[#allocation2 + $0x15c] sm:$0xff]  ;;  %v3842_v0 = vld [vmem:[#allocation2 + $0x168] sm:$0xff] }
 0x160   : > { %5339 = vmatprep.mubr.bf16.mxu0 %v4906_v48  ;;  %v9439_v39 = vor.u32 %v4915_v56, %v4897_v58  ;;  %10341 = vst [vmem:[#allocation11_spill] sm:$0xff] %v9442_v34  ;;  %v9446_v47 = vadd.f32 %v9361_v29, %v9355_v10  ;;  %v6675_v60 = vadd.f32 %v9341_v21, %v9324_v33  ;;  %v716_v42 = vadd.s32 216, %v7396_v6  ;;  %v3831_v56 = vld [vmem:[#allocation2 + $0x128] sm:$0xf]  ;;  %v9456_v58 = vpop.f32.mrf.mxu0  ;;  %v3833_v48 = vld [vmem:[#allocation2 + $0x134] sm:$0xf] }
 0x161   : > { %5340 = vmatmul.mubr.bf16.gmra.mxu0 %v4898_v3  ;;  %v4217_v61 = vor.u32 %v4215_v41, %v4214_v5  ;;  %v9451_v27 = vadd.f32 %v9375_v36, %v2527_v26  ;;  %v4842_v19 = vsel %vm4638_vm11, %v4837_v54, %v4841_v14  ;;  %v4219_v10 = vrot.slane %v4214_v5, 4  ;;  %v2543_v30 = vpop.f32.mrf.mxu1 }
 0x162   : > { %10342 = vst [vmem:[#allocation12_spill] sm:$0xff] %v9446_v47  ;;  %v4344_v29 = vsel %vm4292_vm13, %v3827_v44, 0  ;;  %v4346_v33 = vsel %vm9213_vm14, %v3829_v32, 0  ;;  %7145 = vmatmul.mubr.bf16.gmra.mxu1 %v4842_v19  ;;  %v9467_v36 = vadd.f32 %v9384_v52, %v6675_v60  ;;  %v914_v26 = vand.u32 15, %v716_v42  ;;  %v9469_v54 = vpop.f32.mrf.mxu0 }
 0x163   : > { %10343 = vst [vmem:[#allocation9_spill] sm:$0xff] %v9451_v27  ;;  %v4218_v21 = vsel %vm8835_vm9, %v8814_v43, %v4217_v61  ;;  %v6291_v41 = vcombine.low %v4344_v29, %v4346_v33  ;;  %v9478_v40 = vsel %vm8835_vm9, %v4219_v10, %v8811_v63  ;;  %v4859_v45 = vshrl.u32 %v9421_v8, 16 }
 0x164   : > { %10344 = vst [vmem:[#allocation10_spill] sm:$0xff] %v9467_v36  ;;  %vm9471_vm6 = vcmp.ne.s16.totalorder %v4218_v21, 0  ;;  %v4348_v52 = vsel %vm4294_vm0, %v3831_v56, 0  ;;  %vm1164_vm13 = vcmp.ne.s32.totalorder %v914_v26, 15  ;;  %vm4300_vm14 = vcmp.ne.s16.totalorder %v9478_v40, 0  ;;  %v9488_v32 = vpop.f32.mrf.mxu0 }
 0x165   : > { %v4357_v3 = vsel %vm9471_vm6, %v3840_v12, 0  ;;  %v4863_v5 = vshll.u32 %v6291_v41, 16  ;;  %v9486_v44 = vpop.f32.mrf.mxu1  ;;  %vm3947_vm4 = vmpackc.low %vm1164_vm13, %vm1164_vm13  ;;  %v4359_v35 = vsel %vm4300_vm14, %v3842_v0, 0  ;;  %v4861_v8 = vor.u32 %v4859_v45, %v4841_v14 }
 0x166   : > { %v6299_v61 = vcombine.high %v9414_v4, %v4357_v3  ;;  %v6298_v60 = vcombine.low %v9414_v4, %v4357_v3  ;;  %v3979_v42 = vsel %vm3947_vm4, 65537, %v9286_v17  ;;  %v4350_v12 = vsel %vm9334_vm15, %v3833_v48, 0  ;;  %v9499_v29 = vpop.f32.mrf.mxu0 }
 0x167   : > { %v4865_v56 = vrot.slane %v4863_v5, 1  ;;  %v4883_v19 = vshrl.u32 %v6291_v41, 16  ;;  %v9497_v10 = vpop.f32.mrf.mxu1  ;;  %v4230_v26 = vshrl.u32 %v3979_v42, 16  ;;  %v4233_v4 = vshll.u32 %v3979_v42, 16 }
 0x168   : > { %v4927_v33 = vshll.u32 %v6299_v61, 16  ;;  %v4919_v21 = vshll.u32 %v6298_v60, 16  ;;  %v4947_v3 = vshrl.u32 %v6299_v61, 16  ;;  %v4939_v0 = vshrl.u32 %v6298_v60, 16  ;;  %v9504_v5 = vpop.f32.mrf.mxu0  ;;  %v3835_v60 = vld [vmem:[#allocation2 + $0x140] sm:$0xf] }
 0x169   : > { %v4866_v36 = vsel %vm4638_vm11, %v4861_v8, %v4865_v56  ;;  %v6294_v14 = vcombine.low %v4348_v52, %v4350_v12  ;;  %v9502_v45 = vpop.f32.mrf.mxu1  ;;  %v4232_v41 = vrot.slane %v4230_v26, 7  ;;  %v4885_v34 = vor.u32 %v4883_v19, %v4865_v56 }
 0x16a   : > { %v4929_v55 = vrot.slane %v4927_v33, 1  ;;  %v4921_v48 = vrot.slane %v4919_v21, 1  ;;  %7148 = vmatprep.mubr.bf16.mxu1 %v4866_v36  ;;  %v6678_v47 = vadd.f32 %v9357_v18, %v9352_v16  ;;  %v6681_v61 = vadd.f32 %v9386_v23, %v9370_v38  ;;  %v9513_v42 = vpop.f32.mrf.mxu0  ;;  %v3837_v33 = vld [vmem:[#allocation2 + $0x14c] sm:$0xf]  ;;  %v3844_v16 = vld [vmem:[#allocation2 + $0x174] sm:$0xff] }
 0x16b   : > { %v4887_v27 = vshll.u32 %v6294_v14, 16  ;;  %v718_v8 = vadd.s32 232, %v7396_v6  ;;  %v9511_v52 = vpop.f32.mrf.mxu1  ;;  %v4235_v56 = vor.u32 %v4233_v4, %v4232_v41  ;;  %v4237_v4 = vrot.slane %v4232_v41, 4 }
 0x16c   : > { %v4930_v12 = vsel %vm4638_vm11, %v9433_v46, %v4929_v55  ;;  %v4922_v36 = vsel %vm4638_vm11, %v9439_v39, %v4921_v48  ;;  %v4949_v19 = vor.u32 %v4947_v3, %v4929_v55  ;;  %v4941_v18 = vor.u32 %v4939_v0, %v4921_v48  ;;  %v3839_v55 = vld [vmem:[#allocation2 + $0x158] sm:$0xf] }
 0x16d   : > { %5347 = vmatprep.mubr.bf16.mxu0 %v4930_v12  ;;  %v4889_v38 = vrot.slane %v4887_v27, 1  ;;  %v9520_v23 = vadd.f32 %v6678_v47, %v9435_v57  ;;  %v9522_v21 = vadd.f32 %v6681_v61, %v2543_v30  ;;  %v9524_v26 = vpop.f32.mrf.mxu1  ;;  %v4236_v46 = vsel %vm8835_vm9, %v8814_v43, %v4235_v56  ;;  %v3846_v47 = vld [vmem:[#allocation2 + $0x180] sm:$0xff]  ;;  %v9540_v61 = vpop.f32.mrf.mxu0 }
 0x16e   : > { %5348 = vmatmul.mubr.bf16.gmra.mxu0 %v4922_v36  ;;  %v928_v39 = vand.u32 15, %v718_v8  ;;  %v4352_v3 = vsel %vm4296_vm7, %v3835_v60, 0  ;;  %vm9531_vm0 = vcmp.ne.s16.totalorder %v4236_v46, 0  ;;  %v4354_v27 = vsel %vm9394_vm3, %v3837_v33, 0  ;;  %v3841_v60 = vld [vmem:[#allocation2 + $0x164] sm:$0xf] }
 0x16f   : > { %10347 = vst [vmem:[#allocation21_spill] sm:$0xff] %v9520_v23  ;;  %10348 = vst [vmem:[#allocation20_spill] sm:$0xff] %v9522_v21  ;;  %v4890_v57 = vsel %vm4638_vm11, %v4885_v34, %v4889_v38  ;;  %v4907_v30 = vshrl.u32 %v6294_v14, 16  ;;  %v9538_v48 = vpop.f32.mrf.mxu1  ;;  %v4361_v62 = vsel %vm9531_vm0, %v3844_v16, 0  ;;  %v9547_v41 = vsel %vm8835_vm9, %v4237_v4, %v8811_v63 }
 0x170   : > { %7149 = vmatmul.mubr.bf16.gmra.mxu1 %v4890_v57  ;;  %vm1166_vm15 = vcmp.ne.s32.totalorder %v928_v39, 15  ;;  %v6297_v34 = vcombine.low %v4352_v3, %v4354_v27  ;;  %v6302_v8 = vcombine.high %v4359_v35, %v4361_v62  ;;  %v6301_v28 = vcombine.low %v4359_v35, %v4361_v62  ;;  %v9559_v57 = vpop.f32.mrf.mxu0 }
 0x171   : > { %vm3949_vm12 = vmpackc.low %vm1166_vm15, %vm1166_vm15  ;;  %vm4302_vm7 = vcmp.ne.s16.totalorder %v9547_v41, 0  ;;  %v4909_v14 = vor.u32 %v4907_v30, %v4889_v38  ;;  %v9550_v12 = vpop.f32.mrf.mxu1  ;;  %v4356_v16 = vsel %vm4298_vm8, %v3839_v55, 0  ;;  %v4358_v62 = vsel %vm9471_vm6, %v3841_v60, 0 }
 0x172   : > { %v3981_v36 = vsel %vm3949_vm12, 65537, %v9286_v17  ;;  %v4363_v56 = vsel %vm4302_vm7, %v3846_v47, 0  ;;  %v4911_v33 = vshll.u32 %v6297_v34, 16  ;;  %v4951_v46 = vshll.u32 %v6302_v8, 16 }
 0x173   : > { %v4943_v39 = vshll.u32 %v6301_v28, 16  ;;  %v4248_v4 = vshrl.u32 %v3981_v36, 16  ;;  %v4251_v35 = vshll.u32 %v3981_v36, 16  ;;  %v9557_v3 = vpop.f32.mrf.mxu1  ;;  %v4971_v38 = vshrl.u32 %v6302_v8, 16 }
 0x174   : > { %v4913_v27 = vrot.slane %v4911_v33, 1  ;;  %v4963_v30 = vshrl.u32 %v6301_v28, 16  ;;  %v4953_v21 = vrot.slane %v4951_v46, 1  ;;  %v6300_v53 = vcombine.low %v4356_v16, %v4358_v62  ;;  %v3843_v16 = vld [vmem:[#allocation2 + $0x170] sm:$0xf] }
 0x175   : > { %v4945_v47 = vrot.slane %v4943_v39, 1  ;;  %v4250_v23 = vrot.slane %v4248_v4, 7  ;;  %v9563_v11 = vpop.f32.mrf.mxu1  ;;  %v4931_v37 = vshrl.u32 %v6297_v34, 16  ;;  %v6684_v36 = vadd.f32 %v9418_v49, %v9410_v2  ;;  %v3845_v46 = vld [vmem:[#allocation2 + $0x17c] sm:$0xf]  ;;  %v3848_v34 = vld [vmem:[#allocation2 + $0x18c] sm:$0xff] }
 0x176   : > { %v4914_v55 = vsel %vm4638_vm11, %v4909_v14, %v4913_v27  ;;  %v6687_v8 = vadd.f32 %v9437_v50, %v9425_v51  ;;  %v4954_v28 = vsel %vm4638_vm11, %v4949_v19, %v4953_v21  ;;  %v9572_v33 = vor.u32 %v4971_v38, %v4953_v21  ;;  %v9576_v14 = vpop.f32.mrf.mxu0 }
 0x177   : > { %v4946_v1 = vsel %vm4638_vm11, %v4941_v18, %v4945_v47  ;;  %v4253_v60 = vor.u32 %v4251_v35, %v4250_v23  ;;  %7152 = vmatprep.mubr.bf16.mxu1 %v4914_v55  ;;  %v9574_v39 = vpop.f32.mrf.mxu1  ;;  %5355 = vmatprep.mubr.bf16.mxu0 %v4954_v28  ;;  %v4965_v2 = vor.u32 %v4963_v30, %v4945_v47  ;;  %v4935_v4 = vshll.u32 %v6300_v53, 16 }
 0x178   : > { %v4933_v49 = vor.u32 %v4931_v37, %v4913_v27  ;;  %v9579_v50 = vadd.f32 %v9423_v24, %v6684_v36  ;;  %5356 = vmatmul.mubr.bf16.gmra.mxu0 %v4946_v1  ;;  %v9585_v19 = vadd.f32 %v9454_v9, %v6687_v8  ;;  %v720_v18 = vadd.s32 248, %v7396_v6  ;;  %v9590_v38 = vpop.f32.mrf.mxu0  ;;  %v3850_v27 = vld [vmem:[#allocation2 + $0x198] sm:$0xff] }
 0x179   : > { %v4254_v51 = vsel %vm8835_vm9, %v8814_v43, %v4253_v60  ;;  %v4255_v21 = vrot.slane %v4250_v23, 4  ;;  %v9588_v35 = vpop.f32.mrf.mxu1  ;;  %v4937_v24 = vrot.slane %v4935_v4, 1  ;;  %v4360_v30 = vsel %vm4300_vm14, %v3843_v16, 0  ;;  %v3847_v60 = vld [vmem:[#allocation2 + $0x188] sm:$0xf] }
 0x17a   : > { %10351 = vst [vmem:[#allocation22_spill] sm:$0xff] %v9585_v19  ;;  %vm9592_vm2 = vcmp.ne.s16.totalorder %v4254_v51, 0  ;;  %v4362_v9 = vsel %vm9531_vm0, %v3845_v46, 0  ;;  %v942_v23 = vand.u32 15, %v720_v18  ;;  %v9609_v36 = vpop.f32.mrf.mxu0  ;;  %v4955_v1 = vshrl.u32 %v6300_v53, 16 }
 0x17b   : > { %v4365_v6 = vsel %vm9592_vm2, %v3848_v34, 0  ;;  %v9605_v62 = vsel %vm8835_vm9, %v4255_v21, %v8811_v63  ;;  %v6303_v47 = vcombine.low %v4360_v30, %v4362_v9  ;;  %v9607_v55 = vpop.f32.mrf.mxu1  ;;  %v4938_v28 = vsel %vm4638_vm11, %v4933_v49, %v4937_v24  ;;  %v3849_v51 = vld [vmem:[#allocation2 + $0x194] sm:$0xf] }
 0x17c   : > { %v6305_v8 = vcombine.high %v4363_v56, %v4365_v6  ;;  %v6304_v40 = vcombine.low %v4363_v56, %v4365_v6  ;;  %vm4304_vm5 = vcmp.ne.s16.totalorder %v9605_v62, 0  ;;  %7153 = vmatmul.mubr.bf16.gmra.mxu1 %v4938_v28  ;;  %vm1168_vm3 = vcmp.ne.s32.totalorder %v942_v23, 15  ;;  %v9619_v46 = vpop.f32.mrf.mxu0 }
 0x17d   : > { %v9615_v0 = vsel %vm4304_vm5, %v3850_v27, 0  ;;  %v4959_v63 = vshll.u32 %v6303_v47, 16  ;;  %v9617_v16 = vpop.f32.mrf.mxu1  ;;  %vm3951_vm8 = vmpackc.low %vm1168_vm3, %vm1168_vm3  ;;  %v9623_v49 = vadd.f32 %v9524_v26, %v9060_v59  ;;  %v4957_v21 = vor.u32 %v4955_v1, %v4937_v24 }
 0x17e   : > { %v4975_v34 = vshll.u32 %v6305_v8, 16  ;;  %v4967_v4 = vshll.u32 %v6304_v40, 16  ;;  %v4995_v56 = vshrl.u32 %v6305_v8, 16  ;;  %v3983_v18 = vsel %vm3951_vm8, 65537, %v9286_v17 }
 0x17f   : > { %10354 = vst [vmem:[#allocation23_spill] sm:$0xff] %v9623_v49  ;;  %v4961_v27 = vrot.slane %v4959_v63, 1  ;;  %v4987_v53 = vshrl.u32 %v6304_v40, 16  ;;  %v9626_v30 = vpop.f32.mrf.mxu1  ;;  %v4266_v23 = vshrl.u32 %v3983_v18, 16  ;;  %v4269_v28 = vshll.u32 %v3983_v18, 16  ;;  %v9628_v19 = vpop.f32.mrf.mxu0 }
 0x180   : > { %v4977_v9 = vrot.slane %v4975_v34, 1  ;;  %v4969_v6 = vrot.slane %v4967_v4, 1  ;;  %v4364_v59 = vsel %vm4302_vm7, %v3847_v60, 0  ;;  %v4366_v26 = vsel %vm9592_vm2, %v3849_v51, 0  ;;  %v3851_v51 = vld [vmem:[#allocation2 + $0x1a0] sm:$0xf] }
 0x181   : > { %v4962_v8 = vsel %vm4638_vm11, %v4957_v21, %v4961_v27  ;;  %v4979_v17 = vshrl.u32 %v6303_v47, 16  ;;  %v9635_v24 = vpop.f32.mrf.mxu1  ;;  %v4268_v63 = vrot.slane %v4266_v23, 7  ;;  %v9642_v4 = vpop.f32.mrf.mxu0  ;;  %v6306_v60 = vcombine.low %v4364_v59, %v4366_v26  ;;  %v3855_v26 = vld [vmem:[#allocation2 + $0x1b8] sm:$0x1] }
 0x182   : > { %v4978_v40 = vsel %vm4638_vm11, %v9572_v33, %v4977_v9  ;;  %v4970_v1 = vsel %vm4638_vm11, %v4965_v2, %v4969_v6  ;;  %v9640_v34 = vor.u32 %v4995_v56, %v4977_v9  ;;  %7156 = vmatprep.mubr.bf16.mxu1 %v4962_v8  ;;  %v9644_v41 = vor.u32 %v4987_v53, %v4969_v6  ;;  %v3852_v33 = vld [vmem:[#allocation2 + $0x1a4] sm:$0xff]  ;;  %v10355_v56 = vld [vmem:[#allocation14_spill] sm:$0xff]  ;;  %v3853_v53 = vld [vmem:[#allocation2 + $0x1ac] sm:$0xf] }
 0x183   : > { %5363 = vmatprep.mubr.bf16.mxu0 %v4978_v40  ;;  %v4981_v37 = vor.u32 %v4979_v17, %v4961_v27  ;;  %v6690_v47 = vadd.f32 %v9469_v54, %v9456_v58  ;;  %v9648_v18 = vpop.f32.mrf.mxu1  ;;  %v4271_v2 = vor.u32 %v4269_v28, %v4268_v63  ;;  %v9652_v21 = vadd.f32 %v10355_v56, %v9538_v48  ;;  %v10356_v9 = vld [vmem:[#allocation16_spill] sm:$0xff]  ;;  %v9660_v6 = vpop.f32.mrf.mxu0  ;;  %v10358_v28 = vld [vmem:[#allocation13_spill] sm:$0xff] }
 0x184   : > { %5364 = vmatmul.mubr.bf16.gmra.mxu0 %v4970_v1  ;;  %v9656_v23 = vadd.f32 %v9550_v12, %v10356_v9  ;;  %v6693_v27 = vadd.f32 %v9499_v29, %v9488_v32  ;;  %v4983_v58 = vshll.u32 %v6306_v60, 16  ;;  %v9667_v8 = vadd.f32 %v10358_v28, %v9557_v3  ;;  %v3854_v48 = vld [vmem:[#allocation2 + $0x1b0] sm:$0x11] }
 0x185   : > { %v9663_v54 = vadd.f32 %v6690_v47, %v9497_v10  ;;  %v4273_v59 = vrot.slane %v4268_v63, 4  ;;  %v9669_v17 = vpop.f32.mrf.mxu1  ;;  %v4272_v32 = vsel %vm8835_vm9, %v8814_v43, %v4271_v2  ;;  %v4368_v10 = vsel %vm4304_vm5, %v3851_v51, 0  ;;  %v9679_v40 = vpop.f32.mrf.mxu0  ;;  %v10362_v63 = vld [vmem:[#allocation17_spill] sm:$0xff] }
 0x186   : > { %10357 = vst [vmem:[#allocation14_spill] sm:$0xff] %v9656_v23  ;;  %10359 = vst [vmem:[#allocation16_spill] sm:$0xff] %v9667_v8  ;;  %v9675_v29 = vadd.f32 %v6693_v27, %v9511_v52  ;;  %v5003_v12 = vshrl.u32 %v6306_v60, 16  ;;  %vm9681_vm1 = vcmp.ne.s16.totalorder %v4272_v32, 0  ;;  %v4985_v1 = vrot.slane %v4983_v58, 1 }
 0x187   : > { %vm4306_vm10 = vcmp.ne.s16.totalorder %v4273_v59, 0  ;;  %v9687_v47 = vadd.f32 %v9563_v11, %v10362_v63  ;;  %v6771_v43 = vpop.f32.mrf.mxu1  ;;  %v4369_v7 = vsel %vm9681_vm1, %v3852_v33, 0  ;;  %v4370_v62 = vsel %vm9681_vm1, %v3853_v53, 0  ;;  %v9693_v51 = vpop.f32.mrf.mxu0 }
 0x188   : > { %v4371_v52 = vsel %vm4306_vm10, %v3854_v48, 0  ;;  %v4372_v60 = vsel %vm4306_vm10, %v3855_v26, 0  ;;  %v6308_v2 = vcombine.high %v9615_v0, %v4369_v7  ;;  %v6307_v56 = vcombine.low %v9615_v0, %v4369_v7 }
 0x189   : > { %10363 = vst [vmem:[#allocation13_spill] sm:$0xff] %v9687_v47  ;;  %v4986_v9 = vsel %vm4638_vm11, %v4981_v37, %v4985_v1  ;;  %v6311_v27 = vcombine.high %v4371_v52, %v4371_v52  ;;  %v6773_v11 = vpop.f32.mrf.mxu1  ;;  %v6309_v58 = vcombine.low %v4368_v10, %v4370_v62  ;;  %v5005_v28 = vor.u32 %v5003_v12, %v4985_v1  ;;  %v9698_v48 = vpop.f32.mrf.mxu0  ;;  %v10364_v62 = vld [vmem:[#allocation15_spill] sm:$0xff] }
 0x18a   : > { %7157 = vmatmul.mubr.bf16.gmra.mxu1 %v4986_v9  ;;  %v6310_v59 = vcombine.low %v4371_v52, %v4371_v52  ;;  %v6312_v33 = vcombine.low %v4372_v60, %v4372_v60  ;;  %v4999_v32 = vshll.u32 %v6308_v2, 16  ;;  %v4991_v53 = vshll.u32 %v6307_v56, 16 }
 0x18b   : > { %v5019_v26 = vshrl.u32 %v6308_v2, 16  ;;  %v5023_v3 = vshll.u32 %v6311_v27, 16  ;;  %v6774_v63 = vpop.f32.mrf.mxu1  ;;  %v5007_v47 = vshll.u32 %v6309_v58, 16  ;;  %v5011_v23 = vshrl.u32 %v6307_v56, 16  ;;  %v9700_v7 = vpop.f32.mrf.mxu0 }
 0x18c   : > { %v5015_v49 = vshll.u32 %v6310_v59, 16  ;;  %v5027_v0 = vshrl.u32 %v6309_v58, 16  ;;  %v5001_v37 = vrot.slane %v4999_v32, 1  ;;  %v4993_v8 = vrot.slane %v4991_v53, 1 }
 0x18d   : > { %v5025_v9 = vrot.slane %v5023_v3, 1  ;;  %v5031_v10 = vshll.u32 %v6312_v33, 16  ;;  %v6776_v12 = vpop.f32.mrf.mxu1  ;;  %v5009_v1 = vrot.slane %v5007_v47, 1  ;;  %v6696_v52 = vadd.f32 %v9513_v42, %v9504_v5  ;;  %v9708_v2 = vpop.f32.mrf.mxu0  ;;  %v10365_v3 = vld [vmem:[#allocation3_spill] sm:$0xff] }
 0x18e   : > { %v9706_v60 = vadd.f32 %v10364_v62, %v9574_v39  ;;  %v5002_v56 = vsel %vm4638_vm11, %v9640_v34, %v5001_v37  ;;  %v4994_v27 = vsel %vm4638_vm11, %v9644_v41, %v4993_v8  ;;  %v5021_v58 = vor.u32 %v5019_v26, %v5001_v37 }
 0x18f   : > { %v6777_v59 = vpop.f32.mrf.mxu1  ;;  %5371 = vmatprep.mubr.bf16.mxu0 %v5002_v56  ;;  %v5010_v47 = vsel %vm4638_vm11, %v5005_v28, %v5009_v1  ;;  %v5029_v33 = vor.u32 %v5027_v0, %v5009_v1  ;;  %v5033_v32 = vrot.slane %v5031_v10, 1  ;;  %v9716_v5 = vadd.f32 %v9486_v44, %v6696_v52  ;;  %v9718_v42 = vpop.f32.mrf.mxu0  ;;  %v10366_v0 = vld [vmem:[#allocation18_spill] sm:$0xff] }
 0x190   : > { %5372 = vmatmul.mubr.bf16.gmra.mxu0 %v4994_v27  ;;  %v5026_v39 = vsel %vm4638_vm11, %v5021_v58, %v5025_v9  ;;  %7160 = vmatprep.mubr.bf16.mxu1 %v5010_v47  ;;  %v5013_v34 = vor.u32 %v5011_v23, %v4993_v8  ;;  %v5017_v53 = vrot.slane %v5015_v49, 1  ;;  %v9723_v41 = vadd.f32 %v9588_v35, %v10365_v3 }
 0x191   : > { %v6779_v26 = vpop.f32.mrf.mxu1  ;;  %5379 = vmatprep.mubr.bf16.mxu0 %v5026_v39  ;;  %v5034_v28 = vsel %vm4638_vm11, %v5029_v33, %v5033_v32  ;;  %v6699_v44 = vadd.f32 %v9559_v57, %v9540_v61  ;;  %v9730_v37 = vadd.f32 %v10366_v0, %v9607_v55  ;;  %v6766_v9 = vadd.f32 %v9626_v30, %v9617_v16  ;;  %v9734_v23 = vpop.f32.mrf.mxu0  ;;  %v10367_v30 = vld [vmem:[#allocation4_spill] sm:$0xff]  ;;  %v10368_v33 = vld [vmem:[#allocation19_spill] sm:$0xff] }
 0x192   : > { %7161 = vmatmul.mubr.bf16.gmra.mxu1 %v5034_v28  ;;  %v6769_v35 = vadd.f32 %v9648_v18, %v9635_v24  ;;  %v6772_v49 = vadd.f32 %v6771_v43, %v9669_v17  ;;  %v6775_v8 = vadd.f32 %v6774_v63, %v6773_v11  ;;  %v6778_v10 = vadd.f32 %v6777_v59, %v6776_v12 }
 0x193   : > { %v6780_v1 = vpop.f32.mrf.mxu1  ;;  %v9740_v61 = vadd.f32 %v9502_v45, %v6699_v44  ;;  %v3503_v57 = vadd.f32 %v6766_v9, %v9234_v31  ;;  %v9743_v52 = vpop.f32.mrf.mxu0  ;;  %v5018_v17 = vsel %vm4638_vm11, %v5013_v34, %v5017_v53  ;;  %vm5886_vm9 = vcmask 1040384  }
 0x194   : > { %v6781_v55 = vadd.f32 %v6780_v1, %v6779_v26  ;;  %v3506_v16 = vadd.f32 %v6769_v35, %v9244_v15  ;;  %v3511_v62 = vadd.f32 %v6772_v49, %v10367_v30  ;;  %v3514_v56 = vadd.f32 %v6775_v8, %v9237_v25  ;;  %v10369_v26 = vld [vmem:[#allocation8_spill] sm:$0xff]  ;;  %v10370_v8 = vld [vmem:[#allocation6_spill] sm:$0xff] }
 0x195   : > { %v3519_v24 = vadd.f32 %v6778_v10, %v9298_v20  ;;  %v6782_v18 = vpop.f32.mrf.mxu1  ;;  %v9751_v43 = vadd.f32 %v9590_v38, %v3503_v57  ;;  %v9754_v31 = vpop.f32.mrf.mxu0 }
 0x196   : > { %v3522_v45 = vadd.f32 %v6781_v55, %v9309_v13  ;;  %v9757_v11 = vadd.f32 %v9619_v46, %v3506_v16  ;;  %v9760_v63 = vadd.f32 %v9576_v14, %v3511_v62  ;;  %v9763_v25 = vadd.f32 %v9609_v36, %v3514_v56  ;;  %v10372_v62 = vld [vmem:[#allocation7_spill] sm:$0xff] }
 0x197   : > { %v6783_v15 = vpop.f32.mrf.mxu1  ;;  %v9766_v20 = vadd.f32 %v9642_v4, %v3519_v24  ;;  %v9768_v38 = vpop.f32.mrf.mxu0 }
 0x198   : > { %v6784_v12 = vadd.f32 %v6783_v15, %v6782_v18  ;;  %v9771_v13 = vadd.f32 %v9679_v40, %v3522_v45  ;;  %5380 = vmatmul.mubr.bf16.gmra.mxu0 %v5018_v17 }
 0x199   : > { %v6785_v27 = vpop.f32.mrf.mxu1  ;;  %v9774_v58 = vpop.f32.mrf.mxu0 }
 0x19a   : > { %v3527_v46 = vadd.f32 %v6784_v12, %v9280_v22  ;;  %v10374_v12 = vld [vmem:[#allocation5_spill] sm:$0xff] }
 0x19b   : > { %v6786_v14 = vpop.f32.mrf.mxu1  ;;  %v9776_v47 = vpop.f32.mrf.mxu0 }
 0x19c   : > { %v6787_v59 = vadd.f32 %v6786_v14, %v6785_v27  ;;  %v9779_v36 = vadd.f32 %v9628_v19, %v3527_v46 }
 0x19d   : > { %v6788_v4 = vpop.f32.mrf.mxu1  ;;  %v9782_v39 = vpop.f32.mrf.mxu0 }
 0x19e   : > { %v3530_v32 = vadd.f32 %v6787_v59, %v10368_v33 }
 0x19f   : > { %v6789_v40 = vpop.f32.mrf.mxu1  ;;  %v9784_v53 = vpop.f32.mrf.mxu0 }
 0x1a0   : > { %v6790_v34 = vadd.f32 %v6789_v40, %v6788_v4  ;;  %v9787_v22 = vadd.f32 %v9660_v6, %v3530_v32  ;;  %v10376_v32 = vld [vmem:[#allocation12_spill] sm:$0xff] }
 0x1a1   : > { %v6791_v3 = vpop.f32.mrf.mxu1  ;;  %v9790_v44 = vpop.f32.mrf.mxu0 }
 0x1a2   : > { %v3535_v28 = vadd.f32 %v6790_v34, %v10369_v26 }
 0x1a3   : > { %v6792_v0 = vpop.f32.mrf.mxu1  ;;  %v9792_v9 = vpop.f32.mrf.mxu0 }
 0x1a4   : > { %v6793_v19 = vadd.f32 %v6792_v0, %v6791_v3  ;;  %v9795_v35 = vadd.f32 %v9698_v48, %v3535_v28 }
 0x1a5   : > { %v6794_v49 = vpop.f32.mrf.mxu1  ;;  %v9798_v1 = vpop.f32.mrf.mxu0 }
 0x1a6   : > { %v3538_v10 = vadd.f32 %v6793_v19, %v10370_v8  ;;  %v10378_v19 = vld [vmem:[#allocation9_spill] sm:$0xff] }
 0x1a7   : > { %v6795_v57 = vpop.f32.mrf.mxu1  ;;  %v9800_v55 = vpop.f32.mrf.mxu0 }
 0x1a8   : > { %v6796_v6 = vadd.f32 %v6795_v57, %v6794_v49  ;;  %10371 = vst [vmem:[#allocation17_spill] sm:$0xff] %v9800_v55  ;;  %v9803_v16 = vadd.f32 %v9708_v2, %v3538_v10 }
 0x1a9   : > { %v6797_v30 = vpop.f32.mrf.mxu1  ;;  %v9806_v24 = vpop.f32.mrf.mxu0 }
 0x1aa   : > { %v3543_v56 = vadd.f32 %v6796_v6, %v10372_v62  ;;  %v10379_v62 = vld [vmem:[#allocation11_spill] sm:$0xff] }
 0x1ab   : > { %v6798_v18 = vpop.f32.mrf.mxu1  ;;  %v9808_v17 = vpop.f32.mrf.mxu0 }
 0x1ac   : > { %v6799_v48 = vadd.f32 %v6798_v18, %v6797_v30  ;;  %10373 = vst [vmem:[#allocation15_spill] sm:$0xff] %v9808_v17  ;;  %v9811_v45 = vadd.f32 %v9693_v51, %v3543_v56 }
 0x1ad   : > { %v6800_v15 = vpop.f32.mrf.mxu1  ;;  %v9814_v46 = vpop.f32.mrf.mxu0 }
 0x1ae   : > { %v3546_v27 = vadd.f32 %v6799_v48, %v10374_v12 }
 0x1af   : > { %v6801_v14 = vpop.f32.mrf.mxu1  ;;  %v9816_v59 = vpop.f32.mrf.mxu0 }
 0x1b0   : > { %v6802_v2 = vadd.f32 %v6801_v14, %v6800_v15  ;;  %10375 = vst [vmem:[#allocation3_spill] sm:$0xff] %v9816_v59  ;;  %v9819_v4 = vadd.f32 %v9700_v7, %v3546_v27  ;;  %v10380_v14 = vld [vmem:[#allocation10_spill] sm:$0xff] }
 0x1b1   : > { %v6803_v33 = vpop.f32.mrf.mxu1  ;;  %v9822_v34 = vpop.f32.mrf.mxu0 }
 0x1b2   : > { %v3551_v40 = vadd.f32 %v6802_v2, %v10376_v32 }
 0x1b3   : > { %v6804_v3 = vpop.f32.mrf.mxu1  ;;  %v9824_v26 = vpop.f32.mrf.mxu0 }
 0x1b4   : > { %v6805_v51 = vadd.f32 %v6804_v3, %v6803_v33  ;;  %10377 = vst [vmem:[#allocation18_spill] sm:$0xff] %v9824_v26  ;;  %v9827_v28 = vadd.f32 %v9734_v23, %v3551_v40 }
 0x1b5   : > { %v6806_v0 = vpop.f32.mrf.mxu1  ;;  %v9830_v8 = vpop.f32.mrf.mxu0 }
 0x1b6   : > { %v3554_v49 = vadd.f32 %v6805_v51, %v10378_v19 }
 0x1b7   : > { %v6807_v10 = vpop.f32.mrf.mxu1  ;;  %v9832_v57 = vpop.f32.mrf.mxu0 }
 0x1b8   : > { %v6808_v7 = vadd.f32 %v6807_v10, %v6806_v0  ;;  %v9835_v6 = vadd.f32 %v9754_v31, %v3554_v49  ;;  %v10381_v0 = vld [vmem:[#allocation21_spill] sm:$0xff] }
 0x1b9   : > { %v6809_v30 = vpop.f32.mrf.mxu1  ;;  %v9838_v18 = vpop.f32.mrf.mxu0 }
 0x1ba   : > { %v3559_v56 = vadd.f32 %v6808_v7, %v10379_v62  ;;  %v10382_v62 = vld [vmem:[#allocation20_spill] sm:$0xff] }
 0x1bb   : > { %v6810_v48 = vpop.f32.mrf.mxu1  ;;  %v9840_v15 = vpop.f32.mrf.mxu0 }
 0x1bc   : > { %v6811_v23 = vadd.f32 %v6810_v48, %v6809_v30  ;;  %v9843_v12 = vadd.f32 %v9718_v42, %v3559_v56 }
 0x1bd   : > { %v6812_v27 = vpop.f32.mrf.mxu1  ;;  %v9846_v33 = vpop.f32.mrf.mxu0 }
 0x1be   : > { %v3562_v2 = vadd.f32 %v6811_v23, %v10380_v14 }
 0x1bf   : > { %v6813_v32 = vpop.f32.mrf.mxu1  ;;  %v9848_v40 = vpop.f32.mrf.mxu0 }
 0x1c0   : > { %v6814_v31 = vadd.f32 %v6813_v32, %v6812_v27  ;;  %v9851_v3 = vadd.f32 %v9743_v52, %v3562_v2 }
 0x1c1   : > { %v6815_v51 = vpop.f32.mrf.mxu1  ;;  %v9854_v7 = vpop.f32.mrf.mxu0 }
 0x1c2   : > { %v3567_v19 = vadd.f32 %v6814_v31, %v10381_v0 }
 0x1c3   : > { %v6816_v49 = vpop.f32.mrf.mxu1  ;;  %v9860_v27 = vpop.f32.mrf.mxu0 }
 0x1c4   : > { %v6817_v10 = vadd.f32 %v6816_v49, %v6815_v51  ;;  %v9857_v42 = vadd.f32 %v9774_v58, %v3567_v19  ;;  %v10383_v19 = vld [vmem:[#allocation22_spill] sm:$0xff] }
 0x1c5   : > { %v6818_v30 = vpop.f32.mrf.mxu1  ;;  %v9866_v51 = vpop.f32.mrf.mxu0 }
 0x1c6   : > { %v3570_v56 = vadd.f32 %v6817_v10, %v10382_v62 }
 0x1c7   : > { %v6819_v48 = vpop.f32.mrf.mxu1 }
 0x1c8   : > { %v6820_v23 = vadd.f32 %v6819_v48, %v6818_v30  ;;  %v9863_v52 = vadd.f32 %v9782_v39, %v3570_v56 }
 0x1c9   : > { %v6821_v14 = vpop.f32.mrf.mxu1 }
 0x1ca   : > { %v3575_v2 = vadd.f32 %v6820_v23, %v9579_v50 }
 0x1cb   : > { %v6822_v32 = vpop.f32.mrf.mxu1 }
 0x1cc   : > { %v6823_v31 = vadd.f32 %v6822_v32, %v6821_v14  ;;  %v9869_v58 = vadd.f32 %v9768_v38, %v3575_v2 }
 0x1cd   : > { %v6824_v0 = vpop.f32.mrf.mxu1 }
 0x1ce   : > { %v3578_v49 = vadd.f32 %v6823_v31, %v10383_v19  ;;  %v9872_v30 = vpop.f32.mrf.mxu0 }
 0x1cf   : > { %v6825_v10 = vpop.f32.mrf.mxu1 }
 0x1d0   : > { %v6826_v62 = vadd.f32 %v6825_v10, %v6824_v0  ;;  %v9875_v39 = vadd.f32 %v9776_v47, %v3578_v49  ;;  %v9878_v48 = vpop.f32.mrf.mxu0 }
 0x1d1   : > { %v6827_v56 = vpop.f32.mrf.mxu1 }
 0x1d2   : > { %v3583_v50 = vadd.f32 %v6826_v62, %v9663_v54  ;;  %v9880_v14 = vpop.f32.mrf.mxu0 }
 0x1d3   : > { %v6828_v23 = vpop.f32.mrf.mxu1 }
 0x1d4   : > { %v6829_v38 = vadd.f32 %v6828_v23, %v6827_v56  ;;  %v9883_v2 = vadd.f32 %v9790_v44, %v3583_v50  ;;  %v9886_v19 = vpop.f32.mrf.mxu0 }
 0x1d5   : > { %v6830_v32 = vpop.f32.mrf.mxu1 }
 0x1d6   : > { %10384 = vst [vmem:[#allocation4_spill] sm:$0xff] %v9883_v2  ;;  %v3586_v31 = vadd.f32 %v6829_v38, %v9675_v29  ;;  %v9888_v47 = vpop.f32.mrf.mxu0 }
 0x1d7   : > { %v6831_v0 = vpop.f32.mrf.mxu1 }
 0x1d8   : > { %v6832_v49 = vadd.f32 %v6831_v0, %v6830_v32  ;;  %v9891_v54 = vadd.f32 %v9798_v1, %v3586_v31  ;;  %v9894_v26 = vpop.f32.mrf.mxu0 }
 0x1d9   : > { %v6833_v10 = vpop.f32.mrf.mxu1 }
 0x1da   : > { %10385 = vst [vmem:[#allocation19_spill] sm:$0xff] %v9891_v54  ;;  %v3591_v62 = vadd.f32 %v6832_v49, %v9716_v5  ;;  %v9896_v44 = vpop.f32.mrf.mxu0 }
 0x1db   : > { %v6834_v56 = vpop.f32.mrf.mxu1 }
 0x1dc   : > { %v6835_v50 = vadd.f32 %v6834_v56, %v6833_v10  ;;  %v9899_v29 = vadd.f32 %v9784_v53, %v3591_v62  ;;  %v9902_v59 = vpop.f32.mrf.mxu0 }
 0x1dd   : > { %v6836_v23 = vpop.f32.mrf.mxu1 }
 0x1de   : > { %10386 = vst [vmem:[#allocation8_spill] sm:$0xff] %v9899_v29  ;;  %v3594_v38 = vadd.f32 %v6835_v50, %v9740_v61  ;;  %v9904_v1 = vpop.f32.mrf.mxu0  ;;  %v10389_v50 = vld [vmem:[#allocation16_spill] sm:$0xff] }
 0x1df   : > { %v6837_v32 = vpop.f32.mrf.mxu1 }
 0x1e0   : > { %v6838_v31 = vadd.f32 %v6837_v32, %v6836_v23  ;;  %v9907_v5 = vadd.f32 %v9792_v9, %v3594_v38  ;;  %v9910_v17 = vpop.f32.mrf.mxu0 }
 0x1e1   : > { %v6839_v0 = vpop.f32.mrf.mxu1 }
 0x1e2   : > { %10387 = vst [vmem:[#allocation6_spill] sm:$0xff] %v9907_v5  ;;  %v3599_v49 = vadd.f32 %v6838_v31, %v9652_v21  ;;  %v9912_v53 = vpop.f32.mrf.mxu0  ;;  %v10391_v31 = vld [vmem:[#allocation23_spill] sm:$0xff] }
 0x1e3   : > { %v6840_v10 = vpop.f32.mrf.mxu1 }
 0x1e4   : > { %v6841_v62 = vadd.f32 %v6840_v10, %v6839_v0  ;;  %v9915_v61 = vadd.f32 %v9806_v24, %v3599_v49  ;;  %v9918_v54 = vpop.f32.mrf.mxu0 }
 0x1e5   : > { %v6842_v56 = vpop.f32.mrf.mxu1 }
 0x1e6   : > { %10388 = vst [vmem:[#allocation7_spill] sm:$0xff] %v9915_v61  ;;  %v3602_v55 = vadd.f32 %v6841_v62, %v10389_v50  ;;  %v9920_v9 = vpop.f32.mrf.mxu0  ;;  %v10393_v50 = vld [vmem:[#allocation14_spill] sm:$0xff] }
 0x1e7   : > { %v6843_v23 = vpop.f32.mrf.mxu1 }
 0x1e8   : > { %v6844_v38 = vadd.f32 %v6843_v23, %v6842_v56  ;;  %v9923_v21 = vadd.f32 %v9814_v46, %v3602_v55  ;;  %v9928_v0 = vpop.f32.mrf.mxu0 }
 0x1e9   : > { %v6845_v32 = vpop.f32.mrf.mxu1 }
 0x1ea   : > { %10390 = vst [vmem:[#allocation5_spill] sm:$0xff] %v9923_v21  ;;  %v9926_v5 = vadd.f32 %v6844_v38, %v10391_v31  ;;  %v9930_v49 = vpop.f32.mrf.mxu0 }
 0x1eb   : > { %v6846_v24 = vpop.f32.mrf.mxu1 }
 0x1ec   : > { %10392 = vst [vmem:[#allocation12_spill] sm:$0xff] %v9926_v5  ;;  %v6847_v10 = vadd.f32 %v6846_v24, %v6845_v32  ;;  %v9935_v29 = vpop.f32.mrf.mxu0 }
 0x1ed   : > { %v6848_v62 = vpop.f32.mrf.mxu1 }
 0x1ee   : > { %v9933_v61 = vadd.f32 %v6847_v10, %v10393_v50 }
 0x1ef   : > { %v6849_v2 = vpop.f32.mrf.mxu1 }
 0x1f0   : > { %10394 = vst [vmem:[#allocation9_spill] sm:$0xff] %v9933_v61  ;;  %v6850_v56 = vadd.f32 %v6849_v2, %v6848_v62 }
 0x1f1   : > { %v6851_v55 = vpop.f32.mrf.mxu1 }
 0x1f2   : > { %v3615_v46 = vadd.f32 %v6850_v56, %v9706_v60  ;;  %v10396_v56 = vld [vmem:[#allocation13_spill] sm:$0xff] }
 0x1f3   : > { %v6852_v23 = vpop.f32.mrf.mxu1  ;;  %v9938_v38 = vpop.f32.mrf.mxu0 }
 0x1f4   : > { %v6853_v31 = vadd.f32 %v6852_v23, %v6851_v55  ;;  %v9941_v21 = vadd.f32 %v9822_v34, %v3615_v46 }
 0x1f5   : > { %v6854_v5 = vpop.f32.mrf.mxu1  ;;  %v9943_v32 = vpop.f32.mrf.mxu0 }
 0x1f6   : > { %10395 = vst [vmem:[#allocation11_spill] sm:$0xff] %v9941_v21  ;;  %v3618_v24 = vadd.f32 %v6853_v31, %v9730_v37  ;;  %v6908_v37 = vadd.f32 %v9854_v7, %v9848_v40  ;;  %v6902_v31 = vadd.f32 %v9838_v18, %v9832_v57  ;;  %v6905_v40 = vadd.f32 %v9846_v33, %v9840_v15  ;;  %v9980_v18 = vld [vmem:[%s10142_s4] ss:$0 sm:$0xff] }
 0x1f7   : > { %v6855_v10 = vpop.f32.mrf.mxu1  ;;  %v9946_v50 = vpop.f32.mrf.mxu0 }
 0x1f8   : > { %v6856_v61 = vadd.f32 %v6855_v10, %v6854_v5  ;;  %v9949_v2 = vadd.f32 %v9830_v8, %v3618_v24 }
 0x1f9   : > { %v6857_v60 = vpop.f32.mrf.mxu1  ;;  %v9951_v62 = vpop.f32.mrf.mxu0 }
 0x1fa   : > { %v9954_v55 = vadd.f32 %v6856_v61, %v10396_v56 }
 0x1fb   : > { %v6858_v34 = vpop.f32.mrf.mxu1 }
 0x1fc   : > { %10397 = vst [vmem:[#allocation10_spill] sm:$0xff] %v9954_v55  ;;  %v6859_v46 = vadd.f32 %v6858_v34, %v6857_v60  ;;  %v9956_v23 = vpop.f32.mrf.mxu0  ;;  %v6911_v60 = vadd.f32 %v9866_v51, %v9860_v27 }
 0x1fe   : > { %v9959_v21 = vadd.f32 %v6859_v46, %v9723_v41  ;;  %v9963_v5 = vpop.f32.mrf.mxu0 }
 0x1ff   : > { %v7134_v8 = vpop.f32.mrf.mxu1 }
 0x200   : > { %10398 = vst [vmem:[#allocation21_spill] sm:$0xff] %v9959_v21  ;;  %v9967_v24 = vpop.f32.mrf.mxu0  ;;  %v5431_v61 = vadd.f32 %v7134_v8, %v6908_v37 }
 0x201   : > { %v5422_v10 = vpop.f32.mrf.mxu1 }
 0x202   : > { %v9971_v56 = vpop.f32.mrf.mxu0  ;;  %v5423_v41 = vadd.f32 %v6902_v31, %v5422_v10  ;;  %v5551_v7 = vadd.f32 %v5431_v61, %v9760_v63  ;;  %v6914_v10 = vadd.f32 %v9878_v48, %v9872_v30  ;;  %v6917_v30 = vadd.f32 %v9886_v19, %v9880_v14 }
 0x203   : > { %v7135_v34 = vpop.f32.mrf.mxu1  ;;  %v6932_v14 = vadd.f32 %v9928_v0, %v9920_v9 }
 0x204   : > { %v5549_v46 = vadd.f32 %v5423_v41, %v9751_v43  ;;  %v5434_v57 = vadd.f32 %v7135_v34, %v6911_v60  ;;  %v9982_v27 = vpop.f32.mrf.mxu0  ;;  %v5590_v31 = vadd.f32 %v9980_v18, %v5551_v7  ;;  %v6920_v60 = vadd.f32 %v9894_v26, %v9888_v47 }
 0x205   : > { %v5425_v37 = vpop.f32.mrf.mxu1  ;;  %v6923_v26 = vadd.f32 %v9902_v59, %v9896_v44 }
 0x206   : > { %v5552_v51 = vadd.f32 %v5434_v57, %v9763_v25  ;;  %v5426_v8 = vadd.f32 %v6905_v40, %v5425_v37  ;;  %v5588_v15 = vadd.f32 %v9980_v18, %v5549_v46  ;;  %v9996_v33 = vpop.f32.mrf.mxu0  ;;  %v5819_v37 = vmul.f32 %v5590_v31, %v5590_v31 }
 0x208   : > { %v5591_v63 = vadd.f32 %v9980_v18, %v5552_v51  ;;  %v5550_v43 = vadd.f32 %v5426_v8, %v9757_v11  ;;  %v5817_v41 = vmul.f32 %v5588_v15, %v5588_v15  ;;  %v10004_v51 = vpop.f32.mrf.mxu0 }
 0x20a   : > { %v6510_v25 = vpack.c.bf16 %v5591_v63, %v5590_v31  ;;  %v5589_v61 = vadd.f32 %v9980_v18, %v5550_v43  ;;  %v5820_v47 = vmul.f32 %v5591_v63, %v5591_v63 }
 0x20b   : > { %v7138_v11 = vpop.f32.mrf.mxu1 }
 0x20c   : > { %6597 = vst [vmem:[%s9994_s16 + $0x8] sm:$0xff] %v6510_v25   ;;  %v6505_v34 = vpack.c.bf16 %v5589_v61, %v5588_v15  ;;  %v5780_v40 = vadd.f32 %v5589_v61, %v5588_v15  ;;  %v5818_v7 = vmul.f32 %v5589_v61, %v5589_v61  ;;  %v5447_v46 = vadd.f32 %v7138_v11, %v6920_v60 }
 0x20d   : > { %v5438_v57 = vpop.f32.mrf.mxu1 }
 0x20e   : > { %6506 = vst [vmem:[%s9994_s16] sm:$0xff] %v6505_v34   ;;  %v5781_v8 = vadd.f32 %v5780_v40, %v5590_v31  ;;  %v5849_v43 = vadd.f32 %v5818_v7, %v5817_v41  ;;  %v5439_v21 = vadd.f32 %v6914_v10, %v5438_v57  ;;  %v5555_v60 = vadd.f32 %v5447_v46, %v9779_v36  ;;  %v10013_v34 = vpop.f32.mrf.mxu0 }
 0x20f   : > { %v7139_v48 = vpop.f32.mrf.mxu1  ;;  %v6926_v36 = vadd.f32 %v9910_v17, %v9904_v1 }
 0x210   : > { %v5850_v25 = vadd.f32 %v5849_v43, %v5819_v37  ;;  %v5553_v15 = vadd.f32 %v5439_v21, %v9766_v20  ;;  %v5782_v61 = vadd.f32 %v5781_v8, %v5591_v63  ;;  %v5450_v11 = vadd.f32 %v7139_v48, %v6923_v26 }
 0x211   : > { %v5441_v55 = vpop.f32.mrf.mxu1  ;;  %v5594_v63 = vadd.f32 %v9980_v18, %v5555_v60 }
 0x212   : > { %v5592_v31 = vadd.f32 %v9980_v18, %v5553_v15  ;;  %v5851_v10 = vadd.f32 %v5850_v25, %v5820_v47  ;;  %v5442_v41 = vadd.f32 %v6917_v30, %v5441_v55  ;;  %v5556_v59 = vadd.f32 %v5450_v11, %v9787_v22 }
 0x213   : > { %v6929_v30 = vadd.f32 %v9918_v54, %v9912_v53  ;;  %v5823_v25 = vmul.f32 %v5594_v63, %v5594_v63 }
 0x214   : > { %v5783_v19 = vadd.f32 %v5782_v61, %v5592_v31  ;;  %v5821_v44 = vmul.f32 %v5592_v31, %v5592_v31  ;;  %v5554_v20 = vadd.f32 %v5442_v41, %v9771_v13  ;;  %v5595_v40 = vadd.f32 %v9980_v18, %v5556_v59 }
 0x215   : > { %v6935_v13 = vadd.f32 %v9935_v29, %v9930_v49 }
 0x216   : > { %v7142_v21 = vpop.f32.mrf.mxu1  ;;  %v5852_v46 = vadd.f32 %v5851_v10, %v5821_v44  ;;  %v5593_v9 = vadd.f32 %v9980_v18, %v5554_v20  ;;  %v6520_v0 = vpack.c.bf16 %v5595_v40, %v5594_v63  ;;  %v5824_v54 = vmul.f32 %v5595_v40, %v5595_v40 }
 0x217   : > { %v5463_v7 = vadd.f32 %v7142_v21, %v6932_v14  ;;  %v10024_v55 = vpop.f32.mrf.mxu0 }
 0x218   : > { %v5454_v22 = vpop.f32.mrf.mxu1  ;;  %v6515_v17 = vpack.c.bf16 %v5593_v9, %v5592_v31  ;;  %v5784_v1 = vadd.f32 %v5783_v19, %v5593_v9  ;;  %v5822_v8 = vmul.f32 %v5593_v9, %v5593_v9  ;;  %6599 = vst [vmem:[%s9994_s16 + $0x18] sm:$0xff] %v6520_v0  }
 0x219   : > { %v5455_v57 = vadd.f32 %v6926_v36, %v5454_v22  ;;  %v10029_v37 = vpop.f32.mrf.mxu0  ;;  %v5559_v26 = vadd.f32 %v5463_v7, %v9811_v45  ;;  %v6938_v22 = vadd.f32 %v9943_v32, %v9938_v38 }
 0x21a   : > { %v7143_v43 = vpop.f32.mrf.mxu1  ;;  %6598 = vst [vmem:[%s9994_s16 + $0x10] sm:$0xff] %v6515_v17   ;;  %v5785_v29 = vadd.f32 %v5784_v1, %v5594_v63  ;;  %v5853_v49 = vadd.f32 %v5852_v46, %v5822_v8  ;;  %v6944_v46 = vadd.f32 %v9963_v5, %v9956_v23  ;;  %v6947_v23 = vadd.f32 %v9971_v56, %v9967_v24 }
 0x21b   : > { %v5557_v48 = vadd.f32 %v5455_v57, %v9795_v35  ;;  %v5466_v47 = vadd.f32 %v7143_v43, %v6935_v13  ;;  %v10036_v15 = vpop.f32.mrf.mxu0  ;;  %v5598_v35 = vadd.f32 %v9980_v18, %v5559_v26 }
 0x21c   : > { %v5457_v61 = vpop.f32.mrf.mxu1  ;;  %v5854_v45 = vadd.f32 %v5853_v49, %v5823_v25  ;;  %v5786_v10 = vadd.f32 %v5785_v29, %v5595_v40 }
 0x21d   : > { %v5596_v60 = vadd.f32 %v9980_v18, %v5557_v48  ;;  %v5560_v11 = vadd.f32 %v5466_v47, %v9819_v4  ;;  %v5458_v31 = vadd.f32 %v6929_v30, %v5457_v61  ;;  %v10041_v53 = vpop.f32.mrf.mxu0  ;;  %v5827_v13 = vmul.f32 %v5598_v35, %v5598_v35 }
 0x21e   : > { %v5855_v44 = vadd.f32 %v5854_v45, %v5824_v54  ;;  %v6941_v47 = vadd.f32 %v9951_v62, %v9946_v50 }
 0x21f   : > { %v5599_v41 = vadd.f32 %v9980_v18, %v5560_v11  ;;  %v5558_v14 = vadd.f32 %v5458_v31, %v9803_v16  ;;  %v5787_v59 = vadd.f32 %v5786_v10, %v5596_v60  ;;  %v5825_v19 = vmul.f32 %v5596_v60, %v5596_v60 }
 0x220   : > { %v6956_v10 = vadd.f32 %v10029_v37, %v10024_v55  ;;  %v6959_v55 = vadd.f32 %v10041_v53, %v10036_v15 }
 0x221   : > { %v6530_v20 = vpack.c.bf16 %v5599_v41, %v5598_v35  ;;  %v5597_v4 = vadd.f32 %v9980_v18, %v5558_v14  ;;  %v10047_v21 = vpop.f32.mrf.mxu0  ;;  %v5856_v36 = vadd.f32 %v5855_v44, %v5825_v19  ;;  %v5828_v43 = vmul.f32 %v5599_v41, %v5599_v41 }
 0x222   : > { %v7146_v16 = vpop.f32.mrf.mxu1 }
 0x223   : > { %6601 = vst [vmem:[%s9994_s16 + $0x28] sm:$0xff] %v6530_v20   ;;  %v6525_v63 = vpack.c.bf16 %v5597_v4, %v5596_v60  ;;  %v5788_v7 = vadd.f32 %v5787_v59, %v5597_v4  ;;  %v5826_v40 = vmul.f32 %v5597_v4, %v5597_v4  ;;  %v10052_v9 = vpop.f32.mrf.mxu0  ;;  %v5479_v17 = vadd.f32 %v7146_v16, %v6944_v46 }
 0x224   : > { %v5470_v1 = vpop.f32.mrf.mxu1 }
 0x225   : > { %6600 = vst [vmem:[%s9994_s16 + $0x20] sm:$0xff] %v6525_v63   ;;  %v5789_v0 = vadd.f32 %v5788_v7, %v5598_v35  ;;  %v5857_v57 = vadd.f32 %v5856_v36, %v5826_v40  ;;  %v10057_v8 = vpop.f32.mrf.mxu0  ;;  %v5471_v26 = vadd.f32 %v6938_v22, %v5470_v1  ;;  %v5563_v25 = vadd.f32 %v5479_v17, %v9843_v12 }
 0x226   : > { %v7147_v5 = vpop.f32.mrf.mxu1 }
 0x227   : > { %v5858_v30 = vadd.f32 %v5857_v57, %v5827_v13  ;;  %v5790_v48 = vadd.f32 %v5789_v0, %v5599_v41  ;;  %v5561_v38 = vadd.f32 %v5471_v26, %v9827_v28  ;;  %v5482_v29 = vadd.f32 %v7147_v5, %v6947_v23  ;;  %v10065_v61 = vpop.f32.mrf.mxu0 }
 0x228   : > { %v5473_v49 = vpop.f32.mrf.mxu1  ;;  %v5602_v50 = vadd.f32 %v9980_v18, %v5563_v25 }
 0x229   : > { %v5859_v32 = vadd.f32 %v5858_v30, %v5828_v43  ;;  %v5600_v60 = vadd.f32 %v9980_v18, %v5561_v38  ;;  %v5474_v11 = vadd.f32 %v6941_v47, %v5473_v49  ;;  %v5564_v31 = vadd.f32 %v5482_v29, %v9851_v3 }
 0x22a   : > { %v5831_v20 = vmul.f32 %v5602_v50, %v5602_v50 }
 0x22b   : > { %v5791_v54 = vadd.f32 %v5790_v48, %v5600_v60  ;;  %v5829_v24 = vmul.f32 %v5600_v60, %v5600_v60  ;;  %v5562_v56 = vadd.f32 %v5474_v11, %v9835_v6  ;;  %v5603_v28 = vadd.f32 %v9980_v18, %v5564_v31 }
 0x22c   : > { %v6950_v6 = vadd.f32 %v9996_v33, %v9982_v27  ;;  %v6953_v27 = vadd.f32 %v10013_v34, %v10004_v51 }
 0x22d   : > { %v5860_v62 = vadd.f32 %v5859_v32, %v5829_v24  ;;  %v5601_v45 = vadd.f32 %v9980_v18, %v5562_v56  ;;  %v6540_v35 = vpack.c.bf16 %v5603_v28, %v5602_v50  ;;  %v5832_v40 = vmul.f32 %v5603_v28, %v5603_v28 }
 0x22e   : > { %v6966_v12 = vpop.f32.mrf.mxu0 }
 0x22f   : > { %v6535_v3 = vpack.c.bf16 %v5601_v45, %v5600_v60  ;;  %v5792_v14 = vadd.f32 %v5791_v54, %v5601_v45  ;;  %v5830_v59 = vmul.f32 %v5601_v45, %v5601_v45  ;;  %6603 = vst [vmem:[%s9994_s16 + $0x38] sm:$0xff] %v6540_v35   ;;  %v6962_v60 = vadd.f32 %v10052_v9, %v10047_v21  ;;  %v10399_v45 = vld [vmem:[#allocation8_spill] sm:$0xff] }
 0x230   : > { %v6967_v41 = vpop.f32.mrf.mxu0  ;;  %v7150_v19 = vpop.f32.mrf.mxu1 }
 0x231   : > { %v5495_v44 = vadd.f32 %v7150_v19, %v6956_v10  ;;  %6602 = vst [vmem:[%s9994_s16 + $0x30] sm:$0xff] %v6535_v3   ;;  %v5793_v36 = vadd.f32 %v5792_v14, %v5602_v50  ;;  %v5861_v63 = vadd.f32 %v5860_v62, %v5830_v59  ;;  %v6968_v38 = vadd.f32 %v6967_v41, %v6966_v12  ;;  %v10400_v14 = vld [vmem:[#allocation4_spill] sm:$0xff] }
 0x232   : > { %v6969_v4 = vpop.f32.mrf.mxu0  ;;  %v5486_v7 = vpop.f32.mrf.mxu1  ;;  %v6965_v3 = vadd.f32 %v10065_v61, %v10057_v8  ;;  %v10402_v8 = vld [vmem:[#allocation19_spill] sm:$0xff] }
 0x233   : > { %v5487_v37 = vadd.f32 %v6950_v6, %v5486_v7  ;;  %v5862_v46 = vadd.f32 %v5861_v63, %v5831_v20  ;;  %v5567_v16 = vadd.f32 %v5495_v44, %v9869_v58  ;;  %v5794_v22 = vadd.f32 %v5793_v36, %v5603_v28  ;;  %v10401_v20 = vld [vmem:[#allocation6_spill] sm:$0xff] }
 0x234   : > { %v7151_v13 = vpop.f32.mrf.mxu1  ;;  %v6970_v33 = vpop.f32.mrf.mxu0 }
 0x235   : > { %v5565_v0 = vadd.f32 %v5487_v37, %v9857_v42  ;;  %v5498_v57 = vadd.f32 %v7151_v13, %v6959_v55  ;;  %v5863_v17 = vadd.f32 %v5862_v46, %v5832_v40  ;;  %v5606_v30 = vadd.f32 %v9980_v18, %v5567_v16 }
 0x236   : > { %v5489_v1 = vpop.f32.mrf.mxu1  ;;  %v6971_v56 = vadd.f32 %v6970_v33, %v6969_v4 }
 0x237   : > { %v5604_v43 = vadd.f32 %v9980_v18, %v5565_v0  ;;  %v5568_v15 = vadd.f32 %v5498_v57, %v9875_v39  ;;  %v5490_v53 = vadd.f32 %v6953_v27, %v5489_v1  ;;  %v5835_v31 = vmul.f32 %v5606_v30, %v5606_v30 }
 0x238   : > { %v6972_v58 = vpop.f32.mrf.mxu0 }
 0x239   : > { %v5795_v26 = vadd.f32 %v5794_v22, %v5604_v43  ;;  %v5833_v48 = vmul.f32 %v5604_v43, %v5604_v43  ;;  %v5607_v23 = vadd.f32 %v9980_v18, %v5568_v15  ;;  %v5566_v51 = vadd.f32 %v5490_v53, %v9863_v52 }
 0x23a   : > { %v6973_v42 = vpop.f32.mrf.mxu0 }
 0x23b   : > { %v5864_v34 = vadd.f32 %v5863_v17, %v5833_v48  ;;  %v6550_v5 = vpack.c.bf16 %v5607_v23, %v5606_v30  ;;  %v5605_v47 = vadd.f32 %v9980_v18, %v5566_v51  ;;  %v5836_v62 = vmul.f32 %v5607_v23, %v5607_v23  ;;  %v10403_v48 = vld [vmem:[#allocation12_spill] sm:$0xff] }
 0x23c   : > { %v6975_v32 = vpop.f32.mrf.mxu0  ;;  %v7154_v49 = vpop.f32.mrf.mxu1 }
 0x23d   : > { %6605 = vst [vmem:[%s9994_s16 + $0x48] sm:$0xff] %v6550_v5   ;;  %v6545_v39 = vpack.c.bf16 %v5605_v47, %v5604_v43  ;;  %v5796_v25 = vadd.f32 %v5795_v26, %v5605_v47  ;;  %v5834_v29 = vmul.f32 %v5605_v47, %v5605_v47  ;;  %v5511_v11 = vadd.f32 %v7154_v49, %v6968_v38 }
 0x23e   : > { %v5502_v24 = vpop.f32.mrf.mxu1  ;;  %v6976_v50 = vpop.f32.mrf.mxu0  ;;  %v6974_v43 = vadd.f32 %v6973_v42, %v6972_v58  ;;  %v10406_v58 = vld [vmem:[#allocation9_spill] sm:$0xff]  ;;  %v10407_v42 = vld [vmem:[#allocation15_spill] sm:$0xff] }
 0x23f   : > { %6604 = vst [vmem:[%s9994_s16 + $0x40] sm:$0xff] %v6545_v39   ;;  %v5797_v54 = vadd.f32 %v5796_v25, %v5606_v30  ;;  %v5865_v52 = vadd.f32 %v5864_v34, %v5834_v29  ;;  %v5503_v28 = vadd.f32 %v6962_v60, %v5502_v24  ;;  %v5571_v10 = vadd.f32 %v5511_v11, %v10399_v45  ;;  %v10405_v11 = vld [vmem:[#allocation7_spill] sm:$0xff] }
 0x240   : > { %v7155_v41 = vpop.f32.mrf.mxu1  ;;  %v6977_v60 = vadd.f32 %v6976_v50, %v6975_v32  ;;  %v10408_v50 = vld [vmem:[#allocation5_spill] sm:$0xff] }
 0x241   : > { %v5866_v12 = vadd.f32 %v5865_v52, %v5835_v31  ;;  %v5798_v35 = vadd.f32 %v5797_v54, %v5607_v23  ;;  %v5569_v21 = vadd.f32 %v5503_v28, %v10400_v14  ;;  %v5514_v9 = vadd.f32 %v7155_v41, %v6971_v56  ;;  %v10404_v23 = vld [vmem:[#allocation17_spill] sm:$0xff] }
 0x242   : > { %v5505_v19 = vpop.f32.mrf.mxu1  ;;  %v5610_v63 = vadd.f32 %v9980_v18, %v5571_v10  ;;  %v3768_v51 = vadd.f32 %v10404_v23, %v10403_v48  ;;  %v3771_v54 = vadd.f32 %v10407_v42, %v10406_v58  ;;  %v10413_v58 = vld [vmem:[#allocation18_spill] sm:$0xff] }
 0x243   : > { %v5867_v59 = vadd.f32 %v5866_v12, %v5836_v62  ;;  %v5608_v44 = vadd.f32 %v9980_v18, %v5569_v21  ;;  %v5572_v4 = vadd.f32 %v5514_v9, %v10401_v20  ;;  %v5506_v36 = vadd.f32 %v6965_v3, %v5505_v19 }
 0x244   : > { %v6978_v6 = vpop.f32.mrf.mxu0  ;;  %v5839_v53 = vmul.f32 %v5610_v63, %v5610_v63 }
 0x245   : > { %v5799_v55 = vadd.f32 %v5798_v35, %v5608_v44  ;;  %v5837_v37 = vmul.f32 %v5608_v44, %v5608_v44  ;;  %v5611_v40 = vadd.f32 %v9980_v18, %v5572_v4  ;;  %v5570_v61 = vadd.f32 %v5506_v36, %v10402_v8  ;;  %v10409_v8 = vld [vmem:[#allocation11_spill] sm:$0xff] }
 0x246   : > { %v6979_v7 = vpop.f32.mrf.mxu0 }
 0x247   : > { %v5868_v46 = vadd.f32 %v5867_v59, %v5837_v37  ;;  %v6560_v22 = vpack.c.bf16 %v5611_v40, %v5610_v63  ;;  %v5609_v13 = vadd.f32 %v9980_v18, %v5570_v61  ;;  %v6980_v27 = vadd.f32 %v6979_v7, %v6978_v6 }
 0x248   : > { %v6981_v16 = vpop.f32.mrf.mxu0  ;;  %v5840_v38 = vmul.f32 %v5611_v40, %v5611_v40 }
 0x249   : > { %6607 = vst [vmem:[%s9994_s16 + $0x58] sm:$0xff] %v6560_v22   ;;  %v6555_v0 = vpack.c.bf16 %v5609_v13, %v5608_v44  ;;  %v5800_v57 = vadd.f32 %v5799_v55, %v5609_v13  ;;  %v5838_v17 = vmul.f32 %v5609_v13, %v5609_v13 }
 0x24a   : > { %v6982_v33 = vpop.f32.mrf.mxu0  ;;  %v7158_v1 = vpop.f32.mrf.mxu1 }
 0x24b   : > { %v5527_v15 = vadd.f32 %v7158_v1, %v6980_v27  ;;  %6606 = vst [vmem:[%s9994_s16 + $0x50] sm:$0xff] %v6555_v0   ;;  %v5801_v30 = vadd.f32 %v5800_v57, %v5610_v63  ;;  %v5869_v26 = vadd.f32 %v5868_v46, %v5838_v17  ;;  %v6983_v5 = vadd.f32 %v6982_v33, %v6981_v16 }
 0x24c   : > { %v5518_v34 = vpop.f32.mrf.mxu1 }
 0x24d   : > { %v5519_v47 = vadd.f32 %v6974_v43, %v5518_v34  ;;  %v5870_v39 = vadd.f32 %v5869_v26, %v5839_v53  ;;  %v5575_v25 = vadd.f32 %v5527_v15, %v3768_v51  ;;  %v5802_v29 = vadd.f32 %v5801_v30, %v5611_v40  ;;  %v10410_v51 = vld [vmem:[#allocation10_spill] sm:$0xff]  ;;  %v10411_v34 = vld [vmem:[#allocation3_spill] sm:$0xff] }
 0x24e   : > { %v7159_v49 = vpop.f32.mrf.mxu1 }
 0x24f   : > { %v5573_v31 = vadd.f32 %v5519_v47, %v10405_v11  ;;  %v5530_v52 = vadd.f32 %v7159_v49, %v6983_v5  ;;  %v5871_v24 = vadd.f32 %v5870_v39, %v5840_v38  ;;  %v5614_v10 = vadd.f32 %v9980_v18, %v5575_v25 }
 0x250   : > { %v5521_v56 = vpop.f32.mrf.mxu1  ;;  %v6984_v28 = vpop.f32.mrf.mxu0  ;;  %v3784_v5 = vadd.f32 %v10411_v34, %v10410_v51 }
 0x251   : > { %v5612_v62 = vadd.f32 %v9980_v18, %v5573_v31  ;;  %v5576_v12 = vadd.f32 %v5530_v52, %v3771_v54  ;;  %v5522_v45 = vadd.f32 %v6977_v60, %v5521_v56  ;;  %v5843_v46 = vmul.f32 %v5614_v10, %v5614_v10 }
 0x252   : > { %v6985_v35 = vpop.f32.mrf.mxu0  ;;  %v7162_v21 = vpop.f32.mrf.mxu1 }
 0x253   : > { %v5803_v41 = vadd.f32 %v5802_v29, %v5612_v62  ;;  %v5841_v3 = vmul.f32 %v5612_v62, %v5612_v62  ;;  %v5615_v32 = vadd.f32 %v9980_v18, %v5576_v12  ;;  %v5574_v14 = vadd.f32 %v5522_v45, %v10408_v50 }
 0x254   : > { %v6986_v9 = vadd.f32 %v6985_v35, %v6984_v28  ;;  %v6987_v19 = vpop.f32.mrf.mxu0  ;;  %v5534_v20 = vpop.f32.mrf.mxu1 }
 0x255   : > { %v5872_v59 = vadd.f32 %v5871_v24, %v5841_v3  ;;  %v6570_v6 = vpack.c.bf16 %v5615_v32, %v5614_v10  ;;  %v5613_v44 = vadd.f32 %v9980_v18, %v5574_v14  ;;  %v5844_v57 = vmul.f32 %v5615_v32, %v5615_v32 }
 0x256   : > { %v5535_v4 = vadd.f32 %v6986_v9, %v5534_v20  ;;  %v6988_v36 = vpop.f32.mrf.mxu0  ;;  %v7163_v37 = vpop.f32.mrf.mxu1 }
 0x257   : > { %6609 = vst [vmem:[%s9994_s16 + $0x68] sm:$0xff] %v6570_v6   ;;  %v6565_v63 = vpack.c.bf16 %v5613_v44, %v5612_v62  ;;  %v5804_v7 = vadd.f32 %v5803_v41, %v5613_v44  ;;  %v5842_v55 = vmul.f32 %v5613_v44, %v5613_v44  ;;  %v6989_v40 = vadd.f32 %v6988_v36, %v6987_v19 }
 0x258   : > { %v5577_v61 = vadd.f32 %v5535_v4, %v10409_v8  ;;  %v6990_v13 = vpop.f32.mrf.mxu0  ;;  %v5537_v27 = vpop.f32.mrf.mxu1 }
 0x259   : > { %6608 = vst [vmem:[%s9994_s16 + $0x60] sm:$0xff] %v6565_v63   ;;  %v5805_v16 = vadd.f32 %v5804_v7, %v5614_v10  ;;  %v5873_v22 = vadd.f32 %v5872_v59, %v5842_v55  ;;  %v5538_v0 = vadd.f32 %v6989_v40, %v5537_v27 }
 0x25a   : > { %v5616_v33 = vadd.f32 %v9980_v18, %v5577_v61  ;;  %v6991_v1 = vpop.f32.mrf.mxu0 }
 0x25b   : > { %v5874_v17 = vadd.f32 %v5873_v22, %v5843_v46  ;;  %v5806_v43 = vadd.f32 %v5805_v16, %v5615_v32  ;;  %v6992_v15 = vadd.f32 %v6991_v1, %v6990_v13  ;;  %v5578_v53 = vadd.f32 %v5538_v0, %v9949_v2  ;;  %v10412_v2 = vld [vmem:[#allocation21_spill] sm:$0xff] }
 0x25c   : > { %v5845_v26 = vmul.f32 %v5616_v33, %v5616_v33  ;;  %v6993_v23 = vpop.f32.mrf.mxu0  ;;  %v3787_v42 = vadd.f32 %v10413_v58, %v10412_v2 }
 0x25d   : > { %v5807_v30 = vadd.f32 %v5806_v43, %v5616_v33  ;;  %v5875_v48 = vadd.f32 %v5874_v17, %v5844_v57  ;;  %v5543_v47 = vadd.f32 %v7162_v21, %v6992_v15  ;;  %v5617_v38 = vadd.f32 %v9980_v18, %v5578_v53 }
 0x25e   : > { %v6994_v25 = vpop.f32.mrf.mxu0 }
 0x25f   : > { %v5876_v39 = vadd.f32 %v5875_v48, %v5845_v26  ;;  %v5579_v29 = vadd.f32 %v5543_v47, %v3784_v5  ;;  %v6995_v49 = vadd.f32 %v6994_v25, %v6993_v23  ;;  %v6575_v60 = vpack.c.bf16 %v5617_v38, %v5616_v33 }
 0x260   : > { %v5808_v11 = vadd.f32 %v5807_v30, %v5617_v38  ;;  %v5846_v31 = vmul.f32 %v5617_v38, %v5617_v38 }
 0x261   : > { %v5618_v54 = vadd.f32 %v9980_v18, %v5579_v29  ;;  %v5546_v52 = vadd.f32 %v7163_v37, %v6995_v49  ;;  %6610 = vst [vmem:[%s9994_s16 + $0x70] sm:$0xff] %v6575_v60  }
 0x262   : > { %v5877_v24 = vadd.f32 %v5876_v39, %v5846_v31 }
 0x263   : > { %v5847_v56 = vmul.f32 %v5618_v54, %v5618_v54  ;;  %v5580_v28 = vadd.f32 %v5546_v52, %v3787_v42  ;;  %v5809_v62 = vadd.f32 %v5808_v11, %v5618_v54 }
 0x265   : > { %v5619_v12 = vadd.f32 %v9980_v18, %v5580_v28  ;;  %v5878_v45 = vadd.f32 %v5877_v24, %v5847_v56 }
 0x267   : > { %v6580_v10 = vpack.c.bf16 %v5619_v12, %v5618_v54  ;;  %v5848_v35 = vmul.f32 %v5619_v12, %v5619_v12  ;;  %v5810_v41 = vadd.f32 %v5809_v62, %v5619_v12 }
 0x269   : > { %6611 = vst [vmem:[%s9994_s16 + $0x78] sm:$0xff] %v6580_v10   ;;  %v5811_v3 = vrot.slane %v5810_v41, 4  ;;  %v5879_v32 = vadd.f32 %v5878_v45, %v5848_v35 }
 0x26b   : > { %v5812_v50 = vadd.f32 %v5811_v3, %v5810_v41  ;;  %v5880_v14 = vrot.slane %v5879_v32, 4 }
 0x26d   : > { %v5813_v21 = vrot.slane %v5812_v50, 2  ;;  %v5881_v9 = vadd.f32 %v5880_v14, %v5879_v32 }
 0x26f   : > { %v5814_v59 = vadd.f32 %v5813_v21, %v5812_v50  ;;  %v5882_v19 = vrot.slane %v5881_v9, 2 }
 0x271   : > { %v5815_v6 = vrot.slane %v5814_v59, 1  ;;  %v5883_v44 = vadd.f32 %v5882_v19, %v5881_v9 }
 0x273   : > { %v5884_v20 = vrot.slane %v5883_v44, 1  ;;  %v5816_v18 = vadd.f32 %v5815_v6, %v5814_v59 }
 0x275   : > { %v5885_v4 = vadd.f32 %v5884_v20, %v5883_v44 }
 0x277   : > { %v5887_v36 = vsel %vm5886_vm9, %v5816_v18, %v5885_v4 }
 0x278   : > { %5888 = vst [vmem:[%s262_s19] sm:$0x3] %v5887_v36 }
 0x279 PF: > { %s17_s21 = sadd.s32 1, %s7318_s21  }
 0x27a   : > { %p14_p4 = scmp.ge.s32.totalorder %s17_s21, 4  }
 0x27c   :  { %16 = sbr.rel (!%p14_p4) target bundleno = 1 (0x1), region = 84 }

</bundles_post_ra>
